<compile_context>
chip_gen: v7x
topology: tpu7x:2x2x1
jax: 0.10.0
libtpu: 0.0.40
codegen_flags: <defaults>
</compile_context>

<pallas_src>
import functools

import jax
import jax.numpy as jnp
from jax.experimental import pallas as pl
from jax.experimental.pallas import tpu as pltpu
from jax.scipy.stats import norm as jnorm

F32 = jnp.float32
LANES = 128


def _round_up(x, m):
    return (x + m - 1) // m * m


# ----------------------------------------------------------------------------
# Pallas kernels: fused  (patches @ W + b)  ->  activation  |  GDN epilogue.
# K and N always fit in one block (K <= 256, N = 128 lanes), so there is no
# reduction grid axis and no accumulator scratch — the grid only tiles M.
# ----------------------------------------------------------------------------
def _mm_act_kernel(a_ref, b_ref, bias_ref, o_ref, *, act):
    r = jnp.dot(a_ref[...], b_ref[...], preferred_element_type=jnp.float32)
    r = r + bias_ref[...]
    if act == "relu":
        r = jnp.maximum(r, 0.0)
    elif act == "leaky_relu":
        r = jnp.where(r >= 0.0, r, 0.2 * r)
    o_ref[...] = r.astype(o_ref.dtype)


def _mm_gdn_kernel(a_ref, b_ref, bias_ref, g_ref, gb_ref, o_ref, *, inverse):
    # conv output, then GDN:  y_i = r_i / sqrt(beta_i + sum_j gamma_ij r_j^2)
    # (inverse GDN multiplies by the sqrt).  gamma is lane-padded (block-diagonal
    # for phase-stacked transposed convs); padded channels have beta = 1 so the
    # rsqrt stays finite and padded lanes stay exactly zero.
    r = jnp.dot(a_ref[...], b_ref[...], preferred_element_type=jnp.float32)
    r = r + bias_ref[...]
    norm = jnp.dot(r * r, g_ref[...], preferred_element_type=jnp.float32) + gb_ref[...]
    if inverse:
        o_ref[...] = (r * jnp.sqrt(norm)).astype(o_ref.dtype)
    else:
        o_ref[...] = (r * jax.lax.rsqrt(norm)).astype(o_ref.dtype)


def fused_matmul(a, w_p, bias_p, act="none", gdn=None):
    """(M, Kp) @ (Kp, 128) + bias, with fused ReLU or (inverse-)GDN epilogue."""
    M, Kp = a.shape
    N = w_p.shape[1]                       # always 128 (lane-dense output)
    TM = min(512, _round_up(M, 8))
    Mp = _round_up(M, TM)
    if Mp != M:                            # only happens for the 2-row hyper layers
        a = jnp.zeros((Mp, Kp), F32).at[:M].set(a)

    in_specs = [
        pl.BlockSpec((TM, Kp), lambda i: (i, 0)),
        pl.BlockSpec((Kp, N), lambda i: (0, 0)),
        pl.BlockSpec((1, N), lambda i: (0, 0)),
    ]
    args = [a, w_p, bias_p]
    if gdn is None:
        kern = functools.partial(_mm_act_kernel, act=act)
    else:
        gamma_p, beta_p, inverse = gdn
        in_specs += [pl.BlockSpec((N, N), lambda i: (0, 0)),
                     pl.BlockSpec((1, N), lambda i: (0, 0))]
        args += [gamma_p, beta_p]
        kern = functools.partial(_mm_gdn_kernel, inverse=inverse)

    out = pl.pallas_call(
        kern,
        out_shape=jax.ShapeDtypeStruct((Mp, N), F32),
        grid_spec=pltpu.PrefetchScalarGridSpec(
            num_scalar_prefetch=0,
            grid=(Mp // TM,),
            in_specs=in_specs,
            out_specs=pl.BlockSpec((TM, N), lambda i: (i, 0)),
        ),
        compiler_params=pltpu.CompilerParams(dimension_semantics=("parallel",)),
    )(*args)
    return out if Mp == M else out[:M]


# ----------------------------------------------------------------------------
# im2col glue (JAX); K is padded *inside* the single concatenate (no extra pad op).
# ----------------------------------------------------------------------------
def _im2col(x, kh, kw, stride, Kp):
    B, H, W, Cin = x.shape
    p = kh // 2
    xp = jnp.pad(x, ((0, 0), (p, p), (p, p), (0, 0)))
    Ho = (H + 2 * p - kh) // stride + 1
    Wo = (W + 2 * p - kw) // stride + 1
    cols = []
    for dy in range(kh):
        for dx in range(kw):
            cols.append(xp[:, dy:dy + stride * (Ho - 1) + 1:stride,
                           dx:dx + stride * (Wo - 1) + 1:stride, :])
    K = kh * kw * Cin
    if Kp > K:
        cols.append(jnp.zeros((B, Ho, Wo, Kp - K), F32))
    patches = jnp.concatenate(cols, axis=-1).astype(F32).reshape(B * Ho * Wo, Kp)
    return patches, Ho, Wo


def conv2d(x, layer, stride, act="none", gdn=None):
    """Conv2d with padding = k//2 (PyTorch-style), fused bias/act/GDN."""
    B = x.shape[0]
    patches, Ho, Wo = _im2col(x, layer["kh"], layer["kw"], stride, layer["Kp"])
    g = None if gdn is None else (gdn["gamma_p"], gdn["beta_p"], gdn["inverse"])
    out = fused_matmul(patches, layer["w_p"], layer["b_p"], act=act, gdn=g)
    return out[:, :layer["cout"]].reshape(B, Ho, Wo, layer["cout"])


def conv_transpose2d_s2(x, layer, act="none", gdn=None):
    """ConvTranspose2d(k=5, stride=2, pad=2, output_pad=1) via sub-pixel phases.

    The 4 output phases (parity of output row/col) are stride-1 correlations of
    the 1-padded input with 3x3 phase kernels; their weights are stacked along
    the lane dim so a single matmul produces all phases, then interleaved.
    """
    B, H, W, _ = x.shape
    cout = layer["cout"]
    patches, _, _ = _im2col(x, 3, 3, 1, layer["Kp"])   # (B*H*W, Kp)
    g = None if gdn is None else (gdn["gamma_p"], gdn["beta_p"], gdn["inverse"])
    out = fused_matmul(patches, layer["w_p"], layer["b_p"], act=act, gdn=g)
    out = out[:, :4 * cout].reshape(B, H, W, 2, 2, cout)
    out = out.transpose(0, 1, 3, 2, 4, 5).reshape(B, 2 * H, 2 * W, cout)
    return out


# ----------------------------------------------------------------------------
# Transforms (mirroring the nn.Sequential stacks of the PyTorch module).
# GDN is fused into the preceding conv's Pallas epilogue.
# ----------------------------------------------------------------------------
def analysis_transform(x, p):          # AugmentedNormalizedAnalysisTransform
    h = conv2d(x, p["c1"], stride=2, gdn=p["g1"])
    h = conv2d(h, p["c2"], stride=2, gdn=p["g2"])
    h = conv2d(h, p["c3"], stride=2, gdn=p["g3"])
    h = conv2d(h, p["c4"], stride=2)
    return h


def synthesis_transform(y, p):         # AugmentedNormalizedSynthesisTransform
    h = conv_transpose2d_s2(y, p["c1"], gdn=p["g1"])
    h = conv_transpose2d_s2(h, p["c2"], gdn=p["g2"])
    h = conv_transpose2d_s2(h, p["c3"], gdn=p["g3"])
    h = conv_transpose2d_s2(h, p["c4"])
    return h


def hyper_analysis_transform(y, p):    # GoogleHyperAnalysisTransform
    h = conv2d(y, p["c1"], stride=1, act="relu")
    h = conv2d(h, p["c2"], stride=2, act="relu")
    h = conv2d(h, p["c3"], stride=2)
    return h


def hyper_synthesis_transform(z, p):   # GoogleHyperSynthesisTransform
    h = conv_transpose2d_s2(z, p["c1"], act="relu")
    h = conv_transpose2d_s2(h, p["c2"], act="relu")
    h = conv2d(h, p["c3"], stride=1)   # stride-1 tconv == conv with pre-flipped weights
    return h


# ----------------------------------------------------------------------------
# Entropy models — tiny elementwise math (<= 256 values) kept in plain jnp,
# per performance review (a Pallas launch would cost 10-100x the compute).
# ----------------------------------------------------------------------------
def entropy_bottleneck_forward(z):
    # TODO(synk): learned factorized CDF replaced by unit-logistic prior; the
    # quant_mode='noise' training path is replaced by the deterministic round.
    zt = jnp.round(z)
    lik = jax.nn.sigmoid(zt + 0.5) - jax.nn.sigmoid(zt - 0.5)
    return zt, jnp.maximum(lik, 1e-9)


def gaussian_conditional_forward(y, mean, scale_raw):
    # TODO(synk): exact scale parameterization of the reference GaussianConditional
    # is not in the provided source; softplus + lower bound keeps sigma positive.
    s = jnp.maximum(jax.nn.softplus(scale_raw), 0.11)
    yt = jnp.round(y - mean) + mean
    d = yt - mean
    lik = jnorm.cdf((d + 0.5) / s) - jnorm.cdf((d - 0.5) / s)
    return yt, jnp.maximum(lik, 1e-9)


# ----------------------------------------------------------------------------
# Parameter construction: deterministic synthetic weights, pre-padded to the
# 128-lane shapes the Pallas kernels consume (constant, never re-padded at run).
# ----------------------------------------------------------------------------
def _pad_row(v):
    return jnp.zeros((1, LANES), F32).at[0, :v.shape[0]].set(v)


def _conv_layer(key, k, cin, cout, flip=False):
    w = jax.random.normal(key, (k, k, cin, cout), F32) / jnp.sqrt(float(k * k * cin))
    if flip:                               # stride-1 ConvTranspose2d equivalence
        w = w[::-1, ::-1, :, :]
    K = k * k * cin
    Kp = _round_up(K, LANES)
    w_p = jnp.zeros((Kp, LANES), F32).at[:K, :cout].set(w.reshape(K, cout))
    return {"kh": k, "kw": k, "cin": cin, "cout": cout, "Kp": Kp,
            "w_p": w_p, "b_p": _pad_row(jnp.zeros((cout,), F32))}


def _tconv_s2_layer(key, cin, cout):
    # ConvTranspose2d(k=5, s=2, p=2, op=1).  Phase (r, c) of the output
    # (pixel (2m+r, 2n+c)) is a stride-1 correlation over input rows/cols
    # {m-1, m, m+1} with the even/odd taps of the flipped kernel:
    #   r=0 -> [w4, w2, w0],  r=1 -> [0, w3, w1]   (same along x).
    k = 5
    w = jax.random.normal(key, (k, k, cin, cout), F32) / jnp.sqrt(float(k * k * cin))
    b = jnp.zeros((cout,), F32)

    def ysel(r):
        if r == 0:
            return jnp.stack([w[4], w[2], w[0]], 0)                    # (3,5,ci,co)
        return jnp.stack([jnp.zeros_like(w[0]), w[3], w[1]], 0)

    phases = []
    for r in (0, 1):
        wy = ysel(r)
        for c in (0, 1):
            if c == 0:
                wp = jnp.stack([wy[:, 4], wy[:, 2], wy[:, 0]], 1)      # (3,3,ci,co)
            else:
                wp = jnp.stack([jnp.zeros_like(wy[:, 0]), wy[:, 3], wy[:, 1]], 1)
            phases.append(wp.reshape(9 * cin, cout))
    wstk = jnp.concatenate(phases, axis=1)                             # (9*ci, 4*co)

    K = 9 * cin
    Kp = _round_up(K, LANES)
    w_p = jnp.zeros((Kp, LANES), F32).at[:K, :4 * cout].set(wstk)
    return {"kh": 3, "kw": 3, "cin": cin, "cout": cout, "Kp": Kp,
            "w_p": w_p, "b_p": _pad_row(jnp.tile(b, 4))}


def _gdn_layer(c, nphase, inverse):
    # TODO(synk): GeneralizedDivisiveNorm's non-negative reparameterization is
    # replaced by its effective init values (beta=1, gamma=0.1*I).
    gamma = 0.1 * jnp.eye(c, dtype=F32)
    g_p = jnp.zeros((LANES, LANES), F32)
    for ph in range(nphase):               # block-diagonal for phase-stacked tconv
        g_p = g_p.at[ph * c:(ph + 1) * c, ph * c:(ph + 1) * c].set(gamma)
    b_p = jnp.ones((1, LANES), F32)        # padded channels keep beta=1 (finite rsqrt)
    b_p = b_p.at[0, :nphase * c].set(jnp.tile(jnp.ones((c,), F32), nphase))
    return {"gamma_p": g_p, "beta_p": b_p, "inverse": inverse}


def init_params(key, in_ch=3, out_ch=3, num_features=8, num_filters=8,
                num_hyperpriors=8, hyper_filters=8, k=5):
    ks = jax.random.split(key, 15)
    p = {}
    p["analysis0"] = {
        "c1": _conv_layer(ks[0], k, in_ch, num_filters),
        "g1": _gdn_layer(num_filters, 1, False),
        "c2": _conv_layer(ks[1], k, num_filters, num_filters),
        "g2": _gdn_layer(num_filters, 1, False),
        "c3": _conv_layer(ks[2], k, num_filters, num_filters),
        "g3": _gdn_layer(num_filters, 1, False),
        "c4": _conv_layer(ks[3], k, num_filters, 2 * num_features),   # use_affine -> 2F
    }
    p["synthesis0"] = {   # last layer -> use_affine=False -> out_ch (not 2*out_ch)
        "c1": _tconv_s2_layer(ks[4], num_features, num_filters),
        "g1": _gdn_layer(num_filters, 4, True),
        "c2": _tconv_s2_layer(ks[5], num_filters, num_filters),
        "g2": _gdn_layer(num_filters, 4, True),
        "c3": _tconv_s2_layer(ks[6], num_filters, num_filters),
        "g3": _gdn_layer(num_filters, 4, True),
        "c4": _tconv_s2_layer(ks[7], num_filters, out_ch),
    }
    p["hyper_analysis"] = {
        "c1": _conv_layer(ks[8], 3, num_features, hyper_filters),
        "c2": _conv_layer(ks[9], 5, hyper_filters, hyper_filters),
        "c3": _conv_layer(ks[10], 5, hyper_filters, num_hyperpriors),
    }
    hf32 = hyper_filters * 3 // 2
    p["hyper_synthesis"] = {   # use_mean=True -> condition_size=2 -> outputs 2F channels
        "c1": _tconv_s2_layer(ks[11], num_hyperpriors, hyper_filters),
        "c2": _tconv_s2_layer(ks[12], hyper_filters, hf32),
        "c3": _conv_layer(ks[13], 3, hf32, 2 * num_features, flip=True),
    }
    p["init_eps_key"] = ks[14]   # deterministic stand-in for torch.randn_like (init_code='gaussian')
    return p


# ----------------------------------------------------------------------------
# Full forward pass (num_layers=1, use_affine=True, use_mean=True, Gaussian).
# ----------------------------------------------------------------------------
def anf_hyperprior_forward(x_nchw, params):
    x = jnp.transpose(x_nchw, (0, 2, 3, 1)).astype(F32)   # NCHW -> NHWC

    # ---- encode: analysis0 (AugmentedNormalizedFlow, transpose=False, affine) ----
    cond = analysis_transform(x, params["analysis0"])      # (B, H/16, W/16, 2F)
    loc, s_raw = jnp.split(cond, 2, axis=-1)
    # TODO(synk): exact soft-clamp of the ANF scale branch is not in the provided
    # source; tanh soft-clamp + exp is used here.
    scale = jnp.exp(jnp.tanh(s_raw))
    eps = jax.random.normal(params["init_eps_key"], loc.shape, F32)
    code = eps * scale + loc                                # augmented code y1

    # ---- hyper prior (use_mean=True -> use_abs=False: raw code goes in) ----
    z = hyper_analysis_transform(code, params["hyper_analysis"])          # (B,1,1,HP)
    z_tilde, z_lik = entropy_bottleneck_forward(z)
    condition = hyper_synthesis_transform(z_tilde, params["hyper_synthesis"])  # (B,h,w,2F)
    mean, sc = jnp.split(condition, 2, axis=-1)
    y_tilde, y_lik = gaussian_conditional_forward(code, mean, sc)

    # ---- last-layer synthesis, forward direction: Y_error = x - g_s(y_tilde) ----
    s_loc = synthesis_transform(y_tilde, params["synthesis0"])            # (B,H,W,out)
    y_error = x - s_loc

    # ---- decode(None, y_tilde): reverse coupling with input=None -> x_hat = g_s(y_tilde)
    x_hat = s_loc   # identical deterministic network evaluation; reuse
    # QE is None (use_QE=False) -> no DeQuantizationModule.

    to_nchw = lambda a: jnp.transpose(a, (0, 3, 1, 2))
    return to_nchw(x_hat), (to_nchw(y_lik), to_nchw(z_lik)), to_nchw(y_error)


if __name__ == "__main__":
    key = jax.random.PRNGKey(0)
    pkey, xkey = jax.random.split(key)
    params = init_params(pkey)
    # divisor = 64 -> spatial must be a multiple of 64.
    x = jax.random.normal(xkey, (2, 3, 64, 64), F32)        # NCHW like PyTorch

    # params are closed over (compile-time constants: padded weights, static ints).
    fwd = jax.jit(functools.partial(anf_hyperprior_forward, params=params))
    x_hat, (y_lik, z_lik), y_err = fwd(x)
    jax.block_until_ready((x_hat, y_lik, z_lik, y_err))

    assert x_hat.shape == x.shape and y_err.shape == x.shape
    assert y_lik.shape == (2, 8, 4, 4) and z_lik.shape == (2, 8, 1, 1)
    assert bool(jnp.all(jnp.isfinite(x_hat))) and bool(jnp.all(jnp.isfinite(y_err)))
    assert bool(jnp.all(y_lik > 0)) and bool(jnp.all(z_lik > 0))
    print("KERNEL_OK")
</pallas_src>

<mosaic_0001>
module attributes {stable_mosaic.version = 11 : i64} {
  func.func @_mm_gdn_kernel(%arg0: i32, %arg1: memref<512x128xf32, #tpu.memory_space<vmem>>, %arg2: memref<128x128xf32, #tpu.memory_space<vmem>>, %arg3: memref<1x128xf32, #tpu.memory_space<vmem>>, %arg4: memref<128x128xf32, #tpu.memory_space<vmem>>, %arg5: memref<1x128xf32, #tpu.memory_space<vmem>>, %arg6: memref<512x128xf32, #tpu.memory_space<vmem>>) attributes {dimension_semantics = [#tpu.dimension_semantics<parallel>], iteration_bounds = array<i64: 4>, scalar_prefetch = 0 : i64, scratch_operands = 0 : i64, tpu.core_type = #tpu.core_type<tc>, window_params = [{transform_indices = @transform_0, window_bounds = array<i64: 512, 128>}, {pipeline_mode = #tpu.pipeline_mode<synchronous>, transform_indices = @transform_1, window_bounds = array<i64: 128, 128>}, {pipeline_mode = #tpu.pipeline_mode<synchronous>, transform_indices = @transform_2, window_bounds = array<i64: 1, 128>}, {pipeline_mode = #tpu.pipeline_mode<synchronous>, transform_indices = @transform_3, window_bounds = array<i64: 128, 128>}, {pipeline_mode = #tpu.pipeline_mode<synchronous>, transform_indices = @transform_4, window_bounds = array<i64: 1, 128>}, {transform_indices = @transform_5, window_bounds = array<i64: 512, 128>}]} {
    %c0 = arith.constant 0 : index
    %c0_0 = arith.constant 0 : index
    %0 = vector.load %arg1[%c0, %c0_0] : memref<512x128xf32, #tpu.memory_space<vmem>>, vector<512x128xf32>
    %c0_1 = arith.constant 0 : index
    %c0_2 = arith.constant 0 : index
    %1 = vector.load %arg2[%c0_1, %c0_2] : memref<128x128xf32, #tpu.memory_space<vmem>>, vector<128x128xf32>
    %cst = arith.constant dense<0.000000e+00> : vector<512x128xf32>
    %2 = tpu.matmul %0, %1, %cst {dimension_numbers = #tpu.dot_dimension_numbers<[1], [0], [0], [1], [0, 0, 1, 1], [], []>} : vector<512x128xf32>, vector<128x128xf32>, vector<512x128xf32> -> vector<512x128xf32>
    %c0_3 = arith.constant 0 : index
    %c0_4 = arith.constant 0 : index
    %3 = vector.load %arg3[%c0_3, %c0_4] : memref<1x128xf32, #tpu.memory_space<vmem>>, vector<1x128xf32>
    %4 = vector.broadcast %3 : vector<1x128xf32> to vector<512x128xf32>
    %5 = arith.addf %2, %4 : vector<512x128xf32>
    %6 = arith.mulf %5, %5 : vector<512x128xf32>
    %c0_5 = arith.constant 0 : index
    %c0_6 = arith.constant 0 : index
    %7 = vector.load %arg4[%c0_5, %c0_6] : memref<128x128xf32, #tpu.memory_space<vmem>>, vector<128x128xf32>
    %cst_7 = arith.constant dense<0.000000e+00> : vector<512x128xf32>
    %8 = tpu.matmul %6, %7, %cst_7 {dimension_numbers = #tpu.dot_dimension_numbers<[1], [0], [0], [1], [0, 0, 1, 1], [], []>} : vector<512x128xf32>, vector<128x128xf32>, vector<512x128xf32> -> vector<512x128xf32>
    %c0_8 = arith.constant 0 : index
    %c0_9 = arith.constant 0 : index
    %9 = vector.load %arg5[%c0_8, %c0_9] : memref<1x128xf32, #tpu.memory_space<vmem>>, vector<1x128xf32>
    %10 = vector.broadcast %9 : vector<1x128xf32> to vector<512x128xf32>
    %11 = arith.addf %8, %10 : vector<512x128xf32>
    %12 = math.rsqrt %11 : vector<512x128xf32>
    %13 = arith.mulf %5, %12 : vector<512x128xf32>
    %c0_10 = arith.constant 0 : index
    %c0_11 = arith.constant 0 : index
    %14 = vector.load %arg6[%c0_10, %c0_11] : memref<512x128xf32, #tpu.memory_space<vmem>>, vector<512x128xf32>
    tpu.vector_store %arg6[%c0_10, %c0_11], %13 {strides = array<i32>} : memref<512x128xf32, #tpu.memory_space<vmem>>, vector<512x128xf32>,
    return
  }
  func.func @transform_0(%arg0: i32) -> (i32, i32) {
    %c0_i32 = arith.constant 0 : i32
    %c0_i32_0 = arith.constant 0 : i32
    return %arg0, %c0_i32 : i32, i32
  }
  func.func @transform_1(%arg0: i32) -> (i32, i32) {
    %c0_i32 = arith.constant 0 : i32
    %c0_i32_0 = arith.constant 0 : i32
    %c0_i32_1 = arith.constant 0 : i32
    return %c0_i32, %c0_i32_0 : i32, i32
  }
  func.func @transform_2(%arg0: i32) -> (i32, i32) {
    %c0_i32 = arith.constant 0 : i32
    %c0_i32_0 = arith.constant 0 : i32
    %c0_i32_1 = arith.constant 0 : i32
    return %c0_i32, %c0_i32_0 : i32, i32
  }
  func.func @transform_3(%arg0: i32) -> (i32, i32) {
    %c0_i32 = arith.constant 0 : i32
    %c0_i32_0 = arith.constant 0 : i32
    %c0_i32_1 = arith.constant 0 : i32
    return %c0_i32, %c0_i32_0 : i32, i32
  }
  func.func @transform_4(%arg0: i32) -> (i32, i32) {
    %c0_i32 = arith.constant 0 : i32
    %c0_i32_0 = arith.constant 0 : i32
    %c0_i32_1 = arith.constant 0 : i32
    return %c0_i32, %c0_i32_0 : i32, i32
  }
  func.func @transform_5(%arg0: i32) -> (i32, i32) {
    %c0_i32 = arith.constant 0 : i32
    %c0_i32_0 = arith.constant 0 : i32
    return %arg0, %c0_i32 : i32, i32
  }
}

module attributes {stable_mosaic.version = 11 : i64} {
  func.func @_mm_gdn_kernel(%arg0: i32, %arg1: memref<512x256xf32, #tpu.memory_space<vmem>>, %arg2: memref<256x128xf32, #tpu.memory_space<vmem>>, %arg3: memref<1x128xf32, #tpu.memory_space<vmem>>, %arg4: memref<128x128xf32, #tpu.memory_space<vmem>>, %arg5: memref<1x128xf32, #tpu.memory_space<vmem>>, %arg6: memref<512x128xf32, #tpu.memory_space<vmem>>) attributes {dimension_semantics = [#tpu.dimension_semantics<parallel>], iteration_bounds = array<i64: 1>, scalar_prefetch = 0 : i64, scratch_operands = 0 : i64, tpu.core_type = #tpu.core_type<tc>, window_params = [{transform_indices = @transform_0, window_bounds = array<i64: 512, 256>}, {pipeline_mode = #tpu.pipeline_mode<synchronous>, transform_indices = @transform_1, window_bounds = array<i64: 256, 128>}, {pipeline_mode = #tpu.pipeline_mode<synchronous>, transform_indices = @transform_2, window_bounds = array<i64: 1, 128>}, {pipeline_mode = #tpu.pipeline_mode<synchronous>, transform_indices = @transform_3, window_bounds = array<i64: 128, 128>}, {pipeline_mode = #tpu.pipeline_mode<synchronous>, transform_indices = @transform_4, window_bounds = array<i64: 1, 128>}, {transform_indices = @transform_5, window_bounds = array<i64: 512, 128>}]} {
    %c0 = arith.constant 0 : index
    %c0_0 = arith.constant 0 : index
    %0 = vector.load %arg1[%c0, %c0_0] : memref<512x256xf32, #tpu.memory_space<vmem>>, vector<512x256xf32>
    %c0_1 = arith.constant 0 : index
    %c0_2 = arith.constant 0 : index
    %1 = vector.load %arg2[%c0_1, %c0_2] : memref<256x128xf32, #tpu.memory_space<vmem>>, vector<256x128xf32>
    %cst = arith.constant dense<0.000000e+00> : vector<512x128xf32>
    %2 = tpu.matmul %0, %1, %cst {dimension_numbers = #tpu.dot_dimension_numbers<[1], [0], [0], [1], [0, 0, 1, 1], [], []>} : vector<512x256xf32>, vector<256x128xf32>, vector<512x128xf32> -> vector<512x128xf32>
    %c0_3 = arith.constant 0 : index
    %c0_4 = arith.constant 0 : index
    %3 = vector.load %arg3[%c0_3, %c0_4] : memref<1x128xf32, #tpu.memory_space<vmem>>, vector<1x128xf32>
    %4 = vector.broadcast %3 : vector<1x128xf32> to vector<512x128xf32>
    %5 = arith.addf %2, %4 : vector<512x128xf32>
    %6 = arith.mulf %5, %5 : vector<512x128xf32>
    %c0_5 = arith.constant 0 : index
    %c0_6 = arith.constant 0 : index
    %7 = vector.load %arg4[%c0_5, %c0_6] : memref<128x128xf32, #tpu.memory_space<vmem>>, vector<128x128xf32>
    %cst_7 = arith.constant dense<0.000000e+00> : vector<512x128xf32>
    %8 = tpu.matmul %6, %7, %cst_7 {dimension_numbers = #tpu.dot_dimension_numbers<[1], [0], [0], [1], [0, 0, 1, 1], [], []>} : vector<512x128xf32>, vector<128x128xf32>, vector<512x128xf32> -> vector<512x128xf32>
    %c0_8 = arith.constant 0 : index
    %c0_9 = arith.constant 0 : index
    %9 = vector.load %arg5[%c0_8, %c0_9] : memref<1x128xf32, #tpu.memory_space<vmem>>, vector<1x128xf32>
    %10 = vector.broadcast %9 : vector<1x128xf32> to vector<512x128xf32>
    %11 = arith.addf %8, %10 : vector<512x128xf32>
    %12 = math.rsqrt %11 : vector<512x128xf32>
    %13 = arith.mulf %5, %12 : vector<512x128xf32>
    %c0_10 = arith.constant 0 : index
    %c0_11 = arith.constant 0 : index
    %14 = vector.load %arg6[%c0_10, %c0_11] : memref<512x128xf32, #tpu.memory_space<vmem>>, vector<512x128xf32>
    tpu.vector_store %arg6[%c0_10, %c0_11], %13 {strides = array<i32>} : memref<512x128xf32, #tpu.memory_space<vmem>>, vector<512x128xf32>,
    return
  }
  func.func @transform_0(%arg0: i32) -> (i32, i32) {
    %c0_i32 = arith.constant 0 : i32
    %c0_i32_0 = arith.constant 0 : i32
    return %arg0, %c0_i32 : i32, i32
  }
  func.func @transform_1(%arg0: i32) -> (i32, i32) {
    %c0_i32 = arith.constant 0 : i32
    %c0_i32_0 = arith.constant 0 : i32
    %c0_i32_1 = arith.constant 0 : i32
    return %c0_i32, %c0_i32_0 : i32, i32
  }
  func.func @transform_2(%arg0: i32) -> (i32, i32) {
    %c0_i32 = arith.constant 0 : i32
    %c0_i32_0 = arith.constant 0 : i32
    %c0_i32_1 = arith.constant 0 : i32
    return %c0_i32, %c0_i32_0 : i32, i32
  }
  func.func @transform_3(%arg0: i32) -> (i32, i32) {
    %c0_i32 = arith.constant 0 : i32
    %c0_i32_0 = arith.constant 0 : i32
    %c0_i32_1 = arith.constant 0 : i32
    return %c0_i32, %c0_i32_0 : i32, i32
  }
  func.func @transform_4(%arg0: i32) -> (i32, i32) {
    %c0_i32 = arith.constant 0 : i32
    %c0_i32_0 = arith.constant 0 : i32
    %c0_i32_1 = arith.constant 0 : i32
    return %c0_i32, %c0_i32_0 : i32, i32
  }
  func.func @transform_5(%arg0: i32) -> (i32, i32) {
    %c0_i32 = arith.constant 0 : i32
    %c0_i32_0 = arith.constant 0 : i32
    return %arg0, %c0_i32 : i32, i32
  }
}

module attributes {stable_mosaic.version = 11 : i64} {
  func.func @_mm_gdn_kernel(%arg0: i32, %arg1: memref<128x256xf32, #tpu.memory_space<vmem>>, %arg2: memref<256x128xf32, #tpu.memory_space<vmem>>, %arg3: memref<1x128xf32, #tpu.memory_space<vmem>>, %arg4: memref<128x128xf32, #tpu.memory_space<vmem>>, %arg5: memref<1x128xf32, #tpu.memory_space<vmem>>, %arg6: memref<128x128xf32, #tpu.memory_space<vmem>>) attributes {dimension_semantics = [#tpu.dimension_semantics<parallel>], iteration_bounds = array<i64: 1>, scalar_prefetch = 0 : i64, scratch_operands = 0 : i64, tpu.core_type = #tpu.core_type<tc>, window_params = [{transform_indices = @transform_0, window_bounds = array<i64: 128, 256>}, {pipeline_mode = #tpu.pipeline_mode<synchronous>, transform_indices = @transform_1, window_bounds = array<i64: 256, 128>}, {pipeline_mode = #tpu.pipeline_mode<synchronous>, transform_indices = @transform_2, window_bounds = array<i64: 1, 128>}, {pipeline_mode = #tpu.pipeline_mode<synchronous>, transform_indices = @transform_3, window_bounds = array<i64: 128, 128>}, {pipeline_mode = #tpu.pipeline_mode<synchronous>, transform_indices = @transform_4, window_bounds = array<i64: 1, 128>}, {transform_indices = @transform_5, window_bounds = array<i64: 128, 128>}]} {
    %c0 = arith.constant 0 : index
    %c0_0 = arith.constant 0 : index
    %0 = vector.load %arg1[%c0, %c0_0] : memref<128x256xf32, #tpu.memory_space<vmem>>, vector<128x256xf32>
    %c0_1 = arith.constant 0 : index
    %c0_2 = arith.constant 0 : index
    %1 = vector.load %arg2[%c0_1, %c0_2] : memref<256x128xf32, #tpu.memory_space<vmem>>, vector<256x128xf32>
    %cst = arith.constant dense<0.000000e+00> : vector<128x128xf32>
    %2 = tpu.matmul %0, %1, %cst {dimension_numbers = #tpu.dot_dimension_numbers<[1], [0], [0], [1], [0, 0, 1, 1], [], []>} : vector<128x256xf32>, vector<256x128xf32>, vector<128x128xf32> -> vector<128x128xf32>
    %c0_3 = arith.constant 0 : index
    %c0_4 = arith.constant 0 : index
    %3 = vector.load %arg3[%c0_3, %c0_4] : memref<1x128xf32, #tpu.memory_space<vmem>>, vector<1x128xf32>
    %4 = vector.broadcast %3 : vector<1x128xf32> to vector<128x128xf32>
    %5 = arith.addf %2, %4 : vector<128x128xf32>
    %6 = arith.mulf %5, %5 : vector<128x128xf32>
    %c0_5 = arith.constant 0 : index
    %c0_6 = arith.constant 0 : index
    %7 = vector.load %arg4[%c0_5, %c0_6] : memref<128x128xf32, #tpu.memory_space<vmem>>, vector<128x128xf32>
    %cst_7 = arith.constant dense<0.000000e+00> : vector<128x128xf32>
    %8 = tpu.matmul %6, %7, %cst_7 {dimension_numbers = #tpu.dot_dimension_numbers<[1], [0], [0], [1], [0, 0, 1, 1], [], []>} : vector<128x128xf32>, vector<128x128xf32>, vector<128x128xf32> -> vector<128x128xf32>
    %c0_8 = arith.constant 0 : index
    %c0_9 = arith.constant 0 : index
    %9 = vector.load %arg5[%c0_8, %c0_9] : memref<1x128xf32, #tpu.memory_space<vmem>>, vector<1x128xf32>
    %10 = vector.broadcast %9 : vector<1x128xf32> to vector<128x128xf32>
    %11 = arith.addf %8, %10 : vector<128x128xf32>
    %12 = math.rsqrt %11 : vector<128x128xf32>
    %13 = arith.mulf %5, %12 : vector<128x128xf32>
    %c0_10 = arith.constant 0 : index
    %c0_11 = arith.constant 0 : index
    %14 = vector.load %arg6[%c0_10, %c0_11] : memref<128x128xf32, #tpu.memory_space<vmem>>, vector<128x128xf32>
    tpu.vector_store %arg6[%c0_10, %c0_11], %13 {strides = array<i32>} : memref<128x128xf32, #tpu.memory_space<vmem>>, vector<128x128xf32>,
    return
  }
  func.func @transform_0(%arg0: i32) -> (i32, i32) {
    %c0_i32 = arith.constant 0 : i32
    %c0_i32_0 = arith.constant 0 : i32
    return %arg0, %c0_i32 : i32, i32
  }
  func.func @transform_1(%arg0: i32) -> (i32, i32) {
    %c0_i32 = arith.constant 0 : i32
    %c0_i32_0 = arith.constant 0 : i32
    %c0_i32_1 = arith.constant 0 : i32
    return %c0_i32, %c0_i32_0 : i32, i32
  }
  func.func @transform_2(%arg0: i32) -> (i32, i32) {
    %c0_i32 = arith.constant 0 : i32
    %c0_i32_0 = arith.constant 0 : i32
    %c0_i32_1 = arith.constant 0 : i32
    return %c0_i32, %c0_i32_0 : i32, i32
  }
  func.func @transform_3(%arg0: i32) -> (i32, i32) {
    %c0_i32 = arith.constant 0 : i32
    %c0_i32_0 = arith.constant 0 : i32
    %c0_i32_1 = arith.constant 0 : i32
    return %c0_i32, %c0_i32_0 : i32, i32
  }
  func.func @transform_4(%arg0: i32) -> (i32, i32) {
    %c0_i32 = arith.constant 0 : i32
    %c0_i32_0 = arith.constant 0 : i32
    %c0_i32_1 = arith.constant 0 : i32
    return %c0_i32, %c0_i32_0 : i32, i32
  }
  func.func @transform_5(%arg0: i32) -> (i32, i32) {
    %c0_i32 = arith.constant 0 : i32
    %c0_i32_0 = arith.constant 0 : i32
    return %arg0, %c0_i32 : i32, i32
  }
}

module attributes {stable_mosaic.version = 11 : i64} {
  func.func @_mm_act_kernel(%arg0: i32, %arg1: memref<32x256xf32, #tpu.memory_space<vmem>>, %arg2: memref<256x128xf32, #tpu.memory_space<vmem>>, %arg3: memref<1x128xf32, #tpu.memory_space<vmem>>, %arg4: memref<32x128xf32, #tpu.memory_space<vmem>>) attributes {dimension_semantics = [#tpu.dimension_semantics<parallel>], iteration_bounds = array<i64: 1>, scalar_prefetch = 0 : i64, scratch_operands = 0 : i64, tpu.core_type = #tpu.core_type<tc>, window_params = [{transform_indices = @transform_0, window_bounds = array<i64: 32, 256>}, {pipeline_mode = #tpu.pipeline_mode<synchronous>, transform_indices = @transform_1, window_bounds = array<i64: 256, 128>}, {pipeline_mode = #tpu.pipeline_mode<synchronous>, transform_indices = @transform_2, window_bounds = array<i64: 1, 128>}, {transform_indices = @transform_3, window_bounds = array<i64: 32, 128>}]} {
    %c0 = arith.constant 0 : index
    %c0_0 = arith.constant 0 : index
    %0 = vector.load %arg1[%c0, %c0_0] : memref<32x256xf32, #tpu.memory_space<vmem>>, vector<32x256xf32>
    %c0_1 = arith.constant 0 : index
    %c0_2 = arith.constant 0 : index
    %1 = vector.load %arg2[%c0_1, %c0_2] : memref<256x128xf32, #tpu.memory_space<vmem>>, vector<256x128xf32>
    %cst = arith.constant dense<0.000000e+00> : vector<32x128xf32>
    %2 = tpu.matmul %0, %1, %cst {dimension_numbers = #tpu.dot_dimension_numbers<[1], [0], [0], [1], [0, 0, 1, 1], [], []>} : vector<32x256xf32>, vector<256x128xf32>, vector<32x128xf32> -> vector<32x128xf32>
    %c0_3 = arith.constant 0 : index
    %c0_4 = arith.constant 0 : index
    %3 = vector.load %arg3[%c0_3, %c0_4] : memref<1x128xf32, #tpu.memory_space<vmem>>, vector<1x128xf32>
    %4 = vector.broadcast %3 : vector<1x128xf32> to vector<32x128xf32>
    %5 = arith.addf %2, %4 : vector<32x128xf32>
    %c0_5 = arith.constant 0 : index
    %c0_6 = arith.constant 0 : index
    %6 = vector.load %arg4[%c0_5, %c0_6] : memref<32x128xf32, #tpu.memory_space<vmem>>, vector<32x128xf32>
    tpu.vector_store %arg4[%c0_5, %c0_6], %5 {strides = array<i32>} : memref<32x128xf32, #tpu.memory_space<vmem>>, vector<32x128xf32>,
    return
  }
  func.func @transform_0(%arg0: i32) -> (i32, i32) {
    %c0_i32 = arith.constant 0 : i32
    %c0_i32_0 = arith.constant 0 : i32
    return %arg0, %c0_i32 : i32, i32
  }
  func.func @transform_1(%arg0: i32) -> (i32, i32) {
    %c0_i32 = arith.constant 0 : i32
    %c0_i32_0 = arith.constant 0 : i32
    %c0_i32_1 = arith.constant 0 : i32
    return %c0_i32, %c0_i32_0 : i32, i32
  }
  func.func @transform_2(%arg0: i32) -> (i32, i32) {
    %c0_i32 = arith.constant 0 : i32
    %c0_i32_0 = arith.constant 0 : i32
    %c0_i32_1 = arith.constant 0 : i32
    return %c0_i32, %c0_i32_0 : i32, i32
  }
  func.func @transform_3(%arg0: i32) -> (i32, i32) {
    %c0_i32 = arith.constant 0 : i32
    %c0_i32_0 = arith.constant 0 : i32
    return %arg0, %c0_i32 : i32, i32
  }
}

module attributes {stable_mosaic.version = 11 : i64} {
  func.func @_mm_act_kernel(%arg0: i32, %arg1: memref<32x128xf32, #tpu.memory_space<vmem>>, %arg2: memref<128x128xf32, #tpu.memory_space<vmem>>, %arg3: memref<1x128xf32, #tpu.memory_space<vmem>>, %arg4: memref<32x128xf32, #tpu.memory_space<vmem>>) attributes {dimension_semantics = [#tpu.dimension_semantics<parallel>], iteration_bounds = array<i64: 1>, scalar_prefetch = 0 : i64, scratch_operands = 0 : i64, tpu.core_type = #tpu.core_type<tc>, window_params = [{transform_indices = @transform_0, window_bounds = array<i64: 32, 128>}, {pipeline_mode = #tpu.pipeline_mode<synchronous>, transform_indices = @transform_1, window_bounds = array<i64: 128, 128>}, {pipeline_mode = #tpu.pipeline_mode<synchronous>, transform_indices = @transform_2, window_bounds = array<i64: 1, 128>}, {transform_indices = @transform_3, window_bounds = array<i64: 32, 128>}]} {
    %c0 = arith.constant 0 : index
    %c0_0 = arith.constant 0 : index
    %0 = vector.load %arg1[%c0, %c0_0] : memref<32x128xf32, #tpu.memory_space<vmem>>, vector<32x128xf32>
    %c0_1 = arith.constant 0 : index
    %c0_2 = arith.constant 0 : index
    %1 = vector.load %arg2[%c0_1, %c0_2] : memref<128x128xf32, #tpu.memory_space<vmem>>, vector<128x128xf32>
    %cst = arith.constant dense<0.000000e+00> : vector<32x128xf32>
    %2 = tpu.matmul %0, %1, %cst {dimension_numbers = #tpu.dot_dimension_numbers<[1], [0], [0], [1], [0, 0, 1, 1], [], []>} : vector<32x128xf32>, vector<128x128xf32>, vector<32x128xf32> -> vector<32x128xf32>
    %c0_3 = arith.constant 0 : index
    %c0_4 = arith.constant 0 : index
    %3 = vector.load %arg3[%c0_3, %c0_4] : memref<1x128xf32, #tpu.memory_space<vmem>>, vector<1x128xf32>
    %4 = vector.broadcast %3 : vector<1x128xf32> to vector<32x128xf32>
    %5 = arith.addf %2, %4 : vector<32x128xf32>
    %cst_5 = arith.constant 0.000000e+00 : f32
    %6 = vector.broadcast %cst_5 : f32 to vector<32x128xf32>
    %7 = arith.maximumf %5, %6 : vector<32x128xf32>
    %c0_6 = arith.constant 0 : index
    %c0_7 = arith.constant 0 : index
    %8 = vector.load %arg4[%c0_6, %c0_7] : memref<32x128xf32, #tpu.memory_space<vmem>>, vector<32x128xf32>
    tpu.vector_store %arg4[%c0_6, %c0_7], %7 {strides = array<i32>} : memref<32x128xf32, #tpu.memory_space<vmem>>, vector<32x128xf32>,
    return
  }
  func.func @transform_0(%arg0: i32) -> (i32, i32) {
    %c0_i32 = arith.constant 0 : i32
    %c0_i32_0 = arith.constant 0 : i32
    return %arg0, %c0_i32 : i32, i32
  }
  func.func @transform_1(%arg0: i32) -> (i32, i32) {
    %c0_i32 = arith.constant 0 : i32
    %c0_i32_0 = arith.constant 0 : i32
    %c0_i32_1 = arith.constant 0 : i32
    return %c0_i32, %c0_i32_0 : i32, i32
  }
  func.func @transform_2(%arg0: i32) -> (i32, i32) {
    %c0_i32 = arith.constant 0 : i32
    %c0_i32_0 = arith.constant 0 : i32
    %c0_i32_1 = arith.constant 0 : i32
    return %c0_i32, %c0_i32_0 : i32, i32
  }
  func.func @transform_3(%arg0: i32) -> (i32, i32) {
    %c0_i32 = arith.constant 0 : i32
    %c0_i32_0 = arith.constant 0 : i32
    return %arg0, %c0_i32 : i32, i32
  }
}

module attributes {stable_mosaic.version = 11 : i64} {
  func.func @_mm_act_kernel(%arg0: i32, %arg1: memref<8x256xf32, #tpu.memory_space<vmem>>, %arg2: memref<256x128xf32, #tpu.memory_space<vmem>>, %arg3: memref<1x128xf32, #tpu.memory_space<vmem>>, %arg4: memref<8x128xf32, #tpu.memory_space<vmem>>) attributes {dimension_semantics = [#tpu.dimension_semantics<parallel>], iteration_bounds = array<i64: 1>, scalar_prefetch = 0 : i64, scratch_operands = 0 : i64, tpu.core_type = #tpu.core_type<tc>, window_params = [{transform_indices = @transform_0, window_bounds = array<i64: 8, 256>}, {pipeline_mode = #tpu.pipeline_mode<synchronous>, transform_indices = @transform_1, window_bounds = array<i64: 256, 128>}, {pipeline_mode = #tpu.pipeline_mode<synchronous>, transform_indices = @transform_2, window_bounds = array<i64: 1, 128>}, {transform_indices = @transform_3, window_bounds = array<i64: 8, 128>}]} {
    %c0 = arith.constant 0 : index
    %c0_0 = arith.constant 0 : index
    %0 = vector.load %arg1[%c0, %c0_0] : memref<8x256xf32, #tpu.memory_space<vmem>>, vector<8x256xf32>
    %c0_1 = arith.constant 0 : index
    %c0_2 = arith.constant 0 : index
    %1 = vector.load %arg2[%c0_1, %c0_2] : memref<256x128xf32, #tpu.memory_space<vmem>>, vector<256x128xf32>
    %cst = arith.constant dense<0.000000e+00> : vector<8x128xf32>
    %2 = tpu.matmul %0, %1, %cst {dimension_numbers = #tpu.dot_dimension_numbers<[1], [0], [0], [1], [0, 0, 1, 1], [], []>} : vector<8x256xf32>, vector<256x128xf32>, vector<8x128xf32> -> vector<8x128xf32>
    %c0_3 = arith.constant 0 : index
    %c0_4 = arith.constant 0 : index
    %3 = vector.load %arg3[%c0_3, %c0_4] : memref<1x128xf32, #tpu.memory_space<vmem>>, vector<1x128xf32>
    %4 = vector.broadcast %3 : vector<1x128xf32> to vector<8x128xf32>
    %5 = arith.addf %2, %4 : vector<8x128xf32>
    %cst_5 = arith.constant 0.000000e+00 : f32
    %6 = vector.broadcast %cst_5 : f32 to vector<8x128xf32>
    %7 = arith.maximumf %5, %6 : vector<8x128xf32>
    %c0_6 = arith.constant 0 : index
    %c0_7 = arith.constant 0 : index
    %8 = vector.load %arg4[%c0_6, %c0_7] : memref<8x128xf32, #tpu.memory_space<vmem>>, vector<8x128xf32>
    tpu.vector_store %arg4[%c0_6, %c0_7], %7 {strides = array<i32>} : memref<8x128xf32, #tpu.memory_space<vmem>>, vector<8x128xf32>,
    return
  }
  func.func @transform_0(%arg0: i32) -> (i32, i32) {
    %c0_i32 = arith.constant 0 : i32
    %c0_i32_0 = arith.constant 0 : i32
    return %arg0, %c0_i32 : i32, i32
  }
  func.func @transform_1(%arg0: i32) -> (i32, i32) {
    %c0_i32 = arith.constant 0 : i32
    %c0_i32_0 = arith.constant 0 : i32
    %c0_i32_1 = arith.constant 0 : i32
    return %c0_i32, %c0_i32_0 : i32, i32
  }
  func.func @transform_2(%arg0: i32) -> (i32, i32) {
    %c0_i32 = arith.constant 0 : i32
    %c0_i32_0 = arith.constant 0 : i32
    %c0_i32_1 = arith.constant 0 : i32
    return %c0_i32, %c0_i32_0 : i32, i32
  }
  func.func @transform_3(%arg0: i32) -> (i32, i32) {
    %c0_i32 = arith.constant 0 : i32
    %c0_i32_0 = arith.constant 0 : i32
    return %arg0, %c0_i32 : i32, i32
  }
}

module attributes {stable_mosaic.version = 11 : i64} {
  func.func @_mm_act_kernel(%arg0: i32, %arg1: memref<8x256xf32, #tpu.memory_space<vmem>>, %arg2: memref<256x128xf32, #tpu.memory_space<vmem>>, %arg3: memref<1x128xf32, #tpu.memory_space<vmem>>, %arg4: memref<8x128xf32, #tpu.memory_space<vmem>>) attributes {dimension_semantics = [#tpu.dimension_semantics<parallel>], iteration_bounds = array<i64: 1>, scalar_prefetch = 0 : i64, scratch_operands = 0 : i64, tpu.core_type = #tpu.core_type<tc>, window_params = [{transform_indices = @transform_0, window_bounds = array<i64: 8, 256>}, {pipeline_mode = #tpu.pipeline_mode<synchronous>, transform_indices = @transform_1, window_bounds = array<i64: 256, 128>}, {pipeline_mode = #tpu.pipeline_mode<synchronous>, transform_indices = @transform_2, window_bounds = array<i64: 1, 128>}, {transform_indices = @transform_3, window_bounds = array<i64: 8, 128>}]} {
    %c0 = arith.constant 0 : index
    %c0_0 = arith.constant 0 : index
    %0 = vector.load %arg1[%c0, %c0_0] : memref<8x256xf32, #tpu.memory_space<vmem>>, vector<8x256xf32>
    %c0_1 = arith.constant 0 : index
    %c0_2 = arith.constant 0 : index
    %1 = vector.load %arg2[%c0_1, %c0_2] : memref<256x128xf32, #tpu.memory_space<vmem>>, vector<256x128xf32>
    %cst = arith.constant dense<0.000000e+00> : vector<8x128xf32>
    %2 = tpu.matmul %0, %1, %cst {dimension_numbers = #tpu.dot_dimension_numbers<[1], [0], [0], [1], [0, 0, 1, 1], [], []>} : vector<8x256xf32>, vector<256x128xf32>, vector<8x128xf32> -> vector<8x128xf32>
    %c0_3 = arith.constant 0 : index
    %c0_4 = arith.constant 0 : index
    %3 = vector.load %arg3[%c0_3, %c0_4] : memref<1x128xf32, #tpu.memory_space<vmem>>, vector<1x128xf32>
    %4 = vector.broadcast %3 : vector<1x128xf32> to vector<8x128xf32>
    %5 = arith.addf %2, %4 : vector<8x128xf32>
    %c0_5 = arith.constant 0 : index
    %c0_6 = arith.constant 0 : index
    %6 = vector.load %arg4[%c0_5, %c0_6] : memref<8x128xf32, #tpu.memory_space<vmem>>, vector<8x128xf32>
    tpu.vector_store %arg4[%c0_5, %c0_6], %5 {strides = array<i32>} : memref<8x128xf32, #tpu.memory_space<vmem>>, vector<8x128xf32>,
    return
  }
  func.func @transform_0(%arg0: i32) -> (i32, i32) {
    %c0_i32 = arith.constant 0 : i32
    %c0_i32_0 = arith.constant 0 : i32
    return %arg0, %c0_i32 : i32, i32
  }
  func.func @transform_1(%arg0: i32) -> (i32, i32) {
    %c0_i32 = arith.constant 0 : i32
    %c0_i32_0 = arith.constant 0 : i32
    %c0_i32_1 = arith.constant 0 : i32
    return %c0_i32, %c0_i32_0 : i32, i32
  }
  func.func @transform_2(%arg0: i32) -> (i32, i32) {
    %c0_i32 = arith.constant 0 : i32
    %c0_i32_0 = arith.constant 0 : i32
    %c0_i32_1 = arith.constant 0 : i32
    return %c0_i32, %c0_i32_0 : i32, i32
  }
  func.func @transform_3(%arg0: i32) -> (i32, i32) {
    %c0_i32 = arith.constant 0 : i32
    %c0_i32_0 = arith.constant 0 : i32
    return %arg0, %c0_i32 : i32, i32
  }
}

module attributes {stable_mosaic.version = 11 : i64} {
  func.func @_mm_act_kernel(%arg0: i32, %arg1: memref<8x128xf32, #tpu.memory_space<vmem>>, %arg2: memref<128x128xf32, #tpu.memory_space<vmem>>, %arg3: memref<1x128xf32, #tpu.memory_space<vmem>>, %arg4: memref<8x128xf32, #tpu.memory_space<vmem>>) attributes {dimension_semantics = [#tpu.dimension_semantics<parallel>], iteration_bounds = array<i64: 1>, scalar_prefetch = 0 : i64, scratch_operands = 0 : i64, tpu.core_type = #tpu.core_type<tc>, window_params = [{transform_indices = @transform_0, window_bounds = array<i64: 8, 128>}, {pipeline_mode = #tpu.pipeline_mode<synchronous>, transform_indices = @transform_1, window_bounds = array<i64: 128, 128>}, {pipeline_mode = #tpu.pipeline_mode<synchronous>, transform_indices = @transform_2, window_bounds = array<i64: 1, 128>}, {transform_indices = @transform_3, window_bounds = array<i64: 8, 128>}]} {
    %c0 = arith.constant 0 : index
    %c0_0 = arith.constant 0 : index
    %0 = vector.load %arg1[%c0, %c0_0] : memref<8x128xf32, #tpu.memory_space<vmem>>, vector<8x128xf32>
    %c0_1 = arith.constant 0 : index
    %c0_2 = arith.constant 0 : index
    %1 = vector.load %arg2[%c0_1, %c0_2] : memref<128x128xf32, #tpu.memory_space<vmem>>, vector<128x128xf32>
    %cst = arith.constant dense<0.000000e+00> : vector<8x128xf32>
    %2 = tpu.matmul %0, %1, %cst {dimension_numbers = #tpu.dot_dimension_numbers<[1], [0], [0], [1], [0, 0, 1, 1], [], []>} : vector<8x128xf32>, vector<128x128xf32>, vector<8x128xf32> -> vector<8x128xf32>
    %c0_3 = arith.constant 0 : index
    %c0_4 = arith.constant 0 : index
    %3 = vector.load %arg3[%c0_3, %c0_4] : memref<1x128xf32, #tpu.memory_space<vmem>>, vector<1x128xf32>
    %4 = vector.broadcast %3 : vector<1x128xf32> to vector<8x128xf32>
    %5 = arith.addf %2, %4 : vector<8x128xf32>
    %cst_5 = arith.constant 0.000000e+00 : f32
    %6 = vector.broadcast %cst_5 : f32 to vector<8x128xf32>
    %7 = arith.maximumf %5, %6 : vector<8x128xf32>
    %c0_6 = arith.constant 0 : index
    %c0_7 = arith.constant 0 : index
    %8 = vector.load %arg4[%c0_6, %c0_7] : memref<8x128xf32, #tpu.memory_space<vmem>>, vector<8x128xf32>
    tpu.vector_store %arg4[%c0_6, %c0_7], %7 {strides = array<i32>} : memref<8x128xf32, #tpu.memory_space<vmem>>, vector<8x128xf32>,
    return
  }
  func.func @transform_0(%arg0: i32) -> (i32, i32) {
    %c0_i32 = arith.constant 0 : i32
    %c0_i32_0 = arith.constant 0 : i32
    return %arg0, %c0_i32 : i32, i32
  }
  func.func @transform_1(%arg0: i32) -> (i32, i32) {
    %c0_i32 = arith.constant 0 : i32
    %c0_i32_0 = arith.constant 0 : i32
    %c0_i32_1 = arith.constant 0 : i32
    return %c0_i32, %c0_i32_0 : i32, i32
  }
  func.func @transform_2(%arg0: i32) -> (i32, i32) {
    %c0_i32 = arith.constant 0 : i32
    %c0_i32_0 = arith.constant 0 : i32
    %c0_i32_1 = arith.constant 0 : i32
    return %c0_i32, %c0_i32_0 : i32, i32
  }
  func.func @transform_3(%arg0: i32) -> (i32, i32) {
    %c0_i32 = arith.constant 0 : i32
    %c0_i32_0 = arith.constant 0 : i32
    return %arg0, %c0_i32 : i32, i32
  }
}

module attributes {stable_mosaic.version = 11 : i64} {
  func.func @_mm_act_kernel(%arg0: i32, %arg1: memref<32x128xf32, #tpu.memory_space<vmem>>, %arg2: memref<128x128xf32, #tpu.memory_space<vmem>>, %arg3: memref<1x128xf32, #tpu.memory_space<vmem>>, %arg4: memref<32x128xf32, #tpu.memory_space<vmem>>) attributes {dimension_semantics = [#tpu.dimension_semantics<parallel>], iteration_bounds = array<i64: 1>, scalar_prefetch = 0 : i64, scratch_operands = 0 : i64, tpu.core_type = #tpu.core_type<tc>, window_params = [{transform_indices = @transform_0, window_bounds = array<i64: 32, 128>}, {pipeline_mode = #tpu.pipeline_mode<synchronous>, transform_indices = @transform_1, window_bounds = array<i64: 128, 128>}, {pipeline_mode = #tpu.pipeline_mode<synchronous>, transform_indices = @transform_2, window_bounds = array<i64: 1, 128>}, {transform_indices = @transform_3, window_bounds = array<i64: 32, 128>}]} {
    %c0 = arith.constant 0 : index
    %c0_0 = arith.constant 0 : index
    %0 = vector.load %arg1[%c0, %c0_0] : memref<32x128xf32, #tpu.memory_space<vmem>>, vector<32x128xf32>
    %c0_1 = arith.constant 0 : index
    %c0_2 = arith.constant 0 : index
    %1 = vector.load %arg2[%c0_1, %c0_2] : memref<128x128xf32, #tpu.memory_space<vmem>>, vector<128x128xf32>
    %cst = arith.constant dense<0.000000e+00> : vector<32x128xf32>
    %2 = tpu.matmul %0, %1, %cst {dimension_numbers = #tpu.dot_dimension_numbers<[1], [0], [0], [1], [0, 0, 1, 1], [], []>} : vector<32x128xf32>, vector<128x128xf32>, vector<32x128xf32> -> vector<32x128xf32>
    %c0_3 = arith.constant 0 : index
    %c0_4 = arith.constant 0 : index
    %3 = vector.load %arg3[%c0_3, %c0_4] : memref<1x128xf32, #tpu.memory_space<vmem>>, vector<1x128xf32>
    %4 = vector.broadcast %3 : vector<1x128xf32> to vector<32x128xf32>
    %5 = arith.addf %2, %4 : vector<32x128xf32>
    %c0_5 = arith.constant 0 : index
    %c0_6 = arith.constant 0 : index
    %6 = vector.load %arg4[%c0_5, %c0_6] : memref<32x128xf32, #tpu.memory_space<vmem>>, vector<32x128xf32>
    tpu.vector_store %arg4[%c0_5, %c0_6], %5 {strides = array<i32>} : memref<32x128xf32, #tpu.memory_space<vmem>>, vector<32x128xf32>,
    return
  }
  func.func @transform_0(%arg0: i32) -> (i32, i32) {
    %c0_i32 = arith.constant 0 : i32
    %c0_i32_0 = arith.constant 0 : i32
    return %arg0, %c0_i32 : i32, i32
  }
  func.func @transform_1(%arg0: i32) -> (i32, i32) {
    %c0_i32 = arith.constant 0 : i32
    %c0_i32_0 = arith.constant 0 : i32
    %c0_i32_1 = arith.constant 0 : i32
    return %c0_i32, %c0_i32_0 : i32, i32
  }
  func.func @transform_2(%arg0: i32) -> (i32, i32) {
    %c0_i32 = arith.constant 0 : i32
    %c0_i32_0 = arith.constant 0 : i32
    %c0_i32_1 = arith.constant 0 : i32
    return %c0_i32, %c0_i32_0 : i32, i32
  }
  func.func @transform_3(%arg0: i32) -> (i32, i32) {
    %c0_i32 = arith.constant 0 : i32
    %c0_i32_0 = arith.constant 0 : i32
    return %arg0, %c0_i32 : i32, i32
  }
}

module attributes {stable_mosaic.version = 11 : i64} {
  func.func @_mm_gdn_kernel(%arg0: i32, %arg1: memref<32x128xf32, #tpu.memory_space<vmem>>, %arg2: memref<128x128xf32, #tpu.memory_space<vmem>>, %arg3: memref<1x128xf32, #tpu.memory_space<vmem>>, %arg4: memref<128x128xf32, #tpu.memory_space<vmem>>, %arg5: memref<1x128xf32, #tpu.memory_space<vmem>>, %arg6: memref<32x128xf32, #tpu.memory_space<vmem>>) attributes {dimension_semantics = [#tpu.dimension_semantics<parallel>], iteration_bounds = array<i64: 1>, scalar_prefetch = 0 : i64, scratch_operands = 0 : i64, tpu.core_type = #tpu.core_type<tc>, window_params = [{transform_indices = @transform_0, window_bounds = array<i64: 32, 128>}, {pipeline_mode = #tpu.pipeline_mode<synchronous>, transform_indices = @transform_1, window_bounds = array<i64: 128, 128>}, {pipeline_mode = #tpu.pipeline_mode<synchronous>, transform_indices = @transform_2, window_bounds = array<i64: 1, 128>}, {pipeline_mode = #tpu.pipeline_mode<synchronous>, transform_indices = @transform_3, window_bounds = array<i64: 128, 128>}, {pipeline_mode = #tpu.pipeline_mode<synchronous>, transform_indices = @transform_4, window_bounds = array<i64: 1, 128>}, {transform_indices = @transform_5, window_bounds = array<i64: 32, 128>}]} {
    %c0 = arith.constant 0 : index
    %c0_0 = arith.constant 0 : index
    %0 = vector.load %arg1[%c0, %c0_0] : memref<32x128xf32, #tpu.memory_space<vmem>>, vector<32x128xf32>
    %c0_1 = arith.constant 0 : index
    %c0_2 = arith.constant 0 : index
    %1 = vector.load %arg2[%c0_1, %c0_2] : memref<128x128xf32, #tpu.memory_space<vmem>>, vector<128x128xf32>
    %cst = arith.constant dense<0.000000e+00> : vector<32x128xf32>
    %2 = tpu.matmul %0, %1, %cst {dimension_numbers = #tpu.dot_dimension_numbers<[1], [0], [0], [1], [0, 0, 1, 1], [], []>} : vector<32x128xf32>, vector<128x128xf32>, vector<32x128xf32> -> vector<32x128xf32>
    %c0_3 = arith.constant 0 : index
    %c0_4 = arith.constant 0 : index
    %3 = vector.load %arg3[%c0_3, %c0_4] : memref<1x128xf32, #tpu.memory_space<vmem>>, vector<1x128xf32>
    %4 = vector.broadcast %3 : vector<1x128xf32> to vector<32x128xf32>
    %5 = arith.addf %2, %4 : vector<32x128xf32>
    %6 = arith.mulf %5, %5 : vector<32x128xf32>
    %c0_5 = arith.constant 0 : index
    %c0_6 = arith.constant 0 : index
    %7 = vector.load %arg4[%c0_5, %c0_6] : memref<128x128xf32, #tpu.memory_space<vmem>>, vector<128x128xf32>
    %cst_7 = arith.constant dense<0.000000e+00> : vector<32x128xf32>
    %8 = tpu.matmul %6, %7, %cst_7 {dimension_numbers = #tpu.dot_dimension_numbers<[1], [0], [0], [1], [0, 0, 1, 1], [], []>} : vector<32x128xf32>, vector<128x128xf32>, vector<32x128xf32> -> vector<32x128xf32>
    %c0_8 = arith.constant 0 : index
    %c0_9 = arith.constant 0 : index
    %9 = vector.load %arg5[%c0_8, %c0_9] : memref<1x128xf32, #tpu.memory_space<vmem>>, vector<1x128xf32>
    %10 = vector.broadcast %9 : vector<1x128xf32> to vector<32x128xf32>
    %11 = arith.addf %8, %10 : vector<32x128xf32>
    %12 = math.sqrt %11 : vector<32x128xf32>
    %13 = arith.mulf %5, %12 : vector<32x128xf32>
    %c0_10 = arith.constant 0 : index
    %c0_11 = arith.constant 0 : index
    %14 = vector.load %arg6[%c0_10, %c0_11] : memref<32x128xf32, #tpu.memory_space<vmem>>, vector<32x128xf32>
    tpu.vector_store %arg6[%c0_10, %c0_11], %13 {strides = array<i32>} : memref<32x128xf32, #tpu.memory_space<vmem>>, vector<32x128xf32>,
    return
  }
  func.func @transform_0(%arg0: i32) -> (i32, i32) {
    %c0_i32 = arith.constant 0 : i32
    %c0_i32_0 = arith.constant 0 : i32
    return %arg0, %c0_i32 : i32, i32
  }
  func.func @transform_1(%arg0: i32) -> (i32, i32) {
    %c0_i32 = arith.constant 0 : i32
    %c0_i32_0 = arith.constant 0 : i32
    %c0_i32_1 = arith.constant 0 : i32
    return %c0_i32, %c0_i32_0 : i32, i32
  }
  func.func @transform_2(%arg0: i32) -> (i32, i32) {
    %c0_i32 = arith.constant 0 : i32
    %c0_i32_0 = arith.constant 0 : i32
    %c0_i32_1 = arith.constant 0 : i32
    return %c0_i32, %c0_i32_0 : i32, i32
  }
  func.func @transform_3(%arg0: i32) -> (i32, i32) {
    %c0_i32 = arith.constant 0 : i32
    %c0_i32_0 = arith.constant 0 : i32
    %c0_i32_1 = arith.constant 0 : i32
    return %c0_i32, %c0_i32_0 : i32, i32
  }
  func.func @transform_4(%arg0: i32) -> (i32, i32) {
    %c0_i32 = arith.constant 0 : i32
    %c0_i32_0 = arith.constant 0 : i32
    %c0_i32_1 = arith.constant 0 : i32
    return %c0_i32, %c0_i32_0 : i32, i32
  }
  func.func @transform_5(%arg0: i32) -> (i32, i32) {
    %c0_i32 = arith.constant 0 : i32
    %c0_i32_0 = arith.constant 0 : i32
    return %arg0, %c0_i32 : i32, i32
  }
}

module attributes {stable_mosaic.version = 11 : i64} {
  func.func @_mm_gdn_kernel(%arg0: i32, %arg1: memref<128x128xf32, #tpu.memory_space<vmem>>, %arg2: memref<128x128xf32, #tpu.memory_space<vmem>>, %arg3: memref<1x128xf32, #tpu.memory_space<vmem>>, %arg4: memref<128x128xf32, #tpu.memory_space<vmem>>, %arg5: memref<1x128xf32, #tpu.memory_space<vmem>>, %arg6: memref<128x128xf32, #tpu.memory_space<vmem>>) attributes {dimension_semantics = [#tpu.dimension_semantics<parallel>], iteration_bounds = array<i64: 1>, scalar_prefetch = 0 : i64, scratch_operands = 0 : i64, tpu.core_type = #tpu.core_type<tc>, window_params = [{transform_indices = @transform_0, window_bounds = array<i64: 128, 128>}, {pipeline_mode = #tpu.pipeline_mode<synchronous>, transform_indices = @transform_1, window_bounds = array<i64: 128, 128>}, {pipeline_mode = #tpu.pipeline_mode<synchronous>, transform_indices = @transform_2, window_bounds = array<i64: 1, 128>}, {pipeline_mode = #tpu.pipeline_mode<synchronous>, transform_indices = @transform_3, window_bounds = array<i64: 128, 128>}, {pipeline_mode = #tpu.pipeline_mode<synchronous>, transform_indices = @transform_4, window_bounds = array<i64: 1, 128>}, {transform_indices = @transform_5, window_bounds = array<i64: 128, 128>}]} {
    %c0 = arith.constant 0 : index
    %c0_0 = arith.constant 0 : index
    %0 = vector.load %arg1[%c0, %c0_0] : memref<128x128xf32, #tpu.memory_space<vmem>>, vector<128x128xf32>
    %c0_1 = arith.constant 0 : index
    %c0_2 = arith.constant 0 : index
    %1 = vector.load %arg2[%c0_1, %c0_2] : memref<128x128xf32, #tpu.memory_space<vmem>>, vector<128x128xf32>
    %cst = arith.constant dense<0.000000e+00> : vector<128x128xf32>
    %2 = tpu.matmul %0, %1, %cst {dimension_numbers = #tpu.dot_dimension_numbers<[1], [0], [0], [1], [0, 0, 1, 1], [], []>} : vector<128x128xf32>, vector<128x128xf32>, vector<128x128xf32> -> vector<128x128xf32>
    %c0_3 = arith.constant 0 : index
    %c0_4 = arith.constant 0 : index
    %3 = vector.load %arg3[%c0_3, %c0_4] : memref<1x128xf32, #tpu.memory_space<vmem>>, vector<1x128xf32>
    %4 = vector.broadcast %3 : vector<1x128xf32> to vector<128x128xf32>
    %5 = arith.addf %2, %4 : vector<128x128xf32>
    %6 = arith.mulf %5, %5 : vector<128x128xf32>
    %c0_5 = arith.constant 0 : index
    %c0_6 = arith.constant 0 : index
    %7 = vector.load %arg4[%c0_5, %c0_6] : memref<128x128xf32, #tpu.memory_space<vmem>>, vector<128x128xf32>
    %cst_7 = arith.constant dense<0.000000e+00> : vector<128x128xf32>
    %8 = tpu.matmul %6, %7, %cst_7 {dimension_numbers = #tpu.dot_dimension_numbers<[1], [0], [0], [1], [0, 0, 1, 1], [], []>} : vector<128x128xf32>, vector<128x128xf32>, vector<128x128xf32> -> vector<128x128xf32>
    %c0_8 = arith.constant 0 : index
    %c0_9 = arith.constant 0 : index
    %9 = vector.load %arg5[%c0_8, %c0_9] : memref<1x128xf32, #tpu.memory_space<vmem>>, vector<1x128xf32>
    %10 = vector.broadcast %9 : vector<1x128xf32> to vector<128x128xf32>
    %11 = arith.addf %8, %10 : vector<128x128xf32>
    %12 = math.sqrt %11 : vector<128x128xf32>
    %13 = arith.mulf %5, %12 : vector<128x128xf32>
    %c0_10 = arith.constant 0 : index
    %c0_11 = arith.constant 0 : index
    %14 = vector.load %arg6[%c0_10, %c0_11] : memref<128x128xf32, #tpu.memory_space<vmem>>, vector<128x128xf32>
    tpu.vector_store %arg6[%c0_10, %c0_11], %13 {strides = array<i32>} : memref<128x128xf32, #tpu.memory_space<vmem>>, vector<128x128xf32>,
    return
  }
  func.func @transform_0(%arg0: i32) -> (i32, i32) {
    %c0_i32 = arith.constant 0 : i32
    %c0_i32_0 = arith.constant 0 : i32
    return %arg0, %c0_i32 : i32, i32
  }
  func.func @transform_1(%arg0: i32) -> (i32, i32) {
    %c0_i32 = arith.constant 0 : i32
    %c0_i32_0 = arith.constant 0 : i32
    %c0_i32_1 = arith.constant 0 : i32
    return %c0_i32, %c0_i32_0 : i32, i32
  }
  func.func @transform_2(%arg0: i32) -> (i32, i32) {
    %c0_i32 = arith.constant 0 : i32
    %c0_i32_0 = arith.constant 0 : i32
    %c0_i32_1 = arith.constant 0 : i32
    return %c0_i32, %c0_i32_0 : i32, i32
  }
  func.func @transform_3(%arg0: i32) -> (i32, i32) {
    %c0_i32 = arith.constant 0 : i32
    %c0_i32_0 = arith.constant 0 : i32
    %c0_i32_1 = arith.constant 0 : i32
    return %c0_i32, %c0_i32_0 : i32, i32
  }
  func.func @transform_4(%arg0: i32) -> (i32, i32) {
    %c0_i32 = arith.constant 0 : i32
    %c0_i32_0 = arith.constant 0 : i32
    %c0_i32_1 = arith.constant 0 : i32
    return %c0_i32, %c0_i32_0 : i32, i32
  }
  func.func @transform_5(%arg0: i32) -> (i32, i32) {
    %c0_i32 = arith.constant 0 : i32
    %c0_i32_0 = arith.constant 0 : i32
    return %arg0, %c0_i32 : i32, i32
  }
}

module attributes {stable_mosaic.version = 11 : i64} {
  func.func @_mm_gdn_kernel(%arg0: i32, %arg1: memref<512x128xf32, #tpu.memory_space<vmem>>, %arg2: memref<128x128xf32, #tpu.memory_space<vmem>>, %arg3: memref<1x128xf32, #tpu.memory_space<vmem>>, %arg4: memref<128x128xf32, #tpu.memory_space<vmem>>, %arg5: memref<1x128xf32, #tpu.memory_space<vmem>>, %arg6: memref<512x128xf32, #tpu.memory_space<vmem>>) attributes {dimension_semantics = [#tpu.dimension_semantics<parallel>], iteration_bounds = array<i64: 1>, scalar_prefetch = 0 : i64, scratch_operands = 0 : i64, tpu.core_type = #tpu.core_type<tc>, window_params = [{transform_indices = @transform_0, window_bounds = array<i64: 512, 128>}, {pipeline_mode = #tpu.pipeline_mode<synchronous>, transform_indices = @transform_1, window_bounds = array<i64: 128, 128>}, {pipeline_mode = #tpu.pipeline_mode<synchronous>, transform_indices = @transform_2, window_bounds = array<i64: 1, 128>}, {pipeline_mode = #tpu.pipeline_mode<synchronous>, transform_indices = @transform_3, window_bounds = array<i64: 128, 128>}, {pipeline_mode = #tpu.pipeline_mode<synchronous>, transform_indices = @transform_4, window_bounds = array<i64: 1, 128>}, {transform_indices = @transform_5, window_bounds = array<i64: 512, 128>}]} {
    %c0 = arith.constant 0 : index
    %c0_0 = arith.constant 0 : index
    %0 = vector.load %arg1[%c0, %c0_0] : memref<512x128xf32, #tpu.memory_space<vmem>>, vector<512x128xf32>
    %c0_1 = arith.constant 0 : index
    %c0_2 = arith.constant 0 : index
    %1 = vector.load %arg2[%c0_1, %c0_2] : memref<128x128xf32, #tpu.memory_space<vmem>>, vector<128x128xf32>
    %cst = arith.constant dense<0.000000e+00> : vector<512x128xf32>
    %2 = tpu.matmul %0, %1, %cst {dimension_numbers = #tpu.dot_dimension_numbers<[1], [0], [0], [1], [0, 0, 1, 1], [], []>} : vector<512x128xf32>, vector<128x128xf32>, vector<512x128xf32> -> vector<512x128xf32>
    %c0_3 = arith.constant 0 : index
    %c0_4 = arith.constant 0 : index
    %3 = vector.load %arg3[%c0_3, %c0_4] : memref<1x128xf32, #tpu.memory_space<vmem>>, vector<1x128xf32>
    %4 = vector.broadcast %3 : vector<1x128xf32> to vector<512x128xf32>
    %5 = arith.addf %2, %4 : vector<512x128xf32>
    %6 = arith.mulf %5, %5 : vector<512x128xf32>
    %c0_5 = arith.constant 0 : index
    %c0_6 = arith.constant 0 : index
    %7 = vector.load %arg4[%c0_5, %c0_6] : memref<128x128xf32, #tpu.memory_space<vmem>>, vector<128x128xf32>
    %cst_7 = arith.constant dense<0.000000e+00> : vector<512x128xf32>
    %8 = tpu.matmul %6, %7, %cst_7 {dimension_numbers = #tpu.dot_dimension_numbers<[1], [0], [0], [1], [0, 0, 1, 1], [], []>} : vector<512x128xf32>, vector<128x128xf32>, vector<512x128xf32> -> vector<512x128xf32>
    %c0_8 = arith.constant 0 : index
    %c0_9 = arith.constant 0 : index
    %9 = vector.load %arg5[%c0_8, %c0_9] : memref<1x128xf32, #tpu.memory_space<vmem>>, vector<1x128xf32>
    %10 = vector.broadcast %9 : vector<1x128xf32> to vector<512x128xf32>
    %11 = arith.addf %8, %10 : vector<512x128xf32>
    %12 = math.sqrt %11 : vector<512x128xf32>
    %13 = arith.mulf %5, %12 : vector<512x128xf32>
    %c0_10 = arith.constant 0 : index
    %c0_11 = arith.constant 0 : index
    %14 = vector.load %arg6[%c0_10, %c0_11] : memref<512x128xf32, #tpu.memory_space<vmem>>, vector<512x128xf32>
    tpu.vector_store %arg6[%c0_10, %c0_11], %13 {strides = array<i32>} : memref<512x128xf32, #tpu.memory_space<vmem>>, vector<512x128xf32>,
    return
  }
  func.func @transform_0(%arg0: i32) -> (i32, i32) {
    %c0_i32 = arith.constant 0 : i32
    %c0_i32_0 = arith.constant 0 : i32
    return %arg0, %c0_i32 : i32, i32
  }
  func.func @transform_1(%arg0: i32) -> (i32, i32) {
    %c0_i32 = arith.constant 0 : i32
    %c0_i32_0 = arith.constant 0 : i32
    %c0_i32_1 = arith.constant 0 : i32
    return %c0_i32, %c0_i32_0 : i32, i32
  }
  func.func @transform_2(%arg0: i32) -> (i32, i32) {
    %c0_i32 = arith.constant 0 : i32
    %c0_i32_0 = arith.constant 0 : i32
    %c0_i32_1 = arith.constant 0 : i32
    return %c0_i32, %c0_i32_0 : i32, i32
  }
  func.func @transform_3(%arg0: i32) -> (i32, i32) {
    %c0_i32 = arith.constant 0 : i32
    %c0_i32_0 = arith.constant 0 : i32
    %c0_i32_1 = arith.constant 0 : i32
    return %c0_i32, %c0_i32_0 : i32, i32
  }
  func.func @transform_4(%arg0: i32) -> (i32, i32) {
    %c0_i32 = arith.constant 0 : i32
    %c0_i32_0 = arith.constant 0 : i32
    %c0_i32_1 = arith.constant 0 : i32
    return %c0_i32, %c0_i32_0 : i32, i32
  }
  func.func @transform_5(%arg0: i32) -> (i32, i32) {
    %c0_i32 = arith.constant 0 : i32
    %c0_i32_0 = arith.constant 0 : i32
    return %arg0, %c0_i32 : i32, i32
  }
}

module attributes {stable_mosaic.version = 11 : i64} {
  func.func @_mm_act_kernel(%arg0: i32, %arg1: memref<512x128xf32, #tpu.memory_space<vmem>>, %arg2: memref<128x128xf32, #tpu.memory_space<vmem>>, %arg3: memref<1x128xf32, #tpu.memory_space<vmem>>, %arg4: memref<512x128xf32, #tpu.memory_space<vmem>>) attributes {dimension_semantics = [#tpu.dimension_semantics<parallel>], iteration_bounds = array<i64: 4>, scalar_prefetch = 0 : i64, scratch_operands = 0 : i64, tpu.core_type = #tpu.core_type<tc>, window_params = [{transform_indices = @transform_0, window_bounds = array<i64: 512, 128>}, {pipeline_mode = #tpu.pipeline_mode<synchronous>, transform_indices = @transform_1, window_bounds = array<i64: 128, 128>}, {pipeline_mode = #tpu.pipeline_mode<synchronous>, transform_indices = @transform_2, window_bounds = array<i64: 1, 128>}, {transform_indices = @transform_3, window_bounds = array<i64: 512, 128>}]} {
    %c0 = arith.constant 0 : index
    %c0_0 = arith.constant 0 : index
    %0 = vector.load %arg1[%c0, %c0_0] : memref<512x128xf32, #tpu.memory_space<vmem>>, vector<512x128xf32>
    %c0_1 = arith.constant 0 : index
    %c0_2 = arith.constant 0 : index
    %1 = vector.load %arg2[%c0_1, %c0_2] : memref<128x128xf32, #tpu.memory_space<vmem>>, vector<128x128xf32>
    %cst = arith.constant dense<0.000000e+00> : vector<512x128xf32>
    %2 = tpu.matmul %0, %1, %cst {dimension_numbers = #tpu.dot_dimension_numbers<[1], [0], [0], [1], [0, 0, 1, 1], [], []>} : vector<512x128xf32>, vector<128x128xf32>, vector<512x128xf32> -> vector<512x128xf32>
    %c0_3 = arith.constant 0 : index
    %c0_4 = arith.constant 0 : index
    %3 = vector.load %arg3[%c0_3, %c0_4] : memref<1x128xf32, #tpu.memory_space<vmem>>, vector<1x128xf32>
    %4 = vector.broadcast %3 : vector<1x128xf32> to vector<512x128xf32>
    %5 = arith.addf %2, %4 : vector<512x128xf32>
    %c0_5 = arith.constant 0 : index
    %c0_6 = arith.constant 0 : index
    %6 = vector.load %arg4[%c0_5, %c0_6] : memref<512x128xf32, #tpu.memory_space<vmem>>, vector<512x128xf32>
    tpu.vector_store %arg4[%c0_5, %c0_6], %5 {strides = array<i32>} : memref<512x128xf32, #tpu.memory_space<vmem>>, vector<512x128xf32>,
    return
  }
  func.func @transform_0(%arg0: i32) -> (i32, i32) {
    %c0_i32 = arith.constant 0 : i32
    %c0_i32_0 = arith.constant 0 : i32
    return %arg0, %c0_i32 : i32, i32
  }
  func.func @transform_1(%arg0: i32) -> (i32, i32) {
    %c0_i32 = arith.constant 0 : i32
    %c0_i32_0 = arith.constant 0 : i32
    %c0_i32_1 = arith.constant 0 : i32
    return %c0_i32, %c0_i32_0 : i32, i32
  }
  func.func @transform_2(%arg0: i32) -> (i32, i32) {
    %c0_i32 = arith.constant 0 : i32
    %c0_i32_0 = arith.constant 0 : i32
    %c0_i32_1 = arith.constant 0 : i32
    return %c0_i32, %c0_i32_0 : i32, i32
  }
  func.func @transform_3(%arg0: i32) -> (i32, i32) {
    %c0_i32 = arith.constant 0 : i32
    %c0_i32_0 = arith.constant 0 : i32
    return %arg0, %c0_i32 : i32, i32
  }
}

</mosaic_0001>

<bundles_post_ra>
// kernel: anf_hyperprior_forward.14
= control target key start
LH: loop header
LB: loop body
LE: loop exit
PB: predicated region body
PF: predicated region fallthrough
CT: control target
= control target key end

     0   :  { %s2087_s18 = smov 0   ;;  %s2797_s0 = inlined_call_operand.vmem [shape: f32[2048,128], index: 0, kind: input, shape index: {}]   ;;  %s2798_s1 = inlined_call_operand.vmem [shape: f32[128,128], index: 1, kind: input, shape index: {}]   ;;  %s2799_s2 = inlined_call_operand.vmem [shape: f32[1,128], index: 2, kind: input, shape index: {}]   ;;  %s2800_s3 = inlined_call_operand.vmem [shape: f32[128,128], index: 3, kind: input, shape index: {}]   ;;  %s2801_s4 = inlined_call_operand.vmem [shape: f32[1,128], index: 4, kind: input, shape index: {}]   ;;  %s2802_s5 = inlined_call_operand.vmem [shape: f32[2048,128], index: 5, kind: output, shape index: {}]  }
   0x1 LB: > { %s1420_s19 = sadd.s32 4294967295, %s2055_s18   ;;  %p1424_p0 = scmp.ge.s32.totalorder %s2055_s18, 1  ;;  %s2055_s18 = sphi %s2087_s18, %s15_s18  }
   0x2   : > { %p188_p1 = scmp.lt.s32.totalorder %s2055_s18, 5 }
   0x4   : > { %p189_p2 = pnand %p1424_p0, %p188_p1 }
   0x6   : > { %192 = sbr.rel (%p189_p2) target bundleno = 619 (0x26b), region = 40 }
   0xd   : > { %v292_v0 = vld [vmem:[%s2798_s1] sm:$0xff]  ;;  %v293_v1 = vld [vmem:[%s2798_s1 + $0x8] sm:$0xff]  ;;  %v294_v2 = vld [vmem:[%s2798_s1 + $0x10] sm:$0xff]  ;;  %s1425_s26 = sshll.u32 %s1420_s19, 6 }
   0xe   : > { %v1849_v3 = vpack.c.bf16 %v293_v1, %v292_v0  ;;  %v295_v4 = vld [vmem:[%s2798_s1 + $0x18] sm:$0xff]  ;;  %p217_p3 = scmp.lt.s32.totalorder %s1425_s26, 255  ;;  %v296_v6 = vld [vmem:[%s2798_s1 + $0x20] sm:$0xff]  ;;  %v297_v7 = vld [vmem:[%s2798_s1 + $0x28] sm:$0xff] }
   0xf   : > { %v1853_v5 = vpack.c.bf16 %v295_v4, %v294_v2  ;;  %v1857_v8 = vpack.c.bf16 %v297_v7, %v296_v6  ;;  %v298_v9 = vld [vmem:[%s2798_s1 + $0x30] sm:$0xff]  ;;  %v299_v10 = vld [vmem:[%s2798_s1 + $0x38] sm:$0xff]  ;;  %v300_v13 = vld [vmem:[%s2798_s1 + $0x40] sm:$0xff] }
  0x10   : > { %1850 = vmatprep.subr.bf16.mxu0 %v1849_v3  ;;  %s2846_s26 = smov (!%p217_p3, %s1425_s26), 255  ;;  %v1861_v12 = vpack.c.bf16 %v299_v10, %v298_v9  ;;  %v301_v14 = vld [vmem:[%s2798_s1 + $0x48] sm:$0xff]  ;;  %v302_v16 = vld [vmem:[%s2798_s1 + $0x50] sm:$0xff]  ;;  %v303_v17 = vld [vmem:[%s2798_s1 + $0x58] sm:$0xff] }
  0x11   : > { %1852 = vmatpush3.bf16.msra.mxu0 %v1849_v3  ;;  %s1426_s8 = sshll.u32 %s2846_s26, 3  ;;  %v1865_v15 = vpack.c.bf16 %v301_v14, %v300_v13  ;;  %v1869_v18 = vpack.c.bf16 %v303_v17, %v302_v16  ;;  %v304_v19 = vld [vmem:[%s2798_s1 + $0x60] sm:$0xff]  ;;  %v305_v20 = vld [vmem:[%s2798_s1 + $0x68] sm:$0xff]  ;;  %v306_v22 = vld [vmem:[%s2798_s1 + $0x70] sm:$0xff] }
  0x12   : > { %1854 = vmatprep.subr.bf16.mxu0 %v1853_v5  ;;  %s2127_s15 = scalar_lea.vmem %s2797_s0, %s1426_s8  ;;  %v1873_v21 = vpack.c.bf16 %v305_v20, %v304_v19  ;;  %v307_v23 = vld [vmem:[%s2798_s1 + $0x78] sm:$0xff]  ;;  %v764_v25 = vld [vmem:[%s2800_s3] sm:$0xff]  ;;  %v765_v26 = vld [vmem:[%s2800_s3 + $0x8] sm:$0xff]  ;;  %s2606_s29 = scalar_lea.vmem %s2802_s5, %s1426_s8 }
  0x13   : > { %v228_v11 = vld [vmem:[%s2127_s15] sm:$0xff]  ;;  %v1877_v24 = vpack.c.bf16 %v307_v23, %v306_v22  ;;  %v766_v27 = vld [vmem:[%s2800_s3 + $0x10] sm:$0xff]  ;;  %v229_v28 = vld [vmem:[%s2127_s15 + $0x8] sm:$0xff]  ;;  %v1881_v29 = vpack.c.bf16 %v765_v26, %v764_v25 }
  0x14   : > { %1625 = vmatprep.mubr.f32.mxu0 %v228_v11  ;;  %v767_v30 = vld [vmem:[%s2800_s3 + $0x18] sm:$0xff]  ;;  %v230_v31 = vld [vmem:[%s2127_s15 + $0x10] sm:$0xff]  ;;  %v768_v33 = vld [vmem:[%s2800_s3 + $0x20] sm:$0xff] }
  0x15   : > { %1856 = vmatpush3.bf16.msra.mxu0 %v1853_v5  ;;  %v1885_v32 = vpack.c.bf16 %v767_v30, %v766_v27  ;;  %v769_v34 = vld [vmem:[%s2800_s3 + $0x28] sm:$0xff]  ;;  %1882 = vmatprep.subr.bf16.mxu1 %v1881_v29  ;;  %v231_v35 = vld [vmem:[%s2127_s15 + $0x18] sm:$0xff]  ;;  %v232_v37 = vld [vmem:[%s2127_s15 + $0x20] sm:$0xff] }
  0x16   : > { %1858 = vmatprep.subr.bf16.mxu0 %v1857_v8  ;;  %1884 = vmatpush3.bf16.msra.mxu1 %v1881_v29  ;;  %v1889_v36 = vpack.c.bf16 %v769_v34, %v768_v33  ;;  %v770_v38 = vld [vmem:[%s2800_s3 + $0x30] sm:$0xff]  ;;  %v771_v39 = vld [vmem:[%s2800_s3 + $0x38] sm:$0xff]  ;;  %v233_v40 = vld [vmem:[%s2127_s15 + $0x28] sm:$0xff] }
  0x17   : > { %1886 = vmatprep.subr.bf16.mxu1 %v1885_v32  ;;  %v1893_v41 = vpack.c.bf16 %v771_v39, %v770_v38  ;;  %v234_v42 = vld [vmem:[%s2127_s15 + $0x30] sm:$0xff]  ;;  %v772_v43 = vld [vmem:[%s2800_s3 + $0x40] sm:$0xff]  ;;  %v773_v44 = vld [vmem:[%s2800_s3 + $0x48] sm:$0xff] }
  0x18   : > { %v235_v45 = vld [vmem:[%s2127_s15 + $0x38] sm:$0xff]  ;;  %v1897_v46 = vpack.c.bf16 %v773_v44, %v772_v43  ;;  %v236_v47 = vld [vmem:[%s2127_s15 + $0x40] sm:$0xff]  ;;  %v774_v48 = vld [vmem:[%s2800_s3 + $0x50] sm:$0xff] }
  0x19   : > { %1860 = vmatpush3.bf16.msra.mxu0 %v1857_v8  ;;  %v775_v49 = vld [vmem:[%s2800_s3 + $0x58] sm:$0xff]  ;;  %v237_v50 = vld [vmem:[%s2127_s15 + $0x48] sm:$0xff]  ;;  %v238_v52 = vld [vmem:[%s2127_s15 + $0x50] sm:$0xff] }
  0x1a   : > { %1862 = vmatprep.subr.bf16.mxu0 %v1861_v12  ;;  %1888 = vmatpush3.bf16.msra.mxu1 %v1885_v32  ;;  %v1901_v51 = vpack.c.bf16 %v775_v49, %v774_v48  ;;  %v776_v53 = vld [vmem:[%s2800_s3 + $0x60] sm:$0xff]  ;;  %v777_v54 = vld [vmem:[%s2800_s3 + $0x68] sm:$0xff]  ;;  %v239_v55 = vld [vmem:[%s2127_s15 + $0x58] sm:$0xff] }
  0x1b   : > { %1890 = vmatprep.subr.bf16.mxu1 %v1889_v36  ;;  %v1905_v56 = vpack.c.bf16 %v777_v54, %v776_v53  ;;  %v240_v57 = vld [vmem:[%s2127_s15 + $0x60] sm:$0xff]  ;;  %v241_v58 = vld [vmem:[%s2127_s15 + $0x68] sm:$0xff]  ;;  %v242_v59 = vld [vmem:[%s2127_s15 + $0x70] sm:$0xff] }
  0x1c   : > { %v243_v60 = vld [vmem:[%s2127_s15 + $0x78] sm:$0xff]  ;;  %v244_v61 = vld [vmem:[%s2127_s15 + $0x80] sm:$0xff]  ;;  %v245_v62 = vld [vmem:[%s2127_s15 + $0x88] sm:$0xff] }
  0x1d   : > { %1864 = vmatpush3.bf16.msra.mxu0 %v1861_v12  ;;  %v246_v63 = vld [vmem:[%s2127_s15 + $0x90] sm:$0xff]  ;;  %v247_v0 = vld [vmem:[%s2127_s15 + $0x98] sm:$0xff]  ;;  %v248_v1 = vld [vmem:[%s2127_s15 + $0xa0] sm:$0xff] }
  0x1e   : > { %1866 = vmatprep.subr.bf16.mxu0 %v1865_v15  ;;  %1892 = vmatpush3.bf16.msra.mxu1 %v1889_v36  ;;  %v249_v2 = vld [vmem:[%s2127_s15 + $0xa8] sm:$0xff]  ;;  %v250_v3 = vld [vmem:[%s2127_s15 + $0xb0] sm:$0xff]  ;;  %v251_v4 = vld [vmem:[%s2127_s15 + $0xb8] sm:$0xff] }
  0x1f   : > { %1894 = vmatprep.subr.bf16.mxu1 %v1893_v41  ;;  %v252_v5 = vld [vmem:[%s2127_s15 + $0xc0] sm:$0xff]  ;;  %v253_v6 = vld [vmem:[%s2127_s15 + $0xc8] sm:$0xff]  ;;  %v254_v7 = vld [vmem:[%s2127_s15 + $0xd0] sm:$0xff] }
  0x20   : > { %v255_v8 = vld [vmem:[%s2127_s15 + $0xd8] sm:$0xff]  ;;  %v256_v9 = vld [vmem:[%s2127_s15 + $0xe0] sm:$0xff]  ;;  %v257_v10 = vld [vmem:[%s2127_s15 + $0xe8] sm:$0xff] }
  0x21   : > { %1868 = vmatpush3.bf16.msra.mxu0 %v1865_v15  ;;  %v258_v11 = vld [vmem:[%s2127_s15 + $0xf0] sm:$0xff]  ;;  %v259_v12 = vld [vmem:[%s2127_s15 + $0xf8] sm:$0xff]  ;;  %v260_v13 = vld [vmem:[%s2127_s15 + $0x100] sm:$0xff] }
  0x22   : > { %1870 = vmatprep.subr.bf16.mxu0 %v1869_v18  ;;  %1896 = vmatpush3.bf16.msra.mxu1 %v1893_v41  ;;  %v261_v14 = vld [vmem:[%s2127_s15 + $0x108] sm:$0xff]  ;;  %v262_v15 = vld [vmem:[%s2127_s15 + $0x110] sm:$0xff]  ;;  %v263_v16 = vld [vmem:[%s2127_s15 + $0x118] sm:$0xff] }
  0x23   : > { %1898 = vmatprep.subr.bf16.mxu1 %v1897_v46  ;;  %v264_v17 = vld [vmem:[%s2127_s15 + $0x120] sm:$0xff]  ;;  %v266_v19 = vld [vmem:[%s2127_s15 + $0x130] sm:$0xff]  ;;  %v267_v20 = vld [vmem:[%s2127_s15 + $0x138] sm:$0xff] }
  0x24   : > { %v269_v22 = vld [vmem:[%s2127_s15 + $0x148] sm:$0xff]  ;;  %v270_v23 = vld [vmem:[%s2127_s15 + $0x150] sm:$0xff]  ;;  %v272_v25 = vld [vmem:[%s2127_s15 + $0x160] sm:$0xff] }
  0x25   : > { %1872 = vmatpush3.bf16.msra.mxu0 %v1869_v18  ;;  %v265_v18 = vld [vmem:[%s2127_s15 + $0x128] sm:$0xff]  ;;  %v778_v26 = vld [vmem:[%s2800_s3 + $0x70] sm:$0xff]  ;;  %v779_v27 = vld [vmem:[%s2800_s3 + $0x78] sm:$0xff] }
  0x26   : > { %1874 = vmatprep.subr.bf16.mxu0 %v1873_v21  ;;  %1900 = vmatpush3.bf16.msra.mxu1 %v1897_v46  ;;  %v273_v29 = vld [vmem:[%s2127_s15 + $0x168] sm:$0xff]  ;;  %v274_v30 = vld [vmem:[%s2127_s15 + $0x170] sm:$0xff]  ;;  %v276_v32 = vld [vmem:[%s2127_s15 + $0x180] sm:$0xff] }
  0x27   : > { %1902 = vmatprep.subr.bf16.mxu1 %v1901_v51  ;;  %v277_v33 = vld [vmem:[%s2127_s15 + $0x188] sm:$0xff]  ;;  %v278_v34 = vld [vmem:[%s2127_s15 + $0x190] sm:$0xff]  ;;  %v280_v36 = vld [vmem:[%s2127_s15 + $0x1a0] sm:$0xff] }
  0x28   : > { %v282_v38 = vld [vmem:[%s2127_s15 + $0x1b0] sm:$0xff]  ;;  %v283_v39 = vld [vmem:[%s2127_s15 + $0x1b8] sm:$0xff]  ;;  %v285_v41 = vld [vmem:[%s2127_s15 + $0x1c8] sm:$0xff] }
  0x29   : > { %1876 = vmatpush3.bf16.msra.mxu0 %v1873_v21  ;;  %v268_v21 = vld [vmem:[%s2127_s15 + $0x140] sm:$0xff]  ;;  %v287_v43 = vld [vmem:[%s2127_s15 + $0x1d8] sm:$0xff]  ;;  %v290_v46 = vld [vmem:[%s2127_s15 + $0x1f0] sm:$0xff] }
  0x2a   : > { %1878 = vmatprep.subr.bf16.mxu0 %v1877_v24  ;;  %1904 = vmatpush3.bf16.msra.mxu1 %v1901_v51  ;;  %v288_v44 = vld [vmem:[%s2127_s15 + $0x1e0] sm:$0xff] }
  0x2b   : > { %1906 = vmatprep.subr.bf16.mxu1 %v1905_v56  ;;  %v2268_v48 = vld [vmem:[%s2799_s2] ss:$0 sm:$0xff] }
  0x2d   : > { %1880 = vmatpush3.bf16.msra.mxu0 %v1877_v24  ;;  %v271_v24 = vld [vmem:[%s2127_s15 + $0x158] sm:$0xff] }
  0x2e   : > { %1908 = vmatpush3.bf16.msra.mxu1 %v1905_v56 }
  0x30   : > { %1626 = vmatmul.mubr.f32.vlgmr.msra.gmra.mrb[0].mxu0 %v229_v28  ;;  %v1909_v28 = vpack.c.bf16 %v779_v27, %v778_v26 }
  0x31   : > { %1628 = vmatprep.mubr.f32.mxu0 %v230_v31  ;;  %v275_v31 = vld [vmem:[%s2127_s15 + $0x178] sm:$0xff] }
  0x32   : > { %1910 = vmatprep.subr.bf16.mxu1 %v1909_v28 }
  0x33   : > { %1912 = vmatpush3.bf16.msra.mxu1 %v1909_v28 }
  0x34   : > { %1629 = vmatmul.mubr.f32.gmra.mrb[2].mxu0 %v231_v35  ;;  %v279_v35 = vld [vmem:[%s2127_s15 + $0x198] sm:$0xff] }
  0x35   : > { %1631 = vmatprep.mubr.f32.mxu0 %v232_v37  ;;  %v281_v37 = vld [vmem:[%s2127_s15 + $0x1a8] sm:$0xff] }
  0x38   : > { %1632 = vmatmul.mubr.f32.gmra.mrb[4].mxu0 %v233_v40  ;;  %v284_v40 = vld [vmem:[%s2127_s15 + $0x1c0] sm:$0xff] }
  0x39   : > { %1634 = vmatprep.mubr.f32.mxu0 %v234_v42  ;;  %v286_v42 = vld [vmem:[%s2127_s15 + $0x1d0] sm:$0xff] }
  0x3c   : > { %1635 = vmatmul.mubr.f32.gmra.mrb[6].mxu0 %v235_v45  ;;  %v289_v45 = vld [vmem:[%s2127_s15 + $0x1e8] sm:$0xff] }
  0x3d   : > { %1637 = vmatprep.mubr.f32.mxu0 %v236_v47  ;;  %v291_v47 = vld [vmem:[%s2127_s15 + $0x1f8] sm:$0xff] }
  0x40   : > { %1638 = vmatmul.mubr.f32.gmra.mrb[8].mxu0 %v237_v50 }
  0x41   : > { %1640 = vmatprep.mubr.f32.mxu0 %v238_v52 }
  0x44   : > { %1641 = vmatmul.mubr.f32.gmra.mrb[10].mxu0 %v239_v55 }
  0x45   : > { %1643 = vmatprep.mubr.f32.mxu0 %v240_v57 }
  0x48   : > { %1644 = vmatmul.mubr.f32.gmra.mrb[12].mxu0 %v241_v58 }
  0x49   : > { %1646 = vmatprep.mubr.f32.mxu0 %v242_v59 }
  0x4c   : > { %1647 = vmatmul.mubr.f32.gmra.mrb[14].mxu0 %v243_v60 }
  0x4d   : > { %1649 = vmatprep.mubr.f32.mxu0 %v244_v61 }
  0x50   : > { %1650 = vmatmul.mubr.f32.gmra.mrb[16].mxu0 %v245_v62 }
  0x51   : > { %1652 = vmatprep.mubr.f32.mxu0 %v246_v63 }
  0x54   : > { %1653 = vmatmul.mubr.f32.gmra.mrb[18].mxu0 %v247_v0 }
  0x55   : > { %1655 = vmatprep.mubr.f32.mxu0 %v248_v1 }
  0x58   : > { %1656 = vmatmul.mubr.f32.gmra.mrb[20].mxu0 %v249_v2 }
  0x59   : > { %1658 = vmatprep.mubr.f32.mxu0 %v250_v3 }
  0x5c   : > { %1659 = vmatmul.mubr.f32.gmra.mrb[22].mxu0 %v251_v4 }
  0x5d   : > { %1661 = vmatprep.mubr.f32.mxu0 %v252_v5 }
  0x60   : > { %1662 = vmatmul.mubr.f32.gmra.mrb[24].mxu0 %v253_v6 }
  0x61   : > { %1664 = vmatprep.mubr.f32.mxu0 %v254_v7 }
  0x64   : > { %1665 = vmatmul.mubr.f32.gmra.mrb[26].mxu0 %v255_v8 }
  0x65   : > { %1667 = vmatprep.mubr.f32.mxu0 %v256_v9 }
  0x68   : > { %1668 = vmatmul.mubr.f32.gmra.mrb[28].mxu0 %v257_v10 }
  0x69   : > { %1670 = vmatprep.mubr.f32.mxu0 %v258_v11 }
  0x6c   : > { %1671 = vmatmul.mubr.f32.gmra.mrb[30].mxu0 %v259_v12 }
  0x6d   : > { %1673 = vmatprep.mubr.f32.mxu0 %v260_v13 }
  0x70   : > { %1674 = vmatmul.mubr.f32.gmra.mrb[32].mxu0 %v261_v14 }
  0x71   : > { %1676 = vmatprep.mubr.f32.mxu0 %v262_v15 }
  0x74   : > { %1677 = vmatmul.mubr.f32.gmra.mrb[34].mxu0 %v263_v16 }
  0x75   : > { %1679 = vmatprep.mubr.f32.mxu0 %v264_v17 }
  0x78   : > { %1680 = vmatmul.mubr.f32.gmra.mrb[36].mxu0 %v265_v18 }
  0x79   : > { %1682 = vmatprep.mubr.f32.mxu0 %v266_v19 }
  0x7c   : > { %1683 = vmatmul.mubr.f32.gmra.mrb[38].mxu0 %v267_v20 }
  0x7d   : > { %1685 = vmatprep.mubr.f32.mxu0 %v268_v21 }
  0x80   : > { %1686 = vmatmul.mubr.f32.gmra.mrb[40].mxu0 %v269_v22 }
  0x81   : > { %1688 = vmatprep.mubr.f32.mxu0 %v270_v23 }
  0x84   : > { %1689 = vmatmul.mubr.f32.gmra.mrb[42].mxu0 %v271_v24 }
  0x85   : > { %1691 = vmatprep.mubr.f32.mxu0 %v272_v25 }
  0x88   : > { %1692 = vmatmul.mubr.f32.gmra.mrb[44].mxu0 %v273_v29 }
  0x89   : > { %1694 = vmatprep.mubr.f32.mxu0 %v274_v30 }
  0x8c   : > { %1695 = vmatmul.mubr.f32.gmra.mrb[46].mxu0 %v275_v31 }
  0x8d   : > { %1697 = vmatprep.mubr.f32.mxu0 %v276_v32 }
  0x90   : > { %1698 = vmatmul.mubr.f32.gmra.mrb[48].mxu0 %v277_v33 }
  0x91   : > { %1700 = vmatprep.mubr.f32.mxu0 %v278_v34 }
  0x94   : > { %1701 = vmatmul.mubr.f32.gmra.mrb[50].mxu0 %v279_v35 }
  0x95   : > { %1703 = vmatprep.mubr.f32.mxu0 %v280_v36 }
  0x98   : > { %1704 = vmatmul.mubr.f32.gmra.mrb[52].mxu0 %v281_v37 }
  0x99   : > { %1706 = vmatprep.mubr.f32.mxu0 %v282_v38 }
  0x9c   : > { %1707 = vmatmul.mubr.f32.gmra.mrb[54].mxu0 %v283_v39 }
  0x9d   : > { %1709 = vmatprep.mubr.f32.mxu0 %v284_v40 }
  0xa0   : > { %1710 = vmatmul.mubr.f32.gmra.mrb[56].mxu0 %v285_v41 }
  0xa1   : > { %1712 = vmatprep.mubr.f32.mxu0 %v286_v42 }
  0xa4   : > { %1713 = vmatmul.mubr.f32.gmra.mrb[58].mxu0 %v287_v43 }
  0xa5   : > { %1715 = vmatprep.mubr.f32.mxu0 %v288_v44 }
  0xa8   : > { %1716 = vmatmul.mubr.f32.gmra.mrb[60].mxu0 %v289_v45 }
  0xa9   : > { %1718 = vmatprep.mubr.f32.mxu0 %v290_v46 }
  0xac   : > { %1719 = vmatmul.mubr.f32.gmra.mrb[62].mxu0 %v291_v47 }
 0x103   : > { %v1627_v49 = vpop.f32.mrb[0].mxu0 }
 0x104   : > { %v2271_v50 = vadd.f32 %v1627_v49, %v2268_v48  ;;  %v381_v51 = vpop.f32.mrb[1].mxu0 }
 0x105   : > { %v2274_v52 = vadd.f32 %v2268_v48, %v381_v51 }
 0x106   : > { %v701_v55 = vmul.f32 %v2271_v50, %v2271_v50 }
 0x107   : > { %v1630_v53 = vpop.f32.mrb[2].mxu0  ;;  %v700_v54 = vmul.f32 %v2274_v52, %v2274_v52 }
 0x108   : > { %v2281_v56 = vadd.f32 %v1630_v53, %v2268_v48  ;;  %v391_v57 = vpop.f32.mrb[3].mxu0 }
 0x109   : > { %v2284_v58 = vadd.f32 %v2268_v48, %v391_v57  ;;  %1753 = vmatprep.mubr.f32.mxu1 %v700_v54 }
 0x10a   : > { %1754 = vmatmul.mubr.f32.vlgmr.msra.gmra.mrb[0].mxu1 %v701_v55  ;;  %v703_v61 = vmul.f32 %v2281_v56, %v2281_v56 }
 0x10b   : > { %v702_v59 = vmul.f32 %v2284_v58, %v2284_v58  ;;  %v1633_v60 = vpop.f32.mrb[4].mxu0 }
 0x10c   : > { %v2291_v62 = vadd.f32 %v1633_v60, %v2268_v48  ;;  %v401_v63 = vpop.f32.mrb[5].mxu0 }
 0x10d   : > { %v2294_v0 = vadd.f32 %v2268_v48, %v401_v63  ;;  %1756 = vmatprep.mubr.f32.mxu1 %v702_v59 }
 0x10e   : > { %1757 = vmatmul.mubr.f32.gmra.mrb[2].mxu1 %v703_v61  ;;  %v705_v3 = vmul.f32 %v2291_v62, %v2291_v62 }
 0x10f   : > { %v704_v1 = vmul.f32 %v2294_v0, %v2294_v0  ;;  %v1636_v2 = vpop.f32.mrb[6].mxu0 }
 0x110   : > { %v2301_v4 = vadd.f32 %v1636_v2, %v2268_v48  ;;  %v411_v5 = vpop.f32.mrb[7].mxu0 }
 0x111   : > { %v2304_v6 = vadd.f32 %v2268_v48, %v411_v5  ;;  %1759 = vmatprep.mubr.f32.mxu1 %v704_v1 }
 0x112   : > { %1760 = vmatmul.mubr.f32.gmra.mrb[4].mxu1 %v705_v3  ;;  %v707_v9 = vmul.f32 %v2301_v4, %v2301_v4 }
 0x113   : > { %v706_v7 = vmul.f32 %v2304_v6, %v2304_v6  ;;  %v1639_v8 = vpop.f32.mrb[8].mxu0 }
 0x114   : > { %v2311_v10 = vadd.f32 %v1639_v8, %v2268_v48  ;;  %v421_v11 = vpop.f32.mrb[9].mxu0 }
 0x115   : > { %v2314_v12 = vadd.f32 %v2268_v48, %v421_v11  ;;  %1762 = vmatprep.mubr.f32.mxu1 %v706_v7 }
 0x116   : > { %1763 = vmatmul.mubr.f32.gmra.mrb[6].mxu1 %v707_v9  ;;  %v709_v15 = vmul.f32 %v2311_v10, %v2311_v10 }
 0x117   : > { %v708_v13 = vmul.f32 %v2314_v12, %v2314_v12  ;;  %v1642_v14 = vpop.f32.mrb[10].mxu0 }
 0x118   : > { %v2321_v16 = vadd.f32 %v1642_v14, %v2268_v48  ;;  %v431_v17 = vpop.f32.mrb[11].mxu0 }
 0x119   : > { %v2324_v18 = vadd.f32 %v2268_v48, %v431_v17  ;;  %1765 = vmatprep.mubr.f32.mxu1 %v708_v13 }
 0x11a   : > { %1766 = vmatmul.mubr.f32.gmra.mrb[8].mxu1 %v709_v15  ;;  %v711_v21 = vmul.f32 %v2321_v16, %v2321_v16 }
 0x11b   : > { %v710_v19 = vmul.f32 %v2324_v18, %v2324_v18  ;;  %v1645_v20 = vpop.f32.mrb[12].mxu0 }
 0x11c   : > { %v2331_v22 = vadd.f32 %v1645_v20, %v2268_v48  ;;  %v441_v23 = vpop.f32.mrb[13].mxu0 }
 0x11d   : > { %v2334_v24 = vadd.f32 %v2268_v48, %v441_v23  ;;  %1768 = vmatprep.mubr.f32.mxu1 %v710_v19 }
 0x11e   : > { %1769 = vmatmul.mubr.f32.gmra.mrb[10].mxu1 %v711_v21  ;;  %v713_v27 = vmul.f32 %v2331_v22, %v2331_v22 }
 0x11f   : > { %v712_v25 = vmul.f32 %v2334_v24, %v2334_v24  ;;  %v1648_v26 = vpop.f32.mrb[14].mxu0 }
 0x120   : > { %v2341_v28 = vadd.f32 %v1648_v26, %v2268_v48  ;;  %v451_v29 = vpop.f32.mrb[15].mxu0 }
 0x121   : > { %v2344_v30 = vadd.f32 %v2268_v48, %v451_v29  ;;  %1771 = vmatprep.mubr.f32.mxu1 %v712_v25 }
 0x122   : > { %1772 = vmatmul.mubr.f32.gmra.mrb[12].mxu1 %v713_v27  ;;  %v715_v33 = vmul.f32 %v2341_v28, %v2341_v28 }
 0x123   : > { %v714_v31 = vmul.f32 %v2344_v30, %v2344_v30  ;;  %v1651_v32 = vpop.f32.mrb[16].mxu0 }
 0x124   : > { %v2351_v34 = vadd.f32 %v1651_v32, %v2268_v48  ;;  %v461_v35 = vpop.f32.mrb[17].mxu0 }
 0x125   : > { %v2354_v36 = vadd.f32 %v2268_v48, %v461_v35  ;;  %1774 = vmatprep.mubr.f32.mxu1 %v714_v31 }
 0x126   : > { %1775 = vmatmul.mubr.f32.gmra.mrb[14].mxu1 %v715_v33  ;;  %v717_v39 = vmul.f32 %v2351_v34, %v2351_v34 }
 0x127   : > { %v716_v37 = vmul.f32 %v2354_v36, %v2354_v36  ;;  %v1654_v38 = vpop.f32.mrb[18].mxu0 }
 0x128   : > { %v2361_v40 = vadd.f32 %v1654_v38, %v2268_v48  ;;  %v471_v41 = vpop.f32.mrb[19].mxu0 }
 0x129   : > { %v2364_v42 = vadd.f32 %v2268_v48, %v471_v41  ;;  %1777 = vmatprep.mubr.f32.mxu1 %v716_v37 }
 0x12a   : > { %1778 = vmatmul.mubr.f32.gmra.mrb[16].mxu1 %v717_v39  ;;  %v719_v45 = vmul.f32 %v2361_v40, %v2361_v40 }
 0x12b   : > { %v718_v43 = vmul.f32 %v2364_v42, %v2364_v42  ;;  %v1657_v44 = vpop.f32.mrb[20].mxu0 }
 0x12c   : > { %v2371_v46 = vadd.f32 %v1657_v44, %v2268_v48  ;;  %v481_v47 = vpop.f32.mrb[21].mxu0 }
 0x12d   : > { %v2374_v49 = vadd.f32 %v2268_v48, %v481_v47  ;;  %1780 = vmatprep.mubr.f32.mxu1 %v718_v43 }
 0x12e   : > { %1781 = vmatmul.mubr.f32.gmra.mrb[18].mxu1 %v719_v45  ;;  %v721_v54 = vmul.f32 %v2371_v46, %v2371_v46 }
 0x12f   : > { %v720_v51 = vmul.f32 %v2374_v49, %v2374_v49  ;;  %v1660_v53 = vpop.f32.mrb[22].mxu0 }
 0x130   : > { %v2381_v55 = vadd.f32 %v1660_v53, %v2268_v48  ;;  %v491_v57 = vpop.f32.mrb[23].mxu0 }
 0x131   : > { %v2384_v59 = vadd.f32 %v2268_v48, %v491_v57  ;;  %1783 = vmatprep.mubr.f32.mxu1 %v720_v51 }
 0x132   : > { %1784 = vmatmul.mubr.f32.gmra.mrb[20].mxu1 %v721_v54  ;;  %v723_v63 = vmul.f32 %v2381_v55, %v2381_v55 }
 0x133   : > { %v722_v60 = vmul.f32 %v2384_v59, %v2384_v59  ;;  %v1663_v61 = vpop.f32.mrb[24].mxu0 }
 0x134   : > { %v2391_v1 = vadd.f32 %v1663_v61, %v2268_v48  ;;  %v501_v2 = vpop.f32.mrb[25].mxu0 }
 0x135   : > { %v2394_v3 = vadd.f32 %v2268_v48, %v501_v2  ;;  %1786 = vmatprep.mubr.f32.mxu1 %v722_v60 }
 0x136   : > { %1787 = vmatmul.mubr.f32.gmra.mrb[22].mxu1 %v723_v63  ;;  %v725_v8 = vmul.f32 %v2391_v1, %v2391_v1 }
 0x137   : > { %v724_v5 = vmul.f32 %v2394_v3, %v2394_v3  ;;  %v1666_v7 = vpop.f32.mrb[26].mxu0 }
 0x138   : > { %v2401_v9 = vadd.f32 %v1666_v7, %v2268_v48  ;;  %v511_v11 = vpop.f32.mrb[27].mxu0 }
 0x139   : > { %v2404_v13 = vadd.f32 %v2268_v48, %v511_v11  ;;  %1789 = vmatprep.mubr.f32.mxu1 %v724_v5 }
 0x13a   : > { %1790 = vmatmul.mubr.f32.gmra.mrb[24].mxu1 %v725_v8  ;;  %v727_v17 = vmul.f32 %v2401_v9, %v2401_v9 }
 0x13b   : > { %v726_v14 = vmul.f32 %v2404_v13, %v2404_v13  ;;  %v1669_v15 = vpop.f32.mrb[28].mxu0 }
 0x13c   : > { %v2411_v19 = vadd.f32 %v1669_v15, %v2268_v48  ;;  %v521_v20 = vpop.f32.mrb[29].mxu0 }
 0x13d   : > { %v2414_v21 = vadd.f32 %v2268_v48, %v521_v20  ;;  %1792 = vmatprep.mubr.f32.mxu1 %v726_v14 }
 0x13e   : > { %1793 = vmatmul.mubr.f32.gmra.mrb[26].mxu1 %v727_v17  ;;  %v729_v26 = vmul.f32 %v2411_v19, %v2411_v19 }
 0x13f   : > { %v728_v23 = vmul.f32 %v2414_v21, %v2414_v21  ;;  %v1672_v25 = vpop.f32.mrb[30].mxu0 }
 0x140   : > { %v2421_v27 = vadd.f32 %v1672_v25, %v2268_v48  ;;  %v531_v29 = vpop.f32.mrb[31].mxu0 }
 0x141   : > { %v2424_v31 = vadd.f32 %v2268_v48, %v531_v29  ;;  %1795 = vmatprep.mubr.f32.mxu1 %v728_v23 }
 0x142   : > { %1796 = vmatmul.mubr.f32.gmra.mrb[28].mxu1 %v729_v26  ;;  %v731_v35 = vmul.f32 %v2421_v27, %v2421_v27 }
 0x143   : > { %v730_v32 = vmul.f32 %v2424_v31, %v2424_v31  ;;  %v1675_v33 = vpop.f32.mrb[32].mxu0 }
 0x144   : > { %v2431_v37 = vadd.f32 %v1675_v33, %v2268_v48  ;;  %v541_v38 = vpop.f32.mrb[33].mxu0 }
 0x145   : > { %v2434_v39 = vadd.f32 %v2268_v48, %v541_v38  ;;  %1798 = vmatprep.mubr.f32.mxu1 %v730_v32 }
 0x146   : > { %1799 = vmatmul.mubr.f32.gmra.mrb[30].mxu1 %v731_v35  ;;  %v733_v44 = vmul.f32 %v2431_v37, %v2431_v37 }
 0x147   : > { %v732_v41 = vmul.f32 %v2434_v39, %v2434_v39  ;;  %v1678_v43 = vpop.f32.mrb[34].mxu0 }
 0x148   : > { %v2441_v45 = vadd.f32 %v1678_v43, %v2268_v48  ;;  %v551_v47 = vpop.f32.mrb[35].mxu0 }
 0x149   : > { %v2444_v51 = vadd.f32 %v2268_v48, %v551_v47  ;;  %1801 = vmatprep.mubr.f32.mxu1 %v732_v41 }
 0x14a   : > { %1802 = vmatmul.mubr.f32.gmra.mrb[32].mxu1 %v733_v44  ;;  %v735_v57 = vmul.f32 %v2441_v45, %v2441_v45 }
 0x14b   : > { %v734_v53 = vmul.f32 %v2444_v51, %v2444_v51  ;;  %v1681_v54 = vpop.f32.mrb[36].mxu0 }
 0x14c   : > { %v2451_v60 = vadd.f32 %v1681_v54, %v2268_v48  ;;  %v561_v61 = vpop.f32.mrb[37].mxu0 }
 0x14d   : > { %v2454_v63 = vadd.f32 %v2268_v48, %v561_v61  ;;  %1804 = vmatprep.mubr.f32.mxu1 %v734_v53 }
 0x14e   : > { %1805 = vmatmul.mubr.f32.gmra.mrb[34].mxu1 %v735_v57  ;;  %v737_v7 = vmul.f32 %v2451_v60, %v2451_v60 }
 0x14f   : > { %v736_v2 = vmul.f32 %v2454_v63, %v2454_v63  ;;  %v1684_v5 = vpop.f32.mrb[38].mxu0 }
 0x150   : > { %v2461_v8 = vadd.f32 %v1684_v5, %v2268_v48  ;;  %v571_v11 = vpop.f32.mrb[39].mxu0 }
 0x151   : > { %v2464_v14 = vadd.f32 %v2268_v48, %v571_v11  ;;  %1807 = vmatprep.mubr.f32.mxu1 %v736_v2 }
 0x152   : > { %1808 = vmatmul.mubr.f32.gmra.mrb[36].mxu1 %v737_v7  ;;  %v739_v20 = vmul.f32 %v2461_v8, %v2461_v8 }
 0x153   : > { %v738_v15 = vmul.f32 %v2464_v14, %v2464_v14  ;;  %v1687_v17 = vpop.f32.mrb[40].mxu0 }
 0x154   : > { %v2471_v23 = vadd.f32 %v1687_v17, %v2268_v48  ;;  %v581_v25 = vpop.f32.mrb[41].mxu0 }
 0x155   : > { %v2474_v26 = vadd.f32 %v2268_v48, %v581_v25  ;;  %1810 = vmatprep.mubr.f32.mxu1 %v738_v15 }
 0x156   : > { %1811 = vmatmul.mubr.f32.gmra.mrb[38].mxu1 %v739_v20  ;;  %v741_v33 = vmul.f32 %v2471_v23, %v2471_v23 }
 0x157   : > { %v740_v29 = vmul.f32 %v2474_v26, %v2474_v26  ;;  %v1690_v32 = vpop.f32.mrb[42].mxu0 }
 0x158   : > { %v2481_v35 = vadd.f32 %v1690_v32, %v2268_v48  ;;  %v591_v38 = vpop.f32.mrb[43].mxu0 }
 0x159   : > { %v2484_v41 = vadd.f32 %v2268_v48, %v591_v38  ;;  %1813 = vmatprep.mubr.f32.mxu1 %v740_v29 }
 0x15a   : > { %1814 = vmatmul.mubr.f32.gmra.mrb[40].mxu1 %v741_v33  ;;  %v743_v47 = vmul.f32 %v2481_v35, %v2481_v35 }
 0x15b   : > { %v742_v43 = vmul.f32 %v2484_v41, %v2484_v41  ;;  %v1693_v44 = vpop.f32.mrb[44].mxu0 }
 0x15c   : > { %v2491_v53 = vadd.f32 %v1693_v44, %v2268_v48  ;;  %v601_v54 = vpop.f32.mrb[45].mxu0 }
 0x15d   : > { %v2494_v57 = vadd.f32 %v2268_v48, %v601_v54  ;;  %1816 = vmatprep.mubr.f32.mxu1 %v742_v43 }
 0x15e   : > { %1817 = vmatmul.mubr.f32.gmra.mrb[42].mxu1 %v743_v47  ;;  %v745_v5 = vmul.f32 %v2491_v53, %v2491_v53 }
 0x15f   : > { %v744_v61 = vmul.f32 %v2494_v57, %v2494_v57  ;;  %v1696_v2 = vpop.f32.mrb[46].mxu0 }
 0x160   : > { %v2501_v7 = vadd.f32 %v1696_v2, %v2268_v48  ;;  %v611_v11 = vpop.f32.mrb[47].mxu0 }
 0x161   : > { %v2504_v15 = vadd.f32 %v2268_v48, %v611_v11  ;;  %1819 = vmatprep.mubr.f32.mxu1 %v744_v61 }
 0x162   : > { %1820 = vmatmul.mubr.f32.gmra.mrb[44].mxu1 %v745_v5  ;;  %v747_v25 = vmul.f32 %v2501_v7, %v2501_v7 }
 0x163   : > { %v746_v17 = vmul.f32 %v2504_v15, %v2504_v15  ;;  %v1699_v20 = vpop.f32.mrb[48].mxu0 }
 0x164   : > { %v2511_v29 = vadd.f32 %v1699_v20, %v2268_v48  ;;  %v621_v32 = vpop.f32.mrb[49].mxu0 }
 0x165   : > { %v2514_v33 = vadd.f32 %v2268_v48, %v621_v32  ;;  %1822 = vmatprep.mubr.f32.mxu1 %v746_v17 }
 0x166   : > { %1823 = vmatmul.mubr.f32.gmra.mrb[46].mxu1 %v747_v25  ;;  %v749_v44 = vmul.f32 %v2511_v29, %v2511_v29 }
 0x167   : > { %v748_v38 = vmul.f32 %v2514_v33, %v2514_v33  ;;  %v1702_v43 = vpop.f32.mrb[50].mxu0 }
 0x168   : > { %v2521_v47 = vadd.f32 %v1702_v43, %v2268_v48  ;;  %v631_v54 = vpop.f32.mrb[51].mxu0 }
 0x169   : > { %v2524_v61 = vadd.f32 %v2268_v48, %v631_v54  ;;  %1825 = vmatprep.mubr.f32.mxu1 %v748_v38 }
 0x16a   : > { %2817 = vst [vmem:[#allocation2_spill] sm:$0xff] %v2521_v47  ;;  %1826 = vmatmul.mubr.f32.gmra.mrb[48].mxu1 %v749_v44  ;;  %v751_v11 = vmul.f32 %v2521_v47, %v2521_v47 }
 0x16b   : > { %2818 = vst [vmem:[#allocation3_spill] sm:$0xff] %v2524_v61  ;;  %v750_v2 = vmul.f32 %v2524_v61, %v2524_v61  ;;  %v1705_v5 = vpop.f32.mrb[52].mxu0 }
 0x16c   : > { %v2531_v17 = vadd.f32 %v1705_v5, %v2268_v48  ;;  %v641_v20 = vpop.f32.mrb[53].mxu0 }
 0x16d   : > { %v2534_v25 = vadd.f32 %v2268_v48, %v641_v20  ;;  %1828 = vmatprep.mubr.f32.mxu1 %v750_v2 }
 0x16e   : > { %2819 = vst [vmem:[#allocation4_spill] sm:$0xff] %v2531_v17  ;;  %1829 = vmatmul.mubr.f32.gmra.mrb[50].mxu1 %v751_v11  ;;  %v753_v43 = vmul.f32 %v2531_v17, %v2531_v17 }
 0x16f   : > { %2820 = vst [vmem:[#allocation5_spill] sm:$0xff] %v2534_v25  ;;  %v752_v32 = vmul.f32 %v2534_v25, %v2534_v25  ;;  %v1708_v38 = vpop.f32.mrb[54].mxu0 }
 0x170   : > { %v2541_v44 = vadd.f32 %v1708_v38, %v2268_v48  ;;  %v651_v54 = vpop.f32.mrb[55].mxu0 }
 0x171   : > { %v2544_v5 = vadd.f32 %v2268_v48, %v651_v54  ;;  %1831 = vmatprep.mubr.f32.mxu1 %v752_v32 }
 0x172   : > { %2821 = vst [vmem:[#allocation6_spill] sm:$0xff] %v2541_v44  ;;  %1832 = vmatmul.mubr.f32.gmra.mrb[52].mxu1 %v753_v43  ;;  %v755_v20 = vmul.f32 %v2541_v44, %v2541_v44 }
 0x173   : > { %2822 = vst [vmem:[#allocation7_spill] sm:$0xff] %v2544_v5  ;;  %v754_v2 = vmul.f32 %v2544_v5, %v2544_v5  ;;  %v1711_v11 = vpop.f32.mrb[56].mxu0 }
 0x174   : > { %v2551_v25 = vadd.f32 %v1711_v11, %v2268_v48  ;;  %v661_v17 = vpop.f32.mrb[57].mxu0 }
 0x175   : > { %v2554_v38 = vadd.f32 %v2268_v48, %v661_v17  ;;  %1834 = vmatprep.mubr.f32.mxu1 %v754_v2 }
 0x176   : > { %2823 = vst [vmem:[#allocation8_spill] sm:$0xff] %v2551_v25  ;;  %1835 = vmatmul.mubr.f32.gmra.mrb[54].mxu1 %v755_v20  ;;  %v757_v54 = vmul.f32 %v2551_v25, %v2551_v25 }
 0x177   : > { %2824 = vst [vmem:[#allocation9_spill] sm:$0xff] %v2554_v38  ;;  %v756_v32 = vmul.f32 %v2554_v38, %v2554_v38  ;;  %v1714_v43 = vpop.f32.mrb[58].mxu0 }
 0x178   : > { %v2561_v5 = vadd.f32 %v1714_v43, %v2268_v48  ;;  %v671_v44 = vpop.f32.mrb[59].mxu0 }
 0x179   : > { %v2564_v11 = vadd.f32 %v2268_v48, %v671_v44  ;;  %1837 = vmatprep.mubr.f32.mxu1 %v756_v32 }
 0x17a   : > { %2825 = vst [vmem:[#allocation10_spill] sm:$0xff] %v2561_v5  ;;  %1838 = vmatmul.mubr.f32.gmra.mrb[56].mxu1 %v757_v54  ;;  %v759_v20 = vmul.f32 %v2561_v5, %v2561_v5 }
 0x17b   : > { %2826 = vst [vmem:[#allocation11_spill] sm:$0xff] %v2564_v11  ;;  %v758_v17 = vmul.f32 %v2564_v11, %v2564_v11  ;;  %v1717_v2 = vpop.f32.mrb[60].mxu0 }
 0x17c   : > { %v2571_v38 = vadd.f32 %v1717_v2, %v2268_v48  ;;  %v681_v25 = vpop.f32.mrb[61].mxu0 }
 0x17d   : > { %v2574_v43 = vadd.f32 %v2268_v48, %v681_v25  ;;  %1840 = vmatprep.mubr.f32.mxu1 %v758_v17 }
 0x17e   : > { %2827 = vst [vmem:[#allocation12_spill] sm:$0xff] %v2571_v38  ;;  %1841 = vmatmul.mubr.f32.gmra.mrb[58].mxu1 %v759_v20  ;;  %v761_v54 = vmul.f32 %v2571_v38, %v2571_v38  ;;  %v2593_v20 = vld [vmem:[%s2801_s4] ss:$0 sm:$0xff] }
 0x17f   : > { %2828 = vst [vmem:[#allocation13_spill] sm:$0xff] %v2574_v43  ;;  %v760_v44 = vmul.f32 %v2574_v43, %v2574_v43  ;;  %v1720_v32 = vpop.f32.mrb[62].mxu0 }
 0x180   : > { %v2581_v11 = vadd.f32 %v1720_v32, %v2268_v48  ;;  %v691_v5 = vpop.f32.mrb[63].mxu0 }
 0x181   : > { %v2584_v2 = vadd.f32 %v2268_v48, %v691_v5  ;;  %1843 = vmatprep.mubr.f32.mxu1 %v760_v44 }
 0x182   : > { %2829 = vst [vmem:[#allocation14_spill] sm:$0xff] %v2581_v11  ;;  %1844 = vmatmul.mubr.f32.gmra.mrb[60].mxu1 %v761_v54  ;;  %v763_v17 = vmul.f32 %v2581_v11, %v2581_v11 }
 0x183   : > { %2830 = vst [vmem:[#allocation15_spill] sm:$0xff] %v2584_v2  ;;  %v762_v25 = vmul.f32 %v2584_v2, %v2584_v2 }
 0x185   : > { %1846 = vmatprep.mubr.f32.mxu1 %v762_v25 }
 0x186   : > { %1847 = vmatmul.mubr.f32.gmra.mrb[62].mxu1 %v763_v17 }
 0x1dd   : > { %v1755_v32 = vpop.f32.mrb[0].mxu1 }
 0x1de   : > { %v859_v43 = vadd.f32 %v1755_v32, %v2593_v20  ;;  %v853_v48 = vpop.f32.mrb[1].mxu1 }
 0x1df   : > { %v854_v5 = vadd.f32 %v2593_v20, %v853_v48 }
 0x1e0   : > { %1921 = vrsqrt.f32 %v859_v43 }
 0x1e1   : > { %1923 = vrsqrt.f32 %v854_v5  ;;  %v1758_v44 = vpop.f32.mrb[2].mxu1 }
 0x1e2   : > { %v869_v54 = vadd.f32 %v1758_v44, %v2593_v20  ;;  %v863_v2 = vpop.f32.mrb[3].mxu1 }
 0x1e3   : > { %v864_v25 = vadd.f32 %v2593_v20, %v863_v2 }
 0x1e4   : > { %1925 = vrsqrt.f32 %v869_v54 }
 0x1e5   : > { %1927 = vrsqrt.f32 %v864_v25  ;;  %v1761_v17 = vpop.f32.mrb[4].mxu1 }
 0x1e6   : > { %v879_v11 = vadd.f32 %v1761_v17, %v2593_v20  ;;  %v873_v38 = vpop.f32.mrb[5].mxu1 }
 0x1e7   : > { %v874_v32 = vadd.f32 %v2593_v20, %v873_v38 }
 0x1e8   : > { %1929 = vrsqrt.f32 %v879_v11 }
 0x1e9   : > { %1931 = vrsqrt.f32 %v874_v32  ;;  %v1764_v48 = vpop.f32.mrb[6].mxu1 }
 0x1ea   : > { %v1922_v43 = vpop.eup %1921  ;;  %v889_v2 = vadd.f32 %v1764_v48, %v2593_v20  ;;  %v883_v5 = vpop.f32.mrb[7].mxu1 }
 0x1eb   : > { %v1924_v44 = vpop.eup %1923  ;;  %v1237_v54 = vmul.f32 %v1922_v43, %v2271_v50  ;;  %v884_v38 = vadd.f32 %v2593_v20, %v883_v5 }
 0x1ec   : > { %v1236_v11 = vmul.f32 %v1924_v44, %v2274_v52  ;;  %1933 = vrsqrt.f32 %v889_v2 }
 0x1ed   : > { %1301 = vst [vmem:[%s2606_s29 + $0x8] sm:$0xff] %v1237_v54  ;;  %1935 = vrsqrt.f32 %v884_v38  ;;  %v1767_v25 = vpop.f32.mrb[8].mxu1 }
 0x1ee   : > { %v1926_v17 = vpop.eup %1925  ;;  %1300 = vst [vmem:[%s2606_s29] sm:$0xff] %v1236_v11  ;;  %v899_v32 = vadd.f32 %v1767_v25, %v2593_v20  ;;  %v893_v61 = vpop.f32.mrb[9].mxu1 }
 0x1ef   : > { %v1928_v48 = vpop.eup %1927  ;;  %v1239_v47 = vmul.f32 %v1926_v17, %v2281_v56  ;;  %v894_v50 = vadd.f32 %v2593_v20, %v893_v61 }
 0x1f0   : > { %v1238_v43 = vmul.f32 %v1928_v48, %v2284_v58  ;;  %1937 = vrsqrt.f32 %v899_v32 }
 0x1f1   : > { %1303 = vst [vmem:[%s2606_s29 + $0x18] sm:$0xff] %v1239_v47  ;;  %1939 = vrsqrt.f32 %v894_v50  ;;  %v1770_v52 = vpop.f32.mrb[10].mxu1 }
 0x1f2   : > { %v1930_v2 = vpop.eup %1929  ;;  %1302 = vst [vmem:[%s2606_s29 + $0x10] sm:$0xff] %v1238_v43  ;;  %v909_v5 = vadd.f32 %v1770_v52, %v2593_v20  ;;  %v903_v44 = vpop.f32.mrb[11].mxu1 }
 0x1f3   : > { %v1932_v54 = vpop.eup %1931  ;;  %v1241_v38 = vmul.f32 %v1930_v2, %v2291_v62  ;;  %v904_v56 = vadd.f32 %v2593_v20, %v903_v44 }
 0x1f4   : > { %v1240_v61 = vmul.f32 %v1932_v54, %v2294_v0  ;;  %1941 = vrsqrt.f32 %v909_v5 }
 0x1f5   : > { %1305 = vst [vmem:[%s2606_s29 + $0x28] sm:$0xff] %v1241_v38  ;;  %1943 = vrsqrt.f32 %v904_v56  ;;  %v1773_v58 = vpop.f32.mrb[12].mxu1 }
 0x1f6   : > { %v1934_v47 = vpop.eup %1933  ;;  %1304 = vst [vmem:[%s2606_s29 + $0x20] sm:$0xff] %v1240_v61  ;;  %v919_v11 = vadd.f32 %v1773_v58, %v2593_v20  ;;  %v913_v25 = vpop.f32.mrb[13].mxu1 }
 0x1f7   : > { %v1936_v17 = vpop.eup %1935  ;;  %v1243_v32 = vmul.f32 %v1934_v47, %v2301_v4  ;;  %v914_v62 = vadd.f32 %v2593_v20, %v913_v25 }
 0x1f8   : > { %v1242_v48 = vmul.f32 %v1936_v17, %v2304_v6  ;;  %1945 = vrsqrt.f32 %v919_v11 }
 0x1f9   : > { %1307 = vst [vmem:[%s2606_s29 + $0x38] sm:$0xff] %v1243_v32  ;;  %1947 = vrsqrt.f32 %v914_v62  ;;  %v1776_v0 = vpop.f32.mrb[14].mxu1 }
 0x1fa   : > { %v1938_v50 = vpop.eup %1937  ;;  %1306 = vst [vmem:[%s2606_s29 + $0x30] sm:$0xff] %v1242_v48  ;;  %v929_v43 = vadd.f32 %v1776_v0, %v2593_v20  ;;  %v923_v52 = vpop.f32.mrb[15].mxu1 }
 0x1fb   : > { %v1940_v2 = vpop.eup %1939  ;;  %v1245_v5 = vmul.f32 %v1938_v50, %v2311_v10  ;;  %v924_v4 = vadd.f32 %v2593_v20, %v923_v52 }
 0x1fc   : > { %v1244_v44 = vmul.f32 %v1940_v2, %v2314_v12  ;;  %1949 = vrsqrt.f32 %v929_v43 }
 0x1fd   : > { %1309 = vst [vmem:[%s2606_s29 + $0x48] sm:$0xff] %v1245_v5  ;;  %1951 = vrsqrt.f32 %v924_v4  ;;  %v1779_v6 = vpop.f32.mrb[16].mxu1 }
 0x1fe   : > { %v1942_v54 = vpop.eup %1941  ;;  %1308 = vst [vmem:[%s2606_s29 + $0x40] sm:$0xff] %v1244_v44  ;;  %v939_v38 = vadd.f32 %v1779_v6, %v2593_v20  ;;  %v933_v56 = vpop.f32.mrb[17].mxu1 }
 0x1ff   : > { %v1944_v61 = vpop.eup %1943  ;;  %v1247_v58 = vmul.f32 %v1942_v54, %v2321_v16  ;;  %v934_v10 = vadd.f32 %v2593_v20, %v933_v56 }
 0x200   : > { %v1246_v47 = vmul.f32 %v1944_v61, %v2324_v18  ;;  %1953 = vrsqrt.f32 %v939_v38 }
 0x201   : > { %1311 = vst [vmem:[%s2606_s29 + $0x58] sm:$0xff] %v1247_v58  ;;  %1955 = vrsqrt.f32 %v934_v10  ;;  %v1782_v12 = vpop.f32.mrb[18].mxu1 }
 0x202   : > { %v1946_v11 = vpop.eup %1945  ;;  %1310 = vst [vmem:[%s2606_s29 + $0x50] sm:$0xff] %v1246_v47  ;;  %v949_v25 = vadd.f32 %v1782_v12, %v2593_v20  ;;  %v943_v17 = vpop.f32.mrb[19].mxu1 }
 0x203   : > { %v1948_v32 = vpop.eup %1947  ;;  %v1249_v62 = vmul.f32 %v1946_v11, %v2331_v22  ;;  %v944_v16 = vadd.f32 %v2593_v20, %v943_v17 }
 0x204   : > { %v1248_v48 = vmul.f32 %v1948_v32, %v2334_v24  ;;  %1957 = vrsqrt.f32 %v949_v25 }
 0x205   : > { %1313 = vst [vmem:[%s2606_s29 + $0x68] sm:$0xff] %v1249_v62  ;;  %1959 = vrsqrt.f32 %v944_v16  ;;  %v1785_v18 = vpop.f32.mrb[20].mxu1 }
 0x206   : > { %v1950_v0 = vpop.eup %1949  ;;  %1312 = vst [vmem:[%s2606_s29 + $0x60] sm:$0xff] %v1248_v48  ;;  %v959_v50 = vadd.f32 %v1785_v18, %v2593_v20  ;;  %v953_v43 = vpop.f32.mrb[21].mxu1 }
 0x207   : > { %v1952_v52 = vpop.eup %1951  ;;  %v1251_v2 = vmul.f32 %v1950_v0, %v2341_v28  ;;  %v954_v22 = vadd.f32 %v2593_v20, %v953_v43 }
 0x208   : > { %v1250_v5 = vmul.f32 %v1952_v52, %v2344_v30  ;;  %1961 = vrsqrt.f32 %v959_v50 }
 0x209   : > { %1315 = vst [vmem:[%s2606_s29 + $0x78] sm:$0xff] %v1251_v2  ;;  %1963 = vrsqrt.f32 %v954_v22  ;;  %v1788_v24 = vpop.f32.mrb[22].mxu1 }
 0x20a   : > { %v1954_v4 = vpop.eup %1953  ;;  %1314 = vst [vmem:[%s2606_s29 + $0x70] sm:$0xff] %v1250_v5  ;;  %v969_v44 = vadd.f32 %v1788_v24, %v2593_v20  ;;  %v963_v6 = vpop.f32.mrb[23].mxu1 }
 0x20b   : > { %v1956_v54 = vpop.eup %1955  ;;  %v1253_v38 = vmul.f32 %v1954_v4, %v2351_v34  ;;  %v964_v28 = vadd.f32 %v2593_v20, %v963_v6 }
 0x20c   : > { %v1252_v56 = vmul.f32 %v1956_v54, %v2354_v36  ;;  %1965 = vrsqrt.f32 %v969_v44 }
 0x20d   : > { %1317 = vst [vmem:[%s2606_s29 + $0x88] sm:$0xff] %v1253_v38  ;;  %1967 = vrsqrt.f32 %v964_v28  ;;  %v1791_v30 = vpop.f32.mrb[24].mxu1 }
 0x20e   : > { %v1958_v61 = vpop.eup %1957  ;;  %1316 = vst [vmem:[%s2606_s29 + $0x80] sm:$0xff] %v1252_v56  ;;  %v979_v58 = vadd.f32 %v1791_v30, %v2593_v20  ;;  %v973_v10 = vpop.f32.mrb[25].mxu1 }
 0x20f   : > { %v1960_v47 = vpop.eup %1959  ;;  %v1255_v12 = vmul.f32 %v1958_v61, %v2361_v40  ;;  %v974_v34 = vadd.f32 %v2593_v20, %v973_v10 }
 0x210   : > { %v1254_v11 = vmul.f32 %v1960_v47, %v2364_v42  ;;  %1969 = vrsqrt.f32 %v979_v58 }
 0x211   : > { %1319 = vst [vmem:[%s2606_s29 + $0x98] sm:$0xff] %v1255_v12  ;;  %1971 = vrsqrt.f32 %v974_v34  ;;  %v1794_v36 = vpop.f32.mrb[26].mxu1 }
 0x212   : > { %v1962_v25 = vpop.eup %1961  ;;  %1318 = vst [vmem:[%s2606_s29 + $0x90] sm:$0xff] %v1254_v11  ;;  %v989_v17 = vadd.f32 %v1794_v36, %v2593_v20  ;;  %v983_v32 = vpop.f32.mrb[27].mxu1 }
 0x213   : > { %v1964_v62 = vpop.eup %1963  ;;  %v1257_v16 = vmul.f32 %v1962_v25, %v2371_v46  ;;  %v984_v40 = vadd.f32 %v2593_v20, %v983_v32 }
 0x214   : > { %v1256_v48 = vmul.f32 %v1964_v62, %v2374_v49  ;;  %1973 = vrsqrt.f32 %v989_v17 }
 0x215   : > { %1321 = vst [vmem:[%s2606_s29 + $0xa8] sm:$0xff] %v1257_v16  ;;  %1975 = vrsqrt.f32 %v984_v40  ;;  %v1797_v42 = vpop.f32.mrb[28].mxu1 }
 0x216   : > { %v1966_v18 = vpop.eup %1965  ;;  %1320 = vst [vmem:[%s2606_s29 + $0xa0] sm:$0xff] %v1256_v48  ;;  %v999_v0 = vadd.f32 %v1797_v42, %v2593_v20  ;;  %v993_v50 = vpop.f32.mrb[29].mxu1 }
 0x217   : > { %v1968_v43 = vpop.eup %1967  ;;  %v1259_v52 = vmul.f32 %v1966_v18, %v2381_v55  ;;  %v994_v46 = vadd.f32 %v2593_v20, %v993_v50 }
 0x218   : > { %v1258_v2 = vmul.f32 %v1968_v43, %v2384_v59  ;;  %1977 = vrsqrt.f32 %v999_v0 }
 0x219   : > { %1323 = vst [vmem:[%s2606_s29 + $0xb8] sm:$0xff] %v1259_v52  ;;  %1979 = vrsqrt.f32 %v994_v46  ;;  %v1800_v49 = vpop.f32.mrb[30].mxu1 }
 0x21a   : > { %v1970_v22 = vpop.eup %1969  ;;  %1322 = vst [vmem:[%s2606_s29 + $0xb0] sm:$0xff] %v1258_v2  ;;  %v1009_v5 = vadd.f32 %v1800_v49, %v2593_v20  ;;  %v1003_v24 = vpop.f32.mrb[31].mxu1 }
 0x21b   : > { %v1972_v4 = vpop.eup %1971  ;;  %v1261_v44 = vmul.f32 %v1970_v22, %v2391_v1  ;;  %v1004_v55 = vadd.f32 %v2593_v20, %v1003_v24 }
 0x21c   : > { %v1260_v6 = vmul.f32 %v1972_v4, %v2394_v3  ;;  %1981 = vrsqrt.f32 %v1009_v5 }
 0x21d   : > { %1325 = vst [vmem:[%s2606_s29 + $0xc8] sm:$0xff] %v1261_v44  ;;  %1983 = vrsqrt.f32 %v1004_v55  ;;  %v1803_v59 = vpop.f32.mrb[32].mxu1 }
 0x21e   : > { %v1974_v54 = vpop.eup %1973  ;;  %1324 = vst [vmem:[%s2606_s29 + $0xc0] sm:$0xff] %v1260_v6  ;;  %v1019_v38 = vadd.f32 %v1803_v59, %v2593_v20  ;;  %v1013_v28 = vpop.f32.mrb[33].mxu1 }
 0x21f   : > { %v1976_v56 = vpop.eup %1975  ;;  %v1263_v30 = vmul.f32 %v1974_v54, %v2401_v9  ;;  %v1014_v1 = vadd.f32 %v2593_v20, %v1013_v28 }
 0x220   : > { %v1262_v61 = vmul.f32 %v1976_v56, %v2404_v13  ;;  %1985 = vrsqrt.f32 %v1019_v38 }
 0x221   : > { %1327 = vst [vmem:[%s2606_s29 + $0xd8] sm:$0xff] %v1263_v30  ;;  %1987 = vrsqrt.f32 %v1014_v1  ;;  %v1806_v3 = vpop.f32.mrb[34].mxu1 }
 0x222   : > { %v1978_v58 = vpop.eup %1977  ;;  %1326 = vst [vmem:[%s2606_s29 + $0xd0] sm:$0xff] %v1262_v61  ;;  %v1029_v10 = vadd.f32 %v1806_v3, %v2593_v20  ;;  %v1023_v47 = vpop.f32.mrb[35].mxu1 }
 0x223   : > { %v1980_v12 = vpop.eup %1979  ;;  %v1265_v34 = vmul.f32 %v1978_v58, %v2411_v19  ;;  %v1024_v9 = vadd.f32 %v2593_v20, %v1023_v47 }
 0x224   : > { %v1264_v11 = vmul.f32 %v1980_v12, %v2414_v21  ;;  %1989 = vrsqrt.f32 %v1029_v10 }
 0x225   : > { %1329 = vst [vmem:[%s2606_s29 + $0xe8] sm:$0xff] %v1265_v34  ;;  %1991 = vrsqrt.f32 %v1024_v9  ;;  %v1809_v13 = vpop.f32.mrb[36].mxu1 }
 0x226   : > { %v1982_v36 = vpop.eup %1981  ;;  %1328 = vst [vmem:[%s2606_s29 + $0xe0] sm:$0xff] %v1264_v11  ;;  %v1039_v25 = vadd.f32 %v1809_v13, %v2593_v20  ;;  %v1033_v17 = vpop.f32.mrb[37].mxu1 }
 0x227   : > { %v1984_v32 = vpop.eup %1983  ;;  %v1267_v62 = vmul.f32 %v1982_v36, %v2421_v27  ;;  %v1034_v19 = vadd.f32 %v2593_v20, %v1033_v17 }
 0x228   : > { %v1266_v16 = vmul.f32 %v1984_v32, %v2424_v31  ;;  %1993 = vrsqrt.f32 %v1039_v25 }
 0x229   : > { %1331 = vst [vmem:[%s2606_s29 + $0xf8] sm:$0xff] %v1267_v62  ;;  %1995 = vrsqrt.f32 %v1034_v19  ;;  %v1812_v21 = vpop.f32.mrb[38].mxu1 }
 0x22a   : > { %v1986_v40 = vpop.eup %1985  ;;  %1330 = vst [vmem:[%s2606_s29 + $0xf0] sm:$0xff] %v1266_v16  ;;  %v1049_v48 = vadd.f32 %v1812_v21, %v2593_v20  ;;  %v1043_v42 = vpop.f32.mrb[39].mxu1 }
 0x22b   : > { %v1988_v18 = vpop.eup %1987  ;;  %v1269_v0 = vmul.f32 %v1986_v40, %v2431_v37  ;;  %v1044_v27 = vadd.f32 %v2593_v20, %v1043_v42 }
 0x22c   : > { %v1268_v50 = vmul.f32 %v1988_v18, %v2434_v39  ;;  %1997 = vrsqrt.f32 %v1049_v48 }
 0x22d   : > { %1333 = vst [vmem:[%s2606_s29 + $0x108] sm:$0xff] %v1269_v0  ;;  %1999 = vrsqrt.f32 %v1044_v27  ;;  %v1815_v31 = vpop.f32.mrb[40].mxu1 }
 0x22e   : > { %v1990_v43 = vpop.eup %1989  ;;  %1332 = vst [vmem:[%s2606_s29 + $0x100] sm:$0xff] %v1268_v50  ;;  %v1059_v52 = vadd.f32 %v1815_v31, %v2593_v20  ;;  %v1053_v46 = vpop.f32.mrb[41].mxu1 }
 0x22f   : > { %v1992_v2 = vpop.eup %1991  ;;  %v1271_v49 = vmul.f32 %v1990_v43, %v2441_v45  ;;  %v1054_v37 = vadd.f32 %v2593_v20, %v1053_v46 }
 0x230   : > { %v1270_v22 = vmul.f32 %v1992_v2, %v2444_v51  ;;  %2001 = vrsqrt.f32 %v1059_v52 }
 0x231   : > { %1335 = vst [vmem:[%s2606_s29 + $0x118] sm:$0xff] %v1271_v49  ;;  %2003 = vrsqrt.f32 %v1054_v37  ;;  %v1818_v39 = vpop.f32.mrb[42].mxu1 }
 0x232   : > { %v1994_v5 = vpop.eup %1993  ;;  %1334 = vst [vmem:[%s2606_s29 + $0x110] sm:$0xff] %v1270_v22  ;;  %v1069_v24 = vadd.f32 %v1818_v39, %v2593_v20  ;;  %v1063_v4 = vpop.f32.mrb[43].mxu1  ;;  %v2831_v39 = vld [vmem:[#allocation2_spill] sm:$0xff] }
 0x233   : > { %v1996_v44 = vpop.eup %1995  ;;  %v1273_v55 = vmul.f32 %v1994_v5, %v2451_v60  ;;  %v1064_v45 = vadd.f32 %v2593_v20, %v1063_v4 }
 0x234   : > { %v1272_v6 = vmul.f32 %v1996_v44, %v2454_v63  ;;  %2005 = vrsqrt.f32 %v1069_v24  ;;  %v2832_v24 = vld [vmem:[#allocation3_spill] sm:$0xff] }
 0x235   : > { %1337 = vst [vmem:[%s2606_s29 + $0x128] sm:$0xff] %v1273_v55  ;;  %2007 = vrsqrt.f32 %v1064_v45  ;;  %v1821_v51 = vpop.f32.mrb[44].mxu1 }
 0x236   : > { %v1998_v59 = vpop.eup %1997  ;;  %1336 = vst [vmem:[%s2606_s29 + $0x120] sm:$0xff] %v1272_v6  ;;  %v1079_v54 = vadd.f32 %v1821_v51, %v2593_v20  ;;  %v1073_v38 = vpop.f32.mrb[45].mxu1  ;;  %v2833_v51 = vld [vmem:[#allocation4_spill] sm:$0xff] }
 0x237   : > { %v2000_v28 = vpop.eup %1999  ;;  %v1275_v56 = vmul.f32 %v1998_v59, %v2461_v8  ;;  %v1074_v60 = vadd.f32 %v2593_v20, %v1073_v38  ;;  %v2834_v38 = vld [vmem:[#allocation5_spill] sm:$0xff] }
 0x238   : > { %v1274_v30 = vmul.f32 %v2000_v28, %v2464_v14  ;;  %2009 = vrsqrt.f32 %v1079_v54 }
 0x239   : > { %1339 = vst [vmem:[%s2606_s29 + $0x138] sm:$0xff] %v1275_v56  ;;  %2011 = vrsqrt.f32 %v1074_v60  ;;  %v1824_v63 = vpop.f32.mrb[46].mxu1 }
 0x23a   : > { %v2002_v1 = vpop.eup %2001  ;;  %1338 = vst [vmem:[%s2606_s29 + $0x130] sm:$0xff] %v1274_v30  ;;  %v1089_v61 = vadd.f32 %v1824_v63, %v2593_v20  ;;  %v1083_v3 = vpop.f32.mrb[47].mxu1 }
 0x23b   : > { %v2004_v58 = vpop.eup %2003  ;;  %v1277_v10 = vmul.f32 %v2002_v1, %v2471_v23  ;;  %v1084_v8 = vadd.f32 %v2593_v20, %v1083_v3 }
 0x23c   : > { %v1276_v47 = vmul.f32 %v2004_v58, %v2474_v26  ;;  %2013 = vrsqrt.f32 %v1089_v61  ;;  %v2835_v61 = vld [vmem:[#allocation6_spill] sm:$0xff] }
 0x23d   : > { %1341 = vst [vmem:[%s2606_s29 + $0x148] sm:$0xff] %v1277_v10  ;;  %2015 = vrsqrt.f32 %v1084_v8  ;;  %v1827_v14 = vpop.f32.mrb[48].mxu1  ;;  %v2836_v10 = vld [vmem:[#allocation7_spill] sm:$0xff] }
 0x23e   : > { %v2006_v12 = vpop.eup %2005  ;;  %1340 = vst [vmem:[%s2606_s29 + $0x140] sm:$0xff] %v1276_v47  ;;  %v1099_v34 = vadd.f32 %v1827_v14, %v2593_v20  ;;  %v1093_v9 = vpop.f32.mrb[49].mxu1 }
 0x23f   : > { %v2008_v11 = vpop.eup %2007  ;;  %v1279_v13 = vmul.f32 %v2006_v12, %v2481_v35  ;;  %v1094_v23 = vadd.f32 %v2593_v20, %v1093_v9 }
 0x240   : > { %v1278_v36 = vmul.f32 %v2008_v11, %v2484_v41  ;;  %2017 = vrsqrt.f32 %v1099_v34  ;;  %v2837_v11 = vld [vmem:[#allocation8_spill] sm:$0xff] }
 0x241   : > { %1343 = vst [vmem:[%s2606_s29 + $0x158] sm:$0xff] %v1279_v13  ;;  %2019 = vrsqrt.f32 %v1094_v23  ;;  %v1830_v26 = vpop.f32.mrb[50].mxu1 }
 0x242   : > { %v2010_v25 = vpop.eup %2009  ;;  %1342 = vst [vmem:[%s2606_s29 + $0x150] sm:$0xff] %v1278_v36  ;;  %v1109_v17 = vadd.f32 %v1830_v26, %v2593_v20  ;;  %v1103_v32 = vpop.f32.mrb[51].mxu1  ;;  %v2838_v36 = vld [vmem:[#allocation9_spill] sm:$0xff] }
 0x243   : > { %v2012_v62 = vpop.eup %2011  ;;  %v1281_v19 = vmul.f32 %v2010_v25, %v2491_v53  ;;  %v1104_v35 = vadd.f32 %v2593_v20, %v1103_v32  ;;  %v2839_v32 = vld [vmem:[#allocation10_spill] sm:$0xff] }
 0x244   : > { %v1280_v16 = vmul.f32 %v2012_v62, %v2494_v57  ;;  %2021 = vrsqrt.f32 %v1109_v17 }
 0x245   : > { %1345 = vst [vmem:[%s2606_s29 + $0x168] sm:$0xff] %v1281_v19  ;;  %2023 = vrsqrt.f32 %v1104_v35  ;;  %v1833_v41 = vpop.f32.mrb[52].mxu1  ;;  %v2840_v19 = vld [vmem:[#allocation11_spill] sm:$0xff] }
 0x246   : > { %v2014_v21 = vpop.eup %2013  ;;  %1344 = vst [vmem:[%s2606_s29 + $0x160] sm:$0xff] %v1280_v16  ;;  %v1119_v40 = vadd.f32 %v1833_v41, %v2593_v20  ;;  %v1113_v48 = vpop.f32.mrb[53].mxu1  ;;  %v2841_v41 = vld [vmem:[#allocation12_spill] sm:$0xff] }
 0x247   : > { %v2016_v42 = vpop.eup %2015  ;;  %v1283_v18 = vmul.f32 %v2014_v21, %v2501_v7  ;;  %v1114_v53 = vadd.f32 %v2593_v20, %v1113_v48 }
 0x248   : > { %v1282_v0 = vmul.f32 %v2016_v42, %v2504_v15  ;;  %2025 = vrsqrt.f32 %v1119_v40  ;;  %v2842_v40 = vld [vmem:[#allocation13_spill] sm:$0xff] }
 0x249   : > { %1347 = vst [vmem:[%s2606_s29 + $0x178] sm:$0xff] %v1283_v18  ;;  %2027 = vrsqrt.f32 %v1114_v53  ;;  %v1836_v57 = vpop.f32.mrb[54].mxu1  ;;  %v2843_v53 = vld [vmem:[#allocation14_spill] sm:$0xff] }
 0x24a   : > { %v2018_v27 = vpop.eup %2017  ;;  %1346 = vst [vmem:[%s2606_s29 + $0x170] sm:$0xff] %v1282_v0  ;;  %v1129_v50 = vadd.f32 %v1836_v57, %v2593_v20  ;;  %v1123_v31 = vpop.f32.mrb[55].mxu1  ;;  %v2844_v57 = vld [vmem:[#allocation15_spill] sm:$0xff] }
 0x24b   : > { %v2020_v43 = vpop.eup %2019  ;;  %v1285_v52 = vmul.f32 %v2018_v27, %v2511_v29  ;;  %v1124_v7 = vadd.f32 %v2593_v20, %v1123_v31 }
 0x24c   : > { %v1284_v46 = vmul.f32 %v2020_v43, %v2514_v33  ;;  %2029 = vrsqrt.f32 %v1129_v50 }
 0x24d   : > { %1349 = vst [vmem:[%s2606_s29 + $0x188] sm:$0xff] %v1285_v52  ;;  %2031 = vrsqrt.f32 %v1124_v7  ;;  %v1839_v15 = vpop.f32.mrb[56].mxu1 }
 0x24e   : > { %v2022_v2 = vpop.eup %2021  ;;  %1348 = vst [vmem:[%s2606_s29 + $0x180] sm:$0xff] %v1284_v46  ;;  %v1139_v49 = vadd.f32 %v1839_v15, %v2593_v20  ;;  %v1133_v37 = vpop.f32.mrb[57].mxu1 }
 0x24f   : > { %v2024_v22 = vpop.eup %2023  ;;  %v1287_v5 = vmul.f32 %v2022_v2, %v2831_v39  ;;  %v1134_v29 = vadd.f32 %v2593_v20, %v1133_v37 }
 0x250   : > { %v1286_v4 = vmul.f32 %v2024_v22, %v2832_v24  ;;  %2033 = vrsqrt.f32 %v1139_v49 }
 0x251   : > { %1351 = vst [vmem:[%s2606_s29 + $0x198] sm:$0xff] %v1287_v5  ;;  %2035 = vrsqrt.f32 %v1134_v29  ;;  %v1842_v33 = vpop.f32.mrb[58].mxu1 }
 0x252   : > { %v2026_v44 = vpop.eup %2025  ;;  %1350 = vst [vmem:[%s2606_s29 + $0x190] sm:$0xff] %v1286_v4  ;;  %v1149_v55 = vadd.f32 %v1842_v33, %v2593_v20  ;;  %v1143_v45 = vpop.f32.mrb[59].mxu1 }
 0x253   : > { %v2028_v6 = vpop.eup %2027  ;;  %v1289_v59 = vmul.f32 %v2026_v44, %v2833_v51  ;;  %v1144_v54 = vadd.f32 %v2593_v20, %v1143_v45 }
 0x254   : > { %v1288_v28 = vmul.f32 %v2028_v6, %v2834_v38  ;;  %2037 = vrsqrt.f32 %v1149_v55 }
 0x255   : > { %1353 = vst [vmem:[%s2606_s29 + $0x1a8] sm:$0xff] %v1289_v59  ;;  %2039 = vrsqrt.f32 %v1144_v54  ;;  %v1845_v56 = vpop.f32.mrb[60].mxu1 }
 0x256   : > { %v2030_v60 = vpop.eup %2029  ;;  %1352 = vst [vmem:[%s2606_s29 + $0x1a0] sm:$0xff] %v1288_v28  ;;  %v1159_v30 = vadd.f32 %v1845_v56, %v2593_v20  ;;  %v1153_v63 = vpop.f32.mrb[61].mxu1 }
 0x257   : > { %v2032_v1 = vpop.eup %2031  ;;  %v1291_v3 = vmul.f32 %v2030_v60, %v2835_v61  ;;  %v1154_v58 = vadd.f32 %v2593_v20, %v1153_v63 }
 0x258   : > { %v1290_v8 = vmul.f32 %v2032_v1, %v2836_v10  ;;  %2041 = vrsqrt.f32 %v1159_v30 }
 0x259   : > { %1355 = vst [vmem:[%s2606_s29 + $0x1b8] sm:$0xff] %v1291_v3  ;;  %2043 = vrsqrt.f32 %v1154_v58  ;;  %v1848_v47 = vpop.f32.mrb[62].mxu1 }
 0x25a   : > { %v2034_v14 = vpop.eup %2033  ;;  %1354 = vst [vmem:[%s2606_s29 + $0x1b0] sm:$0xff] %v1290_v8  ;;  %v1169_v12 = vadd.f32 %v1848_v47, %v2593_v20  ;;  %v1163_v34 = vpop.f32.mrb[63].mxu1 }
 0x25b   : > { %v2036_v9 = vpop.eup %2035  ;;  %v1293_v13 = vmul.f32 %v2034_v14, %v2837_v11  ;;  %v1164_v23 = vadd.f32 %v2593_v20, %v1163_v34 }
 0x25c   : > { %v1292_v26 = vmul.f32 %v2036_v9, %v2838_v36  ;;  %2045 = vrsqrt.f32 %v1169_v12 }
 0x25d   : > { %1357 = vst [vmem:[%s2606_s29 + $0x1c8] sm:$0xff] %v1293_v13  ;;  %2047 = vrsqrt.f32 %v1164_v23 }
 0x25e   : > { %v2038_v25 = vpop.eup %2037  ;;  %1356 = vst [vmem:[%s2606_s29 + $0x1c0] sm:$0xff] %v1292_v26 }
 0x25f   : > { %v2040_v17 = vpop.eup %2039  ;;  %v1295_v62 = vmul.f32 %v2038_v25, %v2839_v32 }
 0x260   : > { %v1294_v35 = vmul.f32 %v2040_v17, %v2840_v19 }
 0x261   : > { %1359 = vst [vmem:[%s2606_s29 + $0x1d8] sm:$0xff] %v1295_v62 }
 0x262   : > { %v2042_v16 = vpop.eup %2041  ;;  %1358 = vst [vmem:[%s2606_s29 + $0x1d0] sm:$0xff] %v1294_v35 }
 0x263   : > { %v2044_v20 = vpop.eup %2043  ;;  %v1297_v21 = vmul.f32 %v2042_v16, %v2841_v41 }
 0x264   : > { %v1296_v48 = vmul.f32 %v2044_v20, %v2842_v40 }
 0x265   : > { %1361 = vst [vmem:[%s2606_s29 + $0x1e8] sm:$0xff] %v1297_v21 }
 0x266   : > { %v2046_v42 = vpop.eup %2045  ;;  %1360 = vst [vmem:[%s2606_s29 + $0x1e0] sm:$0xff] %v1296_v48 }
 0x267   : > { %v2048_v18 = vpop.eup %2047  ;;  %v1299_v0 = vmul.f32 %v2046_v42, %v2843_v53 }
 0x268   : > { %v1298_v27 = vmul.f32 %v2048_v18, %v2844_v57 }
 0x269   : > { %1363 = vst [vmem:[%s2606_s29 + $0x1f8] sm:$0xff] %v1299_v0 }
 0x26a   : > { %1362 = vst [vmem:[%s2606_s29 + $0x1f0] sm:$0xff] %v1298_v27 }
 0x26b PF: > { %s15_s18 = sadd.s32 1, %s2055_s18  }
 0x26c   : > { %p12_p4 = scmp.ge.s32.totalorder %s15_s18, 6  }
 0x26e   :  { %14 = sbr.rel (!%p12_p4) target bundleno = 1 (0x1), region = 70 }

// kernel: anf_hyperprior_forward.15
= control target key start
LH: loop header
LB: loop body
LE: loop exit
PB: predicated region body
PF: predicated region fallthrough
CT: control target
= control target key end

     0   :  { %v1691_v0 = vmov 0.0|0.0   ;;  %s2980_s1 = inlined_call_operand.vmem [shape: f32[256,128], index: 1, kind: input, shape index: {}]   ;;  %s2981_s0 = inlined_call_operand.vmem [shape: f32[512,256], index: 0, kind: input, shape index: {}]   ;;  %s2982_s3 = inlined_call_operand.vmem [shape: f32[128,128], index: 3, kind: input, shape index: {}]   ;;  %s2983_s2 = inlined_call_operand.vmem [shape: f32[1,128], index: 2, kind: input, shape index: {}]   ;;  %s2984_s4 = inlined_call_operand.vmem [shape: f32[1,128], index: 4, kind: input, shape index: {}]   ;;  %s2985_s5 = inlined_call_operand.vmem [shape: f32[512,128], index: 5, kind: output, shape index: {}]  }
   0x1   :  { %1450 = vmatprep.subr.bf16.mxu0 %v1691_v0  ;;  %v148_v1 = vld [vmem:[%s2980_s1] sm:$0xff]  ;;  %v149_v2 = vld [vmem:[%s2980_s1 + $0x8] sm:$0xff]  ;;  %v150_v3 = vld [vmem:[%s2980_s1 + $0x10] sm:$0xff]  ;;  %1530 = vmatprep.subr.bf16.mxu1 %v1691_v0 }
   0x2   :  { %v1451_v4 = vpack.c.bf16 %v149_v2, %v148_v1  ;;  %v151_v5 = vld [vmem:[%s2980_s1 + $0x18] sm:$0xff]  ;;  %v152_v7 = vld [vmem:[%s2980_s1 + $0x20] sm:$0xff]  ;;  %v153_v8 = vld [vmem:[%s2980_s1 + $0x28] sm:$0xff] }
   0x3   :  { %v1454_v6 = vpack.c.bf16 %v151_v5, %v150_v3  ;;  %v1457_v9 = vpack.c.bf16 %v153_v8, %v152_v7  ;;  %v154_v10 = vld [vmem:[%s2980_s1 + $0x30] sm:$0xff]  ;;  %v155_v11 = vld [vmem:[%s2980_s1 + $0x38] sm:$0xff]  ;;  %v21_v12 = vld [vmem:[%s2981_s0 + $0x8] sm:$0xff] }
   0x4   :  { %1452 = vmatpush1.bf16.msra.mxu0 %v1451_v4  ;;  %1546 = vmatpush1.bf16.msra.mxu1 %v1451_v4  ;;  %v1460_v13 = vpack.c.bf16 %v155_v11, %v154_v10  ;;  %v156_v14 = vld [vmem:[%s2980_s1 + $0x40] sm:$0xff]  ;;  %v157_v15 = vld [vmem:[%s2980_s1 + $0x48] sm:$0xff]  ;;  %v158_v17 = vld [vmem:[%s2980_s1 + $0x50] sm:$0xff] }
   0x5   :  { %1453 = vmatprep.subr.bf16.mxu0 %v1691_v0  ;;  %1531 = vmatprep.subr.bf16.mxu1 %v1691_v0  ;;  %v1463_v16 = vpack.c.bf16 %v157_v15, %v156_v14  ;;  %v159_v18 = vld [vmem:[%s2980_s1 + $0x58] sm:$0xff]  ;;  %v160_v20 = vld [vmem:[%s2980_s1 + $0x60] sm:$0xff]  ;;  %v161_v21 = vld [vmem:[%s2980_s1 + $0x68] sm:$0xff] }
   0x6   :  { %251 = vmatprep.mubr.f32.mxu0 %v21_v12  ;;  %v1466_v19 = vpack.c.bf16 %v159_v18, %v158_v17  ;;  %v1469_v22 = vpack.c.bf16 %v161_v21, %v160_v20  ;;  %v162_v23 = vld [vmem:[%s2980_s1 + $0x70] sm:$0xff]  ;;  %v163_v24 = vld [vmem:[%s2980_s1 + $0x78] sm:$0xff]  ;;  %v164_v26 = vld [vmem:[%s2980_s1 + $0x80] sm:$0xff] }
   0x7   :  { %v1472_v25 = vpack.c.bf16 %v163_v24, %v162_v23  ;;  %v165_v27 = vld [vmem:[%s2980_s1 + $0x88] sm:$0xff]  ;;  %v166_v29 = vld [vmem:[%s2980_s1 + $0x90] sm:$0xff]  ;;  %v167_v30 = vld [vmem:[%s2980_s1 + $0x98] sm:$0xff] }
   0x8   :  { %1455 = vmatpush1.bf16.msra.mxu0 %v1454_v6  ;;  %1547 = vmatpush1.bf16.msra.mxu1 %v1454_v6  ;;  %v1475_v28 = vpack.c.bf16 %v165_v27, %v164_v26  ;;  %v1478_v31 = vpack.c.bf16 %v167_v30, %v166_v29  ;;  %v168_v32 = vld [vmem:[%s2980_s1 + $0xa0] sm:$0xff]  ;;  %v169_v33 = vld [vmem:[%s2980_s1 + $0xa8] sm:$0xff]  ;;  %v170_v35 = vld [vmem:[%s2980_s1 + $0xb0] sm:$0xff] }
   0x9   :  { %1456 = vmatprep.subr.bf16.mxu0 %v1691_v0  ;;  %1532 = vmatprep.subr.bf16.mxu1 %v1691_v0  ;;  %v1481_v34 = vpack.c.bf16 %v169_v33, %v168_v32  ;;  %v171_v36 = vld [vmem:[%s2980_s1 + $0xb8] sm:$0xff]  ;;  %v172_v38 = vld [vmem:[%s2980_s1 + $0xc0] sm:$0xff]  ;;  %v173_v39 = vld [vmem:[%s2980_s1 + $0xc8] sm:$0xff] }
   0xa   :  { %v1484_v37 = vpack.c.bf16 %v171_v36, %v170_v35  ;;  %v1487_v40 = vpack.c.bf16 %v173_v39, %v172_v38  ;;  %v174_v41 = vld [vmem:[%s2980_s1 + $0xd0] sm:$0xff]  ;;  %v175_v42 = vld [vmem:[%s2980_s1 + $0xd8] sm:$0xff]  ;;  %v176_v44 = vld [vmem:[%s2980_s1 + $0xe0] sm:$0xff] }
   0xb   :  { %v1490_v43 = vpack.c.bf16 %v175_v42, %v174_v41  ;;  %v177_v45 = vld [vmem:[%s2980_s1 + $0xe8] sm:$0xff]  ;;  %v178_v47 = vld [vmem:[%s2980_s1 + $0xf0] sm:$0xff]  ;;  %v179_v48 = vld [vmem:[%s2980_s1 + $0xf8] sm:$0xff] }
   0xc   :  { %1458 = vmatpush1.bf16.msra.mxu0 %v1457_v9  ;;  %1548 = vmatpush1.bf16.msra.mxu1 %v1457_v9  ;;  %v1493_v46 = vpack.c.bf16 %v177_v45, %v176_v44  ;;  %v1496_v49 = vpack.c.bf16 %v179_v48, %v178_v47  ;;  %v20_v50 = vld [vmem:[%s2981_s0] sm:$0xff]  ;;  %v23_v51 = vld [vmem:[%s2981_s0 + $0x18] sm:$0xff]  ;;  %v22_v52 = vld [vmem:[%s2981_s0 + $0x10] sm:$0xff] }
   0xd   :  { %1459 = vmatprep.subr.bf16.mxu0 %v1691_v0  ;;  %1533 = vmatprep.subr.bf16.mxu1 %v1691_v0  ;;  %v25_v53 = vld [vmem:[%s2981_s0 + $0x28] sm:$0xff]  ;;  %v24_v54 = vld [vmem:[%s2981_s0 + $0x20] sm:$0xff]  ;;  %v27_v55 = vld [vmem:[%s2981_s0 + $0x38] sm:$0xff] }
   0xe   :  { %v26_v56 = vld [vmem:[%s2981_s0 + $0x30] sm:$0xff]  ;;  %v29_v57 = vld [vmem:[%s2981_s0 + $0x48] sm:$0xff]  ;;  %v28_v58 = vld [vmem:[%s2981_s0 + $0x40] sm:$0xff] }
   0xf   :  { %v31_v59 = vld [vmem:[%s2981_s0 + $0x58] sm:$0xff]  ;;  %v30_v60 = vld [vmem:[%s2981_s0 + $0x50] sm:$0xff]  ;;  %v33_v61 = vld [vmem:[%s2981_s0 + $0x68] sm:$0xff] }
  0x10   :  { %1461 = vmatpush1.bf16.msra.mxu0 %v1460_v13  ;;  %1549 = vmatpush1.bf16.msra.mxu1 %v1460_v13  ;;  %v32_v62 = vld [vmem:[%s2981_s0 + $0x60] sm:$0xff]  ;;  %v35_v63 = vld [vmem:[%s2981_s0 + $0x78] sm:$0xff]  ;;  %v34_v1 = vld [vmem:[%s2981_s0 + $0x70] sm:$0xff] }
  0x11   :  { %1462 = vmatprep.subr.bf16.mxu0 %v1691_v0  ;;  %1534 = vmatprep.subr.bf16.mxu1 %v1691_v0  ;;  %v116_v2 = vld [vmem:[%s2981_s0 + $0x300] sm:$0xff]  ;;  %v37_v3 = vld [vmem:[%s2981_s0 + $0x88] sm:$0xff]  ;;  %v119_v4 = vld [vmem:[%s2981_s0 + $0x318] sm:$0xff] }
  0x12   :  { %v36_v5 = vld [vmem:[%s2981_s0 + $0x80] sm:$0xff]  ;;  %v118_v6 = vld [vmem:[%s2981_s0 + $0x310] sm:$0xff]  ;;  %v39_v7 = vld [vmem:[%s2981_s0 + $0x98] sm:$0xff] }
  0x13   :  { %v121_v8 = vld [vmem:[%s2981_s0 + $0x328] sm:$0xff]  ;;  %v38_v9 = vld [vmem:[%s2981_s0 + $0x90] sm:$0xff]  ;;  %v120_v10 = vld [vmem:[%s2981_s0 + $0x320] sm:$0xff] }
  0x14   :  { %1464 = vmatpush1.bf16.msra.mxu0 %v1463_v16  ;;  %1550 = vmatpush1.bf16.msra.mxu1 %v1463_v16  ;;  %v41_v11 = vld [vmem:[%s2981_s0 + $0xa8] sm:$0xff]  ;;  %v123_v12 = vld [vmem:[%s2981_s0 + $0x338] sm:$0xff]  ;;  %v40_v13 = vld [vmem:[%s2981_s0 + $0xa0] sm:$0xff] }
  0x15   :  { %1465 = vmatprep.subr.bf16.mxu0 %v1691_v0  ;;  %1535 = vmatprep.subr.bf16.mxu1 %v1691_v0  ;;  %v122_v14 = vld [vmem:[%s2981_s0 + $0x330] sm:$0xff]  ;;  %v43_v15 = vld [vmem:[%s2981_s0 + $0xb8] sm:$0xff]  ;;  %v125_v16 = vld [vmem:[%s2981_s0 + $0x348] sm:$0xff] }
  0x16   :  { %v42_v17 = vld [vmem:[%s2981_s0 + $0xb0] sm:$0xff]  ;;  %v124_v18 = vld [vmem:[%s2981_s0 + $0x340] sm:$0xff]  ;;  %v127_v20 = vld [vmem:[%s2981_s0 + $0x358] sm:$0xff] }
  0x17   :  { %v44_v21 = vld [vmem:[%s2981_s0 + $0xc0] sm:$0xff]  ;;  %v47_v23 = vld [vmem:[%s2981_s0 + $0xd8] sm:$0xff]  ;;  %v129_v24 = vld [vmem:[%s2981_s0 + $0x368] sm:$0xff] }
  0x18   :  { %1467 = vmatpush1.bf16.msra.mxu0 %v1466_v19  ;;  %1551 = vmatpush1.bf16.msra.mxu1 %v1466_v19  ;;  %v45_v19 = vld [vmem:[%s2981_s0 + $0xc8] sm:$0xff]  ;;  %v128_v26 = vld [vmem:[%s2981_s0 + $0x360] sm:$0xff]  ;;  %v130_v30 = vld [vmem:[%s2981_s0 + $0x370] sm:$0xff] }
  0x19   :  { %1468 = vmatprep.subr.bf16.mxu0 %v1691_v0  ;;  %1536 = vmatprep.subr.bf16.mxu1 %v1691_v0  ;;  %v49_v27 = vld [vmem:[%s2981_s0 + $0xe8] sm:$0xff]  ;;  %v48_v29 = vld [vmem:[%s2981_s0 + $0xe0] sm:$0xff]  ;;  %v50_v33 = vld [vmem:[%s2981_s0 + $0xf0] sm:$0xff] }
  0x1a   :  { %v133_v32 = vld [vmem:[%s2981_s0 + $0x388] sm:$0xff]  ;;  %v636_v35 = vld [vmem:[%s2982_s3] sm:$0xff]  ;;  %v135_v39 = vld [vmem:[%s2981_s0 + $0x398] sm:$0xff] }
  0x1b   :  { %v53_v36 = vld [vmem:[%s2981_s0 + $0x108] sm:$0xff]  ;;  %v638_v41 = vld [vmem:[%s2982_s3 + $0x10] sm:$0xff]  ;;  %v52_v42 = vld [vmem:[%s2981_s0 + $0x100] sm:$0xff] }
  0x1c   :  { %1470 = vmatpush1.bf16.msra.mxu0 %v1469_v22  ;;  %1552 = vmatpush1.bf16.msra.mxu1 %v1469_v22  ;;  %v126_v22 = vld [vmem:[%s2981_s0 + $0x350] sm:$0xff]  ;;  %v639_v44 = vld [vmem:[%s2982_s3 + $0x18] sm:$0xff]  ;;  %v640_v47 = vld [vmem:[%s2982_s3 + $0x20] sm:$0xff] }
  0x1d   :  { %1471 = vmatprep.subr.bf16.mxu0 %v1691_v0  ;;  %1537 = vmatprep.subr.bf16.mxu1 %v1691_v0  ;;  %v1502_v45 = vpack.c.bf16 %v639_v44, %v638_v41  ;;  %v641_v48 = vld [vmem:[%s2982_s3 + $0x28] sm:$0xff]  ;;  %v86_v44 = vld [vmem:[%s2981_s0 + $0x210] sm:$0xff] }
  0x1e   :  { %v85_v41 = vld [vmem:[%s2981_s0 + $0x208] sm:$0xff] }
  0x20   :  { %1473 = vmatpush1.bf16.msra.mxu0 %v1472_v25  ;;  %1553 = vmatpush1.bf16.msra.mxu1 %v1472_v25  ;;  %v46_v25 = vld [vmem:[%s2981_s0 + $0xd0] sm:$0xff] }
  0x21   :  { %1474 = vmatprep.subr.bf16.mxu0 %v1691_v0  ;;  %1538 = vmatprep.subr.bf16.mxu1 %v1691_v0 }
  0x24   :  { %1476 = vmatpush1.bf16.msra.mxu0 %v1475_v28  ;;  %1554 = vmatpush1.bf16.msra.mxu1 %v1475_v28  ;;  %v131_v28 = vld [vmem:[%s2981_s0 + $0x378] sm:$0xff] }
  0x25   :  { %1477 = vmatprep.subr.bf16.mxu0 %v1691_v0  ;;  %1539 = vmatprep.subr.bf16.mxu1 %v1691_v0 }
  0x28   :  { %1479 = vmatpush1.bf16.msra.mxu0 %v1478_v31  ;;  %1555 = vmatpush1.bf16.msra.mxu1 %v1478_v31  ;;  %v51_v31 = vld [vmem:[%s2981_s0 + $0xf8] sm:$0xff] }
  0x29   :  { %1480 = vmatprep.subr.bf16.mxu0 %v1691_v0  ;;  %1540 = vmatprep.subr.bf16.mxu1 %v1691_v0 }
  0x2c   :  { %1482 = vmatpush1.bf16.msra.mxu0 %v1481_v34  ;;  %1556 = vmatpush1.bf16.msra.mxu1 %v1481_v34  ;;  %v132_v34 = vld [vmem:[%s2981_s0 + $0x380] sm:$0xff] }
  0x2d   :  { %1483 = vmatprep.subr.bf16.mxu0 %v1691_v0  ;;  %1541 = vmatprep.subr.bf16.mxu1 %v1691_v0 }
  0x30   :  { %1485 = vmatpush1.bf16.msra.mxu0 %v1484_v37  ;;  %1557 = vmatpush1.bf16.msra.mxu1 %v1484_v37  ;;  %v637_v37 = vld [vmem:[%s2982_s3 + $0x8] sm:$0xff] }
  0x31   :  { %1486 = vmatprep.subr.bf16.mxu0 %v1691_v0  ;;  %1542 = vmatprep.subr.bf16.mxu1 %v1691_v0  ;;  %v1498_v38 = vpack.c.bf16 %v637_v37, %v636_v35  ;;  %v79_v35 = vld [vmem:[%s2981_s0 + $0x1d8] sm:$0xff]  ;;  %v81_v37 = vld [vmem:[%s2981_s0 + $0x1e8] sm:$0xff] }
  0x34   :  { %1488 = vmatpush1.bf16.msra.mxu0 %v1487_v40  ;;  %1558 = vmatpush1.bf16.msra.mxu1 %v1487_v40  ;;  %v134_v40 = vld [vmem:[%s2981_s0 + $0x390] sm:$0xff] }
  0x35   :  { %1489 = vmatprep.subr.bf16.mxu0 %v1691_v0  ;;  %1543 = vmatprep.subr.bf16.mxu1 %v1691_v0 }
  0x38   :  { %1491 = vmatpush1.bf16.msra.mxu0 %v1490_v43  ;;  %1559 = vmatpush1.bf16.msra.mxu1 %v1490_v43  ;;  %v55_v43 = vld [vmem:[%s2981_s0 + $0x118] sm:$0xff] }
  0x39   :  { %1492 = vmatprep.subr.bf16.mxu0 %v1691_v0  ;;  %1544 = vmatprep.subr.bf16.mxu1 %v1691_v0 }
  0x3c   :  { %1494 = vmatpush1.bf16.msra.mxu0 %v1493_v46  ;;  %1560 = vmatpush1.bf16.msra.mxu1 %v1493_v46  ;;  %v137_v46 = vld [vmem:[%s2981_s0 + $0x3a8] sm:$0xff] }
  0x3d   :  { %1495 = vmatprep.subr.bf16.mxu0 %v1691_v0  ;;  %1545 = vmatprep.subr.bf16.mxu1 %v1691_v0  ;;  %v117_v0 = vld [vmem:[%s2981_s0 + $0x308] sm:$0xff] }
  0x3e   :  { %491 = vmatprep.mubr.f32.mxu1 %v117_v0  ;;  %v140_v0 = vld [vmem:[%s2981_s0 + $0x3c0] sm:$0xff] }
  0x40   :  { %1497 = vmatpush1.bf16.msra.mxu0 %v1496_v49  ;;  %1561 = vmatpush1.bf16.msra.mxu1 %v1496_v49  ;;  %v1506_v49 = vpack.c.bf16 %v641_v48, %v640_v47  ;;  %v91_v47 = vld [vmem:[%s2981_s0 + $0x238] sm:$0xff]  ;;  %v90_v48 = vld [vmem:[%s2981_s0 + $0x230] sm:$0xff] }
  0x41   :  { %1499 = vmatprep.subr.bf16.mxu1 %v1498_v38 }
  0x43   :  { %252 = vmatmul.mubr.f32.vlgmr.msra.gmra.mrb[0].mxu0 %v20_v50  ;;  %492 = vmatmul.mubr.f32.vlgmr.msra.gmra.mrb[0].mxu1 %v116_v2  ;;  %v136_v50 = vld [vmem:[%s2981_s0 + $0x3a0] sm:$0xff]  ;;  %v647_v2 = vld [vmem:[%s2982_s3 + $0x58] sm:$0xff] }
  0x44   :  { %256 = vmatprep.mubr.f32.mxu0 %v23_v51  ;;  %496 = vmatprep.mubr.f32.mxu1 %v119_v4  ;;  %v642_v51 = vld [vmem:[%s2982_s3 + $0x30] sm:$0xff]  ;;  %v143_v4 = vld [vmem:[%s2981_s0 + $0x3d8] sm:$0xff] }
  0x45   :  { %1501 = vmatpush3.bf16.msra.mxu1 %v1498_v38  ;;  %v80_v38 = vld [vmem:[%s2981_s0 + $0x1e0] sm:$0xff] }
  0x46   :  { %1503 = vmatprep.subr.bf16.mxu1 %v1502_v45 }
  0x47   :  { %257 = vmatmul.mubr.f32.gmra.mrb[2].mxu0 %v22_v52  ;;  %497 = vmatmul.mubr.f32.gmra.mrb[2].mxu1 %v118_v6  ;;  %v643_v52 = vld [vmem:[%s2982_s3 + $0x38] sm:$0xff] }
  0x48   :  { %261 = vmatprep.mubr.f32.mxu0 %v25_v53  ;;  %501 = vmatprep.mubr.f32.mxu1 %v121_v8  ;;  %v54_v53 = vld [vmem:[%s2981_s0 + $0x110] sm:$0xff]  ;;  %v60_v8 = vld [vmem:[%s2981_s0 + $0x140] sm:$0xff] }
  0x49   :  { %1505 = vmatpush3.bf16.msra.mxu1 %v1502_v45  ;;  %v89_v45 = vld [vmem:[%s2981_s0 + $0x228] sm:$0xff] }
  0x4a   :  { %1507 = vmatprep.subr.bf16.mxu1 %v1506_v49 }
  0x4b   :  { %262 = vmatmul.mubr.f32.gmra.mrb[4].mxu0 %v24_v54  ;;  %502 = vmatmul.mubr.f32.gmra.mrb[4].mxu1 %v120_v10  ;;  %v139_v54 = vld [vmem:[%s2981_s0 + $0x3b8] sm:$0xff] }
  0x4c   :  { %266 = vmatprep.mubr.f32.mxu0 %v27_v55  ;;  %506 = vmatprep.mubr.f32.mxu1 %v123_v12  ;;  %v57_v55 = vld [vmem:[%s2981_s0 + $0x128] sm:$0xff]  ;;  %v63_v10 = vld [vmem:[%s2981_s0 + $0x158] sm:$0xff]  ;;  %v648_v12 = vld [vmem:[%s2982_s3 + $0x60] sm:$0xff] }
  0x4d   :  { %1509 = vmatpush3.bf16.msra.mxu1 %v1506_v49  ;;  %v93_v49 = vld [vmem:[%s2981_s0 + $0x248] sm:$0xff] }
  0x4f   :  { %267 = vmatmul.mubr.f32.gmra.mrb[6].mxu0 %v26_v56  ;;  %507 = vmatmul.mubr.f32.gmra.mrb[6].mxu1 %v122_v14  ;;  %v1510_v56 = vpack.c.bf16 %v643_v52, %v642_v51  ;;  %v65_v14 = vld [vmem:[%s2981_s0 + $0x168] sm:$0xff]  ;;  %v95_v51 = vld [vmem:[%s2981_s0 + $0x258] sm:$0xff]  ;;  %v94_v52 = vld [vmem:[%s2981_s0 + $0x250] sm:$0xff] }
  0x50   :  { %271 = vmatprep.mubr.f32.mxu0 %v29_v57  ;;  %511 = vmatprep.mubr.f32.mxu1 %v125_v16  ;;  %v138_v57 = vld [vmem:[%s2981_s0 + $0x3b0] sm:$0xff] }
  0x51   :  { %1511 = vmatprep.subr.bf16.mxu1 %v1510_v56 }
  0x52   :  { %1513 = vmatpush3.bf16.msra.mxu1 %v1510_v56  ;;  %v98_v56 = vld [vmem:[%s2981_s0 + $0x270] sm:$0xff] }
  0x53   :  { %272 = vmatmul.mubr.f32.gmra.mrb[8].mxu0 %v28_v58  ;;  %512 = vmatmul.mubr.f32.gmra.mrb[8].mxu1 %v124_v18  ;;  %v644_v58 = vld [vmem:[%s2982_s3 + $0x40] sm:$0xff]  ;;  %v147_v18 = vld [vmem:[%s2981_s0 + $0x3f8] sm:$0xff] }
  0x54   :  { %276 = vmatprep.mubr.f32.mxu0 %v31_v59  ;;  %516 = vmatprep.mubr.f32.mxu1 %v127_v20  ;;  %v645_v59 = vld [vmem:[%s2982_s3 + $0x48] sm:$0xff]  ;;  %v651_v20 = vld [vmem:[%s2982_s3 + $0x78] sm:$0xff] }
  0x57   :  { %277 = vmatmul.mubr.f32.gmra.mrb[10].mxu0 %v30_v60  ;;  %517 = vmatmul.mubr.f32.gmra.mrb[10].mxu1 %v126_v22  ;;  %v56_v60 = vld [vmem:[%s2981_s0 + $0x120] sm:$0xff]  ;;  %v146_v22 = vld [vmem:[%s2981_s0 + $0x3f0] sm:$0xff] }
  0x58   :  { %281 = vmatprep.mubr.f32.mxu0 %v33_v61  ;;  %521 = vmatprep.mubr.f32.mxu1 %v129_v24  ;;  %v141_v61 = vld [vmem:[%s2981_s0 + $0x3c8] sm:$0xff]  ;;  %v66_v24 = vld [vmem:[%s2981_s0 + $0x170] sm:$0xff] }
  0x5b   :  { %282 = vmatmul.mubr.f32.gmra.mrb[12].mxu0 %v32_v62  ;;  %522 = vmatmul.mubr.f32.gmra.mrb[12].mxu1 %v128_v26  ;;  %v59_v62 = vld [vmem:[%s2981_s0 + $0x138] sm:$0xff]  ;;  %v68_v26 = vld [vmem:[%s2981_s0 + $0x180] sm:$0xff] }
  0x5c   :  { %286 = vmatprep.mubr.f32.mxu0 %v35_v63  ;;  %526 = vmatprep.mubr.f32.mxu1 %v131_v28  ;;  %v1514_v63 = vpack.c.bf16 %v645_v59, %v644_v58  ;;  %v70_v28 = vld [vmem:[%s2981_s0 + $0x190] sm:$0xff]  ;;  %v100_v58 = vld [vmem:[%s2981_s0 + $0x280] sm:$0xff]  ;;  %v103_v59 = vld [vmem:[%s2981_s0 + $0x298] sm:$0xff] }
  0x5e   :  { %1515 = vmatprep.subr.bf16.mxu1 %v1514_v63 }
  0x5f   :  { %287 = vmatmul.mubr.f32.gmra.mrb[14].mxu0 %v34_v1  ;;  %527 = vmatmul.mubr.f32.gmra.mrb[14].mxu1 %v130_v30  ;;  %v646_v1 = vld [vmem:[%s2982_s3 + $0x50] sm:$0xff]  ;;  %v72_v30 = vld [vmem:[%s2981_s0 + $0x1a0] sm:$0xff] }
  0x60   :  { %291 = vmatprep.mubr.f32.mxu0 %v37_v3  ;;  %531 = vmatprep.mubr.f32.mxu1 %v133_v32  ;;  %v58_v3 = vld [vmem:[%s2981_s0 + $0x130] sm:$0xff]  ;;  %v1518_v6 = vpack.c.bf16 %v647_v2, %v646_v1  ;;  %v109_v1 = vld [vmem:[%s2981_s0 + $0x2c8] sm:$0xff]  ;;  %v108_v2 = vld [vmem:[%s2981_s0 + $0x2c0] sm:$0xff] }
  0x61   :  { %1517 = vmatpush3.bf16.msra.mxu1 %v1514_v63  ;;  %v74_v32 = vld [vmem:[%s2981_s0 + $0x1b0] sm:$0xff]  ;;  %v107_v63 = vld [vmem:[%s2981_s0 + $0x2b8] sm:$0xff] }
  0x62   :  { %1519 = vmatprep.subr.bf16.mxu1 %v1518_v6 }
  0x63   :  { %292 = vmatmul.mubr.f32.gmra.mrb[16].mxu0 %v36_v5  ;;  %532 = vmatmul.mubr.f32.gmra.mrb[16].mxu1 %v132_v34  ;;  %v61_v5 = vld [vmem:[%s2981_s0 + $0x148] sm:$0xff]  ;;  %v76_v34 = vld [vmem:[%s2981_s0 + $0x1c0] sm:$0xff] }
  0x64   :  { %296 = vmatprep.mubr.f32.mxu0 %v39_v7  ;;  %536 = vmatprep.mubr.f32.mxu1 %v135_v39  ;;  %v142_v7 = vld [vmem:[%s2981_s0 + $0x3d0] sm:$0xff]  ;;  %v83_v39 = vld [vmem:[%s2981_s0 + $0x1f8] sm:$0xff] }
  0x65   :  { %1521 = vmatpush3.bf16.msra.mxu1 %v1518_v6  ;;  %v112_v6 = vld [vmem:[%s2981_s0 + $0x2e0] sm:$0xff] }
  0x67   :  { %297 = vmatmul.mubr.f32.gmra.mrb[18].mxu0 %v38_v9  ;;  %537 = vmatmul.mubr.f32.gmra.mrb[18].mxu1 %v134_v40  ;;  %v145_v9 = vld [vmem:[%s2981_s0 + $0x3e8] sm:$0xff]  ;;  %v82_v40 = vld [vmem:[%s2981_s0 + $0x1f0] sm:$0xff] }
  0x68   :  { %301 = vmatprep.mubr.f32.mxu0 %v41_v11  ;;  %541 = vmatprep.mubr.f32.mxu1 %v137_v46  ;;  %v62_v11 = vld [vmem:[%s2981_s0 + $0x150] sm:$0xff]  ;;  %v88_v46 = vld [vmem:[%s2981_s0 + $0x220] sm:$0xff] }
  0x6b   :  { %302 = vmatmul.mubr.f32.gmra.mrb[20].mxu0 %v40_v13  ;;  %542 = vmatmul.mubr.f32.gmra.mrb[20].mxu1 %v136_v50  ;;  %v649_v13 = vld [vmem:[%s2982_s3 + $0x68] sm:$0xff]  ;;  %v92_v50 = vld [vmem:[%s2981_s0 + $0x240] sm:$0xff] }
  0x6c   :  { %306 = vmatprep.mubr.f32.mxu0 %v43_v15  ;;  %546 = vmatprep.mubr.f32.mxu1 %v139_v54  ;;  %v144_v15 = vld [vmem:[%s2981_s0 + $0x3e0] sm:$0xff]  ;;  %v1522_v16 = vpack.c.bf16 %v649_v13, %v648_v12 }
  0x6d   :  { %v96_v54 = vld [vmem:[%s2981_s0 + $0x260] sm:$0xff] }
  0x6e   :  { %1523 = vmatprep.subr.bf16.mxu1 %v1522_v16 }
  0x6f   :  { %307 = vmatmul.mubr.f32.gmra.mrb[22].mxu0 %v42_v17  ;;  %547 = vmatmul.mubr.f32.gmra.mrb[22].mxu1 %v138_v57  ;;  %v64_v17 = vld [vmem:[%s2981_s0 + $0x160] sm:$0xff]  ;;  %v101_v57 = vld [vmem:[%s2981_s0 + $0x288] sm:$0xff] }
  0x70   :  { %311 = vmatprep.mubr.f32.mxu0 %v45_v19  ;;  %551 = vmatprep.mubr.f32.mxu1 %v141_v61  ;;  %v650_v19 = vld [vmem:[%s2982_s3 + $0x70] sm:$0xff]  ;;  %v105_v61 = vld [vmem:[%s2981_s0 + $0x2a8] sm:$0xff] }
  0x71   :  { %1525 = vmatpush3.bf16.msra.mxu1 %v1522_v16 }
  0x73   :  { %312 = vmatmul.mubr.f32.gmra.mrb[24].mxu0 %v44_v21  ;;  %552 = vmatmul.mubr.f32.gmra.mrb[24].mxu1 %v140_v0  ;;  %v67_v21 = vld [vmem:[%s2981_s0 + $0x178] sm:$0xff]  ;;  %v106_v0 = vld [vmem:[%s2981_s0 + $0x2b0] sm:$0xff] }
  0x74   :  { %316 = vmatprep.mubr.f32.mxu0 %v47_v23  ;;  %556 = vmatprep.mubr.f32.mxu1 %v143_v4  ;;  %v1526_v23 = vpack.c.bf16 %v651_v20, %v650_v19  ;;  %v110_v4 = vld [vmem:[%s2981_s0 + $0x2d0] sm:$0xff] }
  0x76   :  { %1527 = vmatprep.subr.bf16.mxu1 %v1526_v23 }
  0x77   :  { %317 = vmatmul.mubr.f32.gmra.mrb[26].mxu0 %v46_v25  ;;  %557 = vmatmul.mubr.f32.gmra.mrb[26].mxu1 %v142_v7  ;;  %v69_v25 = vld [vmem:[%s2981_s0 + $0x188] sm:$0xff]  ;;  %v115_v7 = vld [vmem:[%s2981_s0 + $0x2f8] sm:$0xff] }
  0x78   :  { %321 = vmatprep.mubr.f32.mxu0 %v49_v27  ;;  %561 = vmatprep.mubr.f32.mxu1 %v145_v9  ;;  %v71_v27 = vld [vmem:[%s2981_s0 + $0x198] sm:$0xff]  ;;  %v2285_v9 = vld [vmem:[%s2983_s2] ss:$0 sm:$0xff] }
  0x79   :  { %1529 = vmatpush3.bf16.msra.mxu1 %v1526_v23 }
  0x7b   :  { %322 = vmatmul.mubr.f32.gmra.mrb[28].mxu0 %v48_v29  ;;  %562 = vmatmul.mubr.f32.gmra.mrb[28].mxu1 %v144_v15  ;;  %v73_v29 = vld [vmem:[%s2981_s0 + $0x1a8] sm:$0xff] }
  0x7c   :  { %326 = vmatprep.mubr.f32.mxu0 %v51_v31  ;;  %566 = vmatprep.mubr.f32.mxu1 %v147_v18  ;;  %v75_v31 = vld [vmem:[%s2981_s0 + $0x1b8] sm:$0xff] }
  0x7f   :  { %327 = vmatmul.mubr.f32.gmra.mrb[30].mxu0 %v50_v33  ;;  %567 = vmatmul.mubr.f32.gmra.mrb[30].mxu1 %v146_v22  ;;  %v77_v33 = vld [vmem:[%s2981_s0 + $0x1c8] sm:$0xff] }
  0x80   :  { %331 = vmatprep.mubr.f32.mxu0 %v53_v36  ;;  %v78_v36 = vld [vmem:[%s2981_s0 + $0x1d0] sm:$0xff] }
  0x83   :  { %332 = vmatmul.mubr.f32.gmra.mrb[32].mxu0 %v52_v42  ;;  %v84_v42 = vld [vmem:[%s2981_s0 + $0x200] sm:$0xff] }
  0x84   :  { %336 = vmatprep.mubr.f32.mxu0 %v55_v43  ;;  %v87_v43 = vld [vmem:[%s2981_s0 + $0x218] sm:$0xff] }
  0x87   :  { %337 = vmatmul.mubr.f32.gmra.mrb[34].mxu0 %v54_v53  ;;  %v97_v53 = vld [vmem:[%s2981_s0 + $0x268] sm:$0xff] }
  0x88   :  { %341 = vmatprep.mubr.f32.mxu0 %v57_v55  ;;  %v99_v55 = vld [vmem:[%s2981_s0 + $0x278] sm:$0xff] }
  0x8b   :  { %342 = vmatmul.mubr.f32.gmra.mrb[36].mxu0 %v56_v60  ;;  %v102_v60 = vld [vmem:[%s2981_s0 + $0x290] sm:$0xff] }
  0x8c   :  { %346 = vmatprep.mubr.f32.mxu0 %v59_v62  ;;  %v104_v62 = vld [vmem:[%s2981_s0 + $0x2a0] sm:$0xff] }
  0x8f   :  { %347 = vmatmul.mubr.f32.gmra.mrb[38].mxu0 %v58_v3  ;;  %v111_v3 = vld [vmem:[%s2981_s0 + $0x2d8] sm:$0xff] }
  0x90   :  { %351 = vmatprep.mubr.f32.mxu0 %v61_v5  ;;  %v113_v5 = vld [vmem:[%s2981_s0 + $0x2e8] sm:$0xff] }
  0x93   :  { %352 = vmatmul.mubr.f32.gmra.mrb[40].mxu0 %v60_v8  ;;  %v114_v8 = vld [vmem:[%s2981_s0 + $0x2f0] sm:$0xff] }
  0x94   :  { %356 = vmatprep.mubr.f32.mxu0 %v63_v10 }
  0x97   :  { %357 = vmatmul.mubr.f32.gmra.mrb[42].mxu0 %v62_v11 }
  0x98   :  { %361 = vmatprep.mubr.f32.mxu0 %v65_v14 }
  0x9b   :  { %362 = vmatmul.mubr.f32.gmra.mrb[44].mxu0 %v64_v17 }
  0x9c   :  { %366 = vmatprep.mubr.f32.mxu0 %v67_v21 }
  0x9f   :  { %367 = vmatmul.mubr.f32.gmra.mrb[46].mxu0 %v66_v24 }
  0xa0   :  { %371 = vmatprep.mubr.f32.mxu0 %v69_v25 }
  0xa3   :  { %372 = vmatmul.mubr.f32.gmra.mrb[48].mxu0 %v68_v26 }
  0xa4   :  { %376 = vmatprep.mubr.f32.mxu0 %v71_v27 }
  0xa7   :  { %377 = vmatmul.mubr.f32.gmra.mrb[50].mxu0 %v70_v28 }
  0xa8   :  { %381 = vmatprep.mubr.f32.mxu0 %v73_v29 }
  0xab   :  { %382 = vmatmul.mubr.f32.gmra.mrb[52].mxu0 %v72_v30 }
  0xac   :  { %386 = vmatprep.mubr.f32.mxu0 %v75_v31 }
  0xaf   :  { %387 = vmatmul.mubr.f32.gmra.mrb[54].mxu0 %v74_v32 }
  0xb0   :  { %391 = vmatprep.mubr.f32.mxu0 %v77_v33 }
  0xb3   :  { %392 = vmatmul.mubr.f32.gmra.mrb[56].mxu0 %v76_v34 }
  0xb4   :  { %396 = vmatprep.mubr.f32.mxu0 %v79_v35 }
  0xb7   :  { %397 = vmatmul.mubr.f32.gmra.mrb[58].mxu0 %v78_v36 }
  0xb8   :  { %401 = vmatprep.mubr.f32.mxu0 %v81_v37 }
  0xbb   :  { %402 = vmatmul.mubr.f32.gmra.mrb[60].mxu0 %v80_v38 }
  0xbc   :  { %406 = vmatprep.mubr.f32.mxu0 %v83_v39 }
  0xbf   :  { %407 = vmatmul.mubr.f32.gmra.mrb[62].mxu0 %v82_v40 }
  0xc0   :  { %411 = vmatprep.mubr.f32.mxu0 %v85_v41 }
  0xc3   :  { %412 = vmatmul.mubr.f32.gmra.mrb[64].mxu0 %v84_v42 }
  0xc4   :  { %416 = vmatprep.mubr.f32.mxu0 %v87_v43 }
  0xc7   :  { %417 = vmatmul.mubr.f32.gmra.mrb[66].mxu0 %v86_v44 }
  0xc8   :  { %421 = vmatprep.mubr.f32.mxu0 %v89_v45 }
  0xcb   :  { %422 = vmatmul.mubr.f32.gmra.mrb[68].mxu0 %v88_v46 }
  0xcc   :  { %426 = vmatprep.mubr.f32.mxu0 %v91_v47 }
  0xcf   :  { %427 = vmatmul.mubr.f32.gmra.mrb[70].mxu0 %v90_v48 }
  0xd0   :  { %431 = vmatprep.mubr.f32.mxu0 %v93_v49 }
  0xd3   :  { %432 = vmatmul.mubr.f32.gmra.mrb[72].mxu0 %v92_v50 }
  0xd4   :  { %436 = vmatprep.mubr.f32.mxu0 %v95_v51 }
  0xd7   :  { %437 = vmatmul.mubr.f32.gmra.mrb[74].mxu0 %v94_v52 }
  0xd8   :  { %441 = vmatprep.mubr.f32.mxu0 %v97_v53 }
  0xdb   :  { %442 = vmatmul.mubr.f32.gmra.mrb[76].mxu0 %v96_v54 }
  0xdc   :  { %446 = vmatprep.mubr.f32.mxu0 %v99_v55 }
  0xdf   :  { %447 = vmatmul.mubr.f32.gmra.mrb[78].mxu0 %v98_v56 }
  0xe0   :  { %451 = vmatprep.mubr.f32.mxu0 %v101_v57 }
  0xe3   :  { %452 = vmatmul.mubr.f32.gmra.mrb[80].mxu0 %v100_v58 }
  0xe4   :  { %456 = vmatprep.mubr.f32.mxu0 %v103_v59 }
  0xe7   :  { %457 = vmatmul.mubr.f32.gmra.mrb[82].mxu0 %v102_v60 }
  0xe8   :  { %461 = vmatprep.mubr.f32.mxu0 %v105_v61 }
  0xeb   :  { %462 = vmatmul.mubr.f32.gmra.mrb[84].mxu0 %v104_v62 }
  0xec   :  { %466 = vmatprep.mubr.f32.mxu0 %v107_v63 }
  0xef   :  { %467 = vmatmul.mubr.f32.gmra.mrb[86].mxu0 %v106_v0 }
  0xf0   :  { %471 = vmatprep.mubr.f32.mxu0 %v109_v1 }
  0xf3   :  { %472 = vmatmul.mubr.f32.gmra.mrb[88].mxu0 %v108_v2 }
  0xf4   :  { %476 = vmatprep.mubr.f32.mxu0 %v111_v3 }
  0xf7   :  { %477 = vmatmul.mubr.f32.gmra.mrb[90].mxu0 %v110_v4 }
  0xf8   :  { %481 = vmatprep.mubr.f32.mxu0 %v113_v5 }
  0xfb   :  { %482 = vmatmul.mubr.f32.gmra.mrb[92].mxu0 %v112_v6 }
  0xfc   :  { %486 = vmatprep.mubr.f32.mxu0 %v115_v7 }
  0xff   :  { %487 = vmatmul.mubr.f32.gmra.mrb[94].mxu0 %v114_v8 }
 0x116   :  { %v253_v10 = vpop.f32.mrb[0].mxu0  ;;  %v2327_v42 = vpop.f32.mrb[0].mxu1 }
 0x117   :  { %v2288_v11 = vadd.f32 %v2285_v9, %v253_v10  ;;  %v255_v12 = vpop.f32.mrb[1].mxu0  ;;  %v495_v44 = vpop.f32.mrb[1].mxu1 }
 0x119   :  { %v572_v13 = vmul.f32 %v2288_v11, %v2288_v11 }
 0x11a   :  { %v258_v14 = vpop.f32.mrb[2].mxu0  ;;  %v2334_v48 = vpop.f32.mrb[2].mxu1 }
 0x11b   :  { %v2293_v15 = vadd.f32 %v2285_v9, %v258_v14  ;;  %v260_v16 = vpop.f32.mrb[3].mxu0  ;;  %1354 = vmatprep.mubr.f32.mxu1 %v572_v13  ;;  %v500_v50 = vpop.f32.mrb[3].mxu1 }
 0x11d   :  { %v573_v17 = vmul.f32 %v2293_v15, %v2293_v15 }
 0x11e   :  { %v263_v18 = vpop.f32.mrb[4].mxu0  ;;  %v2341_v54 = vpop.f32.mrb[4].mxu1 }
 0x11f   :  { %v2298_v19 = vadd.f32 %v2285_v9, %v263_v18  ;;  %v265_v20 = vpop.f32.mrb[5].mxu0  ;;  %1355 = vmatmul.mubr.f32.vlgmr.msra.gmra.mrb[32].mxu1 %v573_v17  ;;  %v505_v56 = vpop.f32.mrb[5].mxu1 }
 0x121   :  { %v574_v21 = vmul.f32 %v2298_v19, %v2298_v19 }
 0x122   :  { %v268_v22 = vpop.f32.mrb[6].mxu0  ;;  %v2348_v60 = vpop.f32.mrb[6].mxu1 }
 0x123   :  { %v2303_v23 = vadd.f32 %v2285_v9, %v268_v22  ;;  %v270_v24 = vpop.f32.mrb[7].mxu0  ;;  %1357 = vmatprep.mubr.f32.mxu1 %v574_v21  ;;  %v510_v62 = vpop.f32.mrb[7].mxu1 }
 0x125   :  { %v575_v25 = vmul.f32 %v2303_v23, %v2303_v23 }
 0x126   :  { %v273_v26 = vpop.f32.mrb[8].mxu0  ;;  %v2355_v2 = vpop.f32.mrb[8].mxu1 }
 0x127   :  { %v2308_v27 = vadd.f32 %v2285_v9, %v273_v26  ;;  %v275_v28 = vpop.f32.mrb[9].mxu0  ;;  %1358 = vmatmul.mubr.f32.gmra.mrb[34].mxu1 %v575_v25  ;;  %v515_v4 = vpop.f32.mrb[9].mxu1 }
 0x129   :  { %v576_v29 = vmul.f32 %v2308_v27, %v2308_v27 }
 0x12a   :  { %v278_v30 = vpop.f32.mrb[10].mxu0  ;;  %v2362_v8 = vpop.f32.mrb[10].mxu1 }
 0x12b   :  { %v2313_v31 = vadd.f32 %v2285_v9, %v278_v30  ;;  %v280_v32 = vpop.f32.mrb[11].mxu0  ;;  %1360 = vmatprep.mubr.f32.mxu1 %v576_v29  ;;  %v520_v12 = vpop.f32.mrb[11].mxu1 }
 0x12d   :  { %v577_v33 = vmul.f32 %v2313_v31, %v2313_v31 }
 0x12e   :  { %v283_v34 = vpop.f32.mrb[12].mxu0  ;;  %v2369_v17 = vpop.f32.mrb[12].mxu1 }
 0x12f   :  { %v2318_v35 = vadd.f32 %v2285_v9, %v283_v34  ;;  %v285_v36 = vpop.f32.mrb[13].mxu0  ;;  %1361 = vmatmul.mubr.f32.gmra.mrb[36].mxu1 %v577_v33  ;;  %v525_v20 = vpop.f32.mrb[13].mxu1 }
 0x131   :  { %v578_v37 = vmul.f32 %v2318_v35, %v2318_v35 }
 0x132   :  { %v288_v38 = vpop.f32.mrb[14].mxu0  ;;  %v2376_v25 = vpop.f32.mrb[14].mxu1 }
 0x133   :  { %v2323_v39 = vadd.f32 %v2285_v9, %v288_v38  ;;  %v290_v40 = vpop.f32.mrb[15].mxu0  ;;  %1363 = vmatprep.mubr.f32.mxu1 %v578_v37  ;;  %v530_v28 = vpop.f32.mrb[15].mxu1 }
 0x135   :  { %v579_v41 = vmul.f32 %v2323_v39, %v2323_v39 }
 0x136   :  { %v293_v43 = vpop.f32.mrb[16].mxu0  ;;  %v2383_v33 = vpop.f32.mrb[16].mxu1 }
 0x137   :  { %v2330_v45 = vadd.f32 %v2285_v9, %v293_v43  ;;  %v295_v46 = vpop.f32.mrb[17].mxu0  ;;  %1364 = vmatmul.mubr.f32.gmra.mrb[38].mxu1 %v579_v41  ;;  %v535_v36 = vpop.f32.mrb[17].mxu1 }
 0x139   :  { %v580_v47 = vmul.f32 %v2330_v45, %v2330_v45 }
 0x13a   :  { %v298_v49 = vpop.f32.mrb[18].mxu0  ;;  %v2388_v40 = vpop.f32.mrb[18].mxu1 }
 0x13b   :  { %v2337_v51 = vadd.f32 %v2285_v9, %v298_v49  ;;  %v300_v52 = vpop.f32.mrb[19].mxu0  ;;  %1366 = vmatprep.mubr.f32.mxu1 %v580_v47  ;;  %v540_v43 = vpop.f32.mrb[19].mxu1 }
 0x13d   :  { %v581_v53 = vmul.f32 %v2337_v51, %v2337_v51 }
 0x13e   :  { %v303_v55 = vpop.f32.mrb[20].mxu0  ;;  %v2395_v49 = vpop.f32.mrb[20].mxu1 }
 0x13f   :  { %v2344_v57 = vadd.f32 %v2285_v9, %v303_v55  ;;  %v305_v58 = vpop.f32.mrb[21].mxu0  ;;  %1367 = vmatmul.mubr.f32.gmra.mrb[40].mxu1 %v581_v53  ;;  %v545_v52 = vpop.f32.mrb[21].mxu1 }
 0x141   :  { %v582_v59 = vmul.f32 %v2344_v57, %v2344_v57 }
 0x142   :  { %v308_v61 = vpop.f32.mrb[22].mxu0  ;;  %v2402_v58 = vpop.f32.mrb[22].mxu1 }
 0x143   :  { %v2351_v63 = vadd.f32 %v2285_v9, %v308_v61  ;;  %v310_v0 = vpop.f32.mrb[23].mxu0  ;;  %1369 = vmatprep.mubr.f32.mxu1 %v582_v59  ;;  %v550_v61 = vpop.f32.mrb[23].mxu1 }
 0x145   :  { %v583_v1 = vmul.f32 %v2351_v63, %v2351_v63 }
 0x146   :  { %v313_v3 = vpop.f32.mrb[24].mxu0 }
 0x147   :  { %v2358_v5 = vadd.f32 %v2285_v9, %v313_v3  ;;  %v315_v6 = vpop.f32.mrb[25].mxu0  ;;  %1370 = vmatmul.mubr.f32.gmra.mrb[42].mxu1 %v583_v1  ;;  %v2409_v3 = vpop.f32.mrb[24].mxu1 }
 0x148   :  { %v555_v6 = vpop.f32.mrb[25].mxu1 }
 0x149   :  { %v584_v7 = vmul.f32 %v2358_v5, %v2358_v5 }
 0x14a   :  { %v318_v10 = vpop.f32.mrb[26].mxu0 }
 0x14b   :  { %v2365_v13 = vadd.f32 %v2285_v9, %v318_v10  ;;  %v320_v14 = vpop.f32.mrb[27].mxu0  ;;  %1372 = vmatprep.mubr.f32.mxu1 %v584_v7 }
 0x14c   :  { %v2416_v14 = vpop.f32.mrb[26].mxu1 }
 0x14d   :  { %v585_v16 = vmul.f32 %v2365_v13, %v2365_v13 }
 0x14e   :  { %v323_v18 = vpop.f32.mrb[28].mxu0 }
 0x14f   :  { %v2372_v21 = vadd.f32 %v2285_v9, %v323_v18  ;;  %v325_v22 = vpop.f32.mrb[29].mxu0  ;;  %1373 = vmatmul.mubr.f32.gmra.mrb[44].mxu1 %v585_v16  ;;  %v560_v18 = vpop.f32.mrb[27].mxu1 }
 0x151   :  { %v586_v24 = vmul.f32 %v2372_v21, %v2372_v21 }
 0x152   :  { %v328_v26 = vpop.f32.mrb[30].mxu0 }
 0x153   :  { %v2379_v29 = vadd.f32 %v2285_v9, %v328_v26  ;;  %v330_v30 = vpop.f32.mrb[31].mxu0  ;;  %1375 = vmatprep.mubr.f32.mxu1 %v586_v24  ;;  %v2423_v26 = vpop.f32.mrb[28].mxu1 }
 0x154   :  { %v565_v30 = vpop.f32.mrb[29].mxu1 }
 0x155   :  { %v587_v32 = vmul.f32 %v2379_v29, %v2379_v29 }
 0x156   :  { %v333_v34 = vpop.f32.mrb[32].mxu0 }
 0x157   :  { %v2386_v37 = vadd.f32 %v2285_v9, %v333_v34  ;;  %v335_v38 = vpop.f32.mrb[33].mxu0  ;;  %1376 = vmatmul.mubr.f32.gmra.mrb[46].mxu1 %v587_v32 }
 0x158   :  { %v2430_v38 = vpop.f32.mrb[30].mxu1 }
 0x159   :  { %v588_v41 = vmul.f32 %v2386_v37, %v2386_v37 }
 0x15a   :  { %v338_v44 = vpop.f32.mrb[34].mxu0 }
 0x15b   :  { %v2393_v46 = vadd.f32 %v2285_v9, %v338_v44  ;;  %v340_v47 = vpop.f32.mrb[35].mxu0  ;;  %1378 = vmatprep.mubr.f32.mxu1 %v588_v41  ;;  %v570_v41 = vpop.f32.mrb[31].mxu1 }
 0x15d   :  { %v589_v50 = vmul.f32 %v2393_v46, %v2393_v46 }
 0x15e   :  { %v343_v53 = vpop.f32.mrb[36].mxu0 }
 0x15f   :  { %v2400_v55 = vadd.f32 %v2285_v9, %v343_v53  ;;  %v345_v56 = vpop.f32.mrb[37].mxu0  ;;  %1379 = vmatmul.mubr.f32.gmra.mrb[48].mxu1 %v589_v50 }
 0x161   :  { %v590_v59 = vmul.f32 %v2400_v55, %v2400_v55 }
 0x162   :  { %v348_v62 = vpop.f32.mrb[38].mxu0 }
 0x163   :  { %v2407_v0 = vadd.f32 %v2285_v9, %v348_v62  ;;  %v350_v1 = vpop.f32.mrb[39].mxu0  ;;  %1381 = vmatprep.mubr.f32.mxu1 %v590_v59 }
 0x165   :  { %v591_v4 = vmul.f32 %v2407_v0, %v2407_v0 }
 0x166   :  { %v353_v7 = vpop.f32.mrb[40].mxu0 }
 0x167   :  { %v2414_v10 = vadd.f32 %v2285_v9, %v353_v7  ;;  %v355_v12 = vpop.f32.mrb[41].mxu0  ;;  %1382 = vmatmul.mubr.f32.gmra.mrb[50].mxu1 %v591_v4 }
 0x169   :  { %v592_v16 = vmul.f32 %v2414_v10, %v2414_v10 }
 0x16a   :  { %v358_v20 = vpop.f32.mrb[42].mxu0 }
 0x16b   :  { %v2421_v22 = vadd.f32 %v2285_v9, %v358_v20  ;;  %v360_v24 = vpop.f32.mrb[43].mxu0  ;;  %1384 = vmatprep.mubr.f32.mxu1 %v592_v16 }
 0x16d   :  { %v593_v28 = vmul.f32 %v2421_v22, %v2421_v22 }
 0x16e   :  { %v363_v32 = vpop.f32.mrb[44].mxu0 }
 0x16f   :  { %v2428_v34 = vadd.f32 %v2285_v9, %v363_v32  ;;  %v365_v36 = vpop.f32.mrb[45].mxu0  ;;  %1385 = vmatmul.mubr.f32.gmra.mrb[52].mxu1 %v593_v28 }
 0x171   :  { %v594_v43 = vmul.f32 %v2428_v34, %v2428_v34 }
 0x172   :  { %v368_v44 = vpop.f32.mrb[46].mxu0 }
 0x173   :  { %v2435_v47 = vadd.f32 %v2285_v9, %v368_v44  ;;  %v370_v50 = vpop.f32.mrb[47].mxu0  ;;  %1387 = vmatprep.mubr.f32.mxu1 %v594_v43 }
 0x175   :  { %v595_v52 = vmul.f32 %v2435_v47, %v2435_v47 }
 0x176   :  { %v373_v53 = vpop.f32.mrb[48].mxu0 }
 0x177   :  { %v2440_v56 = vadd.f32 %v2285_v9, %v373_v53  ;;  %v375_v59 = vpop.f32.mrb[49].mxu0  ;;  %1388 = vmatmul.mubr.f32.gmra.mrb[54].mxu1 %v595_v52 }
 0x179   :  { %v596_v61 = vmul.f32 %v2440_v56, %v2440_v56 }
 0x17a   :  { %v378_v62 = vpop.f32.mrb[50].mxu0 }
 0x17b   :  { %v2445_v1 = vadd.f32 %v2285_v9, %v378_v62  ;;  %v380_v4 = vpop.f32.mrb[51].mxu0  ;;  %1390 = vmatprep.mubr.f32.mxu1 %v596_v61 }
 0x17d   :  { %v597_v6 = vmul.f32 %v2445_v1, %v2445_v1 }
 0x17e   :  { %v383_v7 = vpop.f32.mrb[52].mxu0 }
 0x17f   :  { %v2450_v12 = vadd.f32 %v2285_v9, %v383_v7  ;;  %v385_v16 = vpop.f32.mrb[53].mxu0  ;;  %1391 = vmatmul.mubr.f32.gmra.mrb[56].mxu1 %v597_v6 }
 0x181   :  { %v598_v18 = vmul.f32 %v2450_v12, %v2450_v12 }
 0x182   :  { %v388_v20 = vpop.f32.mrb[54].mxu0 }
 0x183   :  { %v2455_v24 = vadd.f32 %v2285_v9, %v388_v20  ;;  %v390_v28 = vpop.f32.mrb[55].mxu0  ;;  %1393 = vmatprep.mubr.f32.mxu1 %v598_v18 }
 0x185   :  { %v599_v30 = vmul.f32 %v2455_v24, %v2455_v24 }
 0x186   :  { %v393_v32 = vpop.f32.mrb[56].mxu0 }
 0x187   :  { %v2460_v36 = vadd.f32 %v2285_v9, %v393_v32  ;;  %v395_v41 = vpop.f32.mrb[57].mxu0  ;;  %1394 = vmatmul.mubr.f32.gmra.mrb[58].mxu1 %v599_v30 }
 0x189   :  { %v600_v43 = vmul.f32 %v2460_v36, %v2460_v36 }
 0x18a   :  { %v398_v44 = vpop.f32.mrb[58].mxu0 }
 0x18b   :  { %v2465_v50 = vadd.f32 %v2285_v9, %v398_v44  ;;  %v400_v52 = vpop.f32.mrb[59].mxu0  ;;  %1396 = vmatprep.mubr.f32.mxu1 %v600_v43 }
 0x18d   :  { %v601_v53 = vmul.f32 %v2465_v50, %v2465_v50 }
 0x18e   :  { %v403_v59 = vpop.f32.mrb[60].mxu0 }
 0x18f   :  { %v2470_v61 = vadd.f32 %v2285_v9, %v403_v59  ;;  %v405_v62 = vpop.f32.mrb[61].mxu0  ;;  %1397 = vmatmul.mubr.f32.gmra.mrb[60].mxu1 %v601_v53 }
 0x191   :  { %v602_v4 = vmul.f32 %v2470_v61, %v2470_v61 }
 0x192   :  { %v408_v6 = vpop.f32.mrb[62].mxu0 }
 0x193   :  { %v2475_v7 = vadd.f32 %v2285_v9, %v408_v6  ;;  %v410_v16 = vpop.f32.mrb[63].mxu0  ;;  %1399 = vmatprep.mubr.f32.mxu1 %v602_v4 }
 0x195   :  { %v603_v18 = vmul.f32 %v2475_v7, %v2475_v7 }
 0x196   :  { %v413_v20 = vpop.f32.mrb[64].mxu0 }
 0x197   :  { %v2480_v28 = vadd.f32 %v2285_v9, %v413_v20  ;;  %v415_v30 = vpop.f32.mrb[65].mxu0  ;;  %1400 = vmatmul.mubr.f32.gmra.mrb[62].mxu1 %v603_v18 }
 0x199   :  { %v604_v32 = vmul.f32 %v2480_v28, %v2480_v28 }
 0x19a   :  { %v418_v41 = vpop.f32.mrb[66].mxu0 }
 0x19b   :  { %v2485_v43 = vadd.f32 %v2285_v9, %v418_v41  ;;  %v420_v44 = vpop.f32.mrb[67].mxu0  ;;  %1402 = vmatprep.mubr.f32.mxu1 %v604_v32 }
 0x19d   :  { %v605_v52 = vmul.f32 %v2485_v43, %v2485_v43 }
 0x19e   :  { %v423_v53 = vpop.f32.mrb[68].mxu0 }
 0x19f   :  { %v2490_v59 = vadd.f32 %v2285_v9, %v423_v53  ;;  %v425_v62 = vpop.f32.mrb[69].mxu0  ;;  %1403 = vmatmul.mubr.f32.gmra.mrb[64].mxu1 %v605_v52 }
 0x1a1   :  { %v606_v4 = vmul.f32 %v2490_v59, %v2490_v59 }
 0x1a2   :  { %v428_v6 = vpop.f32.mrb[70].mxu0 }
 0x1a3   :  { %v2495_v16 = vadd.f32 %v2285_v9, %v428_v6  ;;  %v430_v18 = vpop.f32.mrb[71].mxu0  ;;  %1405 = vmatprep.mubr.f32.mxu1 %v606_v4 }
 0x1a5   :  { %v607_v20 = vmul.f32 %v2495_v16, %v2495_v16 }
 0x1a6   :  { %v433_v30 = vpop.f32.mrb[72].mxu0 }
 0x1a7   :  { %v2500_v32 = vadd.f32 %v2285_v9, %v433_v30  ;;  %v435_v41 = vpop.f32.mrb[73].mxu0  ;;  %1406 = vmatmul.mubr.f32.gmra.mrb[66].mxu1 %v607_v20 }
 0x1a9   :  { %3000 = vst [vmem:[#allocation2_spill] sm:$0xff] %v2500_v32  ;;  %v608_v44 = vmul.f32 %v2500_v32, %v2500_v32 }
 0x1aa   :  { %v438_v52 = vpop.f32.mrb[74].mxu0 }
 0x1ab   :  { %v2505_v53 = vadd.f32 %v2285_v9, %v438_v52  ;;  %v440_v62 = vpop.f32.mrb[75].mxu0  ;;  %1408 = vmatprep.mubr.f32.mxu1 %v608_v44 }
 0x1ad   :  { %3001 = vst [vmem:[#allocation3_spill] sm:$0xff] %v2505_v53  ;;  %v609_v4 = vmul.f32 %v2505_v53, %v2505_v53 }
 0x1ae   :  { %v443_v6 = vpop.f32.mrb[76].mxu0 }
 0x1af   :  { %v2510_v18 = vadd.f32 %v2285_v9, %v443_v6  ;;  %v445_v30 = vpop.f32.mrb[77].mxu0  ;;  %1409 = vmatmul.mubr.f32.gmra.mrb[68].mxu1 %v609_v4 }
 0x1b1   :  { %3002 = vst [vmem:[#allocation4_spill] sm:$0xff] %v2510_v18  ;;  %v610_v20 = vmul.f32 %v2510_v18, %v2510_v18 }
 0x1b2   :  { %v448_v41 = vpop.f32.mrb[78].mxu0 }
 0x1b3   :  { %v2515_v32 = vadd.f32 %v2285_v9, %v448_v41  ;;  %v450_v52 = vpop.f32.mrb[79].mxu0  ;;  %1411 = vmatprep.mubr.f32.mxu1 %v610_v20 }
 0x1b5   :  { %3003 = vst [vmem:[#allocation5_spill] sm:$0xff] %v2515_v32  ;;  %v611_v44 = vmul.f32 %v2515_v32, %v2515_v32 }
 0x1b6   :  { %v453_v62 = vpop.f32.mrb[80].mxu0 }
 0x1b7   :  { %v2520_v53 = vadd.f32 %v2285_v9, %v453_v62  ;;  %v455_v6 = vpop.f32.mrb[81].mxu0  ;;  %1412 = vmatmul.mubr.f32.gmra.mrb[70].mxu1 %v611_v44 }
 0x1b9   :  { %3004 = vst [vmem:[#allocation6_spill] sm:$0xff] %v2520_v53  ;;  %v612_v4 = vmul.f32 %v2520_v53, %v2520_v53 }
 0x1ba   :  { %v458_v30 = vpop.f32.mrb[82].mxu0 }
 0x1bb   :  { %v2525_v18 = vadd.f32 %v2285_v9, %v458_v30  ;;  %v460_v41 = vpop.f32.mrb[83].mxu0  ;;  %1414 = vmatprep.mubr.f32.mxu1 %v612_v4 }
 0x1bd   :  { %3005 = vst [vmem:[#allocation7_spill] sm:$0xff] %v2525_v18  ;;  %v613_v20 = vmul.f32 %v2525_v18, %v2525_v18 }
 0x1be   :  { %v463_v52 = vpop.f32.mrb[84].mxu0 }
 0x1bf   :  { %v2530_v32 = vadd.f32 %v2285_v9, %v463_v52  ;;  %v465_v62 = vpop.f32.mrb[85].mxu0  ;;  %1415 = vmatmul.mubr.f32.gmra.mrb[72].mxu1 %v613_v20 }
 0x1c1   :  { %3006 = vst [vmem:[#allocation8_spill] sm:$0xff] %v2530_v32  ;;  %v614_v44 = vmul.f32 %v2530_v32, %v2530_v32 }
 0x1c2   :  { %v468_v6 = vpop.f32.mrb[86].mxu0 }
 0x1c3   :  { %v2535_v53 = vadd.f32 %v2285_v9, %v468_v6  ;;  %v470_v30 = vpop.f32.mrb[87].mxu0  ;;  %1417 = vmatprep.mubr.f32.mxu1 %v614_v44 }
 0x1c5   :  { %3007 = vst [vmem:[#allocation9_spill] sm:$0xff] %v2535_v53  ;;  %v615_v4 = vmul.f32 %v2535_v53, %v2535_v53 }
 0x1c6   :  { %v473_v41 = vpop.f32.mrb[88].mxu0 }
 0x1c7   :  { %v2540_v18 = vadd.f32 %v2285_v9, %v473_v41  ;;  %v475_v52 = vpop.f32.mrb[89].mxu0  ;;  %1418 = vmatmul.mubr.f32.gmra.mrb[74].mxu1 %v615_v4 }
 0x1c8   :  { %v2556_v52 = vadd.f32 %v2285_v9, %v2327_v42  ;;  %v2571_v42 = vadd.f32 %v2285_v9, %v2341_v54 }
 0x1c9   :  { %3008 = vst [vmem:[#allocation10_spill] sm:$0xff] %v2540_v18  ;;  %v616_v20 = vmul.f32 %v2540_v18, %v2540_v18  ;;  %v2563_v18 = vadd.f32 %v2285_v9, %v2334_v48 }
 0x1ca   :  { %v478_v62 = vpop.f32.mrb[90].mxu0  ;;  %v622_v48 = vmul.f32 %v2571_v42, %v2571_v42 }
 0x1cb   :  { %v2545_v32 = vadd.f32 %v2285_v9, %v478_v62  ;;  %v480_v6 = vpop.f32.mrb[91].mxu0  ;;  %1420 = vmatprep.mubr.f32.mxu1 %v616_v20 }
 0x1cd   :  { %v617_v44 = vmul.f32 %v2545_v32, %v2545_v32 }
 0x1ce   :  { %v483_v30 = vpop.f32.mrb[92].mxu0 }
 0x1cf   :  { %v2550_v53 = vadd.f32 %v2285_v9, %v483_v30  ;;  %v485_v41 = vpop.f32.mrb[93].mxu0  ;;  %1421 = vmatmul.mubr.f32.gmra.mrb[76].mxu1 %v617_v44  ;;  %v620_v30 = vmul.f32 %v2556_v52, %v2556_v52 }
 0x1d0   :  { %v621_v41 = vmul.f32 %v2563_v18, %v2563_v18 }
 0x1d1   :  { %v618_v4 = vmul.f32 %v2550_v53, %v2550_v53 }
 0x1d2   :  { %v488_v62 = vpop.f32.mrb[94].mxu0 }
 0x1d3   :  { %v2559_v6 = vadd.f32 %v2285_v9, %v488_v62  ;;  %v490_v20 = vpop.f32.mrb[95].mxu0  ;;  %1423 = vmatprep.mubr.f32.mxu1 %v618_v4  ;;  %v2577_v4 = vadd.f32 %v2285_v9, %v2348_v60  ;;  %v2583_v62 = vadd.f32 %v2285_v9, %v2355_v2 }
 0x1d4   :  { %v2589_v20 = vadd.f32 %v2285_v9, %v2362_v8 }
 0x1d5   :  { %v619_v44 = vmul.f32 %v2559_v6, %v2559_v6  ;;  %v623_v54 = vmul.f32 %v2577_v4, %v2577_v4  ;;  %v624_v60 = vmul.f32 %v2583_v62, %v2583_v62 }
 0x1d6   :  { %v625_v2 = vmul.f32 %v2589_v20, %v2589_v20 }
 0x1d7   :  { %1424 = vmatmul.mubr.f32.gmra.mrb[78].mxu1 %v619_v44  ;;  %v2595_v44 = vadd.f32 %v2285_v9, %v2369_v17 }
 0x1d8   :  { %1426 = vmatprep.mubr.f32.mxu1 %v620_v30  ;;  %v2601_v30 = vadd.f32 %v2285_v9, %v2376_v25 }
 0x1d9   :  { %v626_v8 = vmul.f32 %v2595_v44, %v2595_v44 }
 0x1da   :  { %v627_v17 = vmul.f32 %v2601_v30, %v2601_v30 }
 0x1db   :  { %1427 = vmatmul.mubr.f32.gmra.mrb[80].mxu1 %v621_v41  ;;  %v2607_v41 = vadd.f32 %v2285_v9, %v2383_v33 }
 0x1dc   :  { %1429 = vmatprep.mubr.f32.mxu1 %v622_v48  ;;  %v2613_v48 = vadd.f32 %v2285_v9, %v2388_v40 }
 0x1dd   :  { %v628_v25 = vmul.f32 %v2607_v41, %v2607_v41 }
 0x1de   :  { %v629_v33 = vmul.f32 %v2613_v48, %v2613_v48 }
 0x1df   :  { %1430 = vmatmul.mubr.f32.gmra.mrb[82].mxu1 %v623_v54  ;;  %v2619_v54 = vadd.f32 %v2285_v9, %v2395_v49  ;;  %v2635_v49 = vadd.f32 %v2285_v9, %v2423_v26  ;;  %v2654_v26 = vld [vmem:[%s2984_s4] ss:$0 sm:$0xff] }
 0x1e0   :  { %1432 = vmatprep.mubr.f32.mxu1 %v624_v60  ;;  %v2625_v60 = vadd.f32 %v2285_v9, %v2402_v58  ;;  %v2641_v58 = vadd.f32 %v2285_v9, %v2416_v14 }
 0x1e1   :  { %3009 = vst [vmem:[#allocation11_spill] sm:$0xff] %v2619_v54  ;;  %v630_v40 = vmul.f32 %v2619_v54, %v2619_v54  ;;  %3011 = vst [vmem:[#allocation13_spill] sm:$0xff] %v2635_v49 }
 0x1e2   :  { %3012 = vst [vmem:[#allocation14_spill] sm:$0xff] %v2641_v58  ;;  %v633_v14 = vmul.f32 %v2641_v58, %v2641_v58 }
 0x1e3   :  { %1433 = vmatmul.mubr.f32.gmra.mrb[84].mxu1 %v625_v2  ;;  %v2631_v2 = vadd.f32 %v2285_v9, %v2409_v3  ;;  %v2647_v3 = vadd.f32 %v2285_v9, %v2430_v38 }
 0x1e4   :  { %1435 = vmatprep.mubr.f32.mxu1 %v626_v8  ;;  %v631_v8 = vmul.f32 %v2625_v60, %v2625_v60 }
 0x1e5   :  { %3010 = vst [vmem:[#allocation12_spill] sm:$0xff] %v2631_v2  ;;  %3013 = vst [vmem:[#allocation15_spill] sm:$0xff] %v2647_v3 }
 0x1e7   :  { %1436 = vmatmul.mubr.f32.gmra.mrb[86].mxu1 %v627_v17  ;;  %v632_v17 = vmul.f32 %v2631_v2, %v2631_v2 }
 0x1e8   :  { %1438 = vmatprep.mubr.f32.mxu1 %v628_v25  ;;  %v634_v25 = vmul.f32 %v2635_v49, %v2635_v49 }
 0x1eb   :  { %1439 = vmatmul.mubr.f32.gmra.mrb[88].mxu1 %v629_v33 }
 0x1ec   :  { %1441 = vmatprep.mubr.f32.mxu1 %v630_v40  ;;  %v635_v40 = vmul.f32 %v2647_v3, %v2647_v3 }
 0x1ef   :  { %1442 = vmatmul.mubr.f32.gmra.mrb[90].mxu1 %v631_v8 }
 0x1f0   :  { %1444 = vmatprep.mubr.f32.mxu1 %v632_v17 }
 0x1f2   :  { %v1356_v33 = vpop.f32.mrb[32].mxu1 }
 0x1f3   :  { %v731_v8 = vadd.f32 %v1356_v33, %v2654_v26  ;;  %v725_v9 = vpop.f32.mrb[33].mxu1  ;;  %1445 = vmatmul.mubr.f32.gmra.mrb[92].mxu1 %v633_v14 }
 0x1f4   :  { %v726_v38 = vadd.f32 %v2654_v26, %v725_v9  ;;  %1447 = vmatprep.mubr.f32.mxu1 %v634_v25 }
 0x1f5   :  { %1563 = vrsqrt.f32 %v731_v8 }
 0x1f6   :  { %1565 = vrsqrt.f32 %v726_v38 }
 0x1f7   :  { %1448 = vmatmul.mubr.f32.gmra.mrb[94].mxu1 %v635_v40 }
 0x1fa   :  { %v1359_v17 = vpop.f32.mrb[34].mxu1 }
 0x1fb   :  { %v741_v49 = vadd.f32 %v1359_v17, %v2654_v26  ;;  %v735_v2 = vpop.f32.mrb[35].mxu1 }
 0x1fc   :  { %v736_v58 = vadd.f32 %v2654_v26, %v735_v2 }
 0x1fd   :  { %1567 = vrsqrt.f32 %v741_v49 }
 0x1fe   :  { %1569 = vrsqrt.f32 %v736_v58 }
 0x1ff   :  { %v1564_v54 = vpop.eup %1563 }
 0x200   :  { %v1566_v3 = vpop.eup %1565  ;;  %v1109_v33 = vmul.f32 %v1564_v54, %v2293_v15 }
 0x201   :  { %v1108_v14 = vmul.f32 %v1566_v3, %v2288_v11 }
 0x202   :  { %1173 = vst [vmem:[%s2985_s5 + $0x8] sm:$0xff] %v1109_v33  ;;  %v1362_v25 = vpop.f32.mrb[36].mxu1 }
 0x203   :  { %1172 = vst [vmem:[%s2985_s5] sm:$0xff] %v1108_v14  ;;  %v751_v40 = vadd.f32 %v1362_v25, %v2654_v26  ;;  %v745_v2 = vpop.f32.mrb[37].mxu1 }
 0x204   :  { %v746_v49 = vadd.f32 %v2654_v26, %v745_v2 }
 0x205   :  { %1571 = vrsqrt.f32 %v751_v40 }
 0x206   :  { %1573 = vrsqrt.f32 %v746_v49 }
 0x207   :  { %v1568_v58 = vpop.eup %1567 }
 0x208   :  { %v1570_v15 = vpop.eup %1569  ;;  %v1111_v11 = vmul.f32 %v1568_v58, %v2303_v23 }
 0x209   :  { %v1110_v54 = vmul.f32 %v1570_v15, %v2298_v19 }
 0x20a   :  { %1175 = vst [vmem:[%s2985_s5 + $0x18] sm:$0xff] %v1111_v11  ;;  %v1365_v3 = vpop.f32.mrb[38].mxu1 }
 0x20b   :  { %1174 = vst [vmem:[%s2985_s5 + $0x10] sm:$0xff] %v1110_v54  ;;  %v761_v8 = vadd.f32 %v1365_v3, %v2654_v26  ;;  %v755_v9 = vpop.f32.mrb[39].mxu1 }
 0x20c   :  { %v756_v38 = vadd.f32 %v2654_v26, %v755_v9 }
 0x20d   :  { %1575 = vrsqrt.f32 %v761_v8 }
 0x20e   :  { %1577 = vrsqrt.f32 %v756_v38 }
 0x20f   :  { %v1572_v17 = vpop.eup %1571 }
 0x210   :  { %v1574_v23 = vpop.eup %1573  ;;  %v1113_v19 = vmul.f32 %v1572_v17, %v2313_v31 }
 0x211   :  { %v1112_v33 = vmul.f32 %v1574_v23, %v2308_v27 }
 0x212   :  { %1177 = vst [vmem:[%s2985_s5 + $0x28] sm:$0xff] %v1113_v19  ;;  %v1368_v14 = vpop.f32.mrb[40].mxu1 }
 0x213   :  { %1176 = vst [vmem:[%s2985_s5 + $0x20] sm:$0xff] %v1112_v33  ;;  %v771_v25 = vadd.f32 %v1368_v14, %v2654_v26  ;;  %v765_v40 = vpop.f32.mrb[41].mxu1 }
 0x214   :  { %v766_v2 = vadd.f32 %v2654_v26, %v765_v40 }
 0x215   :  { %1579 = vrsqrt.f32 %v771_v25 }
 0x216   :  { %1581 = vrsqrt.f32 %v766_v2 }
 0x217   :  { %v1576_v49 = vpop.eup %1575 }
 0x218   :  { %v1578_v31 = vpop.eup %1577  ;;  %v1115_v27 = vmul.f32 %v1576_v49, %v2323_v39 }
 0x219   :  { %v1114_v58 = vmul.f32 %v1578_v31, %v2318_v35 }
 0x21a   :  { %1179 = vst [vmem:[%s2985_s5 + $0x38] sm:$0xff] %v1115_v27  ;;  %v1371_v15 = vpop.f32.mrb[42].mxu1 }
 0x21b   :  { %1178 = vst [vmem:[%s2985_s5 + $0x30] sm:$0xff] %v1114_v58  ;;  %v781_v11 = vadd.f32 %v1371_v15, %v2654_v26  ;;  %v775_v54 = vpop.f32.mrb[43].mxu1 }
 0x21c   :  { %v776_v3 = vadd.f32 %v2654_v26, %v775_v54 }
 0x21d   :  { %1583 = vrsqrt.f32 %v781_v11 }
 0x21e   :  { %1585 = vrsqrt.f32 %v776_v3 }
 0x21f   :  { %v1580_v8 = vpop.eup %1579 }
 0x220   :  { %v1582_v39 = vpop.eup %1581  ;;  %v1117_v35 = vmul.f32 %v1580_v8, %v2337_v51 }
 0x221   :  { %v1116_v9 = vmul.f32 %v1582_v39, %v2330_v45 }
 0x222   :  { %1181 = vst [vmem:[%s2985_s5 + $0x48] sm:$0xff] %v1117_v35  ;;  %v1374_v38 = vpop.f32.mrb[44].mxu1 }
 0x223   :  { %1180 = vst [vmem:[%s2985_s5 + $0x40] sm:$0xff] %v1116_v9  ;;  %v791_v17 = vadd.f32 %v1374_v38, %v2654_v26  ;;  %v785_v23 = vpop.f32.mrb[45].mxu1 }
 0x224   :  { %v786_v19 = vadd.f32 %v2654_v26, %v785_v23 }
 0x225   :  { %1587 = vrsqrt.f32 %v791_v17 }
 0x226   :  { %1589 = vrsqrt.f32 %v786_v19 }
 0x227   :  { %v1584_v33 = vpop.eup %1583 }
 0x228   :  { %v1586_v51 = vpop.eup %1585  ;;  %v1119_v45 = vmul.f32 %v1584_v33, %v2351_v63 }
 0x229   :  { %v1118_v14 = vmul.f32 %v1586_v51, %v2344_v57 }
 0x22a   :  { %1183 = vst [vmem:[%s2985_s5 + $0x58] sm:$0xff] %v1119_v45  ;;  %v1377_v25 = vpop.f32.mrb[46].mxu1 }
 0x22b   :  { %1182 = vst [vmem:[%s2985_s5 + $0x50] sm:$0xff] %v1118_v14  ;;  %v801_v40 = vadd.f32 %v1377_v25, %v2654_v26  ;;  %v795_v2 = vpop.f32.mrb[47].mxu1 }
 0x22c   :  { %v796_v49 = vadd.f32 %v2654_v26, %v795_v2 }
 0x22d   :  { %1591 = vrsqrt.f32 %v801_v40 }
 0x22e   :  { %1593 = vrsqrt.f32 %v796_v49 }
 0x22f   :  { %v1588_v31 = vpop.eup %1587 }
 0x230   :  { %v1590_v63 = vpop.eup %1589  ;;  %v1121_v57 = vmul.f32 %v1588_v31, %v2365_v13 }
 0x231   :  { %v1120_v27 = vmul.f32 %v1590_v63, %v2358_v5 }
 0x232   :  { %1185 = vst [vmem:[%s2985_s5 + $0x68] sm:$0xff] %v1121_v57  ;;  %v1380_v58 = vpop.f32.mrb[48].mxu1 }
 0x233   :  { %1184 = vst [vmem:[%s2985_s5 + $0x60] sm:$0xff] %v1120_v27  ;;  %v811_v15 = vadd.f32 %v1380_v58, %v2654_v26  ;;  %v805_v11 = vpop.f32.mrb[49].mxu1 }
 0x234   :  { %v806_v54 = vadd.f32 %v2654_v26, %v805_v11 }
 0x235   :  { %1595 = vrsqrt.f32 %v811_v15 }
 0x236   :  { %1597 = vrsqrt.f32 %v806_v54 }
 0x237   :  { %v1592_v3 = vpop.eup %1591 }
 0x238   :  { %v1594_v13 = vpop.eup %1593  ;;  %v1123_v5 = vmul.f32 %v1592_v3, %v2379_v29 }
 0x239   :  { %v1122_v8 = vmul.f32 %v1594_v13, %v2372_v21 }
 0x23a   :  { %1187 = vst [vmem:[%s2985_s5 + $0x78] sm:$0xff] %v1123_v5  ;;  %v1383_v39 = vpop.f32.mrb[50].mxu1 }
 0x23b   :  { %1186 = vst [vmem:[%s2985_s5 + $0x70] sm:$0xff] %v1122_v8  ;;  %v821_v35 = vadd.f32 %v1383_v39, %v2654_v26  ;;  %v815_v9 = vpop.f32.mrb[51].mxu1 }
 0x23c   :  { %v816_v38 = vadd.f32 %v2654_v26, %v815_v9 }
 0x23d   :  { %1599 = vrsqrt.f32 %v821_v35 }
 0x23e   :  { %1601 = vrsqrt.f32 %v816_v38 }
 0x23f   :  { %v1596_v17 = vpop.eup %1595 }
 0x240   :  { %v1598_v29 = vpop.eup %1597  ;;  %v1125_v21 = vmul.f32 %v1596_v17, %v2393_v46 }
 0x241   :  { %v1124_v23 = vmul.f32 %v1598_v29, %v2386_v37 }
 0x242   :  { %1189 = vst [vmem:[%s2985_s5 + $0x88] sm:$0xff] %v1125_v21  ;;  %v1386_v19 = vpop.f32.mrb[52].mxu1 }
 0x243   :  { %1188 = vst [vmem:[%s2985_s5 + $0x80] sm:$0xff] %v1124_v23  ;;  %v831_v33 = vadd.f32 %v1386_v19, %v2654_v26  ;;  %v825_v51 = vpop.f32.mrb[53].mxu1 }
 0x244   :  { %v826_v45 = vadd.f32 %v2654_v26, %v825_v51 }
 0x245   :  { %1603 = vrsqrt.f32 %v831_v33 }
 0x246   :  { %1605 = vrsqrt.f32 %v826_v45 }
 0x247   :  { %v1600_v14 = vpop.eup %1599 }
 0x248   :  { %v1602_v46 = vpop.eup %1601  ;;  %v1127_v37 = vmul.f32 %v1600_v14, %v2407_v0 }
 0x249   :  { %v1126_v25 = vmul.f32 %v1602_v46, %v2400_v55 }
 0x24a   :  { %1191 = vst [vmem:[%s2985_s5 + $0x98] sm:$0xff] %v1127_v37  ;;  %v1389_v40 = vpop.f32.mrb[54].mxu1 }
 0x24b   :  { %1190 = vst [vmem:[%s2985_s5 + $0x90] sm:$0xff] %v1126_v25  ;;  %v841_v2 = vadd.f32 %v1389_v40, %v2654_v26  ;;  %v835_v49 = vpop.f32.mrb[55].mxu1 }
 0x24c   :  { %v836_v31 = vadd.f32 %v2654_v26, %v835_v49 }
 0x24d   :  { %1607 = vrsqrt.f32 %v841_v2 }
 0x24e   :  { %1609 = vrsqrt.f32 %v836_v31 }
 0x24f   :  { %v1604_v63 = vpop.eup %1603 }
 0x250   :  { %v1606_v0 = vpop.eup %1605  ;;  %v1129_v55 = vmul.f32 %v1604_v63, %v2421_v22 }
 0x251   :  { %v1128_v57 = vmul.f32 %v1606_v0, %v2414_v10 }
 0x252   :  { %1193 = vst [vmem:[%s2985_s5 + $0xa8] sm:$0xff] %v1129_v55  ;;  %v1392_v27 = vpop.f32.mrb[56].mxu1 }
 0x253   :  { %1192 = vst [vmem:[%s2985_s5 + $0xa0] sm:$0xff] %v1128_v57  ;;  %v851_v58 = vadd.f32 %v1392_v27, %v2654_v26  ;;  %v845_v15 = vpop.f32.mrb[57].mxu1 }
 0x254   :  { %v846_v11 = vadd.f32 %v2654_v26, %v845_v15 }
 0x255   :  { %1611 = vrsqrt.f32 %v851_v58 }
 0x256   :  { %1613 = vrsqrt.f32 %v846_v11 }
 0x257   :  { %v1608_v54 = vpop.eup %1607 }
 0x258   :  { %v1610_v22 = vpop.eup %1609  ;;  %v1131_v10 = vmul.f32 %v1608_v54, %v2435_v47 }
 0x259   :  { %v1130_v3 = vmul.f32 %v1610_v22, %v2428_v34 }
 0x25a   :  { %1195 = vst [vmem:[%s2985_s5 + $0xb8] sm:$0xff] %v1131_v10  ;;  %v1395_v13 = vpop.f32.mrb[58].mxu1 }
 0x25b   :  { %1194 = vst [vmem:[%s2985_s5 + $0xb0] sm:$0xff] %v1130_v3  ;;  %v861_v5 = vadd.f32 %v1395_v13, %v2654_v26  ;;  %v855_v8 = vpop.f32.mrb[59].mxu1 }
 0x25c   :  { %v856_v39 = vadd.f32 %v2654_v26, %v855_v8 }
 0x25d   :  { %1615 = vrsqrt.f32 %v861_v5 }
 0x25e   :  { %1617 = vrsqrt.f32 %v856_v39 }
 0x25f   :  { %v1612_v35 = vpop.eup %1611 }
 0x260   :  { %v1614_v47 = vpop.eup %1613  ;;  %v1133_v34 = vmul.f32 %v1612_v35, %v2445_v1 }
 0x261   :  { %v1132_v9 = vmul.f32 %v1614_v47, %v2440_v56 }
 0x262   :  { %1197 = vst [vmem:[%s2985_s5 + $0xc8] sm:$0xff] %v1133_v34  ;;  %v1398_v38 = vpop.f32.mrb[60].mxu1  ;;  %v3014_v34 = vld [vmem:[#allocation3_spill] sm:$0xff] }
 0x263   :  { %1196 = vst [vmem:[%s2985_s5 + $0xc0] sm:$0xff] %v1132_v9  ;;  %v871_v17 = vadd.f32 %v1398_v38, %v2654_v26  ;;  %v865_v29 = vpop.f32.mrb[61].mxu1  ;;  %v3015_v9 = vld [vmem:[#allocation2_spill] sm:$0xff] }
 0x264   :  { %v866_v21 = vadd.f32 %v2654_v26, %v865_v29 }
 0x265   :  { %1619 = vrsqrt.f32 %v871_v17 }
 0x266   :  { %1621 = vrsqrt.f32 %v866_v21 }
 0x267   :  { %v1616_v23 = vpop.eup %1615 }
 0x268   :  { %v1618_v1 = vpop.eup %1617  ;;  %v1135_v56 = vmul.f32 %v1616_v23, %v2455_v24 }
 0x269   :  { %v1134_v19 = vmul.f32 %v1618_v1, %v2450_v12 }
 0x26a   :  { %1199 = vst [vmem:[%s2985_s5 + $0xd8] sm:$0xff] %v1135_v56  ;;  %v1401_v33 = vpop.f32.mrb[62].mxu1 }
 0x26b   :  { %1198 = vst [vmem:[%s2985_s5 + $0xd0] sm:$0xff] %v1134_v19  ;;  %v881_v51 = vadd.f32 %v1401_v33, %v2654_v26  ;;  %v875_v45 = vpop.f32.mrb[63].mxu1  ;;  %v3016_v19 = vld [vmem:[#allocation5_spill] sm:$0xff] }
 0x26c   :  { %v876_v14 = vadd.f32 %v2654_v26, %v875_v45 }
 0x26d   :  { %1623 = vrsqrt.f32 %v881_v51  ;;  %v3017_v51 = vld [vmem:[#allocation4_spill] sm:$0xff] }
 0x26e   :  { %1625 = vrsqrt.f32 %v876_v14 }
 0x26f   :  { %v1620_v46 = vpop.eup %1619 }
 0x270   :  { %v1622_v24 = vpop.eup %1621  ;;  %v1137_v12 = vmul.f32 %v1620_v46, %v2465_v50 }
 0x271   :  { %v1136_v37 = vmul.f32 %v1622_v24, %v2460_v36 }
 0x272   :  { %1201 = vst [vmem:[%s2985_s5 + $0xe8] sm:$0xff] %v1137_v12  ;;  %v1404_v25 = vpop.f32.mrb[64].mxu1 }
 0x273   :  { %1200 = vst [vmem:[%s2985_s5 + $0xe0] sm:$0xff] %v1136_v37  ;;  %v891_v40 = vadd.f32 %v1404_v25, %v2654_v26  ;;  %v885_v2 = vpop.f32.mrb[65].mxu1 }
 0x274   :  { %v886_v49 = vadd.f32 %v2654_v26, %v885_v2 }
 0x275   :  { %1627 = vrsqrt.f32 %v891_v40  ;;  %v3018_v40 = vld [vmem:[#allocation7_spill] sm:$0xff] }
 0x276   :  { %1629 = vrsqrt.f32 %v886_v49  ;;  %v3019_v49 = vld [vmem:[#allocation6_spill] sm:$0xff] }
 0x277   :  { %v1624_v31 = vpop.eup %1623 }
 0x278   :  { %v1626_v50 = vpop.eup %1625  ;;  %v1139_v36 = vmul.f32 %v1624_v31, %v2475_v7 }
 0x279   :  { %v1138_v63 = vmul.f32 %v1626_v50, %v2470_v61 }
 0x27a   :  { %1203 = vst [vmem:[%s2985_s5 + $0xf8] sm:$0xff] %v1139_v36  ;;  %v1407_v0 = vpop.f32.mrb[66].mxu1 }
 0x27b   :  { %1202 = vst [vmem:[%s2985_s5 + $0xf0] sm:$0xff] %v1138_v63  ;;  %v901_v55 = vadd.f32 %v1407_v0, %v2654_v26  ;;  %v895_v57 = vpop.f32.mrb[67].mxu1 }
 0x27c   :  { %v896_v27 = vadd.f32 %v2654_v26, %v895_v57 }
 0x27d   :  { %1631 = vrsqrt.f32 %v901_v55 }
 0x27e   :  { %1633 = vrsqrt.f32 %v896_v27  ;;  %v3020_v27 = vld [vmem:[#allocation9_spill] sm:$0xff] }
 0x27f   :  { %v1628_v58 = vpop.eup %1627 }
 0x280   :  { %v1630_v7 = vpop.eup %1629  ;;  %v1141_v61 = vmul.f32 %v1628_v58, %v2485_v43 }
 0x281   :  { %v1140_v15 = vmul.f32 %v1630_v7, %v2480_v28  ;;  %v3021_v7 = vld [vmem:[#allocation8_spill] sm:$0xff] }
 0x282   :  { %1205 = vst [vmem:[%s2985_s5 + $0x108] sm:$0xff] %v1141_v61  ;;  %v1410_v11 = vpop.f32.mrb[68].mxu1 }
 0x283   :  { %1204 = vst [vmem:[%s2985_s5 + $0x100] sm:$0xff] %v1140_v15  ;;  %v911_v54 = vadd.f32 %v1410_v11, %v2654_v26  ;;  %v905_v22 = vpop.f32.mrb[69].mxu1 }
 0x284   :  { %v906_v10 = vadd.f32 %v2654_v26, %v905_v22 }
 0x285   :  { %1635 = vrsqrt.f32 %v911_v54 }
 0x286   :  { %1637 = vrsqrt.f32 %v906_v10 }
 0x287   :  { %v1632_v3 = vpop.eup %1631 }
 0x288   :  { %v1634_v43 = vpop.eup %1633  ;;  %v1143_v28 = vmul.f32 %v1632_v3, %v2495_v16 }
 0x289   :  { %v1142_v13 = vmul.f32 %v1634_v43, %v2490_v59 }
 0x28a   :  { %1207 = vst [vmem:[%s2985_s5 + $0x118] sm:$0xff] %v1143_v28  ;;  %v1413_v5 = vpop.f32.mrb[70].mxu1 }
 0x28b   :  { %1206 = vst [vmem:[%s2985_s5 + $0x110] sm:$0xff] %v1142_v13  ;;  %v921_v8 = vadd.f32 %v1413_v5, %v2654_v26  ;;  %v915_v39 = vpop.f32.mrb[71].mxu1 }
 0x28c   :  { %v916_v35 = vadd.f32 %v2654_v26, %v915_v39  ;;  %v3022_v39 = vld [vmem:[#allocation10_spill] sm:$0xff] }
 0x28d   :  { %1639 = vrsqrt.f32 %v921_v8 }
 0x28e   :  { %1641 = vrsqrt.f32 %v916_v35 }
 0x28f   :  { %v1636_v47 = vpop.eup %1635 }
 0x290   :  { %v1638_v16 = vpop.eup %1637  ;;  %v1145_v59 = vmul.f32 %v1636_v47, %v3014_v34 }
 0x291   :  { %v1144_v38 = vmul.f32 %v1638_v16, %v3015_v9 }
 0x292   :  { %1209 = vst [vmem:[%s2985_s5 + $0x128] sm:$0xff] %v1145_v59  ;;  %v1416_v17 = vpop.f32.mrb[72].mxu1 }
 0x293   :  { %1208 = vst [vmem:[%s2985_s5 + $0x120] sm:$0xff] %v1144_v38  ;;  %v931_v29 = vadd.f32 %v1416_v17, %v2654_v26  ;;  %v925_v21 = vpop.f32.mrb[73].mxu1 }
 0x294   :  { %v926_v23 = vadd.f32 %v2654_v26, %v925_v21 }
 0x295   :  { %1643 = vrsqrt.f32 %v931_v29 }
 0x296   :  { %1645 = vrsqrt.f32 %v926_v23 }
 0x297   :  { %v1640_v1 = vpop.eup %1639 }
 0x298   :  { %v1642_v56 = vpop.eup %1641  ;;  %v1147_v33 = vmul.f32 %v1640_v1, %v3016_v19 }
 0x299   :  { %v1146_v45 = vmul.f32 %v1642_v56, %v3017_v51 }
 0x29a   :  { %1211 = vst [vmem:[%s2985_s5 + $0x138] sm:$0xff] %v1147_v33  ;;  %v1419_v14 = vpop.f32.mrb[74].mxu1 }
 0x29b   :  { %1210 = vst [vmem:[%s2985_s5 + $0x130] sm:$0xff] %v1146_v45  ;;  %v941_v46 = vadd.f32 %v1419_v14, %v2654_v26  ;;  %v935_v24 = vpop.f32.mrb[75].mxu1 }
 0x29c   :  { %v936_v12 = vadd.f32 %v2654_v26, %v935_v24 }
 0x29d   :  { %1647 = vrsqrt.f32 %v941_v46 }
 0x29e   :  { %1649 = vrsqrt.f32 %v936_v12 }
 0x29f   :  { %v1644_v37 = vpop.eup %1643 }
 0x2a0   :  { %v1646_v25 = vpop.eup %1645  ;;  %v1149_v2 = vmul.f32 %v1644_v37, %v3018_v40 }
 0x2a1   :  { %v1148_v31 = vmul.f32 %v1646_v25, %v3019_v49 }
 0x2a2   :  { %1213 = vst [vmem:[%s2985_s5 + $0x148] sm:$0xff] %v1149_v2  ;;  %v1422_v50 = vpop.f32.mrb[76].mxu1 }
 0x2a3   :  { %1212 = vst [vmem:[%s2985_s5 + $0x140] sm:$0xff] %v1148_v31  ;;  %v951_v36 = vadd.f32 %v1422_v50, %v2654_v26  ;;  %v945_v63 = vpop.f32.mrb[77].mxu1 }
 0x2a4   :  { %v946_v0 = vadd.f32 %v2654_v26, %v945_v63 }
 0x2a5   :  { %1651 = vrsqrt.f32 %v951_v36 }
 0x2a6   :  { %1653 = vrsqrt.f32 %v946_v0 }
 0x2a7   :  { %v1648_v55 = vpop.eup %1647 }
 0x2a8   :  { %v1650_v57 = vpop.eup %1649  ;;  %v1151_v58 = vmul.f32 %v1648_v55, %v3020_v27 }
 0x2a9   :  { %v1150_v61 = vmul.f32 %v1650_v57, %v3021_v7 }
 0x2aa   :  { %1215 = vst [vmem:[%s2985_s5 + $0x158] sm:$0xff] %v1151_v58  ;;  %v1425_v15 = vpop.f32.mrb[78].mxu1 }
 0x2ab   :  { %1214 = vst [vmem:[%s2985_s5 + $0x150] sm:$0xff] %v1150_v61  ;;  %v961_v11 = vadd.f32 %v1425_v15, %v2654_v26  ;;  %v955_v54 = vpop.f32.mrb[79].mxu1 }
 0x2ac   :  { %v956_v22 = vadd.f32 %v2654_v26, %v955_v54 }
 0x2ad   :  { %1655 = vrsqrt.f32 %v961_v11 }
 0x2ae   :  { %1657 = vrsqrt.f32 %v956_v22  ;;  %v1428_v10 = vpop.f32.mrb[80].mxu1 }
 0x2af   :  { %v1652_v3 = vpop.eup %1651  ;;  %v971_v43 = vadd.f32 %v1428_v10, %v2654_v26  ;;  %v965_v28 = vpop.f32.mrb[81].mxu1 }
 0x2b0   :  { %v1654_v13 = vpop.eup %1653  ;;  %v1153_v5 = vmul.f32 %v1652_v3, %v2545_v32  ;;  %v966_v8 = vadd.f32 %v2654_v26, %v965_v28 }
 0x2b1   :  { %v1152_v35 = vmul.f32 %v1654_v13, %v3022_v39  ;;  %1659 = vrsqrt.f32 %v971_v43  ;;  %v3023_v13 = vld [vmem:[#allocation11_spill] sm:$0xff]  ;;  %v3025_v39 = vld [vmem:[#allocation12_spill] sm:$0xff] }
 0x2b2   :  { %1217 = vst [vmem:[%s2985_s5 + $0x168] sm:$0xff] %v1153_v5  ;;  %1661 = vrsqrt.f32 %v966_v8  ;;  %v1431_v47 = vpop.f32.mrb[82].mxu1  ;;  %v3024_v5 = vld [vmem:[#allocation14_spill] sm:$0xff] }
 0x2b3   :  { %1216 = vst [vmem:[%s2985_s5 + $0x160] sm:$0xff] %v1152_v35  ;;  %v981_v16 = vadd.f32 %v1431_v47, %v2654_v26  ;;  %v975_v34 = vpop.f32.mrb[83].mxu1 }
 0x2b4   :  { %v976_v32 = vadd.f32 %v2654_v26, %v975_v34 }
 0x2b5   :  { %1663 = vrsqrt.f32 %v981_v16  ;;  %v3026_v16 = vld [vmem:[#allocation15_spill] sm:$0xff] }
 0x2b6   :  { %1665 = vrsqrt.f32 %v976_v32  ;;  %v1434_v59 = vpop.f32.mrb[84].mxu1  ;;  %v3027_v32 = vld [vmem:[#allocation13_spill] sm:$0xff] }
 0x2b7   :  { %v1656_v9 = vpop.eup %1655  ;;  %v991_v38 = vadd.f32 %v1434_v59, %v2654_v26  ;;  %v985_v17 = vpop.f32.mrb[85].mxu1 }
 0x2b8   :  { %v1658_v29 = vpop.eup %1657  ;;  %v1155_v21 = vmul.f32 %v1656_v9, %v2559_v6  ;;  %v986_v23 = vadd.f32 %v2654_v26, %v985_v17 }
 0x2b9   :  { %v1154_v1 = vmul.f32 %v1658_v29, %v2550_v53  ;;  %1667 = vrsqrt.f32 %v991_v38 }
 0x2ba   :  { %1219 = vst [vmem:[%s2985_s5 + $0x178] sm:$0xff] %v1155_v21  ;;  %1669 = vrsqrt.f32 %v986_v23  ;;  %v1437_v56 = vpop.f32.mrb[86].mxu1 }
 0x2bb   :  { %v1660_v19 = vpop.eup %1659  ;;  %1218 = vst [vmem:[%s2985_s5 + $0x170] sm:$0xff] %v1154_v1  ;;  %v1001_v33 = vadd.f32 %v1437_v56, %v2654_v26  ;;  %v995_v51 = vpop.f32.mrb[87].mxu1 }
 0x2bc   :  { %v1662_v6 = vpop.eup %1661  ;;  %v1157_v45 = vmul.f32 %v1660_v19, %v2563_v18  ;;  %v996_v53 = vadd.f32 %v2654_v26, %v995_v51 }
 0x2bd   :  { %v1156_v14 = vmul.f32 %v1662_v6, %v2556_v52  ;;  %1671 = vrsqrt.f32 %v1001_v33 }
 0x2be   :  { %1221 = vst [vmem:[%s2985_s5 + $0x188] sm:$0xff] %v1157_v45  ;;  %1673 = vrsqrt.f32 %v996_v53  ;;  %v1440_v46 = vpop.f32.mrb[88].mxu1 }
 0x2bf   :  { %v1664_v24 = vpop.eup %1663  ;;  %1220 = vst [vmem:[%s2985_s5 + $0x180] sm:$0xff] %v1156_v14  ;;  %v1011_v12 = vadd.f32 %v1440_v46, %v2654_v26  ;;  %v1005_v37 = vpop.f32.mrb[89].mxu1 }
 0x2c0   :  { %v1666_v18 = vpop.eup %1665  ;;  %v1159_v25 = vmul.f32 %v1664_v24, %v2577_v4  ;;  %v1006_v52 = vadd.f32 %v2654_v26, %v1005_v37 }
 0x2c1   :  { %v1158_v40 = vmul.f32 %v1666_v18, %v2571_v42  ;;  %1675 = vrsqrt.f32 %v1011_v12 }
 0x2c2   :  { %1223 = vst [vmem:[%s2985_s5 + $0x198] sm:$0xff] %v1159_v25  ;;  %1677 = vrsqrt.f32 %v1006_v52  ;;  %v1443_v2 = vpop.f32.mrb[90].mxu1 }
 0x2c3   :  { %v1668_v49 = vpop.eup %1667  ;;  %1222 = vst [vmem:[%s2985_s5 + $0x190] sm:$0xff] %v1158_v40  ;;  %v1021_v31 = vadd.f32 %v1443_v2, %v2654_v26  ;;  %v1015_v50 = vpop.f32.mrb[91].mxu1 }
 0x2c4   :  { %v1670_v4 = vpop.eup %1669  ;;  %v1161_v36 = vmul.f32 %v1668_v49, %v2589_v20  ;;  %v1016_v42 = vadd.f32 %v2654_v26, %v1015_v50 }
 0x2c5   :  { %v1160_v63 = vmul.f32 %v1670_v4, %v2583_v62  ;;  %1679 = vrsqrt.f32 %v1021_v31 }
 0x2c6   :  { %1225 = vst [vmem:[%s2985_s5 + $0x1a8] sm:$0xff] %v1161_v36  ;;  %1681 = vrsqrt.f32 %v1016_v42  ;;  %v1446_v0 = vpop.f32.mrb[92].mxu1 }
 0x2c7   :  { %v1672_v55 = vpop.eup %1671  ;;  %1224 = vst [vmem:[%s2985_s5 + $0x1a0] sm:$0xff] %v1160_v63  ;;  %v1031_v57 = vadd.f32 %v1446_v0, %v2654_v26  ;;  %v1025_v27 = vpop.f32.mrb[93].mxu1 }
 0x2c8   :  { %v1674_v20 = vpop.eup %1673  ;;  %v1163_v58 = vmul.f32 %v1672_v55, %v2601_v30  ;;  %v1026_v62 = vadd.f32 %v2654_v26, %v1025_v27 }
 0x2c9   :  { %v1162_v7 = vmul.f32 %v1674_v20, %v2595_v44  ;;  %1683 = vrsqrt.f32 %v1031_v57 }
 0x2ca   :  { %1227 = vst [vmem:[%s2985_s5 + $0x1b8] sm:$0xff] %v1163_v58  ;;  %1685 = vrsqrt.f32 %v1026_v62  ;;  %v1449_v61 = vpop.f32.mrb[94].mxu1 }
 0x2cb   :  { %v1676_v15 = vpop.eup %1675  ;;  %1226 = vst [vmem:[%s2985_s5 + $0x1b0] sm:$0xff] %v1162_v7  ;;  %v1041_v11 = vadd.f32 %v1449_v61, %v2654_v26  ;;  %v1035_v54 = vpop.f32.mrb[95].mxu1 }
 0x2cc   :  { %v1678_v30 = vpop.eup %1677  ;;  %v1165_v22 = vmul.f32 %v1676_v15, %v2613_v48  ;;  %v1036_v44 = vadd.f32 %v2654_v26, %v1035_v54 }
 0x2cd   :  { %v1164_v10 = vmul.f32 %v1678_v30, %v2607_v41  ;;  %1687 = vrsqrt.f32 %v1041_v11 }
 0x2ce   :  { %1229 = vst [vmem:[%s2985_s5 + $0x1c8] sm:$0xff] %v1165_v22  ;;  %1689 = vrsqrt.f32 %v1036_v44 }
 0x2cf   :  { %v1680_v3 = vpop.eup %1679  ;;  %1228 = vst [vmem:[%s2985_s5 + $0x1c0] sm:$0xff] %v1164_v10 }
 0x2d0   :  { %v1682_v43 = vpop.eup %1681  ;;  %v1167_v28 = vmul.f32 %v1680_v3, %v2625_v60 }
 0x2d1   :  { %v1166_v48 = vmul.f32 %v1682_v43, %v3023_v13 }
 0x2d2   :  { %1231 = vst [vmem:[%s2985_s5 + $0x1d8] sm:$0xff] %v1167_v28 }
 0x2d3   :  { %v1684_v41 = vpop.eup %1683  ;;  %1230 = vst [vmem:[%s2985_s5 + $0x1d0] sm:$0xff] %v1166_v48 }
 0x2d4   :  { %v1686_v26 = vpop.eup %1685  ;;  %v1169_v8 = vmul.f32 %v1684_v41, %v3024_v5 }
 0x2d5   :  { %v1168_v35 = vmul.f32 %v1686_v26, %v3025_v39 }
 0x2d6   :  { %1233 = vst [vmem:[%s2985_s5 + $0x1e8] sm:$0xff] %v1169_v8 }
 0x2d7   :  { %v1688_v60 = vpop.eup %1687  ;;  %1232 = vst [vmem:[%s2985_s5 + $0x1e0] sm:$0xff] %v1168_v35 }
 0x2d8   :  { %v1690_v47 = vpop.eup %1689  ;;  %v1171_v34 = vmul.f32 %v1688_v60, %v3026_v16 }
 0x2d9   :  { %v1170_v59 = vmul.f32 %v1690_v47, %v3027_v32 }
 0x2da   :  { %1235 = vst [vmem:[%s2985_s5 + $0x1f8] sm:$0xff] %v1171_v34 }
 0x2db   :  { %1234 = vst [vmem:[%s2985_s5 + $0x1f0] sm:$0xff] %v1170_v59 }

// kernel: anf_hyperprior_forward.16
= control target key start
LH: loop header
LB: loop body
LE: loop exit
PB: predicated region body
PF: predicated region fallthrough
CT: control target
= control target key end

     0   :  { %s1178_s1 = inlined_call_operand.vmem [shape: f32[256,128], index: 1, kind: input, shape index: {}]   ;;  %s1179_s0 = inlined_call_operand.vmem [shape: f32[128,256], index: 0, kind: input, shape index: {}]   ;;  %s1180_s3 = inlined_call_operand.vmem [shape: f32[128,128], index: 3, kind: input, shape index: {}]   ;;  %s1181_s2 = inlined_call_operand.vmem [shape: f32[1,128], index: 2, kind: input, shape index: {}]   ;;  %s1182_s4 = inlined_call_operand.vmem [shape: f32[1,128], index: 4, kind: input, shape index: {}]   ;;  %s1183_s5 = inlined_call_operand.vmem [shape: f32[128,128], index: 5, kind: output, shape index: {}]  }
   0x1   :  { %v68_v0 = vld [vmem:[%s1178_s1 + $0x80] sm:$0xff]  ;;  %v69_v1 = vld [vmem:[%s1178_s1 + $0x88] sm:$0xff]  ;;  %v70_v5 = vld [vmem:[%s1178_s1 + $0x90] sm:$0xff] }
   0x2   :  { %v52_v2 = vld [vmem:[%s1178_s1] sm:$0xff]  ;;  %v642_v3 = vpack.c.bf16 %v69_v1, %v68_v0  ;;  %v53_v4 = vld [vmem:[%s1178_s1 + $0x8] sm:$0xff]  ;;  %v71_v6 = vld [vmem:[%s1178_s1 + $0x98] sm:$0xff] }
   0x3   :  { %v644_v7 = vpack.c.bf16 %v53_v4, %v52_v2  ;;  %v646_v8 = vpack.c.bf16 %v71_v6, %v70_v5  ;;  %v54_v9 = vld [vmem:[%s1178_s1 + $0x10] sm:$0xff]  ;;  %v55_v10 = vld [vmem:[%s1178_s1 + $0x18] sm:$0xff]  ;;  %v72_v11 = vld [vmem:[%s1178_s1 + $0xa0] sm:$0xff] }
   0x4   :  { %643 = vmatprep.subr.bf16.mxu0 %v642_v3  ;;  %v73_v12 = vld [vmem:[%s1178_s1 + $0xa8] sm:$0xff]  ;;  %v648_v13 = vpack.c.bf16 %v55_v10, %v54_v9  ;;  %v56_v15 = vld [vmem:[%s1178_s1 + $0x20] sm:$0xff]  ;;  %v74_v17 = vld [vmem:[%s1178_s1 + $0xb0] sm:$0xff] }
   0x5   :  { %645 = vmatpush3.bf16.msra.mxu0 %v644_v7  ;;  %v650_v14 = vpack.c.bf16 %v73_v12, %v72_v11  ;;  %v57_v16 = vld [vmem:[%s1178_s1 + $0x28] sm:$0xff]  ;;  %v75_v18 = vld [vmem:[%s1178_s1 + $0xb8] sm:$0xff]  ;;  %v58_v21 = vld [vmem:[%s1178_s1 + $0x30] sm:$0xff] }
   0x6   :  { %647 = vmatprep.subr.bf16.mxu0 %v646_v8  ;;  %v652_v19 = vpack.c.bf16 %v57_v16, %v56_v15  ;;  %v654_v20 = vpack.c.bf16 %v75_v18, %v74_v17  ;;  %v59_v22 = vld [vmem:[%s1178_s1 + $0x38] sm:$0xff]  ;;  %v76_v23 = vld [vmem:[%s1178_s1 + $0xc0] sm:$0xff]  ;;  %v77_v24 = vld [vmem:[%s1178_s1 + $0xc8] sm:$0xff] }
   0x7   :  { %v21_v25 = vld [vmem:[%s1179_s0 + $0x8] sm:$0xff]  ;;  %v656_v26 = vpack.c.bf16 %v59_v22, %v58_v21  ;;  %v658_v27 = vpack.c.bf16 %v77_v24, %v76_v23  ;;  %v60_v28 = vld [vmem:[%s1178_s1 + $0x40] sm:$0xff]  ;;  %v78_v30 = vld [vmem:[%s1178_s1 + $0xd0] sm:$0xff] }
   0x8   :  { %155 = vmatprep.mubr.f32.mxu0 %v21_v25  ;;  %v61_v29 = vld [vmem:[%s1178_s1 + $0x48] sm:$0xff]  ;;  %v79_v31 = vld [vmem:[%s1178_s1 + $0xd8] sm:$0xff]  ;;  %v62_v34 = vld [vmem:[%s1178_s1 + $0x50] sm:$0xff] }
   0x9   :  { %649 = vmatpush3.bf16.msra.mxu0 %v648_v13  ;;  %v660_v32 = vpack.c.bf16 %v61_v29, %v60_v28  ;;  %v662_v33 = vpack.c.bf16 %v79_v31, %v78_v30  ;;  %v63_v35 = vld [vmem:[%s1178_s1 + $0x58] sm:$0xff]  ;;  %v80_v36 = vld [vmem:[%s1178_s1 + $0xe0] sm:$0xff]  ;;  %v81_v37 = vld [vmem:[%s1178_s1 + $0xe8] sm:$0xff] }
   0xa   :  { %651 = vmatprep.subr.bf16.mxu0 %v650_v14  ;;  %v664_v38 = vpack.c.bf16 %v63_v35, %v62_v34  ;;  %v64_v39 = vld [vmem:[%s1178_s1 + $0x60] sm:$0xff]  ;;  %v65_v40 = vld [vmem:[%s1178_s1 + $0x68] sm:$0xff]  ;;  %v666_v41 = vpack.c.bf16 %v81_v37, %v80_v36  ;;  %v82_v42 = vld [vmem:[%s1178_s1 + $0xf0] sm:$0xff] }
   0xb   :  { %v252_v43 = vld [vmem:[%s1180_s3] sm:$0xff]  ;;  %v253_v44 = vld [vmem:[%s1180_s3 + $0x8] sm:$0xff]  ;;  %v83_v45 = vld [vmem:[%s1178_s1 + $0xf8] sm:$0xff]  ;;  %v668_v52 = vpack.c.bf16 %v65_v40, %v64_v39 }
   0xc   :  { %v674_v46 = vpack.c.bf16 %v253_v44, %v252_v43  ;;  %v254_v47 = vld [vmem:[%s1180_s3 + $0x10] sm:$0xff]  ;;  %v255_v48 = vld [vmem:[%s1180_s3 + $0x18] sm:$0xff]  ;;  %v256_v50 = vld [vmem:[%s1180_s3 + $0x20] sm:$0xff]  ;;  %v670_v53 = vpack.c.bf16 %v83_v45, %v82_v42 }
   0xd   :  { %653 = vmatpush3.bf16.msra.mxu0 %v652_v19  ;;  %v678_v49 = vpack.c.bf16 %v255_v48, %v254_v47  ;;  %v257_v51 = vld [vmem:[%s1180_s3 + $0x28] sm:$0xff]  ;;  %v66_v54 = vld [vmem:[%s1178_s1 + $0x70] sm:$0xff]  ;;  %v67_v55 = vld [vmem:[%s1178_s1 + $0x78] sm:$0xff] }
   0xe   :  { %655 = vmatprep.subr.bf16.mxu0 %v654_v20  ;;  %675 = vmatprep.subr.bf16.mxu1 %v674_v46  ;;  %v682_v56 = vpack.c.bf16 %v257_v51, %v256_v50  ;;  %v258_v57 = vld [vmem:[%s1180_s3 + $0x30] sm:$0xff]  ;;  %v259_v58 = vld [vmem:[%s1180_s3 + $0x38] sm:$0xff]  ;;  %v672_v59 = vpack.c.bf16 %v67_v55, %v66_v54  ;;  %v260_v61 = vld [vmem:[%s1180_s3 + $0x40] sm:$0xff] }
   0xf   :  { %677 = vmatpush3.bf16.msra.mxu1 %v674_v46  ;;  %v686_v60 = vpack.c.bf16 %v259_v58, %v258_v57  ;;  %v261_v62 = vld [vmem:[%s1180_s3 + $0x48] sm:$0xff]  ;;  %v20_v63 = vld [vmem:[%s1179_s0] sm:$0xff]  ;;  %v23_v0 = vld [vmem:[%s1179_s0 + $0x18] sm:$0xff] }
  0x10   :  { %679 = vmatprep.subr.bf16.mxu1 %v678_v49  ;;  %v690_v1 = vpack.c.bf16 %v261_v62, %v260_v61  ;;  %v22_v2 = vld [vmem:[%s1179_s0 + $0x10] sm:$0xff]  ;;  %v25_v3 = vld [vmem:[%s1179_s0 + $0x28] sm:$0xff]  ;;  %v24_v4 = vld [vmem:[%s1179_s0 + $0x20] sm:$0xff] }
  0x11   :  { %657 = vmatpush3.bf16.msra.mxu0 %v656_v26  ;;  %v27_v5 = vld [vmem:[%s1179_s0 + $0x38] sm:$0xff]  ;;  %v26_v6 = vld [vmem:[%s1179_s0 + $0x30] sm:$0xff]  ;;  %v29_v7 = vld [vmem:[%s1179_s0 + $0x48] sm:$0xff] }
  0x12   :  { %659 = vmatprep.subr.bf16.mxu0 %v658_v27  ;;  %v28_v8 = vld [vmem:[%s1179_s0 + $0x40] sm:$0xff]  ;;  %v31_v9 = vld [vmem:[%s1179_s0 + $0x58] sm:$0xff]  ;;  %v30_v10 = vld [vmem:[%s1179_s0 + $0x50] sm:$0xff] }
  0x13   :  { %681 = vmatpush3.bf16.msra.mxu1 %v678_v49  ;;  %v33_v11 = vld [vmem:[%s1179_s0 + $0x68] sm:$0xff]  ;;  %v32_v12 = vld [vmem:[%s1179_s0 + $0x60] sm:$0xff]  ;;  %v35_v13 = vld [vmem:[%s1179_s0 + $0x78] sm:$0xff] }
  0x14   :  { %683 = vmatprep.subr.bf16.mxu1 %v682_v56  ;;  %v34_v14 = vld [vmem:[%s1179_s0 + $0x70] sm:$0xff]  ;;  %v37_v15 = vld [vmem:[%s1179_s0 + $0x88] sm:$0xff]  ;;  %v36_v16 = vld [vmem:[%s1179_s0 + $0x80] sm:$0xff] }
  0x15   :  { %661 = vmatpush3.bf16.msra.mxu0 %v660_v32  ;;  %v39_v17 = vld [vmem:[%s1179_s0 + $0x98] sm:$0xff]  ;;  %v38_v18 = vld [vmem:[%s1179_s0 + $0x90] sm:$0xff]  ;;  %v41_v19 = vld [vmem:[%s1179_s0 + $0xa8] sm:$0xff] }
  0x16   :  { %663 = vmatprep.subr.bf16.mxu0 %v662_v33  ;;  %v40_v20 = vld [vmem:[%s1179_s0 + $0xa0] sm:$0xff]  ;;  %v43_v21 = vld [vmem:[%s1179_s0 + $0xb8] sm:$0xff]  ;;  %v42_v22 = vld [vmem:[%s1179_s0 + $0xb0] sm:$0xff] }
  0x17   :  { %685 = vmatpush3.bf16.msra.mxu1 %v682_v56  ;;  %v45_v23 = vld [vmem:[%s1179_s0 + $0xc8] sm:$0xff]  ;;  %v44_v24 = vld [vmem:[%s1179_s0 + $0xc0] sm:$0xff]  ;;  %v47_v25 = vld [vmem:[%s1179_s0 + $0xd8] sm:$0xff] }
  0x18   :  { %687 = vmatprep.subr.bf16.mxu1 %v686_v60  ;;  %v46_v26 = vld [vmem:[%s1179_s0 + $0xd0] sm:$0xff]  ;;  %v49_v27 = vld [vmem:[%s1179_s0 + $0xe8] sm:$0xff]  ;;  %v48_v28 = vld [vmem:[%s1179_s0 + $0xe0] sm:$0xff] }
  0x19   :  { %665 = vmatpush3.bf16.msra.mxu0 %v664_v38  ;;  %v51_v29 = vld [vmem:[%s1179_s0 + $0xf8] sm:$0xff]  ;;  %v50_v30 = vld [vmem:[%s1179_s0 + $0xf0] sm:$0xff]  ;;  %v264_v34 = vld [vmem:[%s1180_s3 + $0x60] sm:$0xff] }
  0x1a   :  { %667 = vmatprep.subr.bf16.mxu0 %v666_v41  ;;  %v262_v31 = vld [vmem:[%s1180_s3 + $0x50] sm:$0xff]  ;;  %v263_v32 = vld [vmem:[%s1180_s3 + $0x58] sm:$0xff]  ;;  %v265_v35 = vld [vmem:[%s1180_s3 + $0x68] sm:$0xff] }
  0x1b   :  { %689 = vmatpush3.bf16.msra.mxu1 %v686_v60  ;;  %v694_v33 = vpack.c.bf16 %v263_v32, %v262_v31  ;;  %v698_v36 = vpack.c.bf16 %v265_v35, %v264_v34  ;;  %v266_v37 = vld [vmem:[%s1180_s3 + $0x70] sm:$0xff]  ;;  %v267_v38 = vld [vmem:[%s1180_s3 + $0x78] sm:$0xff]  ;;  %v1011_v42 = vld [vmem:[%s1181_s2] ss:$0 sm:$0xff] }
  0x1c   :  { %691 = vmatprep.subr.bf16.mxu1 %v690_v1  ;;  %v702_v39 = vpack.c.bf16 %v267_v38, %v266_v37 }
  0x1d   :  { %669 = vmatpush3.bf16.msra.mxu0 %v668_v52 }
  0x1e   :  { %671 = vmatprep.subr.bf16.mxu0 %v670_v53 }
  0x1f   :  { %693 = vmatpush3.bf16.msra.mxu1 %v690_v1 }
  0x20   :  { %695 = vmatprep.subr.bf16.mxu1 %v694_v33 }
  0x21   :  { %673 = vmatpush3.bf16.msra.mxu0 %v672_v59 }
  0x23   :  { %697 = vmatpush3.bf16.msra.mxu1 %v694_v33 }
  0x24   :  { %156 = vmatmul.mubr.f32.vlgmr.msra.gmra.mrb[0].mxu0 %v20_v63  ;;  %699 = vmatprep.subr.bf16.mxu1 %v698_v36 }
  0x25   :  { %160 = vmatprep.mubr.f32.mxu0 %v23_v0 }
  0x27   :  { %701 = vmatpush3.bf16.msra.mxu1 %v698_v36 }
  0x28   :  { %161 = vmatmul.mubr.f32.gmra.mrb[2].mxu0 %v22_v2  ;;  %703 = vmatprep.subr.bf16.mxu1 %v702_v39 }
  0x29   :  { %165 = vmatprep.mubr.f32.mxu0 %v25_v3 }
  0x2b   :  { %705 = vmatpush3.bf16.msra.mxu1 %v702_v39 }
  0x2c   :  { %166 = vmatmul.mubr.f32.gmra.mrb[4].mxu0 %v24_v4 }
  0x2d   :  { %170 = vmatprep.mubr.f32.mxu0 %v27_v5 }
  0x30   :  { %171 = vmatmul.mubr.f32.gmra.mrb[6].mxu0 %v26_v6 }
  0x31   :  { %175 = vmatprep.mubr.f32.mxu0 %v29_v7 }
  0x34   :  { %176 = vmatmul.mubr.f32.gmra.mrb[8].mxu0 %v28_v8 }
  0x35   :  { %180 = vmatprep.mubr.f32.mxu0 %v31_v9 }
  0x38   :  { %181 = vmatmul.mubr.f32.gmra.mrb[10].mxu0 %v30_v10 }
  0x39   :  { %185 = vmatprep.mubr.f32.mxu0 %v33_v11 }
  0x3c   :  { %186 = vmatmul.mubr.f32.gmra.mrb[12].mxu0 %v32_v12 }
  0x3d   :  { %190 = vmatprep.mubr.f32.mxu0 %v35_v13 }
  0x40   :  { %191 = vmatmul.mubr.f32.gmra.mrb[14].mxu0 %v34_v14 }
  0x41   :  { %195 = vmatprep.mubr.f32.mxu0 %v37_v15 }
  0x44   :  { %196 = vmatmul.mubr.f32.gmra.mrb[16].mxu0 %v36_v16 }
  0x45   :  { %200 = vmatprep.mubr.f32.mxu0 %v39_v17 }
  0x48   :  { %201 = vmatmul.mubr.f32.gmra.mrb[18].mxu0 %v38_v18 }
  0x49   :  { %205 = vmatprep.mubr.f32.mxu0 %v41_v19 }
  0x4c   :  { %206 = vmatmul.mubr.f32.gmra.mrb[20].mxu0 %v40_v20 }
  0x4d   :  { %210 = vmatprep.mubr.f32.mxu0 %v43_v21 }
  0x50   :  { %211 = vmatmul.mubr.f32.gmra.mrb[22].mxu0 %v42_v22 }
  0x51   :  { %215 = vmatprep.mubr.f32.mxu0 %v45_v23 }
  0x54   :  { %216 = vmatmul.mubr.f32.gmra.mrb[24].mxu0 %v44_v24 }
  0x55   :  { %220 = vmatprep.mubr.f32.mxu0 %v47_v25 }
  0x58   :  { %221 = vmatmul.mubr.f32.gmra.mrb[26].mxu0 %v46_v26 }
  0x59   :  { %225 = vmatprep.mubr.f32.mxu0 %v49_v27 }
  0x5c   :  { %226 = vmatmul.mubr.f32.gmra.mrb[28].mxu0 %v48_v28 }
  0x5d   :  { %230 = vmatprep.mubr.f32.mxu0 %v51_v29 }
  0x60   :  { %231 = vmatmul.mubr.f32.gmra.mrb[30].mxu0 %v50_v30 }
  0xf7   :  { %v506_v40 = vpop.f32.mrb[0].mxu0 }
  0xf8   :  { %v507_v41 = vpop.f32.mrb[1].mxu0 }
  0xf9   :  { %v508_v43 = vadd.f32 %v507_v41, %v506_v40 }
  0xfb   :  { %v509_v44 = vpop.f32.mrb[2].mxu0  ;;  %v1014_v45 = vadd.f32 %v508_v43, %v1011_v42 }
  0xfc   :  { %v510_v46 = vpop.f32.mrb[3].mxu0 }
  0xfd   :  { %v511_v47 = vadd.f32 %v510_v46, %v509_v44  ;;  %v236_v48 = vmul.f32 %v1014_v45, %v1014_v45 }
  0xff   :  { %v1019_v49 = vadd.f32 %v511_v47, %v1011_v42  ;;  %v512_v50 = vpop.f32.mrb[4].mxu0  ;;  %618 = vmatprep.mubr.f32.mxu1 %v236_v48 }
 0x100   :  { %v513_v51 = vpop.f32.mrb[5].mxu0 }
 0x101   :  { %v514_v52 = vadd.f32 %v513_v51, %v512_v50  ;;  %v237_v53 = vmul.f32 %v1019_v49, %v1019_v49 }
 0x103   :  { %v1024_v54 = vadd.f32 %v514_v52, %v1011_v42  ;;  %v515_v55 = vpop.f32.mrb[6].mxu0  ;;  %619 = vmatmul.mubr.f32.vlgmr.msra.gmra.mrb[0].mxu1 %v237_v53 }
 0x104   :  { %v516_v56 = vpop.f32.mrb[7].mxu0 }
 0x105   :  { %v517_v57 = vadd.f32 %v516_v56, %v515_v55  ;;  %v238_v58 = vmul.f32 %v1024_v54, %v1024_v54 }
 0x107   :  { %v1029_v59 = vadd.f32 %v517_v57, %v1011_v42  ;;  %v518_v60 = vpop.f32.mrb[8].mxu0  ;;  %621 = vmatprep.mubr.f32.mxu1 %v238_v58 }
 0x108   :  { %v519_v61 = vpop.f32.mrb[9].mxu0 }
 0x109   :  { %v520_v62 = vadd.f32 %v519_v61, %v518_v60  ;;  %v239_v63 = vmul.f32 %v1029_v59, %v1029_v59 }
 0x10b   :  { %v1034_v0 = vadd.f32 %v520_v62, %v1011_v42  ;;  %v521_v1 = vpop.f32.mrb[10].mxu0  ;;  %622 = vmatmul.mubr.f32.gmra.mrb[2].mxu1 %v239_v63  ;;  %v1096_v62 = vld [vmem:[%s1182_s4] ss:$0 sm:$0xff] }
 0x10c   :  { %v522_v2 = vpop.f32.mrb[11].mxu0 }
 0x10d   :  { %v523_v3 = vadd.f32 %v522_v2, %v521_v1  ;;  %v240_v4 = vmul.f32 %v1034_v0, %v1034_v0 }
 0x10f   :  { %v1039_v5 = vadd.f32 %v523_v3, %v1011_v42  ;;  %v524_v6 = vpop.f32.mrb[12].mxu0  ;;  %624 = vmatprep.mubr.f32.mxu1 %v240_v4 }
 0x110   :  { %v525_v7 = vpop.f32.mrb[13].mxu0 }
 0x111   :  { %v526_v8 = vadd.f32 %v525_v7, %v524_v6  ;;  %v241_v9 = vmul.f32 %v1039_v5, %v1039_v5 }
 0x113   :  { %v1044_v10 = vadd.f32 %v526_v8, %v1011_v42  ;;  %v527_v11 = vpop.f32.mrb[14].mxu0  ;;  %625 = vmatmul.mubr.f32.gmra.mrb[4].mxu1 %v241_v9 }
 0x114   :  { %v528_v12 = vpop.f32.mrb[15].mxu0 }
 0x115   :  { %v529_v13 = vadd.f32 %v528_v12, %v527_v11  ;;  %v242_v14 = vmul.f32 %v1044_v10, %v1044_v10 }
 0x117   :  { %v1049_v15 = vadd.f32 %v529_v13, %v1011_v42  ;;  %v530_v16 = vpop.f32.mrb[16].mxu0  ;;  %627 = vmatprep.mubr.f32.mxu1 %v242_v14 }
 0x118   :  { %v531_v17 = vpop.f32.mrb[17].mxu0 }
 0x119   :  { %v532_v18 = vadd.f32 %v531_v17, %v530_v16  ;;  %v243_v19 = vmul.f32 %v1049_v15, %v1049_v15 }
 0x11b   :  { %v1054_v20 = vadd.f32 %v532_v18, %v1011_v42  ;;  %v533_v21 = vpop.f32.mrb[18].mxu0  ;;  %628 = vmatmul.mubr.f32.gmra.mrb[6].mxu1 %v243_v19 }
 0x11c   :  { %v534_v22 = vpop.f32.mrb[19].mxu0 }
 0x11d   :  { %v535_v23 = vadd.f32 %v534_v22, %v533_v21  ;;  %v244_v24 = vmul.f32 %v1054_v20, %v1054_v20 }
 0x11f   :  { %v1059_v25 = vadd.f32 %v535_v23, %v1011_v42  ;;  %v536_v26 = vpop.f32.mrb[20].mxu0  ;;  %630 = vmatprep.mubr.f32.mxu1 %v244_v24 }
 0x120   :  { %v537_v27 = vpop.f32.mrb[21].mxu0 }
 0x121   :  { %v538_v28 = vadd.f32 %v537_v27, %v536_v26  ;;  %v245_v29 = vmul.f32 %v1059_v25, %v1059_v25 }
 0x123   :  { %v1064_v30 = vadd.f32 %v538_v28, %v1011_v42  ;;  %v539_v31 = vpop.f32.mrb[22].mxu0  ;;  %631 = vmatmul.mubr.f32.gmra.mrb[8].mxu1 %v245_v29 }
 0x124   :  { %v540_v32 = vpop.f32.mrb[23].mxu0 }
 0x125   :  { %v541_v33 = vadd.f32 %v540_v32, %v539_v31  ;;  %v246_v34 = vmul.f32 %v1064_v30, %v1064_v30 }
 0x127   :  { %v1069_v35 = vadd.f32 %v541_v33, %v1011_v42  ;;  %v542_v36 = vpop.f32.mrb[24].mxu0  ;;  %633 = vmatprep.mubr.f32.mxu1 %v246_v34 }
 0x128   :  { %v543_v37 = vpop.f32.mrb[25].mxu0 }
 0x129   :  { %v544_v38 = vadd.f32 %v543_v37, %v542_v36  ;;  %v247_v39 = vmul.f32 %v1069_v35, %v1069_v35 }
 0x12b   :  { %v1074_v40 = vadd.f32 %v544_v38, %v1011_v42  ;;  %v545_v41 = vpop.f32.mrb[26].mxu0  ;;  %634 = vmatmul.mubr.f32.gmra.mrb[10].mxu1 %v247_v39 }
 0x12c   :  { %v546_v43 = vpop.f32.mrb[27].mxu0 }
 0x12d   :  { %v547_v44 = vadd.f32 %v546_v43, %v545_v41  ;;  %v248_v46 = vmul.f32 %v1074_v40, %v1074_v40 }
 0x12f   :  { %v1079_v47 = vadd.f32 %v547_v44, %v1011_v42  ;;  %v548_v48 = vpop.f32.mrb[28].mxu0  ;;  %636 = vmatprep.mubr.f32.mxu1 %v248_v46 }
 0x130   :  { %v549_v50 = vpop.f32.mrb[29].mxu0 }
 0x131   :  { %v550_v51 = vadd.f32 %v549_v50, %v548_v48  ;;  %v249_v52 = vmul.f32 %v1079_v47, %v1079_v47 }
 0x133   :  { %v1084_v53 = vadd.f32 %v550_v51, %v1011_v42  ;;  %v551_v55 = vpop.f32.mrb[30].mxu0  ;;  %637 = vmatmul.mubr.f32.gmra.mrb[12].mxu1 %v249_v52 }
 0x134   :  { %v552_v56 = vpop.f32.mrb[31].mxu0 }
 0x135   :  { %v553_v57 = vadd.f32 %v552_v56, %v551_v55  ;;  %v250_v58 = vmul.f32 %v1084_v53, %v1084_v53 }
 0x137   :  { %v1089_v60 = vadd.f32 %v553_v57, %v1011_v42  ;;  %639 = vmatprep.mubr.f32.mxu1 %v250_v58 }
 0x139   :  { %v251_v61 = vmul.f32 %v1089_v60, %v1089_v60 }
 0x13b   :  { %640 = vmatmul.mubr.f32.gmra.mrb[14].mxu1 %v251_v61 }
 0x1d6   :  { %v620_v63 = vpop.f32.mrb[0].mxu1 }
 0x1d7   :  { %v347_v1 = vadd.f32 %v620_v63, %v1096_v62  ;;  %v341_v2 = vpop.f32.mrb[1].mxu1 }
 0x1d8   :  { %v342_v3 = vadd.f32 %v1096_v62, %v341_v2 }
 0x1d9   :  { %706 = vrsqrt.f32 %v347_v1 }
 0x1da   :  { %708 = vrsqrt.f32 %v342_v3 }
 0x1de   :  { %v623_v42 = vpop.f32.mrb[2].mxu1 }
 0x1df   :  { %v357_v4 = vadd.f32 %v623_v42, %v1096_v62  ;;  %v351_v6 = vpop.f32.mrb[3].mxu1 }
 0x1e0   :  { %v352_v7 = vadd.f32 %v1096_v62, %v351_v6 }
 0x1e1   :  { %710 = vrsqrt.f32 %v357_v4 }
 0x1e2   :  { %712 = vrsqrt.f32 %v352_v7 }
 0x1e3   :  { %v707_v8 = vpop.eup %706 }
 0x1e4   :  { %v709_v9 = vpop.eup %708  ;;  %v437_v11 = vmul.f32 %v707_v8, %v1019_v49 }
 0x1e5   :  { %v436_v12 = vmul.f32 %v709_v9, %v1014_v45 }
 0x1e6   :  { %453 = vst [vmem:[%s1183_s5 + $0x8] sm:$0xff] %v437_v11  ;;  %v626_v13 = vpop.f32.mrb[4].mxu1 }
 0x1e7   :  { %452 = vst [vmem:[%s1183_s5] sm:$0xff] %v436_v12  ;;  %v367_v14 = vadd.f32 %v626_v13, %v1096_v62  ;;  %v361_v16 = vpop.f32.mrb[5].mxu1 }
 0x1e8   :  { %v362_v17 = vadd.f32 %v1096_v62, %v361_v16 }
 0x1e9   :  { %714 = vrsqrt.f32 %v367_v14 }
 0x1ea   :  { %716 = vrsqrt.f32 %v362_v17 }
 0x1eb   :  { %v711_v18 = vpop.eup %710 }
 0x1ec   :  { %v713_v49 = vpop.eup %712  ;;  %v439_v45 = vmul.f32 %v711_v18, %v1029_v59 }
 0x1ed   :  { %v438_v19 = vmul.f32 %v713_v49, %v1024_v54 }
 0x1ee   :  { %455 = vst [vmem:[%s1183_s5 + $0x18] sm:$0xff] %v439_v45  ;;  %v629_v21 = vpop.f32.mrb[6].mxu1 }
 0x1ef   :  { %454 = vst [vmem:[%s1183_s5 + $0x10] sm:$0xff] %v438_v19  ;;  %v377_v22 = vadd.f32 %v629_v21, %v1096_v62  ;;  %v371_v23 = vpop.f32.mrb[7].mxu1 }
 0x1f0   :  { %v372_v24 = vadd.f32 %v1096_v62, %v371_v23 }
 0x1f1   :  { %718 = vrsqrt.f32 %v377_v22 }
 0x1f2   :  { %720 = vrsqrt.f32 %v372_v24 }
 0x1f3   :  { %v715_v26 = vpop.eup %714 }
 0x1f4   :  { %v717_v59 = vpop.eup %716  ;;  %v441_v54 = vmul.f32 %v715_v26, %v1039_v5 }
 0x1f5   :  { %v440_v27 = vmul.f32 %v717_v59, %v1034_v0 }
 0x1f6   :  { %457 = vst [vmem:[%s1183_s5 + $0x28] sm:$0xff] %v441_v54  ;;  %v632_v28 = vpop.f32.mrb[8].mxu1 }
 0x1f7   :  { %456 = vst [vmem:[%s1183_s5 + $0x20] sm:$0xff] %v440_v27  ;;  %v387_v29 = vadd.f32 %v632_v28, %v1096_v62  ;;  %v381_v31 = vpop.f32.mrb[9].mxu1 }
 0x1f8   :  { %v382_v32 = vadd.f32 %v1096_v62, %v381_v31 }
 0x1f9   :  { %722 = vrsqrt.f32 %v387_v29 }
 0x1fa   :  { %724 = vrsqrt.f32 %v382_v32 }
 0x1fb   :  { %v719_v33 = vpop.eup %718 }
 0x1fc   :  { %v721_v5 = vpop.eup %720  ;;  %v443_v0 = vmul.f32 %v719_v33, %v1049_v15 }
 0x1fd   :  { %v442_v34 = vmul.f32 %v721_v5, %v1044_v10 }
 0x1fe   :  { %459 = vst [vmem:[%s1183_s5 + $0x38] sm:$0xff] %v443_v0  ;;  %v635_v36 = vpop.f32.mrb[10].mxu1 }
 0x1ff   :  { %458 = vst [vmem:[%s1183_s5 + $0x30] sm:$0xff] %v442_v34  ;;  %v397_v37 = vadd.f32 %v635_v36, %v1096_v62  ;;  %v391_v38 = vpop.f32.mrb[11].mxu1 }
 0x200   :  { %v392_v39 = vadd.f32 %v1096_v62, %v391_v38 }
 0x201   :  { %726 = vrsqrt.f32 %v397_v37 }
 0x202   :  { %728 = vrsqrt.f32 %v392_v39 }
 0x203   :  { %v723_v41 = vpop.eup %722 }
 0x204   :  { %v725_v15 = vpop.eup %724  ;;  %v445_v10 = vmul.f32 %v723_v41, %v1059_v25 }
 0x205   :  { %v444_v43 = vmul.f32 %v725_v15, %v1054_v20 }
 0x206   :  { %461 = vst [vmem:[%s1183_s5 + $0x48] sm:$0xff] %v445_v10  ;;  %v638_v44 = vpop.f32.mrb[12].mxu1 }
 0x207   :  { %460 = vst [vmem:[%s1183_s5 + $0x40] sm:$0xff] %v444_v43  ;;  %v407_v46 = vadd.f32 %v638_v44, %v1096_v62  ;;  %v401_v48 = vpop.f32.mrb[13].mxu1 }
 0x208   :  { %v402_v50 = vadd.f32 %v1096_v62, %v401_v48 }
 0x209   :  { %730 = vrsqrt.f32 %v407_v46 }
 0x20a   :  { %732 = vrsqrt.f32 %v402_v50 }
 0x20b   :  { %v727_v51 = vpop.eup %726 }
 0x20c   :  { %v729_v25 = vpop.eup %728  ;;  %v447_v20 = vmul.f32 %v727_v51, %v1069_v35 }
 0x20d   :  { %v446_v52 = vmul.f32 %v729_v25, %v1064_v30 }
 0x20e   :  { %463 = vst [vmem:[%s1183_s5 + $0x58] sm:$0xff] %v447_v20  ;;  %v641_v55 = vpop.f32.mrb[14].mxu1 }
 0x20f   :  { %462 = vst [vmem:[%s1183_s5 + $0x50] sm:$0xff] %v446_v52  ;;  %v417_v56 = vadd.f32 %v641_v55, %v1096_v62  ;;  %v411_v57 = vpop.f32.mrb[15].mxu1 }
 0x210   :  { %v412_v58 = vadd.f32 %v1096_v62, %v411_v57 }
 0x211   :  { %734 = vrsqrt.f32 %v417_v56 }
 0x212   :  { %736 = vrsqrt.f32 %v412_v58 }
 0x213   :  { %v731_v61 = vpop.eup %730 }
 0x214   :  { %v733_v35 = vpop.eup %732  ;;  %v449_v30 = vmul.f32 %v731_v61, %v1079_v47 }
 0x215   :  { %v448_v63 = vmul.f32 %v733_v35, %v1074_v40 }
 0x216   :  { %465 = vst [vmem:[%s1183_s5 + $0x68] sm:$0xff] %v449_v30 }
 0x217   :  { %464 = vst [vmem:[%s1183_s5 + $0x60] sm:$0xff] %v448_v63 }
 0x21b   :  { %v735_v1 = vpop.eup %734 }
 0x21c   :  { %v737_v2 = vpop.eup %736  ;;  %v451_v62 = vmul.f32 %v735_v1, %v1089_v60 }
 0x21d   :  { %v450_v3 = vmul.f32 %v737_v2, %v1084_v53 }
 0x21e   :  { %467 = vst [vmem:[%s1183_s5 + $0x78] sm:$0xff] %v451_v62 }
 0x21f   :  { %466 = vst [vmem:[%s1183_s5 + $0x70] sm:$0xff] %v450_v3 }

// kernel: anf_hyperprior_forward.17
= control target key start
LH: loop header
LB: loop body
LE: loop exit
PB: predicated region body
PF: predicated region fallthrough
CT: control target
= control target key end

     0   :  { %s402_s1 = inlined_call_operand.vmem [shape: f32[256,128], index: 1, kind: input, shape index: {}]   ;;  %s403_s0 = inlined_call_operand.vmem [shape: f32[32,256], index: 0, kind: input, shape index: {}]   ;;  %s404_s2 = inlined_call_operand.vmem [shape: f32[1,128], index: 2, kind: input, shape index: {}]   ;;  %s405_s3 = inlined_call_operand.vmem [shape: f32[32,128], index: 3, kind: output, shape index: {}]  }
   0x1   :  { %v38_v0 = vld [vmem:[%s402_s1 + $0x80] sm:$0xff]  ;;  %v39_v1 = vld [vmem:[%s402_s1 + $0x88] sm:$0xff]  ;;  %v40_v5 = vld [vmem:[%s402_s1 + $0x90] sm:$0xff] }
   0x2   :  { %v22_v2 = vld [vmem:[%s402_s1] sm:$0xff]  ;;  %v199_v3 = vpack.c.bf16 %v39_v1, %v38_v0  ;;  %v23_v4 = vld [vmem:[%s402_s1 + $0x8] sm:$0xff]  ;;  %v41_v6 = vld [vmem:[%s402_s1 + $0x98] sm:$0xff] }
   0x3   :  { %v201_v7 = vpack.c.bf16 %v23_v4, %v22_v2  ;;  %v203_v8 = vpack.c.bf16 %v41_v6, %v40_v5  ;;  %v24_v9 = vld [vmem:[%s402_s1 + $0x10] sm:$0xff]  ;;  %v25_v10 = vld [vmem:[%s402_s1 + $0x18] sm:$0xff]  ;;  %v42_v11 = vld [vmem:[%s402_s1 + $0xa0] sm:$0xff] }
   0x4   :  { %200 = vmatprep.subr.bf16.mxu0 %v199_v3  ;;  %231 = vmatprep.subr.bf16.mxu1 %v199_v3  ;;  %v43_v12 = vld [vmem:[%s402_s1 + $0xa8] sm:$0xff]  ;;  %v205_v13 = vpack.c.bf16 %v25_v10, %v24_v9  ;;  %v26_v15 = vld [vmem:[%s402_s1 + $0x20] sm:$0xff]  ;;  %v44_v17 = vld [vmem:[%s402_s1 + $0xb0] sm:$0xff] }
   0x5   :  { %202 = vmatpush3.bf16.msra.mxu0 %v201_v7  ;;  %239 = vmatpush3.bf16.msra.mxu1 %v201_v7  ;;  %v207_v14 = vpack.c.bf16 %v43_v12, %v42_v11  ;;  %v27_v16 = vld [vmem:[%s402_s1 + $0x28] sm:$0xff]  ;;  %v45_v18 = vld [vmem:[%s402_s1 + $0xb8] sm:$0xff]  ;;  %v28_v21 = vld [vmem:[%s402_s1 + $0x30] sm:$0xff] }
   0x6   :  { %204 = vmatprep.subr.bf16.mxu0 %v203_v8  ;;  %232 = vmatprep.subr.bf16.mxu1 %v203_v8  ;;  %v209_v19 = vpack.c.bf16 %v27_v16, %v26_v15  ;;  %v211_v20 = vpack.c.bf16 %v45_v18, %v44_v17  ;;  %v29_v22 = vld [vmem:[%s402_s1 + $0x38] sm:$0xff]  ;;  %v46_v23 = vld [vmem:[%s402_s1 + $0xc0] sm:$0xff]  ;;  %v47_v24 = vld [vmem:[%s402_s1 + $0xc8] sm:$0xff] }
   0x7   :  { %v15_v25 = vld [vmem:[%s403_s0 + $0x8] sm:$0xff]  ;;  %v213_v27 = vpack.c.bf16 %v29_v22, %v28_v21  ;;  %v215_v28 = vpack.c.bf16 %v47_v24, %v46_v23  ;;  %v30_v29 = vld [vmem:[%s402_s1 + $0x40] sm:$0xff]  ;;  %v48_v31 = vld [vmem:[%s402_s1 + $0xd0] sm:$0xff] }
   0x8   :  { %125 = vmatprep.mubr.f32.mxu0 %v15_v25  ;;  %v19_v26 = vld [vmem:[%s403_s0 + $0x28] sm:$0xff]  ;;  %v49_v32 = vld [vmem:[%s402_s1 + $0xd8] sm:$0xff]  ;;  %v32_v35 = vld [vmem:[%s402_s1 + $0x50] sm:$0xff] }
   0x9   :  { %206 = vmatpush3.bf16.msra.mxu0 %v205_v13  ;;  %240 = vmatpush3.bf16.msra.mxu1 %v205_v13  ;;  %v31_v30 = vld [vmem:[%s402_s1 + $0x48] sm:$0xff]  ;;  %v219_v34 = vpack.c.bf16 %v49_v32, %v48_v31  ;;  %v33_v36 = vld [vmem:[%s402_s1 + $0x58] sm:$0xff]  ;;  %v50_v37 = vld [vmem:[%s402_s1 + $0xe0] sm:$0xff] }
   0xa   :  { %208 = vmatprep.subr.bf16.mxu0 %v207_v14  ;;  %233 = vmatprep.subr.bf16.mxu1 %v207_v14  ;;  %v217_v33 = vpack.c.bf16 %v31_v30, %v30_v29  ;;  %v51_v38 = vld [vmem:[%s402_s1 + $0xe8] sm:$0xff]  ;;  %v221_v39 = vpack.c.bf16 %v33_v36, %v32_v35  ;;  %v34_v41 = vld [vmem:[%s402_s1 + $0x60] sm:$0xff]  ;;  %v52_v43 = vld [vmem:[%s402_s1 + $0xf0] sm:$0xff] }
   0xb   :  { %135 = vmatprep.mubr.f32.mxu1 %v19_v26  ;;  %v223_v40 = vpack.c.bf16 %v51_v38, %v50_v37  ;;  %v35_v42 = vld [vmem:[%s402_s1 + $0x68] sm:$0xff]  ;;  %v53_v44 = vld [vmem:[%s402_s1 + $0xf8] sm:$0xff]  ;;  %v36_v47 = vld [vmem:[%s402_s1 + $0x70] sm:$0xff] }
   0xc   :  { %v225_v45 = vpack.c.bf16 %v35_v42, %v34_v41  ;;  %v227_v46 = vpack.c.bf16 %v53_v44, %v52_v43  ;;  %v37_v48 = vld [vmem:[%s402_s1 + $0x78] sm:$0xff]  ;;  %v14_v50 = vld [vmem:[%s403_s0] sm:$0xff]  ;;  %v16_v54 = vld [vmem:[%s403_s0 + $0x10] sm:$0xff] }
   0xd   :  { %210 = vmatpush3.bf16.msra.mxu0 %v209_v19  ;;  %241 = vmatpush3.bf16.msra.mxu1 %v209_v19  ;;  %v229_v49 = vpack.c.bf16 %v37_v48, %v36_v47  ;;  %v18_v51 = vld [vmem:[%s403_s0 + $0x20] sm:$0xff]  ;;  %v17_v52 = vld [vmem:[%s403_s0 + $0x18] sm:$0xff]  ;;  %v20_v55 = vld [vmem:[%s403_s0 + $0x30] sm:$0xff] }
   0xe   :  { %212 = vmatprep.subr.bf16.mxu0 %v211_v20  ;;  %234 = vmatprep.subr.bf16.mxu1 %v211_v20  ;;  %v21_v53 = vld [vmem:[%s403_s0 + $0x38] sm:$0xff]  ;;  %v154_v58 = vld [vmem:[%s404_s2] ss:$0 sm:$0xff] }
  0x11   :  { %214 = vmatpush3.bf16.msra.mxu0 %v213_v27  ;;  %242 = vmatpush3.bf16.msra.mxu1 %v213_v27 }
  0x12   :  { %216 = vmatprep.subr.bf16.mxu0 %v215_v28  ;;  %235 = vmatprep.subr.bf16.mxu1 %v215_v28 }
  0x15   :  { %218 = vmatpush3.bf16.msra.mxu0 %v217_v33  ;;  %243 = vmatpush3.bf16.msra.mxu1 %v217_v33 }
  0x16   :  { %220 = vmatprep.subr.bf16.mxu0 %v219_v34  ;;  %236 = vmatprep.subr.bf16.mxu1 %v219_v34 }
  0x19   :  { %222 = vmatpush3.bf16.msra.mxu0 %v221_v39  ;;  %244 = vmatpush3.bf16.msra.mxu1 %v221_v39 }
  0x1a   :  { %224 = vmatprep.subr.bf16.mxu0 %v223_v40  ;;  %237 = vmatprep.subr.bf16.mxu1 %v223_v40 }
  0x1d   :  { %226 = vmatpush3.bf16.msra.mxu0 %v225_v45  ;;  %245 = vmatpush3.bf16.msra.mxu1 %v225_v45 }
  0x1e   :  { %228 = vmatprep.subr.bf16.mxu0 %v227_v46  ;;  %238 = vmatprep.subr.bf16.mxu1 %v227_v46 }
  0x21   :  { %230 = vmatpush3.bf16.msra.mxu0 %v229_v49  ;;  %246 = vmatpush3.bf16.msra.mxu1 %v229_v49 }
  0x24   :  { %126 = vmatmul.mubr.f32.vlgmr.msra.gmra.mrb[0].mxu0 %v14_v50  ;;  %136 = vmatmul.mubr.f32.vlgmr.msra.gmra.mrb[0].mxu1 %v18_v51 }
  0x25   :  { %130 = vmatprep.mubr.f32.mxu0 %v17_v52  ;;  %140 = vmatprep.mubr.f32.mxu1 %v21_v53 }
  0x28   :  { %131 = vmatmul.mubr.f32.gmra.mrb[2].mxu0 %v16_v54  ;;  %141 = vmatmul.mubr.f32.gmra.mrb[2].mxu1 %v20_v55 }
  0xf7   :  { %v187_v56 = vpop.f32.mrb[0].mxu0  ;;  %v193_v57 = vpop.f32.mrb[0].mxu1 }
  0xf8   :  { %v188_v59 = vpop.f32.mrb[1].mxu0  ;;  %v194_v60 = vpop.f32.mrb[1].mxu1 }
  0xf9   :  { %v189_v61 = vadd.f32 %v188_v59, %v187_v56  ;;  %v195_v62 = vadd.f32 %v194_v60, %v193_v57 }
  0xfb   :  { %v128_v63 = vadd.f32 %v189_v61, %v154_v58  ;;  %v138_v0 = vadd.f32 %v195_v62, %v154_v58  ;;  %v190_v1 = vpop.f32.mrb[2].mxu0  ;;  %v196_v2 = vpop.f32.mrb[2].mxu1 }
  0xfc   :  { %v191_v3 = vpop.f32.mrb[3].mxu0  ;;  %v197_v4 = vpop.f32.mrb[3].mxu1 }
  0xfd   :  { %146 = vst [vmem:[%s405_s3] sm:$0xff] %v128_v63  ;;  %148 = vst [vmem:[%s405_s3 + $0x10] sm:$0xff] %v138_v0  ;;  %v192_v5 = vadd.f32 %v191_v3, %v190_v1  ;;  %v198_v6 = vadd.f32 %v197_v4, %v196_v2 }
  0xff   :  { %v133_v7 = vadd.f32 %v192_v5, %v154_v58  ;;  %v143_v8 = vadd.f32 %v198_v6, %v154_v58 }
 0x101   :  { %147 = vst [vmem:[%s405_s3 + $0x8] sm:$0xff] %v133_v7  ;;  %149 = vst [vmem:[%s405_s3 + $0x18] sm:$0xff] %v143_v8 }

// kernel: anf_hyperprior_forward.18
= control target key start
LH: loop header
LB: loop body
LE: loop exit
PB: predicated region body
PF: predicated region fallthrough
CT: control target
= control target key end

     0   :  { %s340_s1 = inlined_call_operand.vmem [shape: f32[128,128], index: 1, kind: input, shape index: {}]   ;;  %s341_s0 = inlined_call_operand.vmem [shape: f32[32,128], index: 0, kind: input, shape index: {}]   ;;  %s342_s2 = inlined_call_operand.vmem [shape: f32[1,128], index: 2, kind: input, shape index: {}]   ;;  %s343_s3 = inlined_call_operand.vmem [shape: f32[32,128], index: 3, kind: output, shape index: {}]  }
   0x1   :  { %v18_v0 = vld [vmem:[%s340_s1] sm:$0xff]  ;;  %v19_v1 = vld [vmem:[%s340_s1 + $0x8] sm:$0xff]  ;;  %v20_v2 = vld [vmem:[%s340_s1 + $0x10] sm:$0xff] }
   0x2   :  { %v197_v3 = vpack.c.bf16 %v19_v1, %v18_v0  ;;  %v21_v4 = vld [vmem:[%s340_s1 + $0x18] sm:$0xff]  ;;  %v22_v6 = vld [vmem:[%s340_s1 + $0x20] sm:$0xff]  ;;  %v23_v7 = vld [vmem:[%s340_s1 + $0x28] sm:$0xff] }
   0x3   :  { %v201_v5 = vpack.c.bf16 %v21_v4, %v20_v2  ;;  %v205_v8 = vpack.c.bf16 %v23_v7, %v22_v6  ;;  %v14_v9 = vld [vmem:[%s341_s0] sm:$0xff]  ;;  %v16_v10 = vld [vmem:[%s341_s0 + $0x10] sm:$0xff]  ;;  %v25_v12 = vld [vmem:[%s340_s1 + $0x38] sm:$0xff] }
   0x4   :  { %198 = vmatprep.subr.bf16.mxu0 %v197_v3  ;;  %229 = vmatprep.subr.bf16.mxu1 %v197_v3  ;;  %v24_v11 = vld [vmem:[%s340_s1 + $0x30] sm:$0xff]  ;;  %v26_v14 = vld [vmem:[%s340_s1 + $0x40] sm:$0xff]  ;;  %v27_v15 = vld [vmem:[%s340_s1 + $0x48] sm:$0xff] }
   0x5   :  { %200 = vmatpush3.bf16.msra.mxu0 %v197_v3  ;;  %237 = vmatpush3.bf16.msra.mxu1 %v197_v3  ;;  %v209_v13 = vpack.c.bf16 %v25_v12, %v24_v11  ;;  %v213_v16 = vpack.c.bf16 %v27_v15, %v26_v14  ;;  %v28_v17 = vld [vmem:[%s340_s1 + $0x50] sm:$0xff]  ;;  %v29_v18 = vld [vmem:[%s340_s1 + $0x58] sm:$0xff]  ;;  %v30_v20 = vld [vmem:[%s340_s1 + $0x60] sm:$0xff] }
   0x6   :  { %202 = vmatprep.subr.bf16.mxu0 %v201_v5  ;;  %230 = vmatprep.subr.bf16.mxu1 %v201_v5  ;;  %v217_v19 = vpack.c.bf16 %v29_v18, %v28_v17  ;;  %v31_v21 = vld [vmem:[%s340_s1 + $0x68] sm:$0xff]  ;;  %v32_v23 = vld [vmem:[%s340_s1 + $0x70] sm:$0xff]  ;;  %v33_v24 = vld [vmem:[%s340_s1 + $0x78] sm:$0xff] }
   0x7   :  { %191 = vmatprep.mubr.f32.mxu0 %v14_v9  ;;  %194 = vmatprep.mubr.f32.mxu1 %v16_v10  ;;  %v221_v22 = vpack.c.bf16 %v31_v21, %v30_v20  ;;  %v225_v25 = vpack.c.bf16 %v33_v24, %v32_v23  ;;  %v15_v26 = vld [vmem:[%s341_s0 + $0x8] sm:$0xff]  ;;  %v17_v27 = vld [vmem:[%s341_s0 + $0x18] sm:$0xff]  ;;  %v138_v28 = vld [vmem:[%s342_s2] ss:$0 sm:$0xff] }
   0x9   :  { %204 = vmatpush3.bf16.msra.mxu0 %v201_v5  ;;  %238 = vmatpush3.bf16.msra.mxu1 %v201_v5 }
   0xa   :  { %206 = vmatprep.subr.bf16.mxu0 %v205_v8  ;;  %231 = vmatprep.subr.bf16.mxu1 %v205_v8 }
   0xd   :  { %208 = vmatpush3.bf16.msra.mxu0 %v205_v8  ;;  %239 = vmatpush3.bf16.msra.mxu1 %v205_v8 }
   0xe   :  { %210 = vmatprep.subr.bf16.mxu0 %v209_v13  ;;  %232 = vmatprep.subr.bf16.mxu1 %v209_v13 }
  0x11   :  { %212 = vmatpush3.bf16.msra.mxu0 %v209_v13  ;;  %240 = vmatpush3.bf16.msra.mxu1 %v209_v13 }
  0x12   :  { %214 = vmatprep.subr.bf16.mxu0 %v213_v16  ;;  %233 = vmatprep.subr.bf16.mxu1 %v213_v16 }
  0x15   :  { %216 = vmatpush3.bf16.msra.mxu0 %v213_v16  ;;  %241 = vmatpush3.bf16.msra.mxu1 %v213_v16 }
  0x16   :  { %218 = vmatprep.subr.bf16.mxu0 %v217_v19  ;;  %234 = vmatprep.subr.bf16.mxu1 %v217_v19 }
  0x19   :  { %220 = vmatpush3.bf16.msra.mxu0 %v217_v19  ;;  %242 = vmatpush3.bf16.msra.mxu1 %v217_v19 }
  0x1a   :  { %222 = vmatprep.subr.bf16.mxu0 %v221_v22  ;;  %235 = vmatprep.subr.bf16.mxu1 %v221_v22 }
  0x1d   :  { %224 = vmatpush3.bf16.msra.mxu0 %v221_v22  ;;  %243 = vmatpush3.bf16.msra.mxu1 %v221_v22 }
  0x1e   :  { %226 = vmatprep.subr.bf16.mxu0 %v225_v25  ;;  %236 = vmatprep.subr.bf16.mxu1 %v225_v25 }
  0x21   :  { %228 = vmatpush3.bf16.msra.mxu0 %v225_v25  ;;  %244 = vmatpush3.bf16.msra.mxu1 %v225_v25 }
  0x24   :  { %192 = vmatmul.mubr.f32.vlgmr.msra.gmra.mrb[0].mxu0 %v15_v26  ;;  %195 = vmatmul.mubr.f32.vlgmr.msra.gmra.mrb[0].mxu1 %v17_v27 }
  0xf7   :  { %v193_v29 = vpop.f32.mrb[0].mxu0  ;;  %v196_v30 = vpop.f32.mrb[0].mxu1 }
  0xf8   :  { %v113_v31 = vadd.f32 %v193_v29, %v138_v28  ;;  %v123_v32 = vadd.f32 %v196_v30, %v138_v28  ;;  %v107_v33 = vpop.f32.mrb[1].mxu0  ;;  %v117_v34 = vpop.f32.mrb[1].mxu1 }
  0xf9   :  { %v108_v35 = vadd.f32 %v138_v28, %v107_v33  ;;  %v118_v36 = vadd.f32 %v138_v28, %v117_v34 }
  0xfa   :  { %v127_v37 = vmax.f32 %v113_v31, 0.0  ;;  %v129_v38 = vmax.f32 %v123_v32, 0.0 }
  0xfb   :  { %v126_v39 = vmax.f32 %v108_v35, 0.0  ;;  %v128_v40 = vmax.f32 %v118_v36, 0.0 }
  0xfc   :  { %131 = vst [vmem:[%s343_s3 + $0x8] sm:$0xff] %v127_v37  ;;  %133 = vst [vmem:[%s343_s3 + $0x18] sm:$0xff] %v129_v38 }
  0xfd   :  { %130 = vst [vmem:[%s343_s3] sm:$0xff] %v126_v39  ;;  %132 = vst [vmem:[%s343_s3 + $0x10] sm:$0xff] %v128_v40 }

// kernel: anf_hyperprior_forward.19
= control target key start
LH: loop header
LB: loop body
LE: loop exit
PB: predicated region body
PF: predicated region fallthrough
CT: control target
= control target key end

     0   :  { %s327_s1 = inlined_call_operand.vmem [shape: f32[256,128], index: 1, kind: input, shape index: {}]   ;;  %s328_s0 = inlined_call_operand.vmem [shape: f32[8,256], index: 0, kind: input, shape index: {}]   ;;  %s329_s2 = inlined_call_operand.vmem [shape: f32[1,128], index: 2, kind: input, shape index: {}]   ;;  %s330_s3 = inlined_call_operand.vmem [shape: f32[8,128], index: 3, kind: output, shape index: {}]  }
   0x1   :  { %v32_v0 = vld [vmem:[%s327_s1 + $0x80] sm:$0xff]  ;;  %v33_v1 = vld [vmem:[%s327_s1 + $0x88] sm:$0xff]  ;;  %v34_v5 = vld [vmem:[%s327_s1 + $0x90] sm:$0xff] }
   0x2   :  { %v16_v2 = vld [vmem:[%s327_s1] sm:$0xff]  ;;  %v167_v3 = vpack.c.bf16 %v33_v1, %v32_v0  ;;  %v17_v4 = vld [vmem:[%s327_s1 + $0x8] sm:$0xff]  ;;  %v35_v6 = vld [vmem:[%s327_s1 + $0x98] sm:$0xff] }
   0x3   :  { %v169_v7 = vpack.c.bf16 %v17_v4, %v16_v2  ;;  %v171_v8 = vpack.c.bf16 %v35_v6, %v34_v5  ;;  %v18_v9 = vld [vmem:[%s327_s1 + $0x10] sm:$0xff]  ;;  %v19_v10 = vld [vmem:[%s327_s1 + $0x18] sm:$0xff]  ;;  %v36_v11 = vld [vmem:[%s327_s1 + $0xa0] sm:$0xff] }
   0x4   :  { %168 = vmatprep.subr.bf16.mxu0 %v167_v3  ;;  %v37_v12 = vld [vmem:[%s327_s1 + $0xa8] sm:$0xff]  ;;  %v173_v13 = vpack.c.bf16 %v19_v10, %v18_v9  ;;  %v20_v15 = vld [vmem:[%s327_s1 + $0x20] sm:$0xff]  ;;  %v38_v17 = vld [vmem:[%s327_s1 + $0xb0] sm:$0xff] }
   0x5   :  { %170 = vmatpush3.bf16.msra.mxu0 %v169_v7  ;;  %v175_v14 = vpack.c.bf16 %v37_v12, %v36_v11  ;;  %v21_v16 = vld [vmem:[%s327_s1 + $0x28] sm:$0xff]  ;;  %v39_v18 = vld [vmem:[%s327_s1 + $0xb8] sm:$0xff]  ;;  %v22_v21 = vld [vmem:[%s327_s1 + $0x30] sm:$0xff] }
   0x6   :  { %172 = vmatprep.subr.bf16.mxu0 %v171_v8  ;;  %v177_v19 = vpack.c.bf16 %v21_v16, %v20_v15  ;;  %v179_v20 = vpack.c.bf16 %v39_v18, %v38_v17  ;;  %v23_v22 = vld [vmem:[%s327_s1 + $0x38] sm:$0xff]  ;;  %v40_v23 = vld [vmem:[%s327_s1 + $0xc0] sm:$0xff]  ;;  %v41_v24 = vld [vmem:[%s327_s1 + $0xc8] sm:$0xff] }
   0x7   :  { %v15_v25 = vld [vmem:[%s328_s0 + $0x8] sm:$0xff]  ;;  %v181_v26 = vpack.c.bf16 %v23_v22, %v22_v21  ;;  %v183_v27 = vpack.c.bf16 %v41_v24, %v40_v23  ;;  %v24_v28 = vld [vmem:[%s327_s1 + $0x40] sm:$0xff]  ;;  %v42_v30 = vld [vmem:[%s327_s1 + $0xd0] sm:$0xff] }
   0x8   :  { %119 = vmatprep.mubr.f32.mxu0 %v15_v25  ;;  %v25_v29 = vld [vmem:[%s327_s1 + $0x48] sm:$0xff]  ;;  %v43_v31 = vld [vmem:[%s327_s1 + $0xd8] sm:$0xff]  ;;  %v26_v34 = vld [vmem:[%s327_s1 + $0x50] sm:$0xff] }
   0x9   :  { %174 = vmatpush3.bf16.msra.mxu0 %v173_v13  ;;  %v185_v32 = vpack.c.bf16 %v25_v29, %v24_v28  ;;  %v187_v33 = vpack.c.bf16 %v43_v31, %v42_v30  ;;  %v27_v35 = vld [vmem:[%s327_s1 + $0x58] sm:$0xff]  ;;  %v44_v36 = vld [vmem:[%s327_s1 + $0xe0] sm:$0xff]  ;;  %v45_v37 = vld [vmem:[%s327_s1 + $0xe8] sm:$0xff] }
   0xa   :  { %176 = vmatprep.subr.bf16.mxu0 %v175_v14  ;;  %v189_v38 = vpack.c.bf16 %v27_v35, %v26_v34  ;;  %v191_v39 = vpack.c.bf16 %v45_v37, %v44_v36  ;;  %v28_v40 = vld [vmem:[%s327_s1 + $0x60] sm:$0xff]  ;;  %v29_v41 = vld [vmem:[%s327_s1 + $0x68] sm:$0xff]  ;;  %v46_v42 = vld [vmem:[%s327_s1 + $0xf0] sm:$0xff] }
   0xb   :  { %v47_v43 = vld [vmem:[%s327_s1 + $0xf8] sm:$0xff]  ;;  %v193_v44 = vpack.c.bf16 %v29_v41, %v28_v40  ;;  %v30_v46 = vld [vmem:[%s327_s1 + $0x70] sm:$0xff]  ;;  %v14_v49 = vld [vmem:[%s328_s0] sm:$0xff] }
   0xc   :  { %v195_v45 = vpack.c.bf16 %v47_v43, %v46_v42  ;;  %v31_v47 = vld [vmem:[%s327_s1 + $0x78] sm:$0xff]  ;;  %v131_v51 = vld [vmem:[%s329_s2] ss:$0 sm:$0xff] }
   0xd   :  { %178 = vmatpush3.bf16.msra.mxu0 %v177_v19  ;;  %v197_v48 = vpack.c.bf16 %v31_v47, %v30_v46 }
   0xe   :  { %180 = vmatprep.subr.bf16.mxu0 %v179_v20 }
  0x11   :  { %182 = vmatpush3.bf16.msra.mxu0 %v181_v26 }
  0x12   :  { %184 = vmatprep.subr.bf16.mxu0 %v183_v27 }
  0x15   :  { %186 = vmatpush3.bf16.msra.mxu0 %v185_v32 }
  0x16   :  { %188 = vmatprep.subr.bf16.mxu0 %v187_v33 }
  0x19   :  { %190 = vmatpush3.bf16.msra.mxu0 %v189_v38 }
  0x1a   :  { %192 = vmatprep.subr.bf16.mxu0 %v191_v39 }
  0x1d   :  { %194 = vmatpush3.bf16.msra.mxu0 %v193_v44 }
  0x1e   :  { %196 = vmatprep.subr.bf16.mxu0 %v195_v45 }
  0x21   :  { %198 = vmatpush3.bf16.msra.mxu0 %v197_v48 }
  0x24   :  { %120 = vmatmul.mubr.f32.vlgmr.msra.gmra.mrb[0].mxu0 %v14_v49 }
  0xf7   :  { %v164_v50 = vpop.f32.mrb[0].mxu0 }
  0xf8   :  { %v165_v52 = vpop.f32.mrb[1].mxu0 }
  0xf9   :  { %v166_v53 = vadd.f32 %v165_v52, %v164_v50 }
  0xfb   :  { %v122_v54 = vadd.f32 %v166_v53, %v131_v51 }
  0xfd   :  { %v125_v55 = vmax.f32 %v122_v54, 0.0 }
  0xff   :  { %126 = vst [vmem:[%s330_s3] sm:$0xff] %v125_v55 }

// kernel: anf_hyperprior_forward.20
= control target key start
LH: loop header
LB: loop body
LE: loop exit
PB: predicated region body
PF: predicated region fallthrough
CT: control target
= control target key end

     0   :  { %s326_s1 = inlined_call_operand.vmem [shape: f32[256,128], index: 1, kind: input, shape index: {}]   ;;  %s327_s0 = inlined_call_operand.vmem [shape: f32[8,256], index: 0, kind: input, shape index: {}]   ;;  %s328_s2 = inlined_call_operand.vmem [shape: f32[1,128], index: 2, kind: input, shape index: {}]   ;;  %s329_s3 = inlined_call_operand.vmem [shape: f32[8,128], index: 3, kind: output, shape index: {}]  }
   0x1   :  { %v32_v0 = vld [vmem:[%s326_s1 + $0x80] sm:$0xff]  ;;  %v33_v1 = vld [vmem:[%s326_s1 + $0x88] sm:$0xff]  ;;  %v34_v5 = vld [vmem:[%s326_s1 + $0x90] sm:$0xff] }
   0x2   :  { %v16_v2 = vld [vmem:[%s326_s1] sm:$0xff]  ;;  %v166_v3 = vpack.c.bf16 %v33_v1, %v32_v0  ;;  %v17_v4 = vld [vmem:[%s326_s1 + $0x8] sm:$0xff]  ;;  %v35_v6 = vld [vmem:[%s326_s1 + $0x98] sm:$0xff] }
   0x3   :  { %v168_v7 = vpack.c.bf16 %v17_v4, %v16_v2  ;;  %v170_v8 = vpack.c.bf16 %v35_v6, %v34_v5  ;;  %v18_v9 = vld [vmem:[%s326_s1 + $0x10] sm:$0xff]  ;;  %v19_v10 = vld [vmem:[%s326_s1 + $0x18] sm:$0xff]  ;;  %v36_v11 = vld [vmem:[%s326_s1 + $0xa0] sm:$0xff] }
   0x4   :  { %167 = vmatprep.subr.bf16.mxu0 %v166_v3  ;;  %v37_v12 = vld [vmem:[%s326_s1 + $0xa8] sm:$0xff]  ;;  %v172_v13 = vpack.c.bf16 %v19_v10, %v18_v9  ;;  %v20_v15 = vld [vmem:[%s326_s1 + $0x20] sm:$0xff]  ;;  %v38_v17 = vld [vmem:[%s326_s1 + $0xb0] sm:$0xff] }
   0x5   :  { %169 = vmatpush3.bf16.msra.mxu0 %v168_v7  ;;  %v174_v14 = vpack.c.bf16 %v37_v12, %v36_v11  ;;  %v21_v16 = vld [vmem:[%s326_s1 + $0x28] sm:$0xff]  ;;  %v39_v18 = vld [vmem:[%s326_s1 + $0xb8] sm:$0xff]  ;;  %v22_v21 = vld [vmem:[%s326_s1 + $0x30] sm:$0xff] }
   0x6   :  { %171 = vmatprep.subr.bf16.mxu0 %v170_v8  ;;  %v176_v19 = vpack.c.bf16 %v21_v16, %v20_v15  ;;  %v178_v20 = vpack.c.bf16 %v39_v18, %v38_v17  ;;  %v23_v22 = vld [vmem:[%s326_s1 + $0x38] sm:$0xff]  ;;  %v40_v23 = vld [vmem:[%s326_s1 + $0xc0] sm:$0xff]  ;;  %v41_v24 = vld [vmem:[%s326_s1 + $0xc8] sm:$0xff] }
   0x7   :  { %v15_v25 = vld [vmem:[%s327_s0 + $0x8] sm:$0xff]  ;;  %v180_v26 = vpack.c.bf16 %v23_v22, %v22_v21  ;;  %v182_v27 = vpack.c.bf16 %v41_v24, %v40_v23  ;;  %v24_v28 = vld [vmem:[%s326_s1 + $0x40] sm:$0xff]  ;;  %v42_v30 = vld [vmem:[%s326_s1 + $0xd0] sm:$0xff] }
   0x8   :  { %119 = vmatprep.mubr.f32.mxu0 %v15_v25  ;;  %v25_v29 = vld [vmem:[%s326_s1 + $0x48] sm:$0xff]  ;;  %v43_v31 = vld [vmem:[%s326_s1 + $0xd8] sm:$0xff]  ;;  %v26_v34 = vld [vmem:[%s326_s1 + $0x50] sm:$0xff] }
   0x9   :  { %173 = vmatpush3.bf16.msra.mxu0 %v172_v13  ;;  %v184_v32 = vpack.c.bf16 %v25_v29, %v24_v28  ;;  %v186_v33 = vpack.c.bf16 %v43_v31, %v42_v30  ;;  %v27_v35 = vld [vmem:[%s326_s1 + $0x58] sm:$0xff]  ;;  %v44_v36 = vld [vmem:[%s326_s1 + $0xe0] sm:$0xff]  ;;  %v45_v37 = vld [vmem:[%s326_s1 + $0xe8] sm:$0xff] }
   0xa   :  { %175 = vmatprep.subr.bf16.mxu0 %v174_v14  ;;  %v188_v38 = vpack.c.bf16 %v27_v35, %v26_v34  ;;  %v190_v39 = vpack.c.bf16 %v45_v37, %v44_v36  ;;  %v28_v40 = vld [vmem:[%s326_s1 + $0x60] sm:$0xff]  ;;  %v29_v41 = vld [vmem:[%s326_s1 + $0x68] sm:$0xff]  ;;  %v46_v42 = vld [vmem:[%s326_s1 + $0xf0] sm:$0xff] }
   0xb   :  { %v47_v43 = vld [vmem:[%s326_s1 + $0xf8] sm:$0xff]  ;;  %v192_v44 = vpack.c.bf16 %v29_v41, %v28_v40  ;;  %v30_v46 = vld [vmem:[%s326_s1 + $0x70] sm:$0xff]  ;;  %v14_v49 = vld [vmem:[%s327_s0] sm:$0xff] }
   0xc   :  { %v194_v45 = vpack.c.bf16 %v47_v43, %v46_v42  ;;  %v31_v47 = vld [vmem:[%s326_s1 + $0x78] sm:$0xff]  ;;  %v130_v51 = vld [vmem:[%s328_s2] ss:$0 sm:$0xff] }
   0xd   :  { %177 = vmatpush3.bf16.msra.mxu0 %v176_v19  ;;  %v196_v48 = vpack.c.bf16 %v31_v47, %v30_v46 }
   0xe   :  { %179 = vmatprep.subr.bf16.mxu0 %v178_v20 }
  0x11   :  { %181 = vmatpush3.bf16.msra.mxu0 %v180_v26 }
  0x12   :  { %183 = vmatprep.subr.bf16.mxu0 %v182_v27 }
  0x15   :  { %185 = vmatpush3.bf16.msra.mxu0 %v184_v32 }
  0x16   :  { %187 = vmatprep.subr.bf16.mxu0 %v186_v33 }
  0x19   :  { %189 = vmatpush3.bf16.msra.mxu0 %v188_v38 }
  0x1a   :  { %191 = vmatprep.subr.bf16.mxu0 %v190_v39 }
  0x1d   :  { %193 = vmatpush3.bf16.msra.mxu0 %v192_v44 }
  0x1e   :  { %195 = vmatprep.subr.bf16.mxu0 %v194_v45 }
  0x21   :  { %197 = vmatpush3.bf16.msra.mxu0 %v196_v48 }
  0x24   :  { %120 = vmatmul.mubr.f32.vlgmr.msra.gmra.mrb[0].mxu0 %v14_v49 }
  0xf7   :  { %v163_v50 = vpop.f32.mrb[0].mxu0 }
  0xf8   :  { %v164_v52 = vpop.f32.mrb[1].mxu0 }
  0xf9   :  { %v165_v53 = vadd.f32 %v164_v52, %v163_v50 }
  0xfb   :  { %v122_v54 = vadd.f32 %v165_v53, %v130_v51 }
  0xfd   :  { %125 = vst [vmem:[%s329_s3] sm:$0xff] %v122_v54 }

// kernel: anf_hyperprior_forward.21
= control target key start
LH: loop header
LB: loop body
LE: loop exit
PB: predicated region body
PF: predicated region fallthrough
CT: control target
= control target key end

     0   :  { %v194_v0 = vmov 0.0|0.0   ;;  %vm195_vm0 = vmmov 0   ;;  %v196_v4 = vmov 0.0   ;;  %s274_s1 = inlined_call_operand.vmem [shape: f32[128,128], index: 1, kind: input, shape index: {}]   ;;  %s275_s0 = inlined_call_operand.vmem [shape: f32[8,128], index: 0, kind: input, shape index: {}]   ;;  %s276_s2 = inlined_call_operand.vmem [shape: f32[1,128], index: 2, kind: input, shape index: {}]   ;;  %s277_s3 = inlined_call_operand.vmem [shape: f32[8,128], index: 3, kind: output, shape index: {}]  }
   0x1   :  { %167 = vmatprep.subr.bf16.mxu0 %v194_v0  ;;  %v15_v1 = vld [vmem:[%s274_s1] sm:$0xff]  ;;  %v16_v2 = vld [vmem:[%s274_s1 + $0x8] sm:$0xff]  ;;  %v17_v3 = vld [vmem:[%s274_s1 + $0x10] sm:$0xff]  ;;  %164 = vmatprep.mubr.msk.f32.mxu0 %vm195_vm0, %v196_v4 }
   0x2   :  { %v168_v5 = vpack.c.bf16 %v16_v2, %v15_v1  ;;  %v18_v6 = vld [vmem:[%s274_s1 + $0x18] sm:$0xff]  ;;  %v19_v8 = vld [vmem:[%s274_s1 + $0x20] sm:$0xff]  ;;  %v20_v9 = vld [vmem:[%s274_s1 + $0x28] sm:$0xff] }
   0x3   :  { %v171_v7 = vpack.c.bf16 %v18_v6, %v17_v3  ;;  %v174_v10 = vpack.c.bf16 %v20_v9, %v19_v8  ;;  %v21_v11 = vld [vmem:[%s274_s1 + $0x30] sm:$0xff]  ;;  %v22_v12 = vld [vmem:[%s274_s1 + $0x38] sm:$0xff]  ;;  %v23_v14 = vld [vmem:[%s274_s1 + $0x40] sm:$0xff] }
   0x4   :  { %169 = vmatpush3.bf16.msra.mxu0 %v168_v5  ;;  %v177_v13 = vpack.c.bf16 %v22_v12, %v21_v11  ;;  %v24_v15 = vld [vmem:[%s274_s1 + $0x48] sm:$0xff]  ;;  %v25_v17 = vld [vmem:[%s274_s1 + $0x50] sm:$0xff]  ;;  %v26_v18 = vld [vmem:[%s274_s1 + $0x58] sm:$0xff] }
   0x5   :  { %170 = vmatprep.subr.bf16.mxu0 %v194_v0  ;;  %v180_v16 = vpack.c.bf16 %v24_v15, %v23_v14  ;;  %v183_v19 = vpack.c.bf16 %v26_v18, %v25_v17  ;;  %v27_v20 = vld [vmem:[%s274_s1 + $0x60] sm:$0xff]  ;;  %v28_v21 = vld [vmem:[%s274_s1 + $0x68] sm:$0xff]  ;;  %v29_v23 = vld [vmem:[%s274_s1 + $0x70] sm:$0xff] }
   0x6   :  { %v186_v22 = vpack.c.bf16 %v28_v21, %v27_v20  ;;  %v30_v24 = vld [vmem:[%s274_s1 + $0x78] sm:$0xff]  ;;  %v14_v26 = vld [vmem:[%s275_s0] sm:$0xff] }
   0x7   :  { %v189_v25 = vpack.c.bf16 %v30_v24, %v29_v23  ;;  %v114_v27 = vld [vmem:[%s276_s2] ss:$0 sm:$0xff] }
   0x8   :  { %172 = vmatpush3.bf16.msra.mxu0 %v171_v7 }
   0x9   :  { %173 = vmatprep.subr.bf16.mxu0 %v194_v0 }
   0xc   :  { %175 = vmatpush3.bf16.msra.mxu0 %v174_v10 }
   0xd   :  { %176 = vmatprep.subr.bf16.mxu0 %v194_v0 }
  0x10   :  { %178 = vmatpush3.bf16.msra.mxu0 %v177_v13 }
  0x11   :  { %179 = vmatprep.subr.bf16.mxu0 %v194_v0 }
  0x14   :  { %181 = vmatpush3.bf16.msra.mxu0 %v180_v16 }
  0x15   :  { %182 = vmatprep.subr.bf16.mxu0 %v194_v0 }
  0x18   :  { %184 = vmatpush3.bf16.msra.mxu0 %v183_v19 }
  0x19   :  { %185 = vmatprep.subr.bf16.mxu0 %v194_v0 }
  0x1c   :  { %187 = vmatpush3.bf16.msra.mxu0 %v186_v22 }
  0x1d   :  { %188 = vmatprep.subr.bf16.mxu0 %v194_v0 }
  0x20   :  { %190 = vmatpush3.bf16.msra.mxu0 %v189_v25 }
  0x23   :  { %165 = vmatmul.mubr.f32.vlgmr.msra.gmra.mrb[0].mxu0 %v14_v26 }
  0xf6   :  { %v104_v28 = vpop.f32.mrb[0].mxu0 }
  0xf7   :  { %v105_v29 = vadd.f32 %v114_v27, %v104_v28  ;;  %v166_v30 = vpop.f32.mrb[1].mxu0 }
  0xf9   :  { %v108_v31 = vmax.f32 %v105_v29, 0.0 }
  0xfb   :  { %109 = vst [vmem:[%s277_s3] sm:$0xff] %v108_v31 }

// kernel: anf_hyperprior_forward.23
= control target key start
LH: loop header
LB: loop body
LE: loop exit
PB: predicated region body
PF: predicated region fallthrough
CT: control target
= control target key end

     0   :  { %s336_s1 = inlined_call_operand.vmem [shape: f32[128,128], index: 1, kind: input, shape index: {}]   ;;  %s337_s0 = inlined_call_operand.vmem [shape: f32[32,128], index: 0, kind: input, shape index: {}]   ;;  %s338_s2 = inlined_call_operand.vmem [shape: f32[1,128], index: 2, kind: input, shape index: {}]   ;;  %s339_s3 = inlined_call_operand.vmem [shape: f32[32,128], index: 3, kind: output, shape index: {}]  }
   0x1   :  { %v18_v0 = vld [vmem:[%s336_s1] sm:$0xff]  ;;  %v19_v1 = vld [vmem:[%s336_s1 + $0x8] sm:$0xff]  ;;  %v20_v2 = vld [vmem:[%s336_s1 + $0x10] sm:$0xff] }
   0x2   :  { %v193_v3 = vpack.c.bf16 %v19_v1, %v18_v0  ;;  %v21_v4 = vld [vmem:[%s336_s1 + $0x18] sm:$0xff]  ;;  %v22_v6 = vld [vmem:[%s336_s1 + $0x20] sm:$0xff]  ;;  %v23_v7 = vld [vmem:[%s336_s1 + $0x28] sm:$0xff] }
   0x3   :  { %v197_v5 = vpack.c.bf16 %v21_v4, %v20_v2  ;;  %v201_v8 = vpack.c.bf16 %v23_v7, %v22_v6  ;;  %v14_v9 = vld [vmem:[%s337_s0] sm:$0xff]  ;;  %v16_v10 = vld [vmem:[%s337_s0 + $0x10] sm:$0xff]  ;;  %v25_v12 = vld [vmem:[%s336_s1 + $0x38] sm:$0xff] }
   0x4   :  { %194 = vmatprep.subr.bf16.mxu0 %v193_v3  ;;  %225 = vmatprep.subr.bf16.mxu1 %v193_v3  ;;  %v24_v11 = vld [vmem:[%s336_s1 + $0x30] sm:$0xff]  ;;  %v26_v14 = vld [vmem:[%s336_s1 + $0x40] sm:$0xff]  ;;  %v27_v15 = vld [vmem:[%s336_s1 + $0x48] sm:$0xff] }
   0x5   :  { %196 = vmatpush3.bf16.msra.mxu0 %v193_v3  ;;  %233 = vmatpush3.bf16.msra.mxu1 %v193_v3  ;;  %v205_v13 = vpack.c.bf16 %v25_v12, %v24_v11  ;;  %v209_v16 = vpack.c.bf16 %v27_v15, %v26_v14  ;;  %v28_v17 = vld [vmem:[%s336_s1 + $0x50] sm:$0xff]  ;;  %v29_v18 = vld [vmem:[%s336_s1 + $0x58] sm:$0xff]  ;;  %v30_v20 = vld [vmem:[%s336_s1 + $0x60] sm:$0xff] }
   0x6   :  { %198 = vmatprep.subr.bf16.mxu0 %v197_v5  ;;  %226 = vmatprep.subr.bf16.mxu1 %v197_v5  ;;  %v213_v19 = vpack.c.bf16 %v29_v18, %v28_v17  ;;  %v31_v21 = vld [vmem:[%s336_s1 + $0x68] sm:$0xff]  ;;  %v32_v23 = vld [vmem:[%s336_s1 + $0x70] sm:$0xff]  ;;  %v33_v24 = vld [vmem:[%s336_s1 + $0x78] sm:$0xff] }
   0x7   :  { %187 = vmatprep.mubr.f32.mxu0 %v14_v9  ;;  %190 = vmatprep.mubr.f32.mxu1 %v16_v10  ;;  %v217_v22 = vpack.c.bf16 %v31_v21, %v30_v20  ;;  %v221_v25 = vpack.c.bf16 %v33_v24, %v32_v23  ;;  %v15_v26 = vld [vmem:[%s337_s0 + $0x8] sm:$0xff]  ;;  %v17_v27 = vld [vmem:[%s337_s0 + $0x18] sm:$0xff]  ;;  %v134_v28 = vld [vmem:[%s338_s2] ss:$0 sm:$0xff] }
   0x9   :  { %200 = vmatpush3.bf16.msra.mxu0 %v197_v5  ;;  %234 = vmatpush3.bf16.msra.mxu1 %v197_v5 }
   0xa   :  { %202 = vmatprep.subr.bf16.mxu0 %v201_v8  ;;  %227 = vmatprep.subr.bf16.mxu1 %v201_v8 }
   0xd   :  { %204 = vmatpush3.bf16.msra.mxu0 %v201_v8  ;;  %235 = vmatpush3.bf16.msra.mxu1 %v201_v8 }
   0xe   :  { %206 = vmatprep.subr.bf16.mxu0 %v205_v13  ;;  %228 = vmatprep.subr.bf16.mxu1 %v205_v13 }
  0x11   :  { %208 = vmatpush3.bf16.msra.mxu0 %v205_v13  ;;  %236 = vmatpush3.bf16.msra.mxu1 %v205_v13 }
  0x12   :  { %210 = vmatprep.subr.bf16.mxu0 %v209_v16  ;;  %229 = vmatprep.subr.bf16.mxu1 %v209_v16 }
  0x15   :  { %212 = vmatpush3.bf16.msra.mxu0 %v209_v16  ;;  %237 = vmatpush3.bf16.msra.mxu1 %v209_v16 }
  0x16   :  { %214 = vmatprep.subr.bf16.mxu0 %v213_v19  ;;  %230 = vmatprep.subr.bf16.mxu1 %v213_v19 }
  0x19   :  { %216 = vmatpush3.bf16.msra.mxu0 %v213_v19  ;;  %238 = vmatpush3.bf16.msra.mxu1 %v213_v19 }
  0x1a   :  { %218 = vmatprep.subr.bf16.mxu0 %v217_v22  ;;  %231 = vmatprep.subr.bf16.mxu1 %v217_v22 }
  0x1d   :  { %220 = vmatpush3.bf16.msra.mxu0 %v217_v22  ;;  %239 = vmatpush3.bf16.msra.mxu1 %v217_v22 }
  0x1e   :  { %222 = vmatprep.subr.bf16.mxu0 %v221_v25  ;;  %232 = vmatprep.subr.bf16.mxu1 %v221_v25 }
  0x21   :  { %224 = vmatpush3.bf16.msra.mxu0 %v221_v25  ;;  %240 = vmatpush3.bf16.msra.mxu1 %v221_v25 }
  0x24   :  { %188 = vmatmul.mubr.f32.vlgmr.msra.gmra.mrb[0].mxu0 %v15_v26  ;;  %191 = vmatmul.mubr.f32.vlgmr.msra.gmra.mrb[0].mxu1 %v17_v27 }
  0xf7   :  { %v189_v29 = vpop.f32.mrb[0].mxu0  ;;  %v192_v30 = vpop.f32.mrb[0].mxu1 }
  0xf8   :  { %v113_v31 = vadd.f32 %v189_v29, %v134_v28  ;;  %v123_v32 = vadd.f32 %v192_v30, %v134_v28  ;;  %v107_v33 = vpop.f32.mrb[1].mxu0  ;;  %v117_v34 = vpop.f32.mrb[1].mxu1 }
  0xf9   :  { %v108_v35 = vadd.f32 %v134_v28, %v107_v33  ;;  %v118_v36 = vadd.f32 %v134_v28, %v117_v34 }
  0xfa   :  { %127 = vst [vmem:[%s339_s3 + $0x8] sm:$0xff] %v113_v31  ;;  %129 = vst [vmem:[%s339_s3 + $0x18] sm:$0xff] %v123_v32 }
  0xfb   :  { %126 = vst [vmem:[%s339_s3] sm:$0xff] %v108_v35  ;;  %128 = vst [vmem:[%s339_s3 + $0x10] sm:$0xff] %v118_v36 }

// kernel: anf_hyperprior_forward.24
= control target key start
LH: loop header
LB: loop body
LE: loop exit
PB: predicated region body
PF: predicated region fallthrough
CT: control target
= control target key end

     0   :  { %s630_s1 = inlined_call_operand.vmem [shape: f32[128,128], index: 1, kind: input, shape index: {}]   ;;  %s631_s0 = inlined_call_operand.vmem [shape: f32[32,128], index: 0, kind: input, shape index: {}]   ;;  %s632_s3 = inlined_call_operand.vmem [shape: f32[128,128], index: 3, kind: input, shape index: {}]   ;;  %s633_s2 = inlined_call_operand.vmem [shape: f32[1,128], index: 2, kind: input, shape index: {}]   ;;  %s634_s4 = inlined_call_operand.vmem [shape: f32[1,128], index: 4, kind: input, shape index: {}]   ;;  %s635_s5 = inlined_call_operand.vmem [shape: f32[32,128], index: 5, kind: output, shape index: {}]  }
   0x1   :  { %v24_v0 = vld [vmem:[%s630_s1] sm:$0xff]  ;;  %v25_v1 = vld [vmem:[%s630_s1 + $0x8] sm:$0xff]  ;;  %v26_v2 = vld [vmem:[%s630_s1 + $0x10] sm:$0xff] }
   0x2   :  { %v402_v3 = vpack.c.bf16 %v25_v1, %v24_v0  ;;  %v27_v4 = vld [vmem:[%s630_s1 + $0x18] sm:$0xff]  ;;  %v28_v6 = vld [vmem:[%s630_s1 + $0x20] sm:$0xff]  ;;  %v29_v7 = vld [vmem:[%s630_s1 + $0x28] sm:$0xff] }
   0x3   :  { %v406_v5 = vpack.c.bf16 %v27_v4, %v26_v2  ;;  %v410_v8 = vpack.c.bf16 %v29_v7, %v28_v6  ;;  %v20_v9 = vld [vmem:[%s631_s0] sm:$0xff]  ;;  %v30_v10 = vld [vmem:[%s630_s1 + $0x30] sm:$0xff]  ;;  %v31_v11 = vld [vmem:[%s630_s1 + $0x38] sm:$0xff] }
   0x4   :  { %403 = vmatprep.subr.bf16.mxu0 %v402_v3  ;;  %358 = vmatprep.mubr.f32.mxu0 %v20_v9  ;;  %v136_v12 = vld [vmem:[%s632_s3] sm:$0xff]  ;;  %v137_v13 = vld [vmem:[%s632_s3 + $0x8] sm:$0xff]  ;;  %v138_v14 = vld [vmem:[%s632_s3 + $0x10] sm:$0xff]  ;;  %v414_v18 = vpack.c.bf16 %v31_v11, %v30_v10 }
   0x5   :  { %405 = vmatpush3.bf16.msra.mxu0 %v402_v3  ;;  %v139_v15 = vld [vmem:[%s632_s3 + $0x18] sm:$0xff]  ;;  %v434_v16 = vpack.c.bf16 %v137_v13, %v136_v12  ;;  %v140_v19 = vld [vmem:[%s632_s3 + $0x20] sm:$0xff]  ;;  %v141_v20 = vld [vmem:[%s632_s3 + $0x28] sm:$0xff] }
   0x6   :  { %407 = vmatprep.subr.bf16.mxu0 %v406_v5  ;;  %v438_v17 = vpack.c.bf16 %v139_v15, %v138_v14  ;;  %v32_v21 = vld [vmem:[%s630_s1 + $0x40] sm:$0xff]  ;;  %v33_v22 = vld [vmem:[%s630_s1 + $0x48] sm:$0xff]  ;;  %v442_v23 = vpack.c.bf16 %v141_v20, %v140_v19  ;;  %v142_v25 = vld [vmem:[%s632_s3 + $0x30] sm:$0xff] }
   0x7   :  { %435 = vmatprep.subr.bf16.mxu1 %v434_v16  ;;  %v418_v24 = vpack.c.bf16 %v33_v22, %v32_v21  ;;  %v143_v26 = vld [vmem:[%s632_s3 + $0x38] sm:$0xff]  ;;  %v34_v27 = vld [vmem:[%s630_s1 + $0x50] sm:$0xff]  ;;  %v144_v31 = vld [vmem:[%s632_s3 + $0x40] sm:$0xff] }
   0x8   :  { %437 = vmatpush3.bf16.msra.mxu1 %v434_v16  ;;  %v35_v28 = vld [vmem:[%s630_s1 + $0x58] sm:$0xff]  ;;  %v446_v29 = vpack.c.bf16 %v143_v26, %v142_v25  ;;  %v145_v32 = vld [vmem:[%s632_s3 + $0x48] sm:$0xff]  ;;  %v36_v33 = vld [vmem:[%s630_s1 + $0x60] sm:$0xff] }
   0x9   :  { %409 = vmatpush3.bf16.msra.mxu0 %v406_v5  ;;  %439 = vmatprep.subr.bf16.mxu1 %v438_v17  ;;  %v422_v30 = vpack.c.bf16 %v35_v28, %v34_v27  ;;  %v37_v34 = vld [vmem:[%s630_s1 + $0x68] sm:$0xff]  ;;  %v450_v35 = vpack.c.bf16 %v145_v32, %v144_v31  ;;  %v146_v37 = vld [vmem:[%s632_s3 + $0x50] sm:$0xff]  ;;  %v147_v38 = vld [vmem:[%s632_s3 + $0x58] sm:$0xff] }
   0xa   :  { %411 = vmatprep.subr.bf16.mxu0 %v410_v8  ;;  %v426_v36 = vpack.c.bf16 %v37_v34, %v36_v33  ;;  %v38_v39 = vld [vmem:[%s630_s1 + $0x70] sm:$0xff]  ;;  %v39_v40 = vld [vmem:[%s630_s1 + $0x78] sm:$0xff]  ;;  %v454_v41 = vpack.c.bf16 %v147_v38, %v146_v37  ;;  %v148_v43 = vld [vmem:[%s632_s3 + $0x60] sm:$0xff] }
   0xb   :  { %v430_v42 = vpack.c.bf16 %v39_v40, %v38_v39  ;;  %v149_v44 = vld [vmem:[%s632_s3 + $0x68] sm:$0xff]  ;;  %v22_v47 = vld [vmem:[%s631_s0 + $0x10] sm:$0xff]  ;;  %v23_v48 = vld [vmem:[%s631_s0 + $0x18] sm:$0xff] }
   0xc   :  { %441 = vmatpush3.bf16.msra.mxu1 %v438_v17  ;;  %v458_v45 = vpack.c.bf16 %v149_v44, %v148_v43  ;;  %v21_v46 = vld [vmem:[%s631_s0 + $0x8] sm:$0xff]  ;;  %v150_v49 = vld [vmem:[%s632_s3 + $0x70] sm:$0xff]  ;;  %v151_v50 = vld [vmem:[%s632_s3 + $0x78] sm:$0xff] }
   0xd   :  { %413 = vmatpush3.bf16.msra.mxu0 %v410_v8  ;;  %443 = vmatprep.subr.bf16.mxu1 %v442_v23  ;;  %v462_v51 = vpack.c.bf16 %v151_v50, %v150_v49  ;;  %v284_v52 = vld [vmem:[%s633_s2] ss:$0 sm:$0xff] }
   0xe   :  { %415 = vmatprep.subr.bf16.mxu0 %v414_v18  ;;  %v285_v1 = vld [vmem:[%s634_s4] ss:$0 sm:$0xff] }
  0x10   :  { %445 = vmatpush3.bf16.msra.mxu1 %v442_v23 }
  0x11   :  { %417 = vmatpush3.bf16.msra.mxu0 %v414_v18  ;;  %447 = vmatprep.subr.bf16.mxu1 %v446_v29 }
  0x12   :  { %419 = vmatprep.subr.bf16.mxu0 %v418_v24 }
  0x14   :  { %449 = vmatpush3.bf16.msra.mxu1 %v446_v29 }
  0x15   :  { %421 = vmatpush3.bf16.msra.mxu0 %v418_v24  ;;  %451 = vmatprep.subr.bf16.mxu1 %v450_v35 }
  0x16   :  { %423 = vmatprep.subr.bf16.mxu0 %v422_v30 }
  0x18   :  { %453 = vmatpush3.bf16.msra.mxu1 %v450_v35 }
  0x19   :  { %425 = vmatpush3.bf16.msra.mxu0 %v422_v30  ;;  %455 = vmatprep.subr.bf16.mxu1 %v454_v41 }
  0x1a   :  { %427 = vmatprep.subr.bf16.mxu0 %v426_v36 }
  0x1c   :  { %457 = vmatpush3.bf16.msra.mxu1 %v454_v41 }
  0x1d   :  { %429 = vmatpush3.bf16.msra.mxu0 %v426_v36  ;;  %459 = vmatprep.subr.bf16.mxu1 %v458_v45 }
  0x1e   :  { %431 = vmatprep.subr.bf16.mxu0 %v430_v42 }
  0x20   :  { %461 = vmatpush3.bf16.msra.mxu1 %v458_v45 }
  0x21   :  { %433 = vmatpush3.bf16.msra.mxu0 %v430_v42  ;;  %463 = vmatprep.subr.bf16.mxu1 %v462_v51 }
  0x24   :  { %359 = vmatmul.mubr.f32.vlgmr.msra.gmra.mrb[0].mxu0 %v21_v46  ;;  %465 = vmatpush3.bf16.msra.mxu1 %v462_v51 }
  0x25   :  { %361 = vmatprep.mubr.f32.mxu0 %v22_v47 }
  0x28   :  { %362 = vmatmul.mubr.f32.gmra.mrb[2].mxu0 %v23_v48 }
  0xf7   :  { %v360_v53 = vpop.f32.mrb[0].mxu0 }
  0xf8   :  { %v119_v54 = vadd.f32 %v360_v53, %v284_v52  ;;  %v113_v55 = vpop.f32.mrb[1].mxu0 }
  0xf9   :  { %v114_v56 = vadd.f32 %v284_v52, %v113_v55 }
  0xfa   :  { %v133_v59 = vmul.f32 %v119_v54, %v119_v54 }
  0xfb   :  { %v363_v57 = vpop.f32.mrb[2].mxu0  ;;  %v132_v58 = vmul.f32 %v114_v56, %v114_v56 }
  0xfc   :  { %v129_v60 = vadd.f32 %v363_v57, %v284_v52  ;;  %v123_v61 = vpop.f32.mrb[3].mxu0 }
  0xfd   :  { %v124_v62 = vadd.f32 %v284_v52, %v123_v61  ;;  %396 = vmatprep.mubr.f32.mxu1 %v132_v58 }
  0xfe   :  { %397 = vmatmul.mubr.f32.vlgmr.msra.gmra.mrb[0].mxu1 %v133_v59  ;;  %v135_v0 = vmul.f32 %v129_v60, %v129_v60 }
  0xff   :  { %v134_v63 = vmul.f32 %v124_v62, %v124_v62 }
 0x101   :  { %399 = vmatprep.mubr.f32.mxu1 %v134_v63 }
 0x102   :  { %400 = vmatmul.mubr.f32.gmra.mrb[2].mxu1 %v135_v0 }
 0x1d1   :  { %v398_v2 = vpop.f32.mrb[0].mxu1 }
 0x1d2   :  { %v231_v3 = vadd.f32 %v398_v2, %v285_v1  ;;  %v225_v4 = vpop.f32.mrb[1].mxu1 }
 0x1d3   :  { %v226_v5 = vadd.f32 %v285_v1, %v225_v4 }
 0x1d4   :  { %466 = vrsqrt.f32 %v231_v3  ;;  %vm253_vm0 = vcmp.eq.f32.partialorder %v231_v3, inf  ;;  %v256_v13 = vand.u32 2147483648, %v231_v3  ;;  %vm255_vm1 = vcmp.eq.f32.partialorder %v231_v3, 0.0 }
 0x1d5   :  { %468 = vrsqrt.f32 %v226_v5  ;;  %v401_v6 = vpop.f32.mrb[2].mxu1  ;;  %vm246_vm2 = vcmp.eq.f32.partialorder %v226_v5, inf  ;;  %v249_v16 = vand.u32 2147483648, %v226_v5  ;;  %vm248_vm3 = vcmp.eq.f32.partialorder %v226_v5, 0.0 }
 0x1d6   :  { %v241_v7 = vadd.f32 %v401_v6, %v285_v1  ;;  %v235_v8 = vpop.f32.mrb[3].mxu1 }
 0x1d7   :  { %v236_v9 = vadd.f32 %v285_v1, %v235_v8 }
 0x1d8   :  { %470 = vrsqrt.f32 %v241_v7  ;;  %vm267_vm4 = vcmp.eq.f32.partialorder %v241_v7, inf  ;;  %v270_v25 = vand.u32 2147483648, %v241_v7  ;;  %vm269_vm5 = vcmp.eq.f32.partialorder %v241_v7, 0.0 }
 0x1d9   :  { %472 = vrsqrt.f32 %v236_v9  ;;  %vm260_vm6 = vcmp.eq.f32.partialorder %v236_v9, inf  ;;  %v263_v28 = vand.u32 2147483648, %v236_v9  ;;  %vm262_vm7 = vcmp.eq.f32.partialorder %v236_v9, 0.0 }
 0x1de   :  { %v467_v10 = vpop.eup %466 }
 0x1df   :  { %v469_v11 = vpop.eup %468  ;;  %v252_v12 = vmul.f32 %v467_v10, %v231_v3 }
 0x1e0   :  { %v245_v14 = vmul.f32 %v469_v11, %v226_v5 }
 0x1e1   :  { %v254_v15 = vsel %vm253_vm0, %v231_v3, %v252_v12 }
 0x1e2   :  { %v471_v17 = vpop.eup %470  ;;  %v257_v18 = vsel %vm255_vm1, %v256_v13, %v254_v15  ;;  %v247_v19 = vsel %vm246_vm2, %v226_v5, %v245_v14 }
 0x1e3   :  { %v473_v20 = vpop.eup %472  ;;  %v273_v21 = vmul.f32 %v257_v18, %v119_v54  ;;  %v250_v22 = vsel %vm248_vm3, %v249_v16, %v247_v19  ;;  %v266_v23 = vmul.f32 %v471_v17, %v241_v7 }
 0x1e4   :  { %v272_v24 = vmul.f32 %v250_v22, %v114_v56  ;;  %v259_v26 = vmul.f32 %v473_v20, %v236_v9 }
 0x1e5   :  { %277 = vst [vmem:[%s635_s5 + $0x8] sm:$0xff] %v273_v21  ;;  %v268_v27 = vsel %vm267_vm4, %v241_v7, %v266_v23 }
 0x1e6   :  { %276 = vst [vmem:[%s635_s5] sm:$0xff] %v272_v24  ;;  %v271_v29 = vsel %vm269_vm5, %v270_v25, %v268_v27  ;;  %v261_v30 = vsel %vm260_vm6, %v236_v9, %v259_v26 }
 0x1e7   :  { %v275_v31 = vmul.f32 %v271_v29, %v129_v60  ;;  %v264_v32 = vsel %vm262_vm7, %v263_v28, %v261_v30 }
 0x1e8   :  { %v274_v33 = vmul.f32 %v264_v32, %v124_v62 }
 0x1e9   :  { %279 = vst [vmem:[%s635_s5 + $0x18] sm:$0xff] %v275_v31 }
 0x1ea   :  { %278 = vst [vmem:[%s635_s5 + $0x10] sm:$0xff] %v274_v33 }

// kernel: anf_hyperprior_forward.25
= control target key start
LH: loop header
LB: loop body
LE: loop exit
PB: predicated region body
PF: predicated region fallthrough
CT: control target
= control target key end

     0   :  { %s1236_s1 = inlined_call_operand.vmem [shape: f32[128,128], index: 1, kind: input, shape index: {}]   ;;  %s1237_s0 = inlined_call_operand.vmem [shape: f32[128,128], index: 0, kind: input, shape index: {}]   ;;  %s1238_s3 = inlined_call_operand.vmem [shape: f32[128,128], index: 3, kind: input, shape index: {}]   ;;  %s1239_s2 = inlined_call_operand.vmem [shape: f32[1,128], index: 2, kind: input, shape index: {}]   ;;  %s1240_s4 = inlined_call_operand.vmem [shape: f32[1,128], index: 4, kind: input, shape index: {}]   ;;  %s1241_s5 = inlined_call_operand.vmem [shape: f32[128,128], index: 5, kind: output, shape index: {}]  }
   0x1   :  { %v36_v0 = vld [vmem:[%s1236_s1] sm:$0xff]  ;;  %v37_v1 = vld [vmem:[%s1236_s1 + $0x8] sm:$0xff]  ;;  %v38_v2 = vld [vmem:[%s1236_s1 + $0x10] sm:$0xff] }
   0x2   :  { %v714_v3 = vpack.c.bf16 %v37_v1, %v36_v0  ;;  %v39_v4 = vld [vmem:[%s1236_s1 + $0x18] sm:$0xff]  ;;  %v40_v6 = vld [vmem:[%s1236_s1 + $0x20] sm:$0xff]  ;;  %v41_v7 = vld [vmem:[%s1236_s1 + $0x28] sm:$0xff] }
   0x3   :  { %v718_v5 = vpack.c.bf16 %v39_v4, %v38_v2  ;;  %v722_v8 = vpack.c.bf16 %v41_v7, %v40_v6  ;;  %v20_v9 = vld [vmem:[%s1237_s0] sm:$0xff]  ;;  %v42_v10 = vld [vmem:[%s1236_s1 + $0x30] sm:$0xff]  ;;  %v43_v11 = vld [vmem:[%s1236_s1 + $0x38] sm:$0xff] }
   0x4   :  { %715 = vmatprep.subr.bf16.mxu0 %v714_v3  ;;  %634 = vmatprep.mubr.f32.mxu0 %v20_v9  ;;  %v726_v12 = vpack.c.bf16 %v43_v11, %v42_v10  ;;  %v44_v13 = vld [vmem:[%s1236_s1 + $0x40] sm:$0xff]  ;;  %v45_v14 = vld [vmem:[%s1236_s1 + $0x48] sm:$0xff]  ;;  %v222_v17 = vld [vmem:[%s1238_s3 + $0x10] sm:$0xff] }
   0x5   :  { %717 = vmatpush3.bf16.msra.mxu0 %v714_v3  ;;  %v220_v15 = vld [vmem:[%s1238_s3] sm:$0xff]  ;;  %v221_v16 = vld [vmem:[%s1238_s3 + $0x8] sm:$0xff]  ;;  %v223_v18 = vld [vmem:[%s1238_s3 + $0x18] sm:$0xff]  ;;  %v730_v21 = vpack.c.bf16 %v45_v14, %v44_v13 }
   0x6   :  { %719 = vmatprep.subr.bf16.mxu0 %v718_v5  ;;  %v746_v19 = vpack.c.bf16 %v221_v16, %v220_v15  ;;  %v750_v20 = vpack.c.bf16 %v223_v18, %v222_v17  ;;  %v224_v22 = vld [vmem:[%s1238_s3 + $0x20] sm:$0xff]  ;;  %v225_v23 = vld [vmem:[%s1238_s3 + $0x28] sm:$0xff]  ;;  %v46_v24 = vld [vmem:[%s1236_s1 + $0x50] sm:$0xff] }
   0x7   :  { %v47_v25 = vld [vmem:[%s1236_s1 + $0x58] sm:$0xff]  ;;  %v754_v26 = vpack.c.bf16 %v225_v23, %v224_v22  ;;  %v226_v28 = vld [vmem:[%s1238_s3 + $0x30] sm:$0xff]  ;;  %v48_v30 = vld [vmem:[%s1236_s1 + $0x60] sm:$0xff] }
   0x8   :  { %747 = vmatprep.subr.bf16.mxu1 %v746_v19  ;;  %v734_v27 = vpack.c.bf16 %v47_v25, %v46_v24  ;;  %v227_v29 = vld [vmem:[%s1238_s3 + $0x38] sm:$0xff]  ;;  %v49_v31 = vld [vmem:[%s1236_s1 + $0x68] sm:$0xff]  ;;  %v228_v34 = vld [vmem:[%s1238_s3 + $0x40] sm:$0xff] }
   0x9   :  { %721 = vmatpush3.bf16.msra.mxu0 %v718_v5  ;;  %749 = vmatpush3.bf16.msra.mxu1 %v746_v19  ;;  %v758_v32 = vpack.c.bf16 %v227_v29, %v226_v28  ;;  %v738_v33 = vpack.c.bf16 %v49_v31, %v48_v30  ;;  %v229_v35 = vld [vmem:[%s1238_s3 + $0x48] sm:$0xff]  ;;  %v50_v36 = vld [vmem:[%s1236_s1 + $0x70] sm:$0xff]  ;;  %v51_v37 = vld [vmem:[%s1236_s1 + $0x78] sm:$0xff] }
   0xa   :  { %723 = vmatprep.subr.bf16.mxu0 %v722_v8  ;;  %751 = vmatprep.subr.bf16.mxu1 %v750_v20  ;;  %v762_v38 = vpack.c.bf16 %v229_v35, %v228_v34  ;;  %v742_v39 = vpack.c.bf16 %v51_v37, %v50_v36  ;;  %v230_v40 = vld [vmem:[%s1238_s3 + $0x50] sm:$0xff]  ;;  %v231_v41 = vld [vmem:[%s1238_s3 + $0x58] sm:$0xff]  ;;  %v232_v43 = vld [vmem:[%s1238_s3 + $0x60] sm:$0xff] }
   0xb   :  { %v766_v42 = vpack.c.bf16 %v231_v41, %v230_v40  ;;  %v233_v44 = vld [vmem:[%s1238_s3 + $0x68] sm:$0xff]  ;;  %v22_v47 = vld [vmem:[%s1237_s0 + $0x10] sm:$0xff]  ;;  %v23_v48 = vld [vmem:[%s1237_s0 + $0x18] sm:$0xff] }
   0xc   :  { %v21_v45 = vld [vmem:[%s1237_s0 + $0x8] sm:$0xff]  ;;  %v770_v46 = vpack.c.bf16 %v233_v44, %v232_v43  ;;  %v24_v49 = vld [vmem:[%s1237_s0 + $0x20] sm:$0xff]  ;;  %v26_v51 = vld [vmem:[%s1237_s0 + $0x30] sm:$0xff] }
   0xd   :  { %725 = vmatpush3.bf16.msra.mxu0 %v722_v8  ;;  %753 = vmatpush3.bf16.msra.mxu1 %v750_v20  ;;  %v25_v50 = vld [vmem:[%s1237_s0 + $0x28] sm:$0xff]  ;;  %v27_v52 = vld [vmem:[%s1237_s0 + $0x38] sm:$0xff]  ;;  %v28_v53 = vld [vmem:[%s1237_s0 + $0x40] sm:$0xff] }
   0xe   :  { %727 = vmatprep.subr.bf16.mxu0 %v726_v12  ;;  %755 = vmatprep.subr.bf16.mxu1 %v754_v26  ;;  %v29_v54 = vld [vmem:[%s1237_s0 + $0x48] sm:$0xff]  ;;  %v30_v55 = vld [vmem:[%s1237_s0 + $0x50] sm:$0xff]  ;;  %v31_v56 = vld [vmem:[%s1237_s0 + $0x58] sm:$0xff] }
   0xf   :  { %v32_v57 = vld [vmem:[%s1237_s0 + $0x60] sm:$0xff]  ;;  %v33_v58 = vld [vmem:[%s1237_s0 + $0x68] sm:$0xff]  ;;  %v34_v59 = vld [vmem:[%s1237_s0 + $0x70] sm:$0xff] }
  0x10   :  { %v35_v60 = vld [vmem:[%s1237_s0 + $0x78] sm:$0xff]  ;;  %v234_v61 = vld [vmem:[%s1238_s3 + $0x70] sm:$0xff]  ;;  %v536_v0 = vld [vmem:[%s1239_s2] ss:$0 sm:$0xff] }
  0x11   :  { %729 = vmatpush3.bf16.msra.mxu0 %v726_v12  ;;  %757 = vmatpush3.bf16.msra.mxu1 %v754_v26  ;;  %v235_v62 = vld [vmem:[%s1238_s3 + $0x78] sm:$0xff] }
  0x12   :  { %731 = vmatprep.subr.bf16.mxu0 %v730_v21  ;;  %759 = vmatprep.subr.bf16.mxu1 %v758_v32  ;;  %v774_v63 = vpack.c.bf16 %v235_v62, %v234_v61 }
  0x15   :  { %733 = vmatpush3.bf16.msra.mxu0 %v730_v21  ;;  %761 = vmatpush3.bf16.msra.mxu1 %v758_v32 }
  0x16   :  { %735 = vmatprep.subr.bf16.mxu0 %v734_v27  ;;  %763 = vmatprep.subr.bf16.mxu1 %v762_v38 }
  0x19   :  { %737 = vmatpush3.bf16.msra.mxu0 %v734_v27  ;;  %765 = vmatpush3.bf16.msra.mxu1 %v762_v38 }
  0x1a   :  { %739 = vmatprep.subr.bf16.mxu0 %v738_v33  ;;  %767 = vmatprep.subr.bf16.mxu1 %v766_v42 }
  0x1d   :  { %741 = vmatpush3.bf16.msra.mxu0 %v738_v33  ;;  %769 = vmatpush3.bf16.msra.mxu1 %v766_v42 }
  0x1e   :  { %743 = vmatprep.subr.bf16.mxu0 %v742_v39  ;;  %771 = vmatprep.subr.bf16.mxu1 %v770_v46 }
  0x21   :  { %745 = vmatpush3.bf16.msra.mxu0 %v742_v39  ;;  %773 = vmatpush3.bf16.msra.mxu1 %v770_v46 }
  0x22   :  { %775 = vmatprep.subr.bf16.mxu1 %v774_v63 }
  0x24   :  { %635 = vmatmul.mubr.f32.vlgmr.msra.gmra.mrb[0].mxu0 %v21_v45 }
  0x25   :  { %637 = vmatprep.mubr.f32.mxu0 %v22_v47  ;;  %777 = vmatpush3.bf16.msra.mxu1 %v774_v63 }
  0x28   :  { %638 = vmatmul.mubr.f32.gmra.mrb[2].mxu0 %v23_v48 }
  0x29   :  { %640 = vmatprep.mubr.f32.mxu0 %v24_v49  ;;  %v1054_v49 = vld [vmem:[%s1240_s4] ss:$0 sm:$0xff] }
  0x2c   :  { %641 = vmatmul.mubr.f32.gmra.mrb[4].mxu0 %v25_v50 }
  0x2d   :  { %643 = vmatprep.mubr.f32.mxu0 %v26_v51 }
  0x30   :  { %644 = vmatmul.mubr.f32.gmra.mrb[6].mxu0 %v27_v52 }
  0x31   :  { %646 = vmatprep.mubr.f32.mxu0 %v28_v53 }
  0x34   :  { %647 = vmatmul.mubr.f32.gmra.mrb[8].mxu0 %v29_v54 }
  0x35   :  { %649 = vmatprep.mubr.f32.mxu0 %v30_v55 }
  0x38   :  { %650 = vmatmul.mubr.f32.gmra.mrb[10].mxu0 %v31_v56 }
  0x39   :  { %652 = vmatprep.mubr.f32.mxu0 %v32_v57 }
  0x3c   :  { %653 = vmatmul.mubr.f32.gmra.mrb[12].mxu0 %v33_v58 }
  0x3d   :  { %655 = vmatprep.mubr.f32.mxu0 %v34_v59 }
  0x40   :  { %656 = vmatmul.mubr.f32.gmra.mrb[14].mxu0 %v35_v60 }
  0xf7   :  { %v636_v1 = vpop.f32.mrb[0].mxu0 }
  0xf8   :  { %v987_v2 = vadd.f32 %v636_v1, %v536_v0  ;;  %v125_v3 = vpop.f32.mrb[1].mxu0 }
  0xf9   :  { %v989_v4 = vadd.f32 %v536_v0, %v125_v3 }
  0xfa   :  { %v205_v7 = vmul.f32 %v987_v2, %v987_v2 }
  0xfb   :  { %v639_v5 = vpop.f32.mrb[2].mxu0  ;;  %v204_v6 = vmul.f32 %v989_v4, %v989_v4 }
  0xfc   :  { %v995_v8 = vadd.f32 %v639_v5, %v536_v0  ;;  %v135_v9 = vpop.f32.mrb[3].mxu0 }
  0xfd   :  { %v997_v10 = vadd.f32 %v536_v0, %v135_v9  ;;  %690 = vmatprep.mubr.f32.mxu1 %v204_v6 }
  0xfe   :  { %691 = vmatmul.mubr.f32.vlgmr.msra.gmra.mrb[0].mxu1 %v205_v7  ;;  %v207_v13 = vmul.f32 %v995_v8, %v995_v8 }
  0xff   :  { %v206_v11 = vmul.f32 %v997_v10, %v997_v10  ;;  %v642_v12 = vpop.f32.mrb[4].mxu0 }
 0x100   :  { %v1003_v14 = vadd.f32 %v642_v12, %v536_v0  ;;  %v145_v15 = vpop.f32.mrb[5].mxu0 }
 0x101   :  { %v1005_v16 = vadd.f32 %v536_v0, %v145_v15  ;;  %693 = vmatprep.mubr.f32.mxu1 %v206_v11 }
 0x102   :  { %694 = vmatmul.mubr.f32.gmra.mrb[2].mxu1 %v207_v13  ;;  %v209_v19 = vmul.f32 %v1003_v14, %v1003_v14 }
 0x103   :  { %v208_v17 = vmul.f32 %v1005_v16, %v1005_v16  ;;  %v645_v18 = vpop.f32.mrb[6].mxu0 }
 0x104   :  { %v1011_v20 = vadd.f32 %v645_v18, %v536_v0  ;;  %v155_v21 = vpop.f32.mrb[7].mxu0 }
 0x105   :  { %v1013_v22 = vadd.f32 %v536_v0, %v155_v21  ;;  %696 = vmatprep.mubr.f32.mxu1 %v208_v17 }
 0x106   :  { %697 = vmatmul.mubr.f32.gmra.mrb[4].mxu1 %v209_v19  ;;  %v211_v25 = vmul.f32 %v1011_v20, %v1011_v20 }
 0x107   :  { %v210_v23 = vmul.f32 %v1013_v22, %v1013_v22  ;;  %v648_v24 = vpop.f32.mrb[8].mxu0 }
 0x108   :  { %v1019_v26 = vadd.f32 %v648_v24, %v536_v0  ;;  %v165_v27 = vpop.f32.mrb[9].mxu0 }
 0x109   :  { %v1021_v28 = vadd.f32 %v536_v0, %v165_v27  ;;  %699 = vmatprep.mubr.f32.mxu1 %v210_v23 }
 0x10a   :  { %700 = vmatmul.mubr.f32.gmra.mrb[6].mxu1 %v211_v25  ;;  %v213_v31 = vmul.f32 %v1019_v26, %v1019_v26 }
 0x10b   :  { %v212_v29 = vmul.f32 %v1021_v28, %v1021_v28  ;;  %v651_v30 = vpop.f32.mrb[10].mxu0 }
 0x10c   :  { %v1027_v32 = vadd.f32 %v651_v30, %v536_v0  ;;  %v175_v33 = vpop.f32.mrb[11].mxu0 }
 0x10d   :  { %v1029_v34 = vadd.f32 %v536_v0, %v175_v33  ;;  %702 = vmatprep.mubr.f32.mxu1 %v212_v29 }
 0x10e   :  { %703 = vmatmul.mubr.f32.gmra.mrb[8].mxu1 %v213_v31  ;;  %v215_v37 = vmul.f32 %v1027_v32, %v1027_v32 }
 0x10f   :  { %v214_v35 = vmul.f32 %v1029_v34, %v1029_v34  ;;  %v654_v36 = vpop.f32.mrb[12].mxu0 }
 0x110   :  { %v1035_v38 = vadd.f32 %v654_v36, %v536_v0  ;;  %v185_v39 = vpop.f32.mrb[13].mxu0 }
 0x111   :  { %v1037_v40 = vadd.f32 %v536_v0, %v185_v39  ;;  %705 = vmatprep.mubr.f32.mxu1 %v214_v35 }
 0x112   :  { %706 = vmatmul.mubr.f32.gmra.mrb[10].mxu1 %v215_v37  ;;  %v217_v43 = vmul.f32 %v1035_v38, %v1035_v38 }
 0x113   :  { %v216_v41 = vmul.f32 %v1037_v40, %v1037_v40  ;;  %v657_v42 = vpop.f32.mrb[14].mxu0 }
 0x114   :  { %v1043_v44 = vadd.f32 %v657_v42, %v536_v0  ;;  %v195_v45 = vpop.f32.mrb[15].mxu0 }
 0x115   :  { %v1045_v46 = vadd.f32 %v536_v0, %v195_v45  ;;  %708 = vmatprep.mubr.f32.mxu1 %v216_v41 }
 0x116   :  { %709 = vmatmul.mubr.f32.gmra.mrb[12].mxu1 %v217_v43  ;;  %v219_v48 = vmul.f32 %v1043_v44, %v1043_v44 }
 0x117   :  { %v218_v47 = vmul.f32 %v1045_v46, %v1045_v46 }
 0x119   :  { %711 = vmatprep.mubr.f32.mxu1 %v218_v47 }
 0x11a   :  { %712 = vmatmul.mubr.f32.gmra.mrb[14].mxu1 %v219_v48 }
 0x1d1   :  { %v692_v50 = vpop.f32.mrb[0].mxu1 }
 0x1d2   :  { %v315_v51 = vadd.f32 %v692_v50, %v1054_v49  ;;  %v309_v52 = vpop.f32.mrb[1].mxu1 }
 0x1d3   :  { %v310_v53 = vadd.f32 %v1054_v49, %v309_v52 }
 0x1d4   :  { %778 = vrsqrt.f32 %v315_v51  ;;  %vm397_vm0 = vcmp.eq.f32.partialorder %v315_v51, inf  ;;  %vm399_vm1 = vcmp.eq.f32.partialorder %v315_v51, 0.0  ;;  %v400_v6 = vand.u32 2147483648, %v315_v51 }
 0x1d5   :  { %780 = vrsqrt.f32 %v310_v53  ;;  %v695_v54 = vpop.f32.mrb[2].mxu1  ;;  %vm390_vm2 = vcmp.eq.f32.partialorder %v310_v53, inf  ;;  %vm392_vm3 = vcmp.eq.f32.partialorder %v310_v53, 0.0  ;;  %v393_v11 = vand.u32 2147483648, %v310_v53 }
 0x1d6   :  { %v325_v55 = vadd.f32 %v695_v54, %v1054_v49  ;;  %v319_v56 = vpop.f32.mrb[3].mxu1 }
 0x1d7   :  { %v320_v57 = vadd.f32 %v1054_v49, %v319_v56 }
 0x1d8   :  { %782 = vrsqrt.f32 %v325_v55  ;;  %vm411_vm4 = vcmp.eq.f32.partialorder %v325_v55, inf  ;;  %vm413_vm5 = vcmp.eq.f32.partialorder %v325_v55, 0.0  ;;  %v414_v19 = vand.u32 2147483648, %v325_v55 }
 0x1d9   :  { %784 = vrsqrt.f32 %v320_v57  ;;  %v698_v58 = vpop.f32.mrb[4].mxu1  ;;  %vm404_vm6 = vcmp.eq.f32.partialorder %v320_v57, inf  ;;  %vm406_vm7 = vcmp.eq.f32.partialorder %v320_v57, 0.0 }
 0x1da   :  { %v1061_v59 = vadd.f32 %v698_v58, %v1054_v49  ;;  %v329_v60 = vpop.f32.mrb[5].mxu1 }
 0x1db   :  { %v1064_v61 = vadd.f32 %v1054_v49, %v329_v60 }
 0x1dc   :  { %786 = vrsqrt.f32 %v1061_v59  ;;  %vm425_vm8 = vcmp.eq.f32.partialorder %v1061_v59, inf  ;;  %vm427_vm9 = vcmp.eq.f32.partialorder %v1061_v59, 0.0  ;;  %v428_v48 = vand.u32 2147483648, %v1061_v59 }
 0x1dd   :  { %788 = vrsqrt.f32 %v1064_v61  ;;  %v701_v62 = vpop.f32.mrb[6].mxu1  ;;  %vm418_vm10 = vcmp.eq.f32.partialorder %v1064_v61, inf  ;;  %vm420_vm11 = vcmp.eq.f32.partialorder %v1064_v61, 0.0  ;;  %v421_v52 = vand.u32 2147483648, %v1064_v61 }
 0x1de   :  { %v779_v63 = vpop.eup %778  ;;  %v1069_v0 = vadd.f32 %v701_v62, %v1054_v49  ;;  %v339_v1 = vpop.f32.mrb[7].mxu1 }
 0x1df   :  { %v781_v3 = vpop.eup %780  ;;  %v396_v5 = vmul.f32 %v779_v63, %v315_v51  ;;  %v1072_v7 = vadd.f32 %v1054_v49, %v339_v1 }
 0x1e0   :  { %v389_v9 = vmul.f32 %v781_v3, %v310_v53  ;;  %790 = vrsqrt.f32 %v1069_v0  ;;  %vm439_vm12 = vcmp.eq.f32.partialorder %v1069_v0, inf  ;;  %vm441_vm13 = vcmp.eq.f32.partialorder %v1069_v0, 0.0 }
 0x1e1   :  { %v398_v12 = vsel %vm397_vm0, %v315_v51, %v396_v5  ;;  %792 = vrsqrt.f32 %v1072_v7  ;;  %v704_v13 = vpop.f32.mrb[8].mxu1  ;;  %v442_v5 = vand.u32 2147483648, %v1069_v0  ;;  %vm432_vm14 = vcmp.eq.f32.partialorder %v1072_v7, inf }
 0x1e2   :  { %v783_v15 = vpop.eup %782  ;;  %v401_v17 = vsel %vm399_vm1, %v400_v6, %v398_v12  ;;  %v391_v18 = vsel %vm390_vm2, %v310_v53, %v389_v9  ;;  %v349_v21 = vpop.f32.mrb[9].mxu1  ;;  %v1080_v29 = vadd.f32 %v704_v13, %v1054_v49  ;;  %vm434_vm15 = vcmp.eq.f32.partialorder %v1072_v7, 0.0 }
 0x1e3   :  { %v785_v23 = vpop.eup %784  ;;  %v501_v24 = vmul.f32 %v401_v17, %v987_v2  ;;  %v394_v25 = vsel %vm392_vm3, %v393_v11, %v391_v18  ;;  %v410_v27 = vmul.f32 %v783_v15, %v325_v55  ;;  %v1084_v33 = vadd.f32 %v1054_v49, %v349_v21 }
 0x1e4   :  { %v500_v30 = vmul.f32 %v394_v25, %v989_v4  ;;  %v403_v31 = vmul.f32 %v785_v23, %v320_v57  ;;  %v407_v2 = vand.u32 2147483648, %v320_v57  ;;  %794 = vrsqrt.f32 %v1080_v29 }
 0x1e5   :  { %517 = vst [vmem:[%s1241_s5 + $0x8] sm:$0xff] %v501_v24  ;;  %v412_v35 = vsel %vm411_vm4, %v325_v55, %v410_v27  ;;  %v707_v36 = vpop.f32.mrb[10].mxu1  ;;  %796 = vrsqrt.f32 %v1084_v33  ;;  %vm453_vm0 = vcmp.eq.f32.partialorder %v1080_v29, inf  ;;  %vm455_vm1 = vcmp.eq.f32.partialorder %v1080_v29, 0.0 }
 0x1e6   :  { %v787_v37 = vpop.eup %786  ;;  %516 = vst [vmem:[%s1241_s5] sm:$0xff] %v500_v30  ;;  %v415_v4 = vsel %vm413_vm5, %v414_v19, %v412_v35  ;;  %v405_v39 = vsel %vm404_vm6, %v320_v57, %v403_v31  ;;  %v359_v41 = vpop.f32.mrb[11].mxu1  ;;  %v1115_v53 = vadd.f32 %v707_v36, %v1054_v49  ;;  %vm446_vm2 = vcmp.eq.f32.partialorder %v1084_v33, inf }
 0x1e7   :  { %v789_v42 = vpop.eup %788  ;;  %v503_v43 = vmul.f32 %v415_v4, %v995_v8  ;;  %v408_v45 = vsel %vm406_vm7, %v407_v2, %v405_v39  ;;  %v424_v47 = vmul.f32 %v787_v37, %v1061_v59  ;;  %v449_v24 = vand.u32 2147483648, %v1084_v33 }
 0x1e8   :  { %v502_v50 = vmul.f32 %v408_v45, %v997_v10  ;;  %v417_v51 = vmul.f32 %v789_v42, %v1064_v61  ;;  %v1118_v10 = vadd.f32 %v1054_v49, %v359_v41  ;;  %798 = vrsqrt.f32 %v1115_v53 }
 0x1e9   :  { %519 = vst [vmem:[%s1241_s5 + $0x18] sm:$0xff] %v503_v43  ;;  %v426_v8 = vsel %vm425_vm8, %v1061_v59, %v424_v47  ;;  %v710_v54 = vpop.f32.mrb[12].mxu1  ;;  %vm448_vm3 = vcmp.eq.f32.partialorder %v1084_v33, 0.0  ;;  %vm467_vm4 = vcmp.eq.f32.partialorder %v1115_v53, inf  ;;  %vm469_vm5 = vcmp.eq.f32.partialorder %v1115_v53, 0.0 }
 0x1ea   :  { %v791_v55 = vpop.eup %790  ;;  %518 = vst [vmem:[%s1241_s5 + $0x10] sm:$0xff] %v502_v50  ;;  %v429_v56 = vsel %vm427_vm9, %v428_v48, %v426_v8  ;;  %v419_v57 = vsel %vm418_vm10, %v1064_v61, %v417_v51  ;;  %v1128_v58 = vadd.f32 %v710_v54, %v1054_v49  ;;  %v369_v60 = vpop.f32.mrb[13].mxu1  ;;  %v435_v61 = vand.u32 2147483648, %v1072_v7 }
 0x1eb   :  { %v793_v62 = vpop.eup %792  ;;  %v505_v63 = vmul.f32 %v429_v56, %v1003_v14  ;;  %v422_v1 = vsel %vm420_vm11, %v421_v52, %v419_v57  ;;  %v438_v3 = vmul.f32 %v791_v55, %v1069_v0  ;;  %800 = vrsqrt.f32 %v1118_v10 }
 0x1ec   :  { %v504_v59 = vmul.f32 %v422_v1, %v1005_v16  ;;  %v431_v6 = vmul.f32 %v793_v62, %v1072_v7  ;;  %802 = vrsqrt.f32 %v1128_v58  ;;  %v370_v21 = vadd.f32 %v1054_v49, %v369_v60 }
 0x1ed   :  { %521 = vst [vmem:[%s1241_s5 + $0x28] sm:$0xff] %v505_v63  ;;  %v440_v14 = vsel %vm439_vm12, %v1069_v0, %v438_v3  ;;  %v713_v9 = vpop.f32.mrb[14].mxu1  ;;  %vm460_vm6 = vcmp.eq.f32.partialorder %v1118_v10, inf  ;;  %v463_v39 = vand.u32 2147483648, %v1118_v10  ;;  %vm462_vm7 = vcmp.eq.f32.partialorder %v1118_v10, 0.0 }
 0x1ee   :  { %520 = vst [vmem:[%s1241_s5 + $0x20] sm:$0xff] %v504_v59  ;;  %v443_v16 = vsel %vm441_vm13, %v442_v5, %v440_v14  ;;  %v433_v11 = vsel %vm432_vm14, %v1072_v7, %v431_v6  ;;  %v379_v12 = vpop.f32.mrb[15].mxu1  ;;  %v795_v13 = vpop.eup %794  ;;  %v456_v7 = vand.u32 2147483648, %v1080_v29  ;;  %v1164_v23 = vadd.f32 %v713_v9, %v1054_v49 }
 0x1ef   :  { %v507_v0 = vmul.f32 %v443_v16, %v1011_v20  ;;  %v436_v15 = vsel %vm434_vm15, %v435_v61, %v433_v11  ;;  %v797_v17 = vpop.eup %796  ;;  %v452_v19 = vmul.f32 %v795_v13, %v1080_v29  ;;  %v1173_v25 = vadd.f32 %v1054_v49, %v379_v12 }
 0x1f0   :  { %v506_v18 = vmul.f32 %v436_v15, %v1013_v22  ;;  %v445_v20 = vmul.f32 %v797_v17, %v1084_v33  ;;  %804 = vrsqrt.f32 %v370_v21  ;;  %vm481_vm8 = vcmp.eq.f32.partialorder %v1128_v58, inf }
 0x1f1   :  { %523 = vst [vmem:[%s1241_s5 + $0x38] sm:$0xff] %v507_v0  ;;  %v454_v22 = vsel %vm453_vm0, %v1080_v29, %v452_v19  ;;  %806 = vrsqrt.f32 %v1164_v23  ;;  %v484_v47 = vand.u32 2147483648, %v1128_v58  ;;  %vm483_vm9 = vcmp.eq.f32.partialorder %v1128_v58, 0.0 }
 0x1f2   :  { %522 = vst [vmem:[%s1241_s5 + $0x30] sm:$0xff] %v506_v18  ;;  %v457_v27 = vsel %vm455_vm1, %v456_v7, %v454_v22  ;;  %v447_v30 = vsel %vm446_vm2, %v1084_v33, %v445_v20  ;;  %v799_v2 = vpop.eup %798  ;;  %808 = vrsqrt.f32 %v1173_v25  ;;  %vm474_vm10 = vcmp.eq.f32.partialorder %v370_v21, inf }
 0x1f3   :  { %v509_v31 = vmul.f32 %v457_v27, %v1019_v26  ;;  %v450_v35 = vsel %vm448_vm3, %v449_v24, %v447_v30  ;;  %v466_v49 = vmul.f32 %v799_v2, %v1115_v53  ;;  %v470_v26 = vand.u32 2147483648, %v1115_v53 }
 0x1f4   :  { %v508_v36 = vmul.f32 %v450_v35, %v1021_v28  ;;  %vm476_vm11 = vcmp.eq.f32.partialorder %v370_v21, 0.0  ;;  %vm495_vm12 = vcmp.eq.f32.partialorder %v1164_v23, inf  ;;  %vm497_vm13 = vcmp.eq.f32.partialorder %v1164_v23, 0.0 }
 0x1f5   :  { %525 = vst [vmem:[%s1241_s5 + $0x48] sm:$0xff] %v509_v31  ;;  %v801_v29 = vpop.eup %800  ;;  %v468_v28 = vsel %vm467_vm4, %v1115_v53, %v466_v49  ;;  %vm488_vm14 = vcmp.eq.f32.partialorder %v1173_v25, inf  ;;  %v491_v62 = vand.u32 2147483648, %v1173_v25  ;;  %vm490_vm15 = vcmp.eq.f32.partialorder %v1173_v25, 0.0 }
 0x1f6   :  { %524 = vst [vmem:[%s1241_s5 + $0x40] sm:$0xff] %v508_v36  ;;  %v459_v33 = vmul.f32 %v801_v29, %v1118_v10  ;;  %v803_v37 = vpop.eup %802  ;;  %v471_v4 = vsel %vm469_vm5, %v470_v26, %v468_v28 }
 0x1f7   :  { %v511_v41 = vmul.f32 %v471_v4, %v1027_v32  ;;  %v480_v43 = vmul.f32 %v803_v37, %v1128_v58 }
 0x1f8   :  { %v461_v42 = vsel %vm460_vm6, %v1118_v10, %v459_v33  ;;  %v477_v10 = vand.u32 2147483648, %v370_v21 }
 0x1f9   :  { %v464_v45 = vsel %vm462_vm7, %v463_v39, %v461_v42  ;;  %527 = vst [vmem:[%s1241_s5 + $0x58] sm:$0xff] %v511_v41  ;;  %v482_v50 = vsel %vm481_vm8, %v1128_v58, %v480_v43 }
 0x1fa   :  { %v510_v48 = vmul.f32 %v464_v45, %v1029_v34  ;;  %v805_v32 = vpop.eup %804  ;;  %v485_v51 = vsel %vm483_vm9, %v484_v47, %v482_v50 }
 0x1fb   :  { %v513_v8 = vmul.f32 %v485_v51, %v1035_v38  ;;  %v473_v52 = vmul.f32 %v805_v32, %v370_v21  ;;  %v807_v53 = vpop.eup %806  ;;  %v498_v38 = vand.u32 2147483648, %v1164_v23 }
 0x1fc   :  { %526 = vst [vmem:[%s1241_s5 + $0x50] sm:$0xff] %v510_v48  ;;  %v809_v54 = vpop.eup %808  ;;  %v494_v55 = vmul.f32 %v807_v53, %v1164_v23 }
 0x1fd   :  { %529 = vst [vmem:[%s1241_s5 + $0x68] sm:$0xff] %v513_v8  ;;  %v475_v34 = vsel %vm474_vm10, %v370_v21, %v473_v52  ;;  %v487_v57 = vmul.f32 %v809_v54, %v1173_v25 }
 0x1fe   :  { %v478_v56 = vsel %vm476_vm11, %v477_v10, %v475_v34  ;;  %v496_v60 = vsel %vm495_vm12, %v1164_v23, %v494_v55 }
 0x1ff   :  { %v512_v58 = vmul.f32 %v478_v56, %v1037_v40  ;;  %v499_v63 = vsel %vm497_vm13, %v498_v38, %v496_v60  ;;  %v489_v1 = vsel %vm488_vm14, %v1173_v25, %v487_v57 }
 0x200   :  { %v515_v3 = vmul.f32 %v499_v63, %v1043_v44  ;;  %v492_v59 = vsel %vm490_vm15, %v491_v62, %v489_v1 }
 0x201   :  { %528 = vst [vmem:[%s1241_s5 + $0x60] sm:$0xff] %v512_v58  ;;  %v514_v40 = vmul.f32 %v492_v59, %v1045_v46 }
 0x202   :  { %531 = vst [vmem:[%s1241_s5 + $0x78] sm:$0xff] %v515_v3 }
 0x203   :  { %530 = vst [vmem:[%s1241_s5 + $0x70] sm:$0xff] %v514_v40 }

// kernel: anf_hyperprior_forward.26
= control target key start
LH: loop header
LB: loop body
LE: loop exit
PB: predicated region body
PF: predicated region fallthrough
CT: control target
= control target key end

     0   :  { %s3804_s1 = inlined_call_operand.vmem [shape: f32[128,128], index: 1, kind: input, shape index: {}]   ;;  %s3805_s0 = inlined_call_operand.vmem [shape: f32[512,128], index: 0, kind: input, shape index: {}]   ;;  %s3806_s3 = inlined_call_operand.vmem [shape: f32[128,128], index: 3, kind: input, shape index: {}]   ;;  %s3807_s2 = inlined_call_operand.vmem [shape: f32[1,128], index: 2, kind: input, shape index: {}]   ;;  %s3808_s4 = inlined_call_operand.vmem [shape: f32[1,128], index: 4, kind: input, shape index: {}]   ;;  %s3809_s5 = inlined_call_operand.vmem [shape: f32[512,128], index: 5, kind: output, shape index: {}]  }
   0x1   :  { %v84_v0 = vld [vmem:[%s3804_s1] sm:$0xff]  ;;  %v85_v1 = vld [vmem:[%s3804_s1 + $0x8] sm:$0xff]  ;;  %v86_v2 = vld [vmem:[%s3804_s1 + $0x10] sm:$0xff] }
   0x2   :  { %v1962_v3 = vpack.c.bf16 %v85_v1, %v84_v0  ;;  %v87_v4 = vld [vmem:[%s3804_s1 + $0x18] sm:$0xff]  ;;  %v88_v6 = vld [vmem:[%s3804_s1 + $0x20] sm:$0xff]  ;;  %v89_v7 = vld [vmem:[%s3804_s1 + $0x28] sm:$0xff] }
   0x3   :  { %v1966_v5 = vpack.c.bf16 %v87_v4, %v86_v2  ;;  %v1970_v8 = vpack.c.bf16 %v89_v7, %v88_v6  ;;  %v20_v9 = vld [vmem:[%s3805_s0] sm:$0xff]  ;;  %v90_v10 = vld [vmem:[%s3804_s1 + $0x30] sm:$0xff]  ;;  %v91_v11 = vld [vmem:[%s3804_s1 + $0x38] sm:$0xff] }
   0x4   :  { %1963 = vmatprep.subr.bf16.mxu0 %v1962_v3  ;;  %1738 = vmatprep.mubr.f32.mxu0 %v20_v9  ;;  %v1974_v12 = vpack.c.bf16 %v91_v11, %v90_v10  ;;  %v92_v13 = vld [vmem:[%s3804_s1 + $0x40] sm:$0xff]  ;;  %v93_v14 = vld [vmem:[%s3804_s1 + $0x48] sm:$0xff]  ;;  %v94_v16 = vld [vmem:[%s3804_s1 + $0x50] sm:$0xff] }
   0x5   :  { %1965 = vmatpush3.bf16.msra.mxu0 %v1962_v3  ;;  %v1978_v15 = vpack.c.bf16 %v93_v14, %v92_v13  ;;  %v95_v17 = vld [vmem:[%s3804_s1 + $0x58] sm:$0xff]  ;;  %v96_v19 = vld [vmem:[%s3804_s1 + $0x60] sm:$0xff]  ;;  %v97_v20 = vld [vmem:[%s3804_s1 + $0x68] sm:$0xff] }
   0x6   :  { %1967 = vmatprep.subr.bf16.mxu0 %v1966_v5  ;;  %v1982_v18 = vpack.c.bf16 %v95_v17, %v94_v16  ;;  %v1986_v21 = vpack.c.bf16 %v97_v20, %v96_v19  ;;  %v98_v22 = vld [vmem:[%s3804_s1 + $0x70] sm:$0xff]  ;;  %v99_v23 = vld [vmem:[%s3804_s1 + $0x78] sm:$0xff]  ;;  %v21_v25 = vld [vmem:[%s3805_s0 + $0x8] sm:$0xff] }
   0x7   :  { %v1990_v24 = vpack.c.bf16 %v99_v23, %v98_v22  ;;  %v556_v26 = vld [vmem:[%s3806_s3] sm:$0xff]  ;;  %v557_v27 = vld [vmem:[%s3806_s3 + $0x8] sm:$0xff]  ;;  %v558_v28 = vld [vmem:[%s3806_s3 + $0x10] sm:$0xff] }
   0x8   :  { %v22_v29 = vld [vmem:[%s3805_s0 + $0x10] sm:$0xff]  ;;  %v1994_v30 = vpack.c.bf16 %v557_v27, %v556_v26  ;;  %v559_v31 = vld [vmem:[%s3806_s3 + $0x18] sm:$0xff]  ;;  %v560_v33 = vld [vmem:[%s3806_s3 + $0x20] sm:$0xff] }
   0x9   :  { %1969 = vmatpush3.bf16.msra.mxu0 %v1966_v5  ;;  %v1998_v32 = vpack.c.bf16 %v559_v31, %v558_v28  ;;  %v561_v34 = vld [vmem:[%s3806_s3 + $0x28] sm:$0xff]  ;;  %v23_v35 = vld [vmem:[%s3805_s0 + $0x18] sm:$0xff]  ;;  %v24_v36 = vld [vmem:[%s3805_s0 + $0x20] sm:$0xff] }
   0xa   :  { %1971 = vmatprep.subr.bf16.mxu0 %v1970_v8  ;;  %1995 = vmatprep.subr.bf16.mxu1 %v1994_v30  ;;  %v2002_v37 = vpack.c.bf16 %v561_v34, %v560_v33  ;;  %v562_v38 = vld [vmem:[%s3806_s3 + $0x30] sm:$0xff]  ;;  %v563_v39 = vld [vmem:[%s3806_s3 + $0x38] sm:$0xff]  ;;  %v25_v40 = vld [vmem:[%s3805_s0 + $0x28] sm:$0xff] }
   0xb   :  { %1997 = vmatpush3.bf16.msra.mxu1 %v1994_v30  ;;  %v26_v41 = vld [vmem:[%s3805_s0 + $0x30] sm:$0xff]  ;;  %v2006_v42 = vpack.c.bf16 %v563_v39, %v562_v38  ;;  %v564_v43 = vld [vmem:[%s3806_s3 + $0x40] sm:$0xff]  ;;  %v565_v44 = vld [vmem:[%s3806_s3 + $0x48] sm:$0xff] }
   0xc   :  { %1999 = vmatprep.subr.bf16.mxu1 %v1998_v32  ;;  %v27_v45 = vld [vmem:[%s3805_s0 + $0x38] sm:$0xff]  ;;  %v28_v46 = vld [vmem:[%s3805_s0 + $0x40] sm:$0xff]  ;;  %v2010_v47 = vpack.c.bf16 %v565_v44, %v564_v43  ;;  %v566_v48 = vld [vmem:[%s3806_s3 + $0x50] sm:$0xff] }
   0xd   :  { %1973 = vmatpush3.bf16.msra.mxu0 %v1970_v8  ;;  %v567_v49 = vld [vmem:[%s3806_s3 + $0x58] sm:$0xff]  ;;  %v29_v50 = vld [vmem:[%s3805_s0 + $0x48] sm:$0xff]  ;;  %v30_v51 = vld [vmem:[%s3805_s0 + $0x50] sm:$0xff] }
   0xe   :  { %1975 = vmatprep.subr.bf16.mxu0 %v1974_v12  ;;  %v2014_v52 = vpack.c.bf16 %v567_v49, %v566_v48  ;;  %v568_v53 = vld [vmem:[%s3806_s3 + $0x60] sm:$0xff]  ;;  %v569_v54 = vld [vmem:[%s3806_s3 + $0x68] sm:$0xff]  ;;  %v31_v55 = vld [vmem:[%s3805_s0 + $0x58] sm:$0xff] }
   0xf   :  { %2001 = vmatpush3.bf16.msra.mxu1 %v1998_v32  ;;  %v32_v56 = vld [vmem:[%s3805_s0 + $0x60] sm:$0xff]  ;;  %v2018_v57 = vpack.c.bf16 %v569_v54, %v568_v53  ;;  %v33_v58 = vld [vmem:[%s3805_s0 + $0x68] sm:$0xff]  ;;  %v34_v59 = vld [vmem:[%s3805_s0 + $0x70] sm:$0xff] }
  0x10   :  { %2003 = vmatprep.subr.bf16.mxu1 %v2002_v37  ;;  %v35_v60 = vld [vmem:[%s3805_s0 + $0x78] sm:$0xff]  ;;  %v36_v61 = vld [vmem:[%s3805_s0 + $0x80] sm:$0xff]  ;;  %v37_v62 = vld [vmem:[%s3805_s0 + $0x88] sm:$0xff] }
  0x11   :  { %1977 = vmatpush3.bf16.msra.mxu0 %v1974_v12  ;;  %v38_v63 = vld [vmem:[%s3805_s0 + $0x90] sm:$0xff]  ;;  %v39_v0 = vld [vmem:[%s3805_s0 + $0x98] sm:$0xff]  ;;  %v40_v1 = vld [vmem:[%s3805_s0 + $0xa0] sm:$0xff] }
  0x12   :  { %1979 = vmatprep.subr.bf16.mxu0 %v1978_v15  ;;  %v41_v2 = vld [vmem:[%s3805_s0 + $0xa8] sm:$0xff]  ;;  %v42_v3 = vld [vmem:[%s3805_s0 + $0xb0] sm:$0xff]  ;;  %v43_v4 = vld [vmem:[%s3805_s0 + $0xb8] sm:$0xff] }
  0x13   :  { %2005 = vmatpush3.bf16.msra.mxu1 %v2002_v37  ;;  %v44_v5 = vld [vmem:[%s3805_s0 + $0xc0] sm:$0xff]  ;;  %v45_v6 = vld [vmem:[%s3805_s0 + $0xc8] sm:$0xff]  ;;  %v46_v7 = vld [vmem:[%s3805_s0 + $0xd0] sm:$0xff] }
  0x14   :  { %2007 = vmatprep.subr.bf16.mxu1 %v2006_v42  ;;  %v47_v8 = vld [vmem:[%s3805_s0 + $0xd8] sm:$0xff]  ;;  %v48_v9 = vld [vmem:[%s3805_s0 + $0xe0] sm:$0xff]  ;;  %v49_v10 = vld [vmem:[%s3805_s0 + $0xe8] sm:$0xff] }
  0x15   :  { %1981 = vmatpush3.bf16.msra.mxu0 %v1978_v15  ;;  %v50_v11 = vld [vmem:[%s3805_s0 + $0xf0] sm:$0xff]  ;;  %v51_v12 = vld [vmem:[%s3805_s0 + $0xf8] sm:$0xff]  ;;  %v52_v13 = vld [vmem:[%s3805_s0 + $0x100] sm:$0xff] }
  0x16   :  { %1983 = vmatprep.subr.bf16.mxu0 %v1982_v18  ;;  %v53_v14 = vld [vmem:[%s3805_s0 + $0x108] sm:$0xff]  ;;  %v54_v15 = vld [vmem:[%s3805_s0 + $0x110] sm:$0xff]  ;;  %v55_v16 = vld [vmem:[%s3805_s0 + $0x118] sm:$0xff] }
  0x17   :  { %2009 = vmatpush3.bf16.msra.mxu1 %v2006_v42  ;;  %v56_v17 = vld [vmem:[%s3805_s0 + $0x120] sm:$0xff]  ;;  %v58_v19 = vld [vmem:[%s3805_s0 + $0x130] sm:$0xff]  ;;  %v59_v20 = vld [vmem:[%s3805_s0 + $0x138] sm:$0xff] }
  0x18   :  { %2011 = vmatprep.subr.bf16.mxu1 %v2010_v47  ;;  %v61_v22 = vld [vmem:[%s3805_s0 + $0x148] sm:$0xff]  ;;  %v62_v23 = vld [vmem:[%s3805_s0 + $0x150] sm:$0xff]  ;;  %v571_v27 = vld [vmem:[%s3806_s3 + $0x78] sm:$0xff] }
  0x19   :  { %1985 = vmatpush3.bf16.msra.mxu0 %v1982_v18  ;;  %v57_v18 = vld [vmem:[%s3805_s0 + $0x128] sm:$0xff]  ;;  %v570_v26 = vld [vmem:[%s3806_s3 + $0x70] sm:$0xff]  ;;  %v67_v31 = vld [vmem:[%s3805_s0 + $0x178] sm:$0xff] }
  0x1a   :  { %1987 = vmatprep.subr.bf16.mxu0 %v1986_v21  ;;  %v2022_v28 = vpack.c.bf16 %v571_v27, %v570_v26  ;;  %v66_v30 = vld [vmem:[%s3805_s0 + $0x170] sm:$0xff]  ;;  %v68_v32 = vld [vmem:[%s3805_s0 + $0x180] sm:$0xff]  ;;  %v69_v33 = vld [vmem:[%s3805_s0 + $0x188] sm:$0xff] }
  0x1b   :  { %2013 = vmatpush3.bf16.msra.mxu1 %v2010_v47  ;;  %v70_v34 = vld [vmem:[%s3805_s0 + $0x190] sm:$0xff]  ;;  %v73_v37 = vld [vmem:[%s3805_s0 + $0x1a8] sm:$0xff]  ;;  %v75_v39 = vld [vmem:[%s3805_s0 + $0x1b8] sm:$0xff] }
  0x1c   :  { %2015 = vmatprep.subr.bf16.mxu1 %v2014_v52  ;;  %v74_v38 = vld [vmem:[%s3805_s0 + $0x1b0] sm:$0xff]  ;;  %v79_v43 = vld [vmem:[%s3805_s0 + $0x1d8] sm:$0xff]  ;;  %v80_v44 = vld [vmem:[%s3805_s0 + $0x1e0] sm:$0xff] }
  0x1d   :  { %1989 = vmatpush3.bf16.msra.mxu0 %v1986_v21  ;;  %v60_v21 = vld [vmem:[%s3805_s0 + $0x140] sm:$0xff]  ;;  %v78_v42 = vld [vmem:[%s3805_s0 + $0x1d0] sm:$0xff]  ;;  %v83_v47 = vld [vmem:[%s3805_s0 + $0x1f8] sm:$0xff] }
  0x1e   :  { %1991 = vmatprep.subr.bf16.mxu0 %v1990_v24  ;;  %v2476_v48 = vld [vmem:[%s3807_s2] ss:$0 sm:$0xff] }
  0x1f   :  { %2017 = vmatpush3.bf16.msra.mxu1 %v2014_v52 }
  0x20   :  { %2019 = vmatprep.subr.bf16.mxu1 %v2018_v57 }
  0x21   :  { %1993 = vmatpush3.bf16.msra.mxu0 %v1990_v24  ;;  %v63_v24 = vld [vmem:[%s3805_s0 + $0x158] sm:$0xff] }
  0x23   :  { %2021 = vmatpush3.bf16.msra.mxu1 %v2018_v57 }
  0x24   :  { %1739 = vmatmul.mubr.f32.vlgmr.msra.gmra.mrb[0].mxu0 %v21_v25  ;;  %v64_v25 = vld [vmem:[%s3805_s0 + $0x160] sm:$0xff]  ;;  %2023 = vmatprep.subr.bf16.mxu1 %v2022_v28 }
  0x25   :  { %1741 = vmatprep.mubr.f32.mxu0 %v22_v29  ;;  %v65_v29 = vld [vmem:[%s3805_s0 + $0x168] sm:$0xff] }
  0x27   :  { %2025 = vmatpush3.bf16.msra.mxu1 %v2022_v28 }
  0x28   :  { %1742 = vmatmul.mubr.f32.gmra.mrb[2].mxu0 %v23_v35  ;;  %v71_v35 = vld [vmem:[%s3805_s0 + $0x198] sm:$0xff] }
  0x29   :  { %1744 = vmatprep.mubr.f32.mxu0 %v24_v36  ;;  %v72_v36 = vld [vmem:[%s3805_s0 + $0x1a0] sm:$0xff] }
  0x2c   :  { %1745 = vmatmul.mubr.f32.gmra.mrb[4].mxu0 %v25_v40  ;;  %v76_v40 = vld [vmem:[%s3805_s0 + $0x1c0] sm:$0xff] }
  0x2d   :  { %1747 = vmatprep.mubr.f32.mxu0 %v26_v41  ;;  %v77_v41 = vld [vmem:[%s3805_s0 + $0x1c8] sm:$0xff] }
  0x30   :  { %1748 = vmatmul.mubr.f32.gmra.mrb[6].mxu0 %v27_v45  ;;  %v81_v45 = vld [vmem:[%s3805_s0 + $0x1e8] sm:$0xff] }
  0x31   :  { %1750 = vmatprep.mubr.f32.mxu0 %v28_v46  ;;  %v82_v46 = vld [vmem:[%s3805_s0 + $0x1f0] sm:$0xff] }
  0x34   :  { %1751 = vmatmul.mubr.f32.gmra.mrb[8].mxu0 %v29_v50 }
  0x35   :  { %1753 = vmatprep.mubr.f32.mxu0 %v30_v51 }
  0x38   :  { %1754 = vmatmul.mubr.f32.gmra.mrb[10].mxu0 %v31_v55 }
  0x39   :  { %1756 = vmatprep.mubr.f32.mxu0 %v32_v56 }
  0x3c   :  { %1757 = vmatmul.mubr.f32.gmra.mrb[12].mxu0 %v33_v58 }
  0x3d   :  { %1759 = vmatprep.mubr.f32.mxu0 %v34_v59 }
  0x40   :  { %1760 = vmatmul.mubr.f32.gmra.mrb[14].mxu0 %v35_v60 }
  0x41   :  { %1762 = vmatprep.mubr.f32.mxu0 %v36_v61 }
  0x44   :  { %1763 = vmatmul.mubr.f32.gmra.mrb[16].mxu0 %v37_v62 }
  0x45   :  { %1765 = vmatprep.mubr.f32.mxu0 %v38_v63 }
  0x48   :  { %1766 = vmatmul.mubr.f32.gmra.mrb[18].mxu0 %v39_v0 }
  0x49   :  { %1768 = vmatprep.mubr.f32.mxu0 %v40_v1 }
  0x4c   :  { %1769 = vmatmul.mubr.f32.gmra.mrb[20].mxu0 %v41_v2 }
  0x4d   :  { %1771 = vmatprep.mubr.f32.mxu0 %v42_v3 }
  0x50   :  { %1772 = vmatmul.mubr.f32.gmra.mrb[22].mxu0 %v43_v4 }
  0x51   :  { %1774 = vmatprep.mubr.f32.mxu0 %v44_v5 }
  0x54   :  { %1775 = vmatmul.mubr.f32.gmra.mrb[24].mxu0 %v45_v6 }
  0x55   :  { %1777 = vmatprep.mubr.f32.mxu0 %v46_v7 }
  0x58   :  { %1778 = vmatmul.mubr.f32.gmra.mrb[26].mxu0 %v47_v8 }
  0x59   :  { %1780 = vmatprep.mubr.f32.mxu0 %v48_v9 }
  0x5c   :  { %1781 = vmatmul.mubr.f32.gmra.mrb[28].mxu0 %v49_v10 }
  0x5d   :  { %1783 = vmatprep.mubr.f32.mxu0 %v50_v11 }
  0x60   :  { %1784 = vmatmul.mubr.f32.gmra.mrb[30].mxu0 %v51_v12 }
  0x61   :  { %1786 = vmatprep.mubr.f32.mxu0 %v52_v13 }
  0x64   :  { %1787 = vmatmul.mubr.f32.gmra.mrb[32].mxu0 %v53_v14 }
  0x65   :  { %1789 = vmatprep.mubr.f32.mxu0 %v54_v15 }
  0x68   :  { %1790 = vmatmul.mubr.f32.gmra.mrb[34].mxu0 %v55_v16 }
  0x69   :  { %1792 = vmatprep.mubr.f32.mxu0 %v56_v17 }
  0x6c   :  { %1793 = vmatmul.mubr.f32.gmra.mrb[36].mxu0 %v57_v18 }
  0x6d   :  { %1795 = vmatprep.mubr.f32.mxu0 %v58_v19 }
  0x70   :  { %1796 = vmatmul.mubr.f32.gmra.mrb[38].mxu0 %v59_v20 }
  0x71   :  { %1798 = vmatprep.mubr.f32.mxu0 %v60_v21 }
  0x74   :  { %1799 = vmatmul.mubr.f32.gmra.mrb[40].mxu0 %v61_v22 }
  0x75   :  { %1801 = vmatprep.mubr.f32.mxu0 %v62_v23 }
  0x78   :  { %1802 = vmatmul.mubr.f32.gmra.mrb[42].mxu0 %v63_v24 }
  0x79   :  { %1804 = vmatprep.mubr.f32.mxu0 %v64_v25 }
  0x7c   :  { %1805 = vmatmul.mubr.f32.gmra.mrb[44].mxu0 %v65_v29 }
  0x7d   :  { %1807 = vmatprep.mubr.f32.mxu0 %v66_v30 }
  0x80   :  { %1808 = vmatmul.mubr.f32.gmra.mrb[46].mxu0 %v67_v31 }
  0x81   :  { %1810 = vmatprep.mubr.f32.mxu0 %v68_v32 }
  0x84   :  { %1811 = vmatmul.mubr.f32.gmra.mrb[48].mxu0 %v69_v33 }
  0x85   :  { %1813 = vmatprep.mubr.f32.mxu0 %v70_v34 }
  0x88   :  { %1814 = vmatmul.mubr.f32.gmra.mrb[50].mxu0 %v71_v35 }
  0x89   :  { %1816 = vmatprep.mubr.f32.mxu0 %v72_v36 }
  0x8c   :  { %1817 = vmatmul.mubr.f32.gmra.mrb[52].mxu0 %v73_v37 }
  0x8d   :  { %1819 = vmatprep.mubr.f32.mxu0 %v74_v38 }
  0x90   :  { %1820 = vmatmul.mubr.f32.gmra.mrb[54].mxu0 %v75_v39 }
  0x91   :  { %1822 = vmatprep.mubr.f32.mxu0 %v76_v40 }
  0x94   :  { %1823 = vmatmul.mubr.f32.gmra.mrb[56].mxu0 %v77_v41 }
  0x95   :  { %1825 = vmatprep.mubr.f32.mxu0 %v78_v42 }
  0x98   :  { %1826 = vmatmul.mubr.f32.gmra.mrb[58].mxu0 %v79_v43 }
  0x99   :  { %1828 = vmatprep.mubr.f32.mxu0 %v80_v44 }
  0x9c   :  { %1829 = vmatmul.mubr.f32.gmra.mrb[60].mxu0 %v81_v45 }
  0x9d   :  { %1831 = vmatprep.mubr.f32.mxu0 %v82_v46 }
  0xa0   :  { %1832 = vmatmul.mubr.f32.gmra.mrb[62].mxu0 %v83_v47 }
  0xf7   :  { %v1740_v49 = vpop.f32.mrb[0].mxu0 }
  0xf8   :  { %v2479_v50 = vadd.f32 %v1740_v49, %v2476_v48  ;;  %v173_v51 = vpop.f32.mrb[1].mxu0 }
  0xf9   :  { %v2482_v52 = vadd.f32 %v2476_v48, %v173_v51 }
  0xfa   :  { %v493_v55 = vmul.f32 %v2479_v50, %v2479_v50 }
  0xfb   :  { %v1743_v53 = vpop.f32.mrb[2].mxu0  ;;  %v492_v54 = vmul.f32 %v2482_v52, %v2482_v52 }
  0xfc   :  { %v2489_v56 = vadd.f32 %v1743_v53, %v2476_v48  ;;  %v183_v57 = vpop.f32.mrb[3].mxu0 }
  0xfd   :  { %v2492_v58 = vadd.f32 %v2476_v48, %v183_v57  ;;  %1866 = vmatprep.mubr.f32.mxu1 %v492_v54 }
  0xfe   :  { %1867 = vmatmul.mubr.f32.vlgmr.msra.gmra.mrb[0].mxu1 %v493_v55  ;;  %v495_v61 = vmul.f32 %v2489_v56, %v2489_v56 }
  0xff   :  { %v494_v59 = vmul.f32 %v2492_v58, %v2492_v58  ;;  %v1746_v60 = vpop.f32.mrb[4].mxu0 }
 0x100   :  { %v2499_v62 = vadd.f32 %v1746_v60, %v2476_v48  ;;  %v193_v63 = vpop.f32.mrb[5].mxu0 }
 0x101   :  { %v2502_v0 = vadd.f32 %v2476_v48, %v193_v63  ;;  %1869 = vmatprep.mubr.f32.mxu1 %v494_v59 }
 0x102   :  { %1870 = vmatmul.mubr.f32.gmra.mrb[2].mxu1 %v495_v61  ;;  %v497_v3 = vmul.f32 %v2499_v62, %v2499_v62 }
 0x103   :  { %v496_v1 = vmul.f32 %v2502_v0, %v2502_v0  ;;  %v1749_v2 = vpop.f32.mrb[6].mxu0 }
 0x104   :  { %v2509_v4 = vadd.f32 %v1749_v2, %v2476_v48  ;;  %v203_v5 = vpop.f32.mrb[7].mxu0 }
 0x105   :  { %v2512_v6 = vadd.f32 %v2476_v48, %v203_v5  ;;  %1872 = vmatprep.mubr.f32.mxu1 %v496_v1 }
 0x106   :  { %1873 = vmatmul.mubr.f32.gmra.mrb[4].mxu1 %v497_v3  ;;  %v499_v9 = vmul.f32 %v2509_v4, %v2509_v4 }
 0x107   :  { %v498_v7 = vmul.f32 %v2512_v6, %v2512_v6  ;;  %v1752_v8 = vpop.f32.mrb[8].mxu0 }
 0x108   :  { %v2519_v10 = vadd.f32 %v1752_v8, %v2476_v48  ;;  %v213_v11 = vpop.f32.mrb[9].mxu0 }
 0x109   :  { %v2522_v12 = vadd.f32 %v2476_v48, %v213_v11  ;;  %1875 = vmatprep.mubr.f32.mxu1 %v498_v7 }
 0x10a   :  { %1876 = vmatmul.mubr.f32.gmra.mrb[6].mxu1 %v499_v9  ;;  %v501_v15 = vmul.f32 %v2519_v10, %v2519_v10 }
 0x10b   :  { %v500_v13 = vmul.f32 %v2522_v12, %v2522_v12  ;;  %v1755_v14 = vpop.f32.mrb[10].mxu0 }
 0x10c   :  { %v2529_v16 = vadd.f32 %v1755_v14, %v2476_v48  ;;  %v223_v17 = vpop.f32.mrb[11].mxu0 }
 0x10d   :  { %v2532_v18 = vadd.f32 %v2476_v48, %v223_v17  ;;  %1878 = vmatprep.mubr.f32.mxu1 %v500_v13 }
 0x10e   :  { %1879 = vmatmul.mubr.f32.gmra.mrb[8].mxu1 %v501_v15  ;;  %v503_v21 = vmul.f32 %v2529_v16, %v2529_v16 }
 0x10f   :  { %v502_v19 = vmul.f32 %v2532_v18, %v2532_v18  ;;  %v1758_v20 = vpop.f32.mrb[12].mxu0 }
 0x110   :  { %v2539_v22 = vadd.f32 %v1758_v20, %v2476_v48  ;;  %v233_v23 = vpop.f32.mrb[13].mxu0 }
 0x111   :  { %v2542_v24 = vadd.f32 %v2476_v48, %v233_v23  ;;  %1881 = vmatprep.mubr.f32.mxu1 %v502_v19 }
 0x112   :  { %1882 = vmatmul.mubr.f32.gmra.mrb[10].mxu1 %v503_v21  ;;  %v505_v27 = vmul.f32 %v2539_v22, %v2539_v22 }
 0x113   :  { %v504_v25 = vmul.f32 %v2542_v24, %v2542_v24  ;;  %v1761_v26 = vpop.f32.mrb[14].mxu0 }
 0x114   :  { %v2549_v28 = vadd.f32 %v1761_v26, %v2476_v48  ;;  %v243_v29 = vpop.f32.mrb[15].mxu0 }
 0x115   :  { %v2552_v30 = vadd.f32 %v2476_v48, %v243_v29  ;;  %1884 = vmatprep.mubr.f32.mxu1 %v504_v25 }
 0x116   :  { %1885 = vmatmul.mubr.f32.gmra.mrb[12].mxu1 %v505_v27  ;;  %v507_v33 = vmul.f32 %v2549_v28, %v2549_v28 }
 0x117   :  { %v506_v31 = vmul.f32 %v2552_v30, %v2552_v30  ;;  %v1764_v32 = vpop.f32.mrb[16].mxu0 }
 0x118   :  { %v2559_v34 = vadd.f32 %v1764_v32, %v2476_v48  ;;  %v253_v35 = vpop.f32.mrb[17].mxu0 }
 0x119   :  { %v2562_v36 = vadd.f32 %v2476_v48, %v253_v35  ;;  %1887 = vmatprep.mubr.f32.mxu1 %v506_v31 }
 0x11a   :  { %1888 = vmatmul.mubr.f32.gmra.mrb[14].mxu1 %v507_v33  ;;  %v509_v39 = vmul.f32 %v2559_v34, %v2559_v34 }
 0x11b   :  { %v508_v37 = vmul.f32 %v2562_v36, %v2562_v36  ;;  %v1767_v38 = vpop.f32.mrb[18].mxu0 }
 0x11c   :  { %v2569_v40 = vadd.f32 %v1767_v38, %v2476_v48  ;;  %v263_v41 = vpop.f32.mrb[19].mxu0 }
 0x11d   :  { %v2572_v42 = vadd.f32 %v2476_v48, %v263_v41  ;;  %1890 = vmatprep.mubr.f32.mxu1 %v508_v37 }
 0x11e   :  { %1891 = vmatmul.mubr.f32.gmra.mrb[16].mxu1 %v509_v39  ;;  %v511_v45 = vmul.f32 %v2569_v40, %v2569_v40 }
 0x11f   :  { %v510_v43 = vmul.f32 %v2572_v42, %v2572_v42  ;;  %v1770_v44 = vpop.f32.mrb[20].mxu0 }
 0x120   :  { %v2579_v46 = vadd.f32 %v1770_v44, %v2476_v48  ;;  %v273_v47 = vpop.f32.mrb[21].mxu0 }
 0x121   :  { %v2582_v49 = vadd.f32 %v2476_v48, %v273_v47  ;;  %1893 = vmatprep.mubr.f32.mxu1 %v510_v43 }
 0x122   :  { %1894 = vmatmul.mubr.f32.gmra.mrb[18].mxu1 %v511_v45  ;;  %v513_v54 = vmul.f32 %v2579_v46, %v2579_v46 }
 0x123   :  { %v512_v51 = vmul.f32 %v2582_v49, %v2582_v49  ;;  %v1773_v53 = vpop.f32.mrb[22].mxu0 }
 0x124   :  { %v2589_v55 = vadd.f32 %v1773_v53, %v2476_v48  ;;  %v283_v57 = vpop.f32.mrb[23].mxu0 }
 0x125   :  { %v2592_v59 = vadd.f32 %v2476_v48, %v283_v57  ;;  %1896 = vmatprep.mubr.f32.mxu1 %v512_v51 }
 0x126   :  { %1897 = vmatmul.mubr.f32.gmra.mrb[20].mxu1 %v513_v54  ;;  %v515_v63 = vmul.f32 %v2589_v55, %v2589_v55 }
 0x127   :  { %v514_v60 = vmul.f32 %v2592_v59, %v2592_v59  ;;  %v1776_v61 = vpop.f32.mrb[24].mxu0 }
 0x128   :  { %v2599_v1 = vadd.f32 %v1776_v61, %v2476_v48  ;;  %v293_v2 = vpop.f32.mrb[25].mxu0 }
 0x129   :  { %v2602_v3 = vadd.f32 %v2476_v48, %v293_v2  ;;  %1899 = vmatprep.mubr.f32.mxu1 %v514_v60 }
 0x12a   :  { %1900 = vmatmul.mubr.f32.gmra.mrb[22].mxu1 %v515_v63  ;;  %v517_v8 = vmul.f32 %v2599_v1, %v2599_v1 }
 0x12b   :  { %v516_v5 = vmul.f32 %v2602_v3, %v2602_v3  ;;  %v1779_v7 = vpop.f32.mrb[26].mxu0 }
 0x12c   :  { %v2609_v9 = vadd.f32 %v1779_v7, %v2476_v48  ;;  %v303_v11 = vpop.f32.mrb[27].mxu0 }
 0x12d   :  { %v2612_v13 = vadd.f32 %v2476_v48, %v303_v11  ;;  %1902 = vmatprep.mubr.f32.mxu1 %v516_v5 }
 0x12e   :  { %1903 = vmatmul.mubr.f32.gmra.mrb[24].mxu1 %v517_v8  ;;  %v519_v17 = vmul.f32 %v2609_v9, %v2609_v9 }
 0x12f   :  { %v518_v14 = vmul.f32 %v2612_v13, %v2612_v13  ;;  %v1782_v15 = vpop.f32.mrb[28].mxu0 }
 0x130   :  { %v2619_v19 = vadd.f32 %v1782_v15, %v2476_v48  ;;  %v313_v20 = vpop.f32.mrb[29].mxu0 }
 0x131   :  { %v2622_v21 = vadd.f32 %v2476_v48, %v313_v20  ;;  %1905 = vmatprep.mubr.f32.mxu1 %v518_v14 }
 0x132   :  { %1906 = vmatmul.mubr.f32.gmra.mrb[26].mxu1 %v519_v17  ;;  %v521_v26 = vmul.f32 %v2619_v19, %v2619_v19 }
 0x133   :  { %v520_v23 = vmul.f32 %v2622_v21, %v2622_v21  ;;  %v1785_v25 = vpop.f32.mrb[30].mxu0 }
 0x134   :  { %v2629_v27 = vadd.f32 %v1785_v25, %v2476_v48  ;;  %v323_v29 = vpop.f32.mrb[31].mxu0 }
 0x135   :  { %v2632_v31 = vadd.f32 %v2476_v48, %v323_v29  ;;  %1908 = vmatprep.mubr.f32.mxu1 %v520_v23 }
 0x136   :  { %1909 = vmatmul.mubr.f32.gmra.mrb[28].mxu1 %v521_v26  ;;  %v523_v35 = vmul.f32 %v2629_v27, %v2629_v27 }
 0x137   :  { %v522_v32 = vmul.f32 %v2632_v31, %v2632_v31  ;;  %v1788_v33 = vpop.f32.mrb[32].mxu0 }
 0x138   :  { %v2639_v37 = vadd.f32 %v1788_v33, %v2476_v48  ;;  %v333_v38 = vpop.f32.mrb[33].mxu0 }
 0x139   :  { %v2642_v39 = vadd.f32 %v2476_v48, %v333_v38  ;;  %1911 = vmatprep.mubr.f32.mxu1 %v522_v32 }
 0x13a   :  { %1912 = vmatmul.mubr.f32.gmra.mrb[30].mxu1 %v523_v35  ;;  %v525_v44 = vmul.f32 %v2639_v37, %v2639_v37 }
 0x13b   :  { %v524_v41 = vmul.f32 %v2642_v39, %v2642_v39  ;;  %v1791_v43 = vpop.f32.mrb[34].mxu0 }
 0x13c   :  { %v2649_v45 = vadd.f32 %v1791_v43, %v2476_v48  ;;  %v343_v47 = vpop.f32.mrb[35].mxu0 }
 0x13d   :  { %v2652_v51 = vadd.f32 %v2476_v48, %v343_v47  ;;  %1914 = vmatprep.mubr.f32.mxu1 %v524_v41 }
 0x13e   :  { %1915 = vmatmul.mubr.f32.gmra.mrb[32].mxu1 %v525_v44  ;;  %v527_v57 = vmul.f32 %v2649_v45, %v2649_v45 }
 0x13f   :  { %v526_v53 = vmul.f32 %v2652_v51, %v2652_v51  ;;  %v1794_v54 = vpop.f32.mrb[36].mxu0 }
 0x140   :  { %v2659_v60 = vadd.f32 %v1794_v54, %v2476_v48  ;;  %v353_v61 = vpop.f32.mrb[37].mxu0 }
 0x141   :  { %v2662_v63 = vadd.f32 %v2476_v48, %v353_v61  ;;  %1917 = vmatprep.mubr.f32.mxu1 %v526_v53 }
 0x142   :  { %1918 = vmatmul.mubr.f32.gmra.mrb[34].mxu1 %v527_v57  ;;  %v529_v7 = vmul.f32 %v2659_v60, %v2659_v60 }
 0x143   :  { %v528_v2 = vmul.f32 %v2662_v63, %v2662_v63  ;;  %v1797_v5 = vpop.f32.mrb[38].mxu0 }
 0x144   :  { %v2669_v8 = vadd.f32 %v1797_v5, %v2476_v48  ;;  %v363_v11 = vpop.f32.mrb[39].mxu0 }
 0x145   :  { %v2672_v14 = vadd.f32 %v2476_v48, %v363_v11  ;;  %1920 = vmatprep.mubr.f32.mxu1 %v528_v2 }
 0x146   :  { %3836 = vst [vmem:[#allocation2_spill] sm:$0xff] %v2669_v8  ;;  %1921 = vmatmul.mubr.f32.gmra.mrb[36].mxu1 %v529_v7  ;;  %v531_v20 = vmul.f32 %v2669_v8, %v2669_v8 }
 0x147   :  { %3837 = vst [vmem:[#allocation3_spill] sm:$0xff] %v2672_v14  ;;  %v530_v15 = vmul.f32 %v2672_v14, %v2672_v14  ;;  %v1800_v17 = vpop.f32.mrb[40].mxu0 }
 0x148   :  { %v2679_v23 = vadd.f32 %v1800_v17, %v2476_v48  ;;  %v373_v25 = vpop.f32.mrb[41].mxu0 }
 0x149   :  { %v2682_v26 = vadd.f32 %v2476_v48, %v373_v25  ;;  %1923 = vmatprep.mubr.f32.mxu1 %v530_v15 }
 0x14a   :  { %3838 = vst [vmem:[#allocation4_spill] sm:$0xff] %v2679_v23  ;;  %1924 = vmatmul.mubr.f32.gmra.mrb[38].mxu1 %v531_v20  ;;  %v533_v33 = vmul.f32 %v2679_v23, %v2679_v23 }
 0x14b   :  { %3839 = vst [vmem:[#allocation5_spill] sm:$0xff] %v2682_v26  ;;  %v532_v29 = vmul.f32 %v2682_v26, %v2682_v26  ;;  %v1803_v32 = vpop.f32.mrb[42].mxu0 }
 0x14c   :  { %v2689_v35 = vadd.f32 %v1803_v32, %v2476_v48  ;;  %v383_v38 = vpop.f32.mrb[43].mxu0 }
 0x14d   :  { %v2692_v41 = vadd.f32 %v2476_v48, %v383_v38  ;;  %1926 = vmatprep.mubr.f32.mxu1 %v532_v29 }
 0x14e   :  { %3840 = vst [vmem:[#allocation6_spill] sm:$0xff] %v2689_v35  ;;  %1927 = vmatmul.mubr.f32.gmra.mrb[40].mxu1 %v533_v33  ;;  %v535_v47 = vmul.f32 %v2689_v35, %v2689_v35 }
 0x14f   :  { %3841 = vst [vmem:[#allocation7_spill] sm:$0xff] %v2692_v41  ;;  %v534_v43 = vmul.f32 %v2692_v41, %v2692_v41  ;;  %v1806_v44 = vpop.f32.mrb[44].mxu0 }
 0x150   :  { %v2699_v53 = vadd.f32 %v1806_v44, %v2476_v48  ;;  %v393_v54 = vpop.f32.mrb[45].mxu0 }
 0x151   :  { %v2702_v57 = vadd.f32 %v2476_v48, %v393_v54  ;;  %1929 = vmatprep.mubr.f32.mxu1 %v534_v43 }
 0x152   :  { %3842 = vst [vmem:[#allocation8_spill] sm:$0xff] %v2699_v53  ;;  %1930 = vmatmul.mubr.f32.gmra.mrb[42].mxu1 %v535_v47  ;;  %v537_v5 = vmul.f32 %v2699_v53, %v2699_v53 }
 0x153   :  { %3843 = vst [vmem:[#allocation9_spill] sm:$0xff] %v2702_v57  ;;  %v536_v61 = vmul.f32 %v2702_v57, %v2702_v57  ;;  %v1809_v2 = vpop.f32.mrb[46].mxu0 }
 0x154   :  { %v2709_v7 = vadd.f32 %v1809_v2, %v2476_v48  ;;  %v403_v11 = vpop.f32.mrb[47].mxu0 }
 0x155   :  { %v2712_v15 = vadd.f32 %v2476_v48, %v403_v11  ;;  %1932 = vmatprep.mubr.f32.mxu1 %v536_v61 }
 0x156   :  { %3844 = vst [vmem:[#allocation10_spill] sm:$0xff] %v2709_v7  ;;  %1933 = vmatmul.mubr.f32.gmra.mrb[44].mxu1 %v537_v5  ;;  %v539_v25 = vmul.f32 %v2709_v7, %v2709_v7 }
 0x157   :  { %3845 = vst [vmem:[#allocation11_spill] sm:$0xff] %v2712_v15  ;;  %v538_v17 = vmul.f32 %v2712_v15, %v2712_v15  ;;  %v1812_v20 = vpop.f32.mrb[48].mxu0 }
 0x158   :  { %v2719_v29 = vadd.f32 %v1812_v20, %v2476_v48  ;;  %v413_v32 = vpop.f32.mrb[49].mxu0 }
 0x159   :  { %v2722_v33 = vadd.f32 %v2476_v48, %v413_v32  ;;  %1935 = vmatprep.mubr.f32.mxu1 %v538_v17 }
 0x15a   :  { %3846 = vst [vmem:[#allocation12_spill] sm:$0xff] %v2719_v29  ;;  %1936 = vmatmul.mubr.f32.gmra.mrb[46].mxu1 %v539_v25  ;;  %v541_v44 = vmul.f32 %v2719_v29, %v2719_v29 }
 0x15b   :  { %3847 = vst [vmem:[#allocation13_spill] sm:$0xff] %v2722_v33  ;;  %v540_v38 = vmul.f32 %v2722_v33, %v2722_v33  ;;  %v1815_v43 = vpop.f32.mrb[50].mxu0 }
 0x15c   :  { %v2729_v47 = vadd.f32 %v1815_v43, %v2476_v48  ;;  %v423_v54 = vpop.f32.mrb[51].mxu0 }
 0x15d   :  { %v2732_v61 = vadd.f32 %v2476_v48, %v423_v54  ;;  %1938 = vmatprep.mubr.f32.mxu1 %v540_v38 }
 0x15e   :  { %3848 = vst [vmem:[#allocation14_spill] sm:$0xff] %v2729_v47  ;;  %1939 = vmatmul.mubr.f32.gmra.mrb[48].mxu1 %v541_v44  ;;  %v543_v11 = vmul.f32 %v2729_v47, %v2729_v47 }
 0x15f   :  { %3849 = vst [vmem:[#allocation15_spill] sm:$0xff] %v2732_v61  ;;  %v542_v2 = vmul.f32 %v2732_v61, %v2732_v61  ;;  %v1818_v5 = vpop.f32.mrb[52].mxu0 }
 0x160   :  { %v2739_v17 = vadd.f32 %v1818_v5, %v2476_v48  ;;  %v433_v20 = vpop.f32.mrb[53].mxu0 }
 0x161   :  { %v2742_v25 = vadd.f32 %v2476_v48, %v433_v20  ;;  %1941 = vmatprep.mubr.f32.mxu1 %v542_v2 }
 0x162   :  { %3850 = vst [vmem:[#allocation16_spill] sm:$0xff] %v2739_v17  ;;  %1942 = vmatmul.mubr.f32.gmra.mrb[50].mxu1 %v543_v11  ;;  %v545_v43 = vmul.f32 %v2739_v17, %v2739_v17 }
 0x163   :  { %3851 = vst [vmem:[#allocation17_spill] sm:$0xff] %v2742_v25  ;;  %v544_v32 = vmul.f32 %v2742_v25, %v2742_v25  ;;  %v1821_v38 = vpop.f32.mrb[54].mxu0 }
 0x164   :  { %v2749_v44 = vadd.f32 %v1821_v38, %v2476_v48  ;;  %v443_v54 = vpop.f32.mrb[55].mxu0 }
 0x165   :  { %v2752_v5 = vadd.f32 %v2476_v48, %v443_v54  ;;  %1944 = vmatprep.mubr.f32.mxu1 %v544_v32 }
 0x166   :  { %3852 = vst [vmem:[#allocation18_spill] sm:$0xff] %v2749_v44  ;;  %1945 = vmatmul.mubr.f32.gmra.mrb[52].mxu1 %v545_v43  ;;  %v547_v20 = vmul.f32 %v2749_v44, %v2749_v44 }
 0x167   :  { %3853 = vst [vmem:[#allocation19_spill] sm:$0xff] %v2752_v5  ;;  %v546_v2 = vmul.f32 %v2752_v5, %v2752_v5  ;;  %v1824_v11 = vpop.f32.mrb[56].mxu0 }
 0x168   :  { %v2759_v25 = vadd.f32 %v1824_v11, %v2476_v48  ;;  %v453_v17 = vpop.f32.mrb[57].mxu0 }
 0x169   :  { %v2762_v38 = vadd.f32 %v2476_v48, %v453_v17  ;;  %1947 = vmatprep.mubr.f32.mxu1 %v546_v2 }
 0x16a   :  { %3854 = vst [vmem:[#allocation20_spill] sm:$0xff] %v2759_v25  ;;  %1948 = vmatmul.mubr.f32.gmra.mrb[54].mxu1 %v547_v20  ;;  %v549_v54 = vmul.f32 %v2759_v25, %v2759_v25 }
 0x16b   :  { %3855 = vst [vmem:[#allocation21_spill] sm:$0xff] %v2762_v38  ;;  %v548_v32 = vmul.f32 %v2762_v38, %v2762_v38  ;;  %v1827_v43 = vpop.f32.mrb[58].mxu0 }
 0x16c   :  { %v2769_v5 = vadd.f32 %v1827_v43, %v2476_v48  ;;  %v463_v44 = vpop.f32.mrb[59].mxu0 }
 0x16d   :  { %v2772_v11 = vadd.f32 %v2476_v48, %v463_v44  ;;  %1950 = vmatprep.mubr.f32.mxu1 %v548_v32 }
 0x16e   :  { %3856 = vst [vmem:[#allocation22_spill] sm:$0xff] %v2769_v5  ;;  %1951 = vmatmul.mubr.f32.gmra.mrb[56].mxu1 %v549_v54  ;;  %v551_v20 = vmul.f32 %v2769_v5, %v2769_v5 }
 0x16f   :  { %3857 = vst [vmem:[#allocation23_spill] sm:$0xff] %v2772_v11  ;;  %v550_v17 = vmul.f32 %v2772_v11, %v2772_v11  ;;  %v1830_v2 = vpop.f32.mrb[60].mxu0 }
 0x170   :  { %v2779_v38 = vadd.f32 %v1830_v2, %v2476_v48  ;;  %v473_v25 = vpop.f32.mrb[61].mxu0 }
 0x171   :  { %v2782_v43 = vadd.f32 %v2476_v48, %v473_v25  ;;  %1953 = vmatprep.mubr.f32.mxu1 %v550_v17 }
 0x172   :  { %3858 = vst [vmem:[#allocation24_spill] sm:$0xff] %v2779_v38  ;;  %1954 = vmatmul.mubr.f32.gmra.mrb[58].mxu1 %v551_v20  ;;  %v553_v54 = vmul.f32 %v2779_v38, %v2779_v38  ;;  %v2801_v20 = vld [vmem:[%s3808_s4] ss:$0 sm:$0xff] }
 0x173   :  { %3859 = vst [vmem:[#allocation25_spill] sm:$0xff] %v2782_v43  ;;  %v552_v44 = vmul.f32 %v2782_v43, %v2782_v43  ;;  %v1833_v32 = vpop.f32.mrb[62].mxu0 }
 0x174   :  { %v2789_v11 = vadd.f32 %v1833_v32, %v2476_v48  ;;  %v483_v5 = vpop.f32.mrb[63].mxu0 }
 0x175   :  { %v2792_v2 = vadd.f32 %v2476_v48, %v483_v5  ;;  %1956 = vmatprep.mubr.f32.mxu1 %v552_v44 }
 0x176   :  { %3860 = vst [vmem:[#allocation26_spill] sm:$0xff] %v2789_v11  ;;  %1957 = vmatmul.mubr.f32.gmra.mrb[60].mxu1 %v553_v54  ;;  %v555_v17 = vmul.f32 %v2789_v11, %v2789_v11 }
 0x177   :  { %3861 = vst [vmem:[#allocation27_spill] sm:$0xff] %v2792_v2  ;;  %v554_v25 = vmul.f32 %v2792_v2, %v2792_v2 }
 0x179   :  { %1959 = vmatprep.mubr.f32.mxu1 %v554_v25 }
 0x17a   :  { %1960 = vmatmul.mubr.f32.gmra.mrb[62].mxu1 %v555_v17 }
 0x1d1   :  { %v1868_v32 = vpop.f32.mrb[0].mxu1 }
 0x1d2   :  { %v651_v43 = vadd.f32 %v1868_v32, %v2801_v20  ;;  %v645_v48 = vpop.f32.mrb[1].mxu1 }
 0x1d3   :  { %v646_v5 = vadd.f32 %v2801_v20, %v645_v48 }
 0x1d4   :  { %2026 = vrsqrt.f32 %v651_v43  ;;  %vm973_vm0 = vcmp.eq.f32.partialorder %v651_v43, inf  ;;  %vm975_vm1 = vcmp.eq.f32.partialorder %v651_v43, 0.0 }
 0x1d5   :  { %2028 = vrsqrt.f32 %v646_v5  ;;  %v1871_v44 = vpop.f32.mrb[2].mxu1  ;;  %vm966_vm2 = vcmp.eq.f32.partialorder %v646_v5, inf  ;;  %vm968_vm3 = vcmp.eq.f32.partialorder %v646_v5, 0.0  ;;  %v969_v15 = vand.u32 2147483648, %v646_v5 }
 0x1d6   :  { %v661_v54 = vadd.f32 %v1871_v44, %v2801_v20  ;;  %v655_v2 = vpop.f32.mrb[3].mxu1 }
 0x1d7   :  { %v656_v25 = vadd.f32 %v2801_v20, %v655_v2 }
 0x1d8   :  { %2030 = vrsqrt.f32 %v661_v54  ;;  %vm987_vm4 = vcmp.eq.f32.partialorder %v661_v54, inf  ;;  %vm989_vm5 = vcmp.eq.f32.partialorder %v661_v54, 0.0  ;;  %v990_v41 = vand.u32 2147483648, %v661_v54 }
 0x1d9   :  { %2032 = vrsqrt.f32 %v656_v25  ;;  %v1874_v17 = vpop.f32.mrb[4].mxu1  ;;  %vm980_vm6 = vcmp.eq.f32.partialorder %v656_v25, inf  ;;  %vm982_vm7 = vcmp.eq.f32.partialorder %v656_v25, 0.0 }
 0x1da   :  { %v2808_v11 = vadd.f32 %v1874_v17, %v2801_v20  ;;  %v665_v38 = vpop.f32.mrb[5].mxu1  ;;  %v976_v17 = vand.u32 2147483648, %v651_v43 }
 0x1db   :  { %v2811_v32 = vadd.f32 %v2801_v20, %v665_v38 }
 0x1dc   :  { %2034 = vrsqrt.f32 %v2808_v11  ;;  %vm1001_vm8 = vcmp.eq.f32.partialorder %v2808_v11, inf  ;;  %vm1003_vm9 = vcmp.eq.f32.partialorder %v2808_v11, 0.0 }
 0x1dd   :  { %2036 = vrsqrt.f32 %v2811_v32  ;;  %v1877_v48 = vpop.f32.mrb[6].mxu1  ;;  %vm994_vm10 = vcmp.eq.f32.partialorder %v2811_v32, inf  ;;  %vm996_vm11 = vcmp.eq.f32.partialorder %v2811_v32, 0.0 }
 0x1de   :  { %v2027_v61 = vpop.eup %2026  ;;  %v2816_v2 = vadd.f32 %v1877_v48, %v2801_v20  ;;  %v675_v44 = vpop.f32.mrb[7].mxu1 }
 0x1df   :  { %v2029_v47 = vpop.eup %2028  ;;  %v972_v33 = vmul.f32 %v2027_v61, %v651_v43  ;;  %v2819_v29 = vadd.f32 %v2801_v20, %v675_v44 }
 0x1e0   :  { %v965_v38 = vmul.f32 %v2029_v47, %v646_v5  ;;  %2038 = vrsqrt.f32 %v2816_v2  ;;  %vm1015_vm12 = vcmp.eq.f32.partialorder %v2816_v2, inf  ;;  %vm1017_vm13 = vcmp.eq.f32.partialorder %v2816_v2, 0.0 }
 0x1e1   :  { %v974_v7 = vsel %vm973_vm0, %v651_v43, %v972_v33  ;;  %2040 = vrsqrt.f32 %v2819_v29  ;;  %v1880_v48 = vpop.f32.mrb[8].mxu1  ;;  %vm1008_vm14 = vcmp.eq.f32.partialorder %v2819_v29, inf  ;;  %vm1010_vm15 = vcmp.eq.f32.partialorder %v2819_v29, 0.0 }
 0x1e2   :  { %v2031_v57 = vpop.eup %2030  ;;  %v977_v53 = vsel %vm975_vm1, %v976_v17, %v974_v7  ;;  %v967_v61 = vsel %vm966_vm2, %v646_v5, %v965_v38  ;;  %v685_v35 = vpop.f32.mrb[9].mxu1  ;;  %v2827_v33 = vadd.f32 %v1880_v48, %v2801_v20  ;;  %v1004_v38 = vand.u32 2147483648, %v2808_v11 }
 0x1e3   :  { %v2033_v44 = vpop.eup %2032  ;;  %v1413_v47 = vmul.f32 %v977_v53, %v2479_v50  ;;  %v970_v26 = vsel %vm968_vm3, %v969_v15, %v967_v61  ;;  %v986_v23 = vmul.f32 %v2031_v57, %v661_v54  ;;  %v2831_v43 = vadd.f32 %v2801_v20, %v685_v35 }
 0x1e4   :  { %v1412_v14 = vmul.f32 %v970_v26, %v2482_v52  ;;  %v979_v8 = vmul.f32 %v2033_v44, %v656_v25  ;;  %v983_v50 = vand.u32 2147483648, %v656_v25  ;;  %2042 = vrsqrt.f32 %v2827_v33 }
 0x1e5   :  { %1477 = vst [vmem:[%s3809_s5 + $0x8] sm:$0xff] %v1413_v47  ;;  %v988_v7 = vsel %vm987_vm4, %v661_v54, %v986_v23  ;;  %v1883_v53 = vpop.f32.mrb[10].mxu1  ;;  %2044 = vrsqrt.f32 %v2831_v43  ;;  %vm1029_vm0 = vcmp.eq.f32.partialorder %v2827_v33, inf  ;;  %vm1031_vm1 = vcmp.eq.f32.partialorder %v2827_v33, 0.0 }
 0x1e6   :  { %v2035_v57 = vpop.eup %2034  ;;  %1476 = vst [vmem:[%s3809_s5] sm:$0xff] %v1412_v14  ;;  %v991_v52 = vsel %vm989_vm5, %v990_v41, %v988_v7  ;;  %v981_v26 = vsel %vm980_vm6, %v656_v25, %v979_v8  ;;  %v695_v23 = vpop.f32.mrb[11].mxu1  ;;  %v997_v8 = vand.u32 2147483648, %v2811_v32  ;;  %v2862_v54 = vadd.f32 %v1883_v53, %v2801_v20 }
 0x1e7   :  { %v2037_v35 = vpop.eup %2036  ;;  %v1415_v15 = vmul.f32 %v991_v52, %v2489_v56  ;;  %v984_v5 = vsel %vm982_vm7, %v983_v50, %v981_v26  ;;  %v1000_v17 = vmul.f32 %v2035_v57, %v2808_v11  ;;  %v1018_v26 = vand.u32 2147483648, %v2816_v2 }
 0x1e8   :  { %v1414_v14 = vmul.f32 %v984_v5, %v2492_v58  ;;  %v993_v41 = vmul.f32 %v2037_v35, %v2811_v32  ;;  %v2865_v58 = vadd.f32 %v2801_v20, %v695_v23  ;;  %2046 = vrsqrt.f32 %v2862_v54 }
 0x1e9   :  { %1479 = vst [vmem:[%s3809_s5 + $0x18] sm:$0xff] %v1415_v15  ;;  %v1002_v56 = vsel %vm1001_vm8, %v2808_v11, %v1000_v17  ;;  %v1886_v25 = vpop.f32.mrb[12].mxu1  ;;  %vm1022_vm2 = vcmp.eq.f32.partialorder %v2831_v43, inf  ;;  %vm1024_vm3 = vcmp.eq.f32.partialorder %v2831_v43, 0.0  ;;  %vm1043_vm4 = vcmp.eq.f32.partialorder %v2862_v54, inf }
 0x1ea   :  { %v2039_v48 = vpop.eup %2038  ;;  %1478 = vst [vmem:[%s3809_s5 + $0x10] sm:$0xff] %v1414_v14  ;;  %v1005_v61 = vsel %vm1003_vm9, %v1004_v38, %v1002_v56  ;;  %v995_v44 = vsel %vm994_vm10, %v2811_v32, %v993_v41  ;;  %v2875_v47 = vadd.f32 %v1886_v25, %v2801_v20  ;;  %v705_v7 = vpop.f32.mrb[13].mxu1  ;;  %v1011_v32 = vand.u32 2147483648, %v2819_v29 }
 0x1eb   :  { %v2041_v50 = vpop.eup %2040  ;;  %v1417_v53 = vmul.f32 %v1005_v61, %v2499_v62  ;;  %v998_v57 = vsel %vm996_vm11, %v997_v8, %v995_v44  ;;  %v1014_v52 = vmul.f32 %v2039_v48, %v2816_v2  ;;  %2048 = vrsqrt.f32 %v2865_v58 }
 0x1ec   :  { %v1416_v11 = vmul.f32 %v998_v57, %v2502_v0  ;;  %v1007_v23 = vmul.f32 %v2041_v50, %v2819_v29  ;;  %2050 = vrsqrt.f32 %v2875_v47  ;;  %v1032_v8 = vand.u32 2147483648, %v2827_v33 }
 0x1ed   :  { %1481 = vst [vmem:[%s3809_s5 + $0x28] sm:$0xff] %v1417_v53  ;;  %v1016_v62 = vsel %vm1015_vm12, %v2816_v2, %v1014_v52  ;;  %v1889_v35 = vpop.f32.mrb[14].mxu1  ;;  %v1025_v61 = vand.u32 2147483648, %v2831_v43  ;;  %vm1045_vm5 = vcmp.eq.f32.partialorder %v2862_v54, 0.0  ;;  %vm1036_vm6 = vcmp.eq.f32.partialorder %v2865_v58, inf }
 0x1ee   :  { %1480 = vst [vmem:[%s3809_s5 + $0x20] sm:$0xff] %v1416_v11  ;;  %v1019_v0 = vsel %vm1017_vm13, %v1018_v26, %v1016_v62  ;;  %v1009_v15 = vsel %vm1008_vm14, %v2819_v29, %v1007_v23  ;;  %v715_v5 = vpop.f32.mrb[15].mxu1  ;;  %v2043_v17 = vpop.eup %2042  ;;  %v2911_v29 = vadd.f32 %v2801_v20, %v705_v7  ;;  %v2914_v25 = vadd.f32 %v1889_v35, %v2801_v20 }
 0x1ef   :  { %v1419_v2 = vmul.f32 %v1019_v0, %v2509_v4  ;;  %v1012_v38 = vsel %vm1010_vm15, %v1011_v32, %v1009_v15  ;;  %v2045_v14 = vpop.eup %2044  ;;  %v1028_v56 = vmul.f32 %v2043_v17, %v2827_v33  ;;  %v2923_v44 = vadd.f32 %v2801_v20, %v715_v5 }
 0x1f0   :  { %v1418_v41 = vmul.f32 %v1012_v38, %v2512_v6  ;;  %v1021_v4 = vmul.f32 %v2045_v14, %v2831_v43  ;;  %2052 = vrsqrt.f32 %v2911_v29  ;;  %v1046_v62 = vand.u32 2147483648, %v2862_v54 }
 0x1f1   :  { %1483 = vst [vmem:[%s3809_s5 + $0x38] sm:$0xff] %v1419_v2  ;;  %v1892_v6 = vpop.f32.mrb[16].mxu1  ;;  %v1030_v48 = vsel %vm1029_vm0, %v2827_v33, %v1028_v56  ;;  %2054 = vrsqrt.f32 %v2914_v25  ;;  %vm1038_vm7 = vcmp.eq.f32.partialorder %v2865_v58, 0.0  ;;  %v1039_v32 = vand.u32 2147483648, %v2865_v58 }
 0x1f2   :  { %1482 = vst [vmem:[%s3809_s5 + $0x30] sm:$0xff] %v1418_v41  ;;  %v725_v50 = vpop.f32.mrb[17].mxu1  ;;  %v1033_v7 = vsel %vm1031_vm1, %v1032_v8, %v1030_v48  ;;  %v1023_v53 = vsel %vm1022_vm2, %v2831_v43, %v1021_v4  ;;  %v2928_v57 = vadd.f32 %v1892_v6, %v2801_v20  ;;  %v2047_v33 = vpop.eup %2046  ;;  %2056 = vrsqrt.f32 %v2923_v44 }
 0x1f3   :  { %v1421_v52 = vmul.f32 %v1033_v7, %v2519_v10  ;;  %v1026_v11 = vsel %vm1024_vm3, %v1025_v61, %v1023_v53  ;;  %v1042_v43 = vmul.f32 %v2047_v33, %v2862_v54  ;;  %vm1057_vm8 = vcmp.eq.f32.partialorder %v2875_v47, inf }
 0x1f4   :  { %v1420_v26 = vmul.f32 %v1026_v11, %v2522_v12  ;;  %2058 = vrsqrt.f32 %v2928_v57  ;;  %vm1059_vm9 = vcmp.eq.f32.partialorder %v2875_v47, 0.0  ;;  %v1060_v15 = vand.u32 2147483648, %v2875_v47 }
 0x1f5   :  { %v1895_v23 = vpop.f32.mrb[18].mxu1  ;;  %1485 = vst [vmem:[%s3809_s5 + $0x48] sm:$0xff] %v1421_v52  ;;  %v2049_v12 = vpop.eup %2048  ;;  %v1044_v35 = vsel %vm1043_vm4, %v2862_v54, %v1042_v43  ;;  %vm1050_vm10 = vcmp.eq.f32.partialorder %v2911_v29, inf  ;;  %v2959_v2 = vadd.f32 %v2801_v20, %v725_v50  ;;  %vm1052_vm11 = vcmp.eq.f32.partialorder %v2911_v29, 0.0 }
 0x1f6   :  { %v735_v10 = vpop.f32.mrb[19].mxu1  ;;  %1484 = vst [vmem:[%s3809_s5 + $0x40] sm:$0xff] %v1420_v26  ;;  %v1035_v0 = vmul.f32 %v2049_v12, %v2865_v58  ;;  %v2051_v5 = vpop.eup %2050  ;;  %v1047_v17 = vsel %vm1045_vm5, %v1046_v62, %v1044_v35  ;;  %v2962_v38 = vadd.f32 %v1895_v23, %v2801_v20  ;;  %vm1071_vm12 = vcmp.eq.f32.partialorder %v2914_v25, inf }
 0x1f7   :  { %v1423_v41 = vmul.f32 %v1047_v17, %v2529_v16  ;;  %v1056_v8 = vmul.f32 %v2051_v5, %v2875_v47  ;;  %v2970_v54 = vadd.f32 %v2801_v20, %v735_v10  ;;  %2060 = vrsqrt.f32 %v2959_v2 }
 0x1f8   :  { %v1037_v56 = vsel %vm1036_vm6, %v2865_v58, %v1035_v0  ;;  %v1053_v58 = vand.u32 2147483648, %v2911_v29  ;;  %2062 = vrsqrt.f32 %v2962_v38  ;;  %vm1073_vm13 = vcmp.eq.f32.partialorder %v2914_v25, 0.0 }
 0x1f9   :  { %v1898_v14 = vpop.f32.mrb[20].mxu1  ;;  %v1040_v6 = vsel %vm1038_vm7, %v1039_v32, %v1037_v56  ;;  %1487 = vst [vmem:[%s3809_s5 + $0x58] sm:$0xff] %v1423_v41  ;;  %v1058_v61 = vsel %vm1057_vm8, %v2875_v47, %v1056_v8  ;;  %v1074_v53 = vand.u32 2147483648, %v2914_v25  ;;  %vm1064_vm14 = vcmp.eq.f32.partialorder %v2923_v44, inf }
 0x1fa   :  { %v745_v4 = vpop.f32.mrb[21].mxu1  ;;  %v2977_v48 = vadd.f32 %v1898_v14, %v2801_v20  ;;  %v1422_v16 = vmul.f32 %v1040_v6, %v2532_v18  ;;  %v2053_v50 = vpop.eup %2052  ;;  %v1061_v7 = vsel %vm1059_vm9, %v1060_v15, %v1058_v61  ;;  %2064 = vrsqrt.f32 %v2970_v54 }
 0x1fb   :  { %v1425_v18 = vmul.f32 %v1061_v7, %v2539_v22  ;;  %v1049_v11 = vmul.f32 %v2053_v50, %v2911_v29  ;;  %v2055_v33 = vpop.eup %2054  ;;  %vm1066_vm15 = vcmp.eq.f32.partialorder %v2923_v44, 0.0  ;;  %v1067_v26 = vand.u32 2147483648, %v2923_v44 }
 0x1fc   :  { %1486 = vst [vmem:[%s3809_s5 + $0x50] sm:$0xff] %v1422_v16  ;;  %vm1085_vm0 = vcmp.eq.f32.partialorder %v2928_v57, inf  ;;  %2066 = vrsqrt.f32 %v2977_v48  ;;  %v2057_v23 = vpop.eup %2056  ;;  %v1070_v43 = vmul.f32 %v2055_v33, %v2914_v25  ;;  %vm1087_vm1 = vcmp.eq.f32.partialorder %v2928_v57, 0.0 }
 0x1fd   :  { %v1901_v52 = vpop.f32.mrb[22].mxu1  ;;  %1489 = vst [vmem:[%s3809_s5 + $0x68] sm:$0xff] %v1425_v18  ;;  %v1051_v22 = vsel %vm1050_vm10, %v2911_v29, %v1049_v11  ;;  %v1088_v62 = vand.u32 2147483648, %v2928_v57  ;;  %v1063_v32 = vmul.f32 %v2057_v23, %v2923_v44  ;;  %v3017_v35 = vadd.f32 %v2801_v20, %v745_v4 }
 0x1fe   :  { %v755_v47 = vpop.f32.mrb[23].mxu1  ;;  %v2059_v10 = vpop.eup %2058  ;;  %v1054_v12 = vsel %vm1052_vm11, %v1053_v58, %v1051_v22  ;;  %v3020_v0 = vadd.f32 %v1901_v52, %v2801_v20  ;;  %v1072_v17 = vsel %vm1071_vm12, %v2914_v25, %v1070_v43  ;;  %vm1078_vm2 = vcmp.eq.f32.partialorder %v2959_v2, inf }
 0x1ff   :  { %v1424_v5 = vmul.f32 %v1054_v12, %v2542_v24  ;;  %v1084_v14 = vmul.f32 %v2059_v10, %v2928_v57  ;;  %v1075_v41 = vsel %vm1073_vm13, %v1074_v53, %v1072_v17  ;;  %v1065_v56 = vsel %vm1064_vm14, %v2923_v44, %v1063_v32 }
 0x200   :  { %2068 = vrsqrt.f32 %v3017_v35  ;;  %v3035_v24 = vadd.f32 %v2801_v20, %v755_v47  ;;  %v1427_v8 = vmul.f32 %v1075_v41, %v2549_v28  ;;  %v1068_v4 = vsel %vm1066_vm15, %v1067_v26, %v1065_v56 }
 0x201   :  { %v1904_v15 = vpop.f32.mrb[24].mxu1  ;;  %1488 = vst [vmem:[%s3809_s5 + $0x60] sm:$0xff] %v1424_v5  ;;  %v1086_v25 = vsel %vm1085_vm0, %v2928_v57, %v1084_v14  ;;  %vm1080_vm3 = vcmp.eq.f32.partialorder %v2959_v2, 0.0  ;;  %v2061_v6 = vpop.eup %2060  ;;  %v1426_v16 = vmul.f32 %v1068_v4, %v2552_v30  ;;  %v1081_v58 = vand.u32 2147483648, %v2959_v2 }
 0x202   :  { %v765_v29 = vpop.f32.mrb[25].mxu1  ;;  %v1089_v61 = vsel %vm1087_vm1, %v1088_v62, %v1086_v25  ;;  %2070 = vrsqrt.f32 %v3020_v0  ;;  %v2063_v50 = vpop.eup %2062  ;;  %1491 = vst [vmem:[%s3809_s5 + $0x78] sm:$0xff] %v1427_v8  ;;  %v1077_v7 = vmul.f32 %v2061_v6, %v2959_v2  ;;  %vm1099_vm4 = vcmp.eq.f32.partialorder %v2962_v38, inf }
 0x203   :  { %v1429_v44 = vmul.f32 %v1089_v61, %v2559_v34  ;;  %vm1101_vm5 = vcmp.eq.f32.partialorder %v2962_v38, 0.0  ;;  %1490 = vst [vmem:[%s3809_s5 + $0x70] sm:$0xff] %v1426_v16  ;;  %v1098_v57 = vmul.f32 %v2063_v50, %v2962_v38  ;;  %v1102_v53 = vand.u32 2147483648, %v2962_v38 }
 0x204   :  { %vm1092_vm6 = vcmp.eq.f32.partialorder %v2970_v54, inf  ;;  %2072 = vrsqrt.f32 %v3035_v24  ;;  %v2065_v34 = vpop.eup %2064  ;;  %v1079_v52 = vsel %vm1078_vm2, %v2959_v2, %v1077_v7  ;;  %vm1094_vm7 = vcmp.eq.f32.partialorder %v2970_v54, 0.0 }
 0x205   :  { %v1907_v28 = vpop.f32.mrb[26].mxu1  ;;  %1493 = vst [vmem:[%s3809_s5 + $0x88] sm:$0xff] %v1429_v44  ;;  %v1095_v18 = vand.u32 2147483648, %v2970_v54  ;;  %v3075_v11 = vadd.f32 %v1904_v15, %v2801_v20  ;;  %v1082_v33 = vsel %vm1080_vm3, %v1081_v58, %v1079_v52  ;;  %v1100_v26 = vsel %vm1099_vm4, %v2962_v38, %v1098_v57 }
 0x206   :  { %v775_v30 = vpop.f32.mrb[27].mxu1  ;;  %v2067_v47 = vpop.eup %2066  ;;  %v1091_v23 = vmul.f32 %v2065_v34, %v2970_v54  ;;  %v3084_v22 = vadd.f32 %v2801_v20, %v765_v29  ;;  %v1428_v62 = vmul.f32 %v1082_v33, %v2562_v36  ;;  %v1103_v10 = vsel %vm1101_vm5, %v1102_v53, %v1100_v26 }
 0x207   :  { %v1112_v12 = vmul.f32 %v2067_v47, %v2977_v48  ;;  %2074 = vrsqrt.f32 %v3075_v11  ;;  %v1431_v32 = vmul.f32 %v1103_v10, %v2569_v40  ;;  %vm1113_vm8 = vcmp.eq.f32.partialorder %v2977_v48, inf }
 0x208   :  { %v1093_v15 = vsel %vm1092_vm6, %v2970_v54, %v1091_v23  ;;  %v1116_v5 = vand.u32 2147483648, %v2977_v48  ;;  %1492 = vst [vmem:[%s3809_s5 + $0x80] sm:$0xff] %v1428_v62  ;;  %vm1115_vm9 = vcmp.eq.f32.partialorder %v2977_v48, 0.0  ;;  %2076 = vrsqrt.f32 %v3084_v22 }
 0x209   :  { %v1910_v43 = vpop.f32.mrb[28].mxu1  ;;  %v1096_v36 = vsel %vm1094_vm7, %v1095_v18, %v1093_v15  ;;  %v1114_v38 = vsel %vm1113_vm8, %v2977_v48, %v1112_v12  ;;  %1495 = vst [vmem:[%s3809_s5 + $0x98] sm:$0xff] %v1431_v32  ;;  %vm1106_vm10 = vcmp.eq.f32.partialorder %v3017_v35, inf  ;;  %vm1108_vm11 = vcmp.eq.f32.partialorder %v3017_v35, 0.0 }
 0x20a   :  { %v785_v2 = vpop.f32.mrb[29].mxu1  ;;  %v2069_v40 = vpop.eup %2068  ;;  %v1430_v17 = vmul.f32 %v1096_v36, %v2572_v42  ;;  %v1117_v14 = vsel %vm1115_vm9, %v1116_v5, %v1114_v38  ;;  %v1109_v48 = vand.u32 2147483648, %v3017_v35  ;;  %v3115_v56 = vadd.f32 %v1907_v28, %v2801_v20 }
 0x20b   :  { %v1433_v29 = vmul.f32 %v1117_v14, %v2579_v46  ;;  %v1105_v41 = vmul.f32 %v2069_v40, %v3017_v35  ;;  %vm1127_vm12 = vcmp.eq.f32.partialorder %v3020_v0, inf  ;;  %vm1129_vm13 = vcmp.eq.f32.partialorder %v3020_v0, 0.0 }
 0x20c   :  { %v2071_v4 = vpop.eup %2070  ;;  %1494 = vst [vmem:[%s3809_s5 + $0x90] sm:$0xff] %v1430_v17  ;;  %v3123_v42 = vadd.f32 %v2801_v20, %v775_v30  ;;  %v3126_v46 = vadd.f32 %v1910_v43, %v2801_v20  ;;  %v1130_v16 = vand.u32 2147483648, %v3020_v0  ;;  %2078 = vrsqrt.f32 %v3115_v56 }
 0x20d   :  { %v1913_v54 = vpop.f32.mrb[30].mxu1  ;;  %1497 = vst [vmem:[%s3809_s5 + $0xa8] sm:$0xff] %v1433_v29  ;;  %v1107_v25 = vsel %vm1106_vm10, %v3017_v35, %v1105_v41  ;;  %v1126_v6 = vmul.f32 %v2071_v4, %v3020_v0  ;;  %vm1120_vm14 = vcmp.eq.f32.partialorder %v3035_v24, inf  ;;  %v3140_v28 = vadd.f32 %v2801_v20, %v785_v2 }
 0x20e   :  { %v795_v8 = vpop.f32.mrb[31].mxu1  ;;  %v2073_v61 = vpop.eup %2072  ;;  %v1110_v58 = vsel %vm1108_vm11, %v1109_v48, %v1107_v25  ;;  %2080 = vrsqrt.f32 %v3123_v42  ;;  %vm1122_vm15 = vcmp.eq.f32.partialorder %v3035_v24, 0.0  ;;  %v1123_v53 = vand.u32 2147483648, %v3035_v24 }
 0x20f   :  { %v1432_v44 = vmul.f32 %v1110_v58, %v2582_v49  ;;  %v1128_v7 = vsel %vm1127_vm12, %v3020_v0, %v1126_v6  ;;  %v1119_v30 = vmul.f32 %v2073_v61, %v3035_v24  ;;  %2082 = vrsqrt.f32 %v3126_v46 }
 0x210   :  { %v1131_v57 = vsel %vm1129_vm13, %v1130_v16, %v1128_v7  ;;  %v3153_v34 = vadd.f32 %v1913_v54, %v2801_v20  ;;  %vm1141_vm0 = vcmp.eq.f32.partialorder %v3075_v11, inf  ;;  %vm1143_vm1 = vcmp.eq.f32.partialorder %v3075_v11, 0.0 }
 0x211   :  { %v1916_v50 = vpop.f32.mrb[32].mxu1  ;;  %v2075_v49 = vpop.eup %2074  ;;  %1496 = vst [vmem:[%s3809_s5 + $0xa0] sm:$0xff] %v1432_v44  ;;  %v1435_v52 = vmul.f32 %v1131_v57, %v2589_v55  ;;  %v1121_v18 = vsel %vm1120_vm14, %v3035_v24, %v1119_v30  ;;  %v1144_v33 = vand.u32 2147483648, %v3075_v11  ;;  %2084 = vrsqrt.f32 %v3140_v28 }
 0x212   :  { %v805_v35 = vpop.f32.mrb[33].mxu1  ;;  %v1124_v0 = vsel %vm1122_vm15, %v1123_v53, %v1121_v18  ;;  %v1140_v47 = vmul.f32 %v2075_v49, %v3075_v11  ;;  %v2077_v23 = vpop.eup %2076  ;;  %vm1134_vm2 = vcmp.eq.f32.partialorder %v3084_v22, inf  ;;  %vm1136_vm3 = vcmp.eq.f32.partialorder %v3084_v22, 0.0 }
 0x213   :  { %1499 = vst [vmem:[%s3809_s5 + $0xb8] sm:$0xff] %v1435_v52  ;;  %v1434_v55 = vmul.f32 %v1124_v0, %v2592_v59  ;;  %v1137_v24 = vand.u32 2147483648, %v3084_v22  ;;  %v1133_v10 = vmul.f32 %v2077_v23, %v3084_v22  ;;  %vm1155_vm4 = vcmp.eq.f32.partialorder %v3115_v56, inf }
 0x214   :  { %v1142_v62 = vsel %vm1141_vm0, %v3075_v11, %v1140_v47  ;;  %2086 = vrsqrt.f32 %v3153_v34  ;;  %vm1157_vm5 = vcmp.eq.f32.partialorder %v3115_v56, 0.0  ;;  %v1158_v12 = vand.u32 2147483648, %v3115_v56 }
 0x215   :  { %v1919_v26 = vpop.f32.mrb[34].mxu1  ;;  %1498 = vst [vmem:[%s3809_s5 + $0xb0] sm:$0xff] %v1434_v55  ;;  %v1145_v59 = vsel %vm1143_vm1, %v1144_v33, %v1142_v62  ;;  %v3186_v2 = vadd.f32 %v2801_v20, %v795_v8  ;;  %v1135_v15 = vsel %vm1134_vm2, %v3084_v22, %v1133_v10  ;;  %v3191_v5 = vadd.f32 %v1916_v50, %v2801_v20 }
 0x216   :  { %v815_v43 = vpop.f32.mrb[35].mxu1  ;;  %v1437_v32 = vmul.f32 %v1145_v59, %v2599_v1  ;;  %v3194_v36 = vadd.f32 %v2801_v20, %v805_v35  ;;  %v2079_v11 = vpop.eup %2078  ;;  %v1138_v40 = vsel %vm1136_vm3, %v1137_v24, %v1135_v15  ;;  %vm1148_vm6 = vcmp.eq.f32.partialorder %v3123_v42, inf }
 0x217   :  { %vm1150_vm7 = vcmp.eq.f32.partialorder %v3123_v42, 0.0  ;;  %2088 = vrsqrt.f32 %v3186_v2  ;;  %v1436_v14 = vmul.f32 %v1138_v40, %v2602_v3  ;;  %v1154_v54 = vmul.f32 %v2079_v11, %v3115_v56 }
 0x218   :  { %v2081_v17 = vpop.eup %2080  ;;  %1501 = vst [vmem:[%s3809_s5 + $0xc8] sm:$0xff] %v1437_v32  ;;  %v1151_v22 = vand.u32 2147483648, %v3123_v42  ;;  %2090 = vrsqrt.f32 %v3191_v5  ;;  %vm1169_vm8 = vcmp.eq.f32.partialorder %v3126_v46, inf  ;;  %vm1171_vm9 = vcmp.eq.f32.partialorder %v3126_v46, 0.0 }
 0x219   :  { %v1922_v38 = vpop.f32.mrb[36].mxu1  ;;  %v1147_v29 = vmul.f32 %v2081_v17, %v3123_v42  ;;  %v1172_v41 = vand.u32 2147483648, %v3126_v46  ;;  %v2083_v48 = vpop.eup %2082  ;;  %1500 = vst [vmem:[%s3809_s5 + $0xc0] sm:$0xff] %v1436_v14  ;;  %v1156_v3 = vsel %vm1155_vm4, %v3115_v56, %v1154_v54  ;;  %vm1162_vm10 = vcmp.eq.f32.partialorder %v3140_v28, inf }
 0x21a   :  { %v3201_v1 = vpop.f32.mrb[37].mxu1  ;;  %vm1164_vm11 = vcmp.eq.f32.partialorder %v3140_v28, 0.0  ;;  %2092 = vrsqrt.f32 %v3194_v36  ;;  %v1159_v4 = vsel %vm1157_vm5, %v1158_v12, %v1156_v3  ;;  %v1168_v6 = vmul.f32 %v2083_v48, %v3126_v46 }
 0x21b   :  { %v1149_v25 = vsel %vm1148_vm6, %v3123_v42, %v1147_v29  ;;  %v1165_v16 = vand.u32 2147483648, %v3140_v28  ;;  %v2085_v58 = vpop.eup %2084  ;;  %v1439_v50 = vmul.f32 %v1159_v4, %v2609_v9  ;;  %v3234_v7 = vadd.f32 %v1919_v26, %v2801_v20 }
 0x21c   :  { %v1152_v44 = vsel %vm1150_vm7, %v1151_v22, %v1149_v25  ;;  %v3237_v56 = vadd.f32 %v2801_v20, %v815_v43  ;;  %v1170_v35 = vsel %vm1169_vm8, %v3126_v46, %v1168_v6  ;;  %v1161_v57 = vmul.f32 %v2085_v58, %v3140_v28 }
 0x21d   :  { %v1925_v8 = vpop.f32.mrb[38].mxu1  ;;  %v1438_v30 = vmul.f32 %v1152_v44, %v2612_v13  ;;  %v3245_v53 = vadd.f32 %v1922_v38, %v2801_v20  ;;  %1503 = vst [vmem:[%s3809_s5 + $0xd8] sm:$0xff] %v1439_v50  ;;  %v1173_v42 = vsel %vm1171_vm9, %v1172_v41, %v1170_v35  ;;  %vm1183_vm12 = vcmp.eq.f32.partialorder %v3153_v34, inf }
 0x21e   :  { %v835_v61 = vpop.f32.mrb[39].mxu1  ;;  %v2087_v9 = vpop.eup %2086  ;;  %vm1185_vm13 = vcmp.eq.f32.partialorder %v3153_v34, 0.0  ;;  %2094 = vrsqrt.f32 %v3234_v7  ;;  %v1441_v49 = vmul.f32 %v1173_v42, %v2619_v19  ;;  %v1163_v52 = vsel %vm1162_vm10, %v3140_v28, %v1161_v57 }
 0x21f   :  { %1502 = vst [vmem:[%s3809_s5 + $0xd0] sm:$0xff] %v1438_v30  ;;  %v1182_v46 = vmul.f32 %v2087_v9, %v3153_v34  ;;  %v1186_v18 = vand.u32 2147483648, %v3153_v34  ;;  %v1166_v47 = vsel %vm1164_vm11, %v1165_v16, %v1163_v52  ;;  %vm1176_vm14 = vcmp.eq.f32.partialorder %v3186_v2, inf }
 0x220   :  { %vm1178_vm15 = vcmp.eq.f32.partialorder %v3186_v2, 0.0  ;;  %2096 = vrsqrt.f32 %v3237_v56  ;;  %1505 = vst [vmem:[%s3809_s5 + $0xe8] sm:$0xff] %v1441_v49  ;;  %v1440_v33 = vmul.f32 %v1166_v47, %v2622_v21  ;;  %v1179_v28 = vand.u32 2147483648, %v3186_v2 }
 0x221   :  { %v1928_v13 = vpop.f32.mrb[40].mxu1  ;;  %v2089_v19 = vpop.eup %2088  ;;  %v1184_v26 = vsel %vm1183_vm12, %v3153_v34, %v1182_v46  ;;  %2098 = vrsqrt.f32 %v3245_v53  ;;  %vm1197_vm0 = vcmp.eq.f32.partialorder %v3191_v5, inf  ;;  %vm1199_vm1 = vcmp.eq.f32.partialorder %v3191_v5, 0.0 }
 0x222   :  { %v3264_v0 = vpop.f32.mrb[41].mxu1  ;;  %v2091_v23 = vpop.eup %2090  ;;  %v1187_v55 = vsel %vm1185_vm13, %v1186_v18, %v1184_v26  ;;  %v1175_v24 = vmul.f32 %v2089_v19, %v3186_v2  ;;  %1504 = vst [vmem:[%s3809_s5 + $0xe0] sm:$0xff] %v1440_v33  ;;  %v1200_v10 = vand.u32 2147483648, %v3191_v5  ;;  %v3293_v34 = vadd.f32 %v2801_v20, %v3201_v1 }
 0x223   :  { %v1443_v21 = vmul.f32 %v1187_v55, %v2629_v27  ;;  %v1196_v62 = vmul.f32 %v2091_v23, %v3191_v5  ;;  %vm1190_vm2 = vcmp.eq.f32.partialorder %v3194_v36, inf  ;;  %v3300_v15 = vadd.f32 %v1925_v8, %v2801_v20 }
 0x224   :  { %v2093_v12 = vpop.eup %2092  ;;  %v1177_v32 = vsel %vm1176_vm14, %v3186_v2, %v1175_v24  ;;  %v3303_v27 = vadd.f32 %v2801_v20, %v835_v61  ;;  %2100 = vrsqrt.f32 %v3293_v34  ;;  %v1193_v14 = vand.u32 2147483648, %v3194_v36 }
 0x225   :  { %v1931_v43 = vpop.f32.mrb[42].mxu1  ;;  %1507 = vst [vmem:[%s3809_s5 + $0xf8] sm:$0xff] %v1443_v21  ;;  %v1180_v38 = vsel %vm1178_vm15, %v1179_v28, %v1177_v32  ;;  %v1198_v11 = vsel %vm1197_vm0, %v3191_v5, %v1196_v62  ;;  %v1189_v40 = vmul.f32 %v2093_v12, %v3194_v36  ;;  %v3320_v54 = vadd.f32 %v1928_v13, %v2801_v20 }
 0x226   :  { %v855_v59 = vpop.f32.mrb[43].mxu1  ;;  %v1442_v1 = vmul.f32 %v1180_v38, %v2632_v31  ;;  %v1201_v17 = vsel %vm1199_vm1, %v1200_v10, %v1198_v11  ;;  %vm1192_vm3 = vcmp.eq.f32.partialorder %v3194_v36, 0.0  ;;  %2102 = vrsqrt.f32 %v3300_v15 }
 0x227   :  { %v1445_v22 = vmul.f32 %v1201_v17, %v2639_v37  ;;  %v1191_v29 = vsel %vm1190_vm2, %v3194_v36, %v1189_v40  ;;  %vm1211_vm4 = vcmp.eq.f32.partialorder %v3234_v7, inf  ;;  %vm1213_vm5 = vcmp.eq.f32.partialorder %v3234_v7, 0.0 }
 0x228   :  { %v2095_v31 = vpop.eup %2094  ;;  %1506 = vst [vmem:[%s3809_s5 + $0xf0] sm:$0xff] %v1442_v1  ;;  %v1194_v5 = vsel %vm1192_vm3, %v1193_v14, %v1191_v29  ;;  %v1214_v48 = vand.u32 2147483648, %v3234_v7  ;;  %2104 = vrsqrt.f32 %v3303_v27  ;;  %vm1204_vm6 = vcmp.eq.f32.partialorder %v3237_v56, inf  ;;  %v3463_v29 = vld [vmem:[%s3808_s4] ss:$0 sm:$0xff] }
 0x229   :  { %v1934_v2 = vpop.f32.mrb[44].mxu1  ;;  %1509 = vst [vmem:[%s3809_s5 + $0x108] sm:$0xff] %v1445_v22  ;;  %v1444_v37 = vmul.f32 %v1194_v5, %v2642_v39  ;;  %v1210_v36 = vmul.f32 %v2095_v31, %v3234_v7  ;;  %vm1206_vm7 = vcmp.eq.f32.partialorder %v3237_v56, 0.0  ;;  %v1207_v8 = vand.u32 2147483648, %v3237_v56  ;;  %v3864_v31 = vld [vmem:[#allocation4_spill] sm:$0xff] }
 0x22a   :  { %v3326_v41 = vpop.f32.mrb[45].mxu1  ;;  %v2097_v3 = vpop.eup %2096  ;;  %2106 = vrsqrt.f32 %v3320_v54  ;;  %vm1225_vm8 = vcmp.eq.f32.partialorder %v3245_v53, inf  ;;  %vm1227_vm9 = vcmp.eq.f32.partialorder %v3245_v53, 0.0  ;;  %v3356_v50 = vadd.f32 %v2801_v20, %v3264_v0 }
 0x22b   :  { %v2099_v25 = vpop.eup %2098  ;;  %1508 = vst [vmem:[%s3809_s5 + $0x100] sm:$0xff] %v1444_v37  ;;  %v1212_v39 = vsel %vm1211_vm4, %v3234_v7, %v1210_v36  ;;  %v1203_v6 = vmul.f32 %v2097_v3, %v3237_v56  ;;  %v3359_v44 = vadd.f32 %v1931_v43, %v2801_v20  ;;  %v1228_v57 = vand.u32 2147483648, %v3245_v53 }
 0x22c   :  { %v1215_v61 = vsel %vm1213_vm5, %v1214_v48, %v1212_v39  ;;  %v1224_v58 = vmul.f32 %v2099_v25, %v3245_v53  ;;  %v3367_v7 = vadd.f32 %v2801_v20, %v855_v59  ;;  %vm1218_vm10 = vcmp.eq.f32.partialorder %v3293_v34, inf }
 0x22d   :  { %v1937_v4 = vpop.f32.mrb[46].mxu1  ;;  %v1447_v30 = vmul.f32 %v1215_v61, %v2649_v45  ;;  %v1205_v35 = vsel %vm1204_vm6, %v3237_v56, %v1203_v6  ;;  %2108 = vrsqrt.f32 %v3356_v50  ;;  %vm1220_vm11 = vcmp.eq.f32.partialorder %v3293_v34, 0.0 }
 0x22e   :  { %v875_v16 = vpop.f32.mrb[47].mxu1  ;;  %v1208_v9 = vsel %vm1206_vm7, %v1207_v8, %v1205_v35  ;;  %v1226_v42 = vsel %vm1225_vm8, %v3245_v53, %v1224_v58  ;;  %v2101_v45 = vpop.eup %2100  ;;  %v3382_v56 = vadd.f32 %v1934_v2, %v2801_v20  ;;  %v1221_v47 = vand.u32 2147483648, %v3293_v34 }
 0x22f   :  { %1511 = vst [vmem:[%s3809_s5 + $0x118] sm:$0xff] %v1447_v30  ;;  %v1446_v49 = vmul.f32 %v1208_v9, %v2652_v51  ;;  %v1229_v52 = vsel %vm1227_vm9, %v1228_v57, %v1226_v42  ;;  %v1217_v0 = vmul.f32 %v2101_v45, %v3293_v34  ;;  %2110 = vrsqrt.f32 %v3359_v44  ;;  %v3865_v30 = vld [vmem:[#allocation5_spill] sm:$0xff] }
 0x230   :  { %v1449_v18 = vmul.f32 %v1229_v52, %v2659_v60  ;;  %v2103_v19 = vpop.eup %2102  ;;  %vm1239_vm12 = vcmp.eq.f32.partialorder %v3300_v15, inf  ;;  %vm1241_vm13 = vcmp.eq.f32.partialorder %v3300_v15, 0.0  ;;  %v1242_v51 = vand.u32 2147483648, %v3300_v15  ;;  %v3866_v52 = vld [vmem:[#allocation6_spill] sm:$0xff] }
 0x231   :  { %v1940_v13 = vpop.f32.mrb[48].mxu1  ;;  %1510 = vst [vmem:[%s3809_s5 + $0x110] sm:$0xff] %v1446_v49  ;;  %2112 = vrsqrt.f32 %v3367_v7  ;;  %v1219_v60 = vsel %vm1218_vm10, %v3293_v34, %v1217_v0  ;;  %v1238_v53 = vmul.f32 %v2103_v19, %v3300_v15  ;;  %vm1232_vm14 = vcmp.eq.f32.partialorder %v3303_v27, inf  ;;  %v3867_v19 = vld [vmem:[#allocation7_spill] sm:$0xff] }
 0x232   :  { %v3384_v46 = vpop.f32.mrb[49].mxu1  ;;  %1513 = vst [vmem:[%s3809_s5 + $0x128] sm:$0xff] %v1449_v18  ;;  %vm1234_vm15 = vcmp.eq.f32.partialorder %v3303_v27, 0.0  ;;  %v2105_v26 = vpop.eup %2104  ;;  %v1222_v28 = vsel %vm1220_vm11, %v1221_v47, %v1219_v60  ;;  %v1235_v23 = vand.u32 2147483648, %v3303_v27  ;;  %vm1253_vm0 = vcmp.eq.f32.partialorder %v3320_v54, inf }
 0x233   :  { %2114 = vrsqrt.f32 %v3382_v56  ;;  %v1448_v43 = vmul.f32 %v1222_v28, %v2662_v63  ;;  %v1240_v21 = vsel %vm1239_vm12, %v3300_v15, %v1238_v53  ;;  %v1231_v62 = vmul.f32 %v2105_v26, %v3303_v27  ;;  %v3862_v63 = vld [vmem:[#allocation2_spill] sm:$0xff] }
 0x234   :  { %v2107_v24 = vpop.eup %2106  ;;  %vm1255_vm1 = vcmp.eq.f32.partialorder %v3320_v54, 0.0  ;;  %v1243_v10 = vsel %vm1241_vm13, %v1242_v51, %v1240_v21  ;;  %v3426_v59 = vadd.f32 %v2801_v20, %v3326_v41  ;;  %v3429_v12 = vadd.f32 %v1937_v4, %v2801_v20 }
 0x235   :  { %v3406_v33 = vpop.f32.mrb[50].mxu1  ;;  %v1252_v34 = vmul.f32 %v2107_v24, %v3320_v54  ;;  %1512 = vst [vmem:[%s3809_s5 + $0x120] sm:$0xff] %v1448_v43  ;;  %v1451_v32 = vmul.f32 %v1243_v10, %v3862_v63  ;;  %v1233_v15 = vsel %vm1232_vm14, %v3303_v27, %v1231_v62  ;;  %v1256_v38 = vand.u32 2147483648, %v3320_v54 }
 0x236   :  { %v3413_v55 = vpop.f32.mrb[51].mxu1  ;;  %v3440_v11 = vadd.f32 %v2801_v20, %v875_v16  ;;  %v1236_v1 = vsel %vm1234_vm15, %v1235_v23, %v1233_v15  ;;  %vm1246_vm2 = vcmp.eq.f32.partialorder %v3356_v50, inf  ;;  %2116 = vrsqrt.f32 %v3426_v59  ;;  %v3863_v20 = vld [vmem:[#allocation3_spill] sm:$0xff] }
 0x237   :  { %v1254_v17 = vsel %vm1253_vm0, %v3320_v54, %v1252_v34  ;;  %v2109_v2 = vpop.eup %2108  ;;  %1515 = vst [vmem:[%s3809_s5 + $0x138] sm:$0xff] %v1451_v32  ;;  %v1450_v22 = vmul.f32 %v1236_v1, %v3863_v20  ;;  %vm1248_vm3 = vcmp.eq.f32.partialorder %v3356_v50, 0.0  ;;  %v3466_v41 = vadd.f32 %v3463_v29, %v1940_v13 }
 0x238   :  { %v1257_v27 = vsel %vm1255_vm1, %v1256_v38, %v1254_v17  ;;  %v1245_v37 = vmul.f32 %v2109_v2, %v3356_v50  ;;  %v1249_v36 = vand.u32 2147483648, %v3356_v50  ;;  %2118 = vrsqrt.f32 %v3429_v12  ;;  %v3869_v17 = vld [vmem:[#allocation9_spill] sm:$0xff] }
 0x239   :  { %v3442_v40 = vpop.f32.mrb[52].mxu1  ;;  %v1453_v5 = vmul.f32 %v1257_v27, %v3864_v31  ;;  %v2111_v54 = vpop.eup %2110  ;;  %1514 = vst [vmem:[%s3809_s5 + $0x130] sm:$0xff] %v1450_v22  ;;  %vm1267_vm4 = vcmp.eq.f32.partialorder %v3359_v44, inf  ;;  %vm1269_vm5 = vcmp.eq.f32.partialorder %v3359_v44, 0.0  ;;  %v1270_v48 = vand.u32 2147483648, %v3359_v44 }
 0x23a   :  { %v3451_v14 = vpop.f32.mrb[53].mxu1  ;;  %2120 = vrsqrt.f32 %v3440_v11  ;;  %v1247_v4 = vsel %vm1246_vm2, %v3356_v50, %v1245_v37  ;;  %v1266_v25 = vmul.f32 %v2111_v54, %v3359_v44  ;;  %vm1260_vm6 = vcmp.eq.f32.partialorder %v3367_v7, inf  ;;  %v3871_v54 = vld [vmem:[#allocation11_spill] sm:$0xff] }
 0x23b   :  { %v2113_v8 = vpop.eup %2112  ;;  %1517 = vst [vmem:[%s3809_s5 + $0x148] sm:$0xff] %v1453_v5  ;;  %vm1262_vm7 = vcmp.eq.f32.partialorder %v3367_v7, 0.0  ;;  %v1250_v6 = vsel %vm1248_vm3, %v1249_v36, %v1247_v4  ;;  %v1263_v61 = vand.u32 2147483648, %v3367_v7  ;;  %2122 = vrsqrt.f32 %v3466_v41  ;;  %v3870_v5 = vld [vmem:[#allocation10_spill] sm:$0xff] }
 0x23c   :  { %v1259_v16 = vmul.f32 %v2113_v8, %v3367_v7  ;;  %v1452_v35 = vmul.f32 %v1250_v6, %v3865_v30  ;;  %v1268_v57 = vsel %vm1267_vm4, %v3359_v44, %v1266_v25  ;;  %vm1281_vm8 = vcmp.eq.f32.partialorder %v3382_v56, inf }
 0x23d   :  { %v3479_v3 = vpop.f32.mrb[54].mxu1  ;;  %v2115_v58 = vpop.eup %2114  ;;  %v1284_v9 = vand.u32 2147483648, %v3382_v56  ;;  %v1271_v50 = vsel %vm1269_vm5, %v1270_v48, %v1268_v57  ;;  %v3509_v45 = vadd.f32 %v3463_v29, %v3384_v46  ;;  %v3521_v0 = vadd.f32 %v3463_v29, %v3406_v33  ;;  %v3868_v33 = vld [vmem:[#allocation8_spill] sm:$0xff] }
 0x23e   :  { %v3490_v39 = vpop.f32.mrb[55].mxu1  ;;  %v1261_v42 = vsel %vm1260_vm6, %v3367_v7, %v1259_v16  ;;  %v1280_v13 = vmul.f32 %v2115_v58, %v3382_v56  ;;  %1516 = vst [vmem:[%s3809_s5 + $0x140] sm:$0xff] %v1452_v35  ;;  %v1455_v18 = vmul.f32 %v1271_v50, %v3866_v52  ;;  %v3525_v47 = vadd.f32 %v3463_v29, %v3413_v55 }
 0x23f   :  { %v1264_v44 = vsel %vm1262_vm7, %v1263_v61, %v1261_v42  ;;  %vm1283_vm9 = vcmp.eq.f32.partialorder %v3382_v56, 0.0  ;;  %2124 = vrsqrt.f32 %v3509_v45  ;;  %vm1274_vm10 = vcmp.eq.f32.partialorder %v3426_v59, inf }
 0x240   :  { %v1454_v51 = vmul.f32 %v1264_v44, %v3867_v19  ;;  %v1282_v60 = vsel %vm1281_vm8, %v3382_v56, %v1280_v13  ;;  %v2117_v7 = vpop.eup %2116  ;;  %1519 = vst [vmem:[%s3809_s5 + $0x158] sm:$0xff] %v1455_v18  ;;  %vm1276_vm11 = vcmp.eq.f32.partialorder %v3426_v59, 0.0  ;;  %2126 = vrsqrt.f32 %v3521_v0  ;;  %v3873_v18 = vld [vmem:[#allocation13_spill] sm:$0xff] }
 0x241   :  { %v3511_v49 = vpop.f32.mrb[56].mxu1  ;;  %v1285_v53 = vsel %vm1283_vm9, %v1284_v9, %v1282_v60  ;;  %v1273_v26 = vmul.f32 %v2117_v7, %v3426_v59  ;;  %v1277_v28 = vand.u32 2147483648, %v3426_v59  ;;  %vm1295_vm12 = vcmp.eq.f32.partialorder %v3429_v12, inf  ;;  %v3874_v7 = vld [vmem:[#allocation14_spill] sm:$0xff] }
 0x242   :  { %v3527_v46 = vpop.f32.mrb[57].mxu1  ;;  %1518 = vst [vmem:[%s3809_s5 + $0x150] sm:$0xff] %v1454_v51  ;;  %v1457_v56 = vmul.f32 %v1285_v53, %v3868_v33  ;;  %v2119_v55 = vpop.eup %2118  ;;  %vm1297_vm13 = vcmp.eq.f32.partialorder %v3429_v12, 0.0  ;;  %v1298_v24 = vand.u32 2147483648, %v3429_v12  ;;  %vm1288_vm14 = vcmp.eq.f32.partialorder %v3440_v11, inf }
 0x243   :  { %2128 = vrsqrt.f32 %v3525_v47  ;;  %v1275_v62 = vsel %vm1274_vm10, %v3426_v59, %v1273_v26  ;;  %v1294_v10 = vmul.f32 %v2119_v55, %v3429_v12  ;;  %vm1290_vm15 = vcmp.eq.f32.partialorder %v3440_v11, 0.0 }
 0x244   :  { %v2121_v21 = vpop.eup %2120  ;;  %1521 = vst [vmem:[%s3809_s5 + $0x168] sm:$0xff] %v1457_v56  ;;  %v3564_v34 = vadd.f32 %v3463_v29, %v3442_v40  ;;  %v1278_v63 = vsel %vm1276_vm11, %v1277_v28, %v1275_v62  ;;  %v1291_v15 = vand.u32 2147483648, %v3440_v11  ;;  %v3572_v38 = vadd.f32 %v3463_v29, %v3451_v14 }
 0x245   :  { %v3546_v23 = vpop.f32.mrb[58].mxu1  ;;  %v1287_v32 = vmul.f32 %v2121_v21, %v3440_v11  ;;  %v2123_v1 = vpop.eup %2122  ;;  %v1456_v2 = vmul.f32 %v1278_v63, %v3869_v17  ;;  %v1296_v20 = vsel %vm1295_vm12, %v3429_v12, %v1294_v10  ;;  %v3581_v59 = vadd.f32 %v3463_v29, %v3479_v3  ;;  %v3876_v63 = vld [vmem:[#allocation16_spill] sm:$0xff] }
 0x246   :  { %v3552_v43 = vpop.f32.mrb[59].mxu1  ;;  %2130 = vrsqrt.f32 %v3564_v34  ;;  %v1299_v22 = vsel %vm1297_vm13, %v1298_v24, %v1296_v20  ;;  %v1308_v27 = vmul.f32 %v2123_v1, %v3466_v41  ;;  %vm1309_vm0 = vcmp.eq.f32.partialorder %v3466_v41, inf }
 0x247   :  { %v1289_v14 = vsel %vm1288_vm14, %v3440_v11, %v1287_v32  ;;  %1520 = vst [vmem:[%s3809_s5 + $0x160] sm:$0xff] %v1456_v2  ;;  %v1459_v37 = vmul.f32 %v1299_v22, %v3870_v5  ;;  %v1312_v36 = vand.u32 2147483648, %v3466_v41  ;;  %2132 = vrsqrt.f32 %v3572_v38  ;;  %v3877_v2 = vld [vmem:[#allocation17_spill] sm:$0xff] }
 0x248   :  { %v1292_v12 = vsel %vm1290_vm15, %v1291_v15, %v1289_v14  ;;  %v1310_v3 = vsel %vm1309_vm0, %v3466_v41, %v1308_v27  ;;  %vm1311_vm1 = vcmp.eq.f32.partialorder %v3466_v41, 0.0  ;;  %vm1302_vm2 = vcmp.eq.f32.partialorder %v3509_v45, inf  ;;  %v3872_v41 = vld [vmem:[#allocation12_spill] sm:$0xff]  ;;  %v3878_v14 = vld [vmem:[#allocation18_spill] sm:$0xff] }
 0x249   :  { %v3583_v40 = vpop.f32.mrb[60].mxu1  ;;  %v1458_v48 = vmul.f32 %v1292_v12, %v3871_v54  ;;  %v2125_v8 = vpop.eup %2124  ;;  %1523 = vst [vmem:[%s3809_s5 + $0x178] sm:$0xff] %v1459_v37  ;;  %v1313_v4 = vsel %vm1311_vm1, %v1312_v36, %v1310_v3  ;;  %vm1304_vm3 = vcmp.eq.f32.partialorder %v3509_v45, 0.0  ;;  %2134 = vrsqrt.f32 %v3581_v59 }
 0x24a   :  { %v3592_v31 = vpop.f32.mrb[61].mxu1  ;;  %v2127_v25 = vpop.eup %2126  ;;  %v1461_v6 = vmul.f32 %v1313_v4, %v3872_v41  ;;  %v1301_v16 = vmul.f32 %v2125_v8, %v3509_v45  ;;  %v1305_v61 = vand.u32 2147483648, %v3509_v45  ;;  %vm1323_vm4 = vcmp.eq.f32.partialorder %v3521_v0, inf }
 0x24b   :  { %1522 = vst [vmem:[%s3809_s5 + $0x170] sm:$0xff] %v1458_v48  ;;  %v1322_v30 = vmul.f32 %v2127_v25, %v3521_v0  ;;  %vm1325_vm5 = vcmp.eq.f32.partialorder %v3521_v0, 0.0  ;;  %v3626_v35 = vadd.f32 %v3463_v29, %v3490_v39  ;;  %v3630_v57 = vadd.f32 %v3463_v29, %v3511_v49 }
 0x24c   :  { %1525 = vst [vmem:[%s3809_s5 + $0x188] sm:$0xff] %v1461_v6  ;;  %v1303_v50 = vsel %vm1302_vm2, %v3509_v45, %v1301_v16  ;;  %v1326_v42 = vand.u32 2147483648, %v3521_v0  ;;  %vm1316_vm6 = vcmp.eq.f32.partialorder %v3525_v47, inf  ;;  %v3642_v39 = vadd.f32 %v3463_v29, %v3527_v46 }
 0x24d   :  { %v3611_v11 = vpop.f32.mrb[62].mxu1  ;;  %v2129_v9 = vpop.eup %2128  ;;  %v1306_v13 = vsel %vm1304_vm3, %v1305_v61, %v1303_v50  ;;  %v1324_v49 = vsel %vm1323_vm4, %v3521_v0, %v1322_v30  ;;  %2136 = vrsqrt.f32 %v3626_v35  ;;  %vm1318_vm7 = vcmp.eq.f32.partialorder %v3525_v47, 0.0 }
 0x24e   :  { %v3620_v58 = vpop.f32.mrb[63].mxu1  ;;  %v1315_v52 = vmul.f32 %v2129_v9, %v3525_v47  ;;  %v1460_v44 = vmul.f32 %v1306_v13, %v3873_v18  ;;  %v1327_v19 = vsel %vm1325_vm5, %v1326_v42, %v1324_v49  ;;  %v1319_v51 = vand.u32 2147483648, %v3525_v47  ;;  %v3881_v49 = vld [vmem:[#allocation21_spill] sm:$0xff] }
 0x24f   :  { %v1463_v46 = vmul.f32 %v1327_v19, %v3874_v7  ;;  %2138 = vrsqrt.f32 %v3630_v57  ;;  %v3657_v45 = vadd.f32 %v3463_v29, %v3546_v23  ;;  %vm1337_vm8 = vcmp.eq.f32.partialorder %v3564_v34, inf }
 0x250   :  { %v2131_v60 = vpop.eup %2130  ;;  %v1317_v53 = vsel %vm1316_vm6, %v3525_v47, %v1315_v52  ;;  %1524 = vst [vmem:[%s3809_s5 + $0x180] sm:$0xff] %v1460_v44  ;;  %v3875_v47 = vld [vmem:[#allocation15_spill] sm:$0xff]  ;;  %v1340_v28 = vand.u32 2147483648, %v3564_v34  ;;  %2140 = vrsqrt.f32 %v3642_v39  ;;  %v3672_v23 = vadd.f32 %v3463_v29, %v3552_v43 }
 0x251   :  { %v1320_v0 = vsel %vm1318_vm7, %v1319_v51, %v1317_v53  ;;  %v1336_v33 = vmul.f32 %v2131_v60, %v3564_v34  ;;  %v2133_v56 = vpop.eup %2132  ;;  %1527 = vst [vmem:[%s3809_s5 + $0x198] sm:$0xff] %v1463_v46  ;;  %vm1339_vm9 = vcmp.eq.f32.partialorder %v3564_v34, 0.0  ;;  %v3679_v21 = vadd.f32 %v3463_v29, %v3583_v40  ;;  %v3882_v60 = vld [vmem:[#allocation22_spill] sm:$0xff] }
 0x252   :  { %v1462_v26 = vmul.f32 %v1320_v0, %v3875_v47  ;;  %v1329_v24 = vmul.f32 %v2133_v56, %v3572_v38  ;;  %vm1330_vm10 = vcmp.eq.f32.partialorder %v3572_v38, inf  ;;  %v1333_v43 = vand.u32 2147483648, %v3572_v38  ;;  %v3883_v56 = vld [vmem:[#allocation23_spill] sm:$0xff] }
 0x253   :  { %v1338_v55 = vsel %vm1337_vm8, %v3564_v34, %v1336_v33  ;;  %v2135_v62 = vpop.eup %2134  ;;  %2142 = vrsqrt.f32 %v3657_v45  ;;  %vm1332_vm11 = vcmp.eq.f32.partialorder %v3572_v38, 0.0  ;;  %vm1351_vm12 = vcmp.eq.f32.partialorder %v3581_v59, inf }
 0x254   :  { %1526 = vst [vmem:[%s3809_s5 + $0x190] sm:$0xff] %v1462_v26  ;;  %v1341_v10 = vsel %vm1339_vm9, %v1340_v28, %v1338_v55  ;;  %v1331_v32 = vsel %vm1330_vm10, %v3572_v38, %v1329_v24  ;;  %v1350_v15 = vmul.f32 %v2135_v62, %v3581_v59  ;;  %v1354_v17 = vand.u32 2147483648, %v3581_v59  ;;  %v3884_v55 = vld [vmem:[#allocation24_spill] sm:$0xff] }
 0x255   :  { %v1465_v34 = vmul.f32 %v1341_v10, %v3876_v63  ;;  %v1334_v1 = vsel %vm1332_vm11, %v1333_v43, %v1331_v32  ;;  %2144 = vrsqrt.f32 %v3672_v23  ;;  %vm1353_vm13 = vcmp.eq.f32.partialorder %v3581_v59, 0.0 }
 0x256   :  { %v1464_v20 = vmul.f32 %v1334_v1, %v3877_v2  ;;  %v1352_v40 = vsel %vm1351_vm12, %v3581_v59, %v1350_v15  ;;  %2146 = vrsqrt.f32 %v3679_v21  ;;  %v3708_v37 = vadd.f32 %v3463_v29, %v3592_v31  ;;  %v3885_v1 = vld [vmem:[#allocation25_spill] sm:$0xff] }
 0x257   :  { %1529 = vst [vmem:[%s3809_s5 + $0x1a8] sm:$0xff] %v1465_v34  ;;  %v2137_v38 = vpop.eup %2136  ;;  %v1355_v22 = vsel %vm1353_vm13, %v1354_v17, %v1352_v40  ;;  %v3712_v12 = vadd.f32 %v3463_v29, %v3611_v11  ;;  %vm1344_vm14 = vcmp.eq.f32.partialorder %v3626_v35, inf  ;;  %v1347_v36 = vand.u32 2147483648, %v3626_v35  ;;  %v3886_v40 = vld [vmem:[#allocation26_spill] sm:$0xff] }
 0x258   :  { %1528 = vst [vmem:[%s3809_s5 + $0x1a0] sm:$0xff] %v1464_v20  ;;  %v1467_v27 = vmul.f32 %v1355_v22, %v3878_v14  ;;  %v1343_v5 = vmul.f32 %v2137_v38, %v3626_v35  ;;  %v3718_v54 = vadd.f32 %v3463_v29, %v3620_v58  ;;  %vm1346_vm15 = vcmp.eq.f32.partialorder %v3626_v35, 0.0  ;;  %v3879_v29 = vld [vmem:[#allocation19_spill] sm:$0xff]  ;;  %v3880_v58 = vld [vmem:[#allocation20_spill] sm:$0xff] }
 0x259   :  { %v2139_v59 = vpop.eup %2138  ;;  %2148 = vrsqrt.f32 %v3708_v37  ;;  %vm1365_vm0 = vcmp.eq.f32.partialorder %v3630_v57, inf  ;;  %v1368_v4 = vand.u32 2147483648, %v3630_v57  ;;  %vm1367_vm1 = vcmp.eq.f32.partialorder %v3630_v57, 0.0 }
 0x25a   :  { %1531 = vst [vmem:[%s3809_s5 + $0x1b8] sm:$0xff] %v1467_v27  ;;  %v1345_v31 = vsel %vm1344_vm14, %v3626_v35, %v1343_v5  ;;  %v1364_v48 = vmul.f32 %v2139_v59, %v3630_v57  ;;  %v2141_v3 = vpop.eup %2140  ;;  %2150 = vrsqrt.f32 %v3712_v12  ;;  %vm1358_vm2 = vcmp.eq.f32.partialorder %v3642_v39, inf  ;;  %v3887_v27 = vld [vmem:[#allocation27_spill] sm:$0xff] }
 0x25b   :  { %v1348_v8 = vsel %vm1346_vm15, %v1347_v36, %v1345_v31  ;;  %v1357_v41 = vmul.f32 %v2141_v3, %v3642_v39  ;;  %v1361_v61 = vand.u32 2147483648, %v3642_v39  ;;  %2152 = vrsqrt.f32 %v3718_v54 }
 0x25c   :  { %v1466_v11 = vmul.f32 %v1348_v8, %v3879_v29  ;;  %v1366_v25 = vsel %vm1365_vm0, %v3630_v57, %v1364_v48  ;;  %vm1360_vm3 = vcmp.eq.f32.partialorder %v3642_v39, 0.0  ;;  %vm1379_vm4 = vcmp.eq.f32.partialorder %v3657_v45, inf }
 0x25d   :  { %v2143_v6 = vpop.eup %2142  ;;  %v1369_v16 = vsel %vm1367_vm1, %v1368_v4, %v1366_v25  ;;  %v1359_v35 = vsel %vm1358_vm2, %v3642_v39, %v1357_v41  ;;  %vm1381_vm5 = vcmp.eq.f32.partialorder %v3657_v45, 0.0  ;;  %v1382_v42 = vand.u32 2147483648, %v3657_v45 }
 0x25e   :  { %1530 = vst [vmem:[%s3809_s5 + $0x1b0] sm:$0xff] %v1466_v11  ;;  %v1469_v30 = vmul.f32 %v1369_v16, %v3880_v58  ;;  %v1378_v57 = vmul.f32 %v2143_v6, %v3657_v45  ;;  %v1362_v50 = vsel %vm1360_vm3, %v1361_v61, %v1359_v35  ;;  %vm1372_vm6 = vcmp.eq.f32.partialorder %v3672_v23, inf }
 0x25f   :  { %v2145_v9 = vpop.eup %2144  ;;  %v1468_v52 = vmul.f32 %v1362_v50, %v3881_v49  ;;  %vm1374_vm7 = vcmp.eq.f32.partialorder %v3672_v23, 0.0  ;;  %v1375_v19 = vand.u32 2147483648, %v3672_v23  ;;  %vm1393_vm8 = vcmp.eq.f32.partialorder %v3679_v21, inf }
 0x260   :  { %v2147_v13 = vpop.eup %2146  ;;  %1533 = vst [vmem:[%s3809_s5 + $0x1c8] sm:$0xff] %v1469_v30  ;;  %v1380_v18 = vsel %vm1379_vm4, %v3657_v45, %v1378_v57  ;;  %v1371_v39 = vmul.f32 %v2145_v9, %v3672_v23  ;;  %v1396_v53 = vand.u32 2147483648, %v3679_v21  ;;  %vm1395_vm9 = vcmp.eq.f32.partialorder %v3679_v21, 0.0 }
 0x261   :  { %v1383_v44 = vsel %vm1381_vm5, %v1382_v42, %v1380_v18  ;;  %v1392_v51 = vmul.f32 %v2147_v13, %v3679_v21  ;;  %1532 = vst [vmem:[%s3809_s5 + $0x1c0] sm:$0xff] %v1468_v52  ;;  %vm1386_vm10 = vcmp.eq.f32.partialorder %v3708_v37, inf  ;;  %vm1388_vm11 = vcmp.eq.f32.partialorder %v3708_v37, 0.0 }
 0x262   :  { %v1471_v7 = vmul.f32 %v1383_v44, %v3882_v60  ;;  %v1373_v46 = vsel %vm1372_vm6, %v3672_v23, %v1371_v39  ;;  %vm1407_vm12 = vcmp.eq.f32.partialorder %v3712_v12, inf  ;;  %v1410_v63 = vand.u32 2147483648, %v3712_v12 }
 0x263   :  { %v1376_v45 = vsel %vm1374_vm7, %v1375_v19, %v1373_v46  ;;  %v1394_v0 = vsel %vm1393_vm8, %v3679_v21, %v1392_v51  ;;  %v2149_v33 = vpop.eup %2148  ;;  %v1389_v21 = vand.u32 2147483648, %v3708_v37  ;;  %vm1409_vm13 = vcmp.eq.f32.partialorder %v3712_v12, 0.0 }
 0x264   :  { %1535 = vst [vmem:[%s3809_s5 + $0x1d8] sm:$0xff] %v1471_v7  ;;  %v1470_v47 = vmul.f32 %v1376_v45, %v3883_v56  ;;  %v1397_v26 = vsel %vm1395_vm9, %v1396_v53, %v1394_v0  ;;  %v2151_v28 = vpop.eup %2150  ;;  %v1385_v24 = vmul.f32 %v2149_v33, %v3708_v37  ;;  %vm1400_vm14 = vcmp.eq.f32.partialorder %v3718_v54, inf }
 0x265   :  { %v1473_v23 = vmul.f32 %v1397_v26, %v3884_v55  ;;  %v1406_v62 = vmul.f32 %v2151_v28, %v3712_v12  ;;  %v2153_v10 = vpop.eup %2152  ;;  %v1403_v20 = vand.u32 2147483648, %v3718_v54  ;;  %vm1402_vm15 = vcmp.eq.f32.partialorder %v3718_v54, 0.0 }
 0x266   :  { %1534 = vst [vmem:[%s3809_s5 + $0x1d0] sm:$0xff] %v1470_v47  ;;  %v1387_v43 = vsel %vm1386_vm10, %v3708_v37, %v1385_v24  ;;  %v1399_v15 = vmul.f32 %v2153_v10, %v3718_v54 }
 0x267   :  { %1537 = vst [vmem:[%s3809_s5 + $0x1e8] sm:$0xff] %v1473_v23  ;;  %v1390_v34 = vsel %vm1388_vm11, %v1389_v21, %v1387_v43  ;;  %v1408_v32 = vsel %vm1407_vm12, %v3712_v12, %v1406_v62 }
 0x268   :  { %v1472_v17 = vmul.f32 %v1390_v34, %v3885_v1  ;;  %v1411_v2 = vsel %vm1409_vm13, %v1410_v63, %v1408_v32  ;;  %v1401_v22 = vsel %vm1400_vm14, %v3718_v54, %v1399_v15 }
 0x269   :  { %v1475_v38 = vmul.f32 %v1411_v2, %v3886_v40  ;;  %v1404_v14 = vsel %vm1402_vm15, %v1403_v20, %v1401_v22 }
 0x26a   :  { %1536 = vst [vmem:[%s3809_s5 + $0x1e0] sm:$0xff] %v1472_v17  ;;  %v1474_v5 = vmul.f32 %v1404_v14, %v3887_v27 }
 0x26b   :  { %1539 = vst [vmem:[%s3809_s5 + $0x1f8] sm:$0xff] %v1475_v38 }
 0x26c   :  { %1538 = vst [vmem:[%s3809_s5 + $0x1f0] sm:$0xff] %v1474_v5 }

// kernel: anf_hyperprior_forward.27
= control target key start
LH: loop header
LB: loop body
LE: loop exit
PB: predicated region body
PF: predicated region fallthrough
CT: control target
= control target key end

     0   :  { %s1070_s12 = smov 0   ;;  %s1343_s0 = inlined_call_operand.vmem [shape: f32[2048,128], index: 0, kind: input, shape index: {}]   ;;  %s1344_s1 = inlined_call_operand.vmem [shape: f32[128,128], index: 1, kind: input, shape index: {}]   ;;  %s1345_s2 = inlined_call_operand.vmem [shape: f32[1,128], index: 2, kind: input, shape index: {}]   ;;  %s1346_s3 = inlined_call_operand.vmem [shape: f32[2048,128], index: 3, kind: output, shape index: {}]  }
   0x1 LB: > { %s766_s13 = sadd.s32 4294967295, %s1048_s12   ;;  %p770_p0 = scmp.ge.s32.totalorder %s1048_s12, 1  ;;  %s1048_s12 = sphi %s1070_s12, %s13_s12  }
   0x2   : > { %p138_p1 = scmp.lt.s32.totalorder %s1048_s12, 5 }
   0x4   : > { %p139_p2 = pnand %p770_p0, %p138_p1 }
   0x5   : > { %v238_v0 = vld [vmem:[%s1344_s1] sm:$0xff] (!%p139_p2)  ;;  %v239_v1 = vld [vmem:[%s1344_s1 + $0x8] sm:$0xff] (!%p139_p2)  ;;  %v240_v2 = vld [vmem:[%s1344_s1 + $0x10] sm:$0xff] (!%p139_p2)  ;;  %s771_s20 = sshll.u32 (!%p139_p2), %s766_s13, 6 }
   0x6   : > { %142 = sbr.rel (%p139_p2) target bundleno = 317 (0x13d), region = 32  ;;  %v986_v3 = vpack.c.bf16 (!%p139_p2), %v239_v1, %v238_v0  ;;  %v241_v4 = vld [vmem:[%s1344_s1 + $0x18] sm:$0xff] (!%p139_p2)  ;;  %p163_p3 = scmp.lt.s32.totalorder (!%p139_p2), %s771_s20, 255  ;;  %v242_v6 = vld [vmem:[%s1344_s1 + $0x20] sm:$0xff] (!%p139_p2)  ;;  %v243_v7 = vld [vmem:[%s1344_s1 + $0x28] sm:$0xff] (!%p139_p2) }
   0x7   : > { %v990_v5 = vpack.c.bf16 (!%p139_p2), %v241_v4, %v240_v2  ;;  %v994_v8 = vpack.c.bf16 (!%p139_p2), %v243_v7, %v242_v6  ;;  %v244_v9 = vld [vmem:[%s1344_s1 + $0x30] sm:$0xff] (!%p139_p2)  ;;  %v245_v10 = vld [vmem:[%s1344_s1 + $0x38] sm:$0xff] (!%p139_p2)  ;;  %v246_v14 = vld [vmem:[%s1344_s1 + $0x40] sm:$0xff] (!%p139_p2) }
   0x8   : > { %987 = vmatprep.subr.bf16.mxu0 (!%p139_p2), %v986_v3  ;;  %1018 = vmatprep.subr.bf16.mxu1 (!%p139_p2), %v986_v3  ;;  %v998_v13 = vpack.c.bf16 (!%p139_p2), %v245_v10, %v244_v9  ;;  %v247_v15 = vld [vmem:[%s1344_s1 + $0x48] sm:$0xff] (!%p139_p2)  ;;  %v248_v17 = vld [vmem:[%s1344_s1 + $0x50] sm:$0xff] (!%p139_p2)  ;;  %v249_v18 = vld [vmem:[%s1344_s1 + $0x58] sm:$0xff] (!%p139_p2) }
   0x9   : > { %989 = vmatpush3.bf16.msra.mxu0 (!%p139_p2), %v986_v3  ;;  %1026 = vmatpush3.bf16.msra.mxu1 (!%p139_p2), %v986_v3  ;;  %v1002_v16 = vpack.c.bf16 (!%p139_p2), %v247_v15, %v246_v14  ;;  %v1006_v19 = vpack.c.bf16 (!%p139_p2), %v249_v18, %v248_v17  ;;  %v250_v20 = vld [vmem:[%s1344_s1 + $0x60] sm:$0xff] (!%p139_p2)  ;;  %v251_v21 = vld [vmem:[%s1344_s1 + $0x68] sm:$0xff] (!%p139_p2)  ;;  %v252_v23 = vld [vmem:[%s1344_s1 + $0x70] sm:$0xff] (!%p139_p2) }
   0xa   : > { %991 = vmatprep.subr.bf16.mxu0 (!%p139_p2), %v990_v5  ;;  %1019 = vmatprep.subr.bf16.mxu1 (!%p139_p2), %v990_v5  ;;  %v1010_v22 = vpack.c.bf16 (!%p139_p2), %v251_v21, %v250_v20  ;;  %v253_v24 = vld [vmem:[%s1344_s1 + $0x78] sm:$0xff] (!%p139_p2) }
   0xb   : > { %v1014_v25 = vpack.c.bf16 (!%p139_p2), %v253_v24, %v252_v23  ;;  %v1203_v24 = vld [vmem:[%s1345_s2] ss:$0 sm:$0xff] (!%p139_p2) }
   0xd   : > { %s1348_s20 = smov (!%p163_p3, %s771_s20), 255  ;;  %993 = vmatpush3.bf16.msra.mxu0 %v990_v5  ;;  %1027 = vmatpush3.bf16.msra.mxu1 %v990_v5 }
   0xe   : > { %s772_s27 = sshll.u32 %s1348_s20, 3  ;;  %995 = vmatprep.subr.bf16.mxu0 %v994_v8  ;;  %1020 = vmatprep.subr.bf16.mxu1 %v994_v8 }
   0xf   : > { %s1110_s7 = scalar_lea.vmem %s1343_s0, %s772_s27  ;;  %s1210_s4 = scalar_lea.vmem %s1346_s3, %s772_s27 }
  0x10   : > { %v174_v11 = vld [vmem:[%s1110_s7] sm:$0xff]  ;;  %v175_v26 = vld [vmem:[%s1110_s7 + $0x8] sm:$0xff]  ;;  %v176_v28 = vld [vmem:[%s1110_s7 + $0x10] sm:$0xff] }
  0x11   : > { %v206_v12 = vld [vmem:[%s1110_s7 + $0x100] sm:$0xff]  ;;  %890 = vmatprep.mubr.f32.mxu0 %v174_v11  ;;  %997 = vmatpush3.bf16.msra.mxu0 %v994_v8  ;;  %v207_v27 = vld [vmem:[%s1110_s7 + $0x108] sm:$0xff]  ;;  %v208_v29 = vld [vmem:[%s1110_s7 + $0x110] sm:$0xff] }
  0x12   : > { %938 = vmatprep.mubr.f32.mxu1 %v206_v12  ;;  %1028 = vmatpush3.bf16.msra.mxu1 %v994_v8  ;;  %v177_v30 = vld [vmem:[%s1110_s7 + $0x18] sm:$0xff]  ;;  %v178_v32 = vld [vmem:[%s1110_s7 + $0x20] sm:$0xff]  ;;  %v179_v34 = vld [vmem:[%s1110_s7 + $0x28] sm:$0xff] }
  0x13   : > { %999 = vmatprep.subr.bf16.mxu0 %v998_v13  ;;  %1021 = vmatprep.subr.bf16.mxu1 %v998_v13  ;;  %v209_v31 = vld [vmem:[%s1110_s7 + $0x118] sm:$0xff]  ;;  %v210_v33 = vld [vmem:[%s1110_s7 + $0x120] sm:$0xff]  ;;  %v211_v35 = vld [vmem:[%s1110_s7 + $0x128] sm:$0xff] }
  0x14   : > { %v180_v36 = vld [vmem:[%s1110_s7 + $0x30] sm:$0xff]  ;;  %v181_v38 = vld [vmem:[%s1110_s7 + $0x38] sm:$0xff]  ;;  %v182_v40 = vld [vmem:[%s1110_s7 + $0x40] sm:$0xff] }
  0x15   : > { %1001 = vmatpush3.bf16.msra.mxu0 %v998_v13  ;;  %v212_v37 = vld [vmem:[%s1110_s7 + $0x130] sm:$0xff]  ;;  %v213_v39 = vld [vmem:[%s1110_s7 + $0x138] sm:$0xff]  ;;  %v214_v41 = vld [vmem:[%s1110_s7 + $0x140] sm:$0xff] }
  0x16   : > { %1029 = vmatpush3.bf16.msra.mxu1 %v998_v13  ;;  %1003 = vmatprep.subr.bf16.mxu0 %v1002_v16  ;;  %v183_v42 = vld [vmem:[%s1110_s7 + $0x48] sm:$0xff]  ;;  %v184_v44 = vld [vmem:[%s1110_s7 + $0x50] sm:$0xff]  ;;  %v185_v46 = vld [vmem:[%s1110_s7 + $0x58] sm:$0xff] }
  0x17   : > { %1022 = vmatprep.subr.bf16.mxu1 %v1002_v16  ;;  %v215_v43 = vld [vmem:[%s1110_s7 + $0x148] sm:$0xff]  ;;  %v216_v45 = vld [vmem:[%s1110_s7 + $0x150] sm:$0xff]  ;;  %v217_v47 = vld [vmem:[%s1110_s7 + $0x158] sm:$0xff] }
  0x18   : > { %v186_v48 = vld [vmem:[%s1110_s7 + $0x60] sm:$0xff]  ;;  %v187_v50 = vld [vmem:[%s1110_s7 + $0x68] sm:$0xff]  ;;  %v188_v52 = vld [vmem:[%s1110_s7 + $0x70] sm:$0xff] }
  0x19   : > { %1005 = vmatpush3.bf16.msra.mxu0 %v1002_v16  ;;  %v218_v49 = vld [vmem:[%s1110_s7 + $0x160] sm:$0xff]  ;;  %v219_v51 = vld [vmem:[%s1110_s7 + $0x168] sm:$0xff]  ;;  %v220_v53 = vld [vmem:[%s1110_s7 + $0x170] sm:$0xff] }
  0x1a   : > { %1030 = vmatpush3.bf16.msra.mxu1 %v1002_v16  ;;  %1007 = vmatprep.subr.bf16.mxu0 %v1006_v19  ;;  %v189_v54 = vld [vmem:[%s1110_s7 + $0x78] sm:$0xff]  ;;  %v190_v56 = vld [vmem:[%s1110_s7 + $0x80] sm:$0xff]  ;;  %v191_v58 = vld [vmem:[%s1110_s7 + $0x88] sm:$0xff] }
  0x1b   : > { %1023 = vmatprep.subr.bf16.mxu1 %v1006_v19  ;;  %v221_v55 = vld [vmem:[%s1110_s7 + $0x178] sm:$0xff]  ;;  %v222_v57 = vld [vmem:[%s1110_s7 + $0x180] sm:$0xff]  ;;  %v223_v59 = vld [vmem:[%s1110_s7 + $0x188] sm:$0xff] }
  0x1c   : > { %v192_v60 = vld [vmem:[%s1110_s7 + $0x90] sm:$0xff]  ;;  %v193_v62 = vld [vmem:[%s1110_s7 + $0x98] sm:$0xff]  ;;  %v194_v0 = vld [vmem:[%s1110_s7 + $0xa0] sm:$0xff] }
  0x1d   : > { %1009 = vmatpush3.bf16.msra.mxu0 %v1006_v19  ;;  %v224_v61 = vld [vmem:[%s1110_s7 + $0x190] sm:$0xff]  ;;  %v225_v63 = vld [vmem:[%s1110_s7 + $0x198] sm:$0xff]  ;;  %v226_v1 = vld [vmem:[%s1110_s7 + $0x1a0] sm:$0xff] }
  0x1e   : > { %1031 = vmatpush3.bf16.msra.mxu1 %v1006_v19  ;;  %1011 = vmatprep.subr.bf16.mxu0 %v1010_v22  ;;  %v195_v2 = vld [vmem:[%s1110_s7 + $0xa8] sm:$0xff]  ;;  %v196_v4 = vld [vmem:[%s1110_s7 + $0xb0] sm:$0xff]  ;;  %v197_v6 = vld [vmem:[%s1110_s7 + $0xb8] sm:$0xff] }
  0x1f   : > { %1024 = vmatprep.subr.bf16.mxu1 %v1010_v22  ;;  %v227_v3 = vld [vmem:[%s1110_s7 + $0x1a8] sm:$0xff]  ;;  %v228_v5 = vld [vmem:[%s1110_s7 + $0x1b0] sm:$0xff]  ;;  %v229_v7 = vld [vmem:[%s1110_s7 + $0x1b8] sm:$0xff] }
  0x20   : > { %v198_v8 = vld [vmem:[%s1110_s7 + $0xc0] sm:$0xff]  ;;  %v199_v10 = vld [vmem:[%s1110_s7 + $0xc8] sm:$0xff]  ;;  %v200_v12 = vld [vmem:[%s1110_s7 + $0xd0] sm:$0xff] }
  0x21   : > { %1013 = vmatpush3.bf16.msra.mxu0 %v1010_v22  ;;  %v230_v9 = vld [vmem:[%s1110_s7 + $0x1c0] sm:$0xff]  ;;  %v231_v11 = vld [vmem:[%s1110_s7 + $0x1c8] sm:$0xff]  ;;  %v232_v13 = vld [vmem:[%s1110_s7 + $0x1d0] sm:$0xff] }
  0x22   : > { %1032 = vmatpush3.bf16.msra.mxu1 %v1010_v22  ;;  %1015 = vmatprep.subr.bf16.mxu0 %v1014_v25  ;;  %v201_v14 = vld [vmem:[%s1110_s7 + $0xd8] sm:$0xff]  ;;  %v202_v16 = vld [vmem:[%s1110_s7 + $0xe0] sm:$0xff]  ;;  %v203_v18 = vld [vmem:[%s1110_s7 + $0xe8] sm:$0xff] }
  0x23   : > { %1025 = vmatprep.subr.bf16.mxu1 %v1014_v25  ;;  %v233_v15 = vld [vmem:[%s1110_s7 + $0x1d8] sm:$0xff]  ;;  %v234_v17 = vld [vmem:[%s1110_s7 + $0x1e0] sm:$0xff]  ;;  %v235_v19 = vld [vmem:[%s1110_s7 + $0x1e8] sm:$0xff] }
  0x24   : > { %v204_v20 = vld [vmem:[%s1110_s7 + $0xf0] sm:$0xff]  ;;  %v205_v22 = vld [vmem:[%s1110_s7 + $0xf8] sm:$0xff] }
  0x25   : > { %1017 = vmatpush3.bf16.msra.mxu0 %v1014_v25  ;;  %v236_v21 = vld [vmem:[%s1110_s7 + $0x1f0] sm:$0xff]  ;;  %v237_v23 = vld [vmem:[%s1110_s7 + $0x1f8] sm:$0xff] }
  0x26   : > { %1033 = vmatpush3.bf16.msra.mxu1 %v1014_v25 }
  0x28   : > { %891 = vmatmul.mubr.f32.vlgmr.msra.gmra.mrb[0].mxu0 %v175_v26 }
  0x29   : > { %939 = vmatmul.mubr.f32.vlgmr.msra.gmra.mrb[0].mxu1 %v207_v27  ;;  %893 = vmatprep.mubr.f32.mxu0 %v176_v28 }
  0x2a   : > { %941 = vmatprep.mubr.f32.mxu1 %v208_v29 }
  0x2c   : > { %894 = vmatmul.mubr.f32.gmra.mrb[2].mxu0 %v177_v30 }
  0x2d   : > { %942 = vmatmul.mubr.f32.gmra.mrb[2].mxu1 %v209_v31  ;;  %896 = vmatprep.mubr.f32.mxu0 %v178_v32 }
  0x2e   : > { %944 = vmatprep.mubr.f32.mxu1 %v210_v33 }
  0x30   : > { %897 = vmatmul.mubr.f32.gmra.mrb[4].mxu0 %v179_v34 }
  0x31   : > { %945 = vmatmul.mubr.f32.gmra.mrb[4].mxu1 %v211_v35  ;;  %899 = vmatprep.mubr.f32.mxu0 %v180_v36 }
  0x32   : > { %947 = vmatprep.mubr.f32.mxu1 %v212_v37 }
  0x34   : > { %900 = vmatmul.mubr.f32.gmra.mrb[6].mxu0 %v181_v38 }
  0x35   : > { %948 = vmatmul.mubr.f32.gmra.mrb[6].mxu1 %v213_v39  ;;  %902 = vmatprep.mubr.f32.mxu0 %v182_v40 }
  0x36   : > { %950 = vmatprep.mubr.f32.mxu1 %v214_v41 }
  0x38   : > { %903 = vmatmul.mubr.f32.gmra.mrb[8].mxu0 %v183_v42 }
  0x39   : > { %951 = vmatmul.mubr.f32.gmra.mrb[8].mxu1 %v215_v43  ;;  %905 = vmatprep.mubr.f32.mxu0 %v184_v44 }
  0x3a   : > { %953 = vmatprep.mubr.f32.mxu1 %v216_v45 }
  0x3c   : > { %906 = vmatmul.mubr.f32.gmra.mrb[10].mxu0 %v185_v46 }
  0x3d   : > { %954 = vmatmul.mubr.f32.gmra.mrb[10].mxu1 %v217_v47  ;;  %908 = vmatprep.mubr.f32.mxu0 %v186_v48 }
  0x3e   : > { %956 = vmatprep.mubr.f32.mxu1 %v218_v49 }
  0x40   : > { %909 = vmatmul.mubr.f32.gmra.mrb[12].mxu0 %v187_v50 }
  0x41   : > { %957 = vmatmul.mubr.f32.gmra.mrb[12].mxu1 %v219_v51  ;;  %911 = vmatprep.mubr.f32.mxu0 %v188_v52 }
  0x42   : > { %959 = vmatprep.mubr.f32.mxu1 %v220_v53 }
  0x44   : > { %912 = vmatmul.mubr.f32.gmra.mrb[14].mxu0 %v189_v54 }
  0x45   : > { %960 = vmatmul.mubr.f32.gmra.mrb[14].mxu1 %v221_v55  ;;  %914 = vmatprep.mubr.f32.mxu0 %v190_v56 }
  0x46   : > { %962 = vmatprep.mubr.f32.mxu1 %v222_v57 }
  0x48   : > { %915 = vmatmul.mubr.f32.gmra.mrb[16].mxu0 %v191_v58 }
  0x49   : > { %963 = vmatmul.mubr.f32.gmra.mrb[16].mxu1 %v223_v59  ;;  %917 = vmatprep.mubr.f32.mxu0 %v192_v60 }
  0x4a   : > { %965 = vmatprep.mubr.f32.mxu1 %v224_v61 }
  0x4c   : > { %918 = vmatmul.mubr.f32.gmra.mrb[18].mxu0 %v193_v62 }
  0x4d   : > { %966 = vmatmul.mubr.f32.gmra.mrb[18].mxu1 %v225_v63  ;;  %920 = vmatprep.mubr.f32.mxu0 %v194_v0 }
  0x4e   : > { %968 = vmatprep.mubr.f32.mxu1 %v226_v1 }
  0x50   : > { %921 = vmatmul.mubr.f32.gmra.mrb[20].mxu0 %v195_v2 }
  0x51   : > { %969 = vmatmul.mubr.f32.gmra.mrb[20].mxu1 %v227_v3  ;;  %923 = vmatprep.mubr.f32.mxu0 %v196_v4 }
  0x52   : > { %971 = vmatprep.mubr.f32.mxu1 %v228_v5 }
  0x54   : > { %924 = vmatmul.mubr.f32.gmra.mrb[22].mxu0 %v197_v6 }
  0x55   : > { %972 = vmatmul.mubr.f32.gmra.mrb[22].mxu1 %v229_v7  ;;  %926 = vmatprep.mubr.f32.mxu0 %v198_v8 }
  0x56   : > { %974 = vmatprep.mubr.f32.mxu1 %v230_v9 }
  0x58   : > { %927 = vmatmul.mubr.f32.gmra.mrb[24].mxu0 %v199_v10 }
  0x59   : > { %975 = vmatmul.mubr.f32.gmra.mrb[24].mxu1 %v231_v11  ;;  %929 = vmatprep.mubr.f32.mxu0 %v200_v12 }
  0x5a   : > { %977 = vmatprep.mubr.f32.mxu1 %v232_v13 }
  0x5c   : > { %930 = vmatmul.mubr.f32.gmra.mrb[26].mxu0 %v201_v14 }
  0x5d   : > { %978 = vmatmul.mubr.f32.gmra.mrb[26].mxu1 %v233_v15  ;;  %932 = vmatprep.mubr.f32.mxu0 %v202_v16 }
  0x5e   : > { %980 = vmatprep.mubr.f32.mxu1 %v234_v17 }
  0x60   : > { %933 = vmatmul.mubr.f32.gmra.mrb[28].mxu0 %v203_v18 }
  0x61   : > { %981 = vmatmul.mubr.f32.gmra.mrb[28].mxu1 %v235_v19  ;;  %935 = vmatprep.mubr.f32.mxu0 %v204_v20 }
  0x62   : > { %983 = vmatprep.mubr.f32.mxu1 %v236_v21 }
  0x64   : > { %936 = vmatmul.mubr.f32.gmra.mrb[30].mxu0 %v205_v22 }
  0x65   : > { %984 = vmatmul.mubr.f32.gmra.mrb[30].mxu1 %v237_v23 }
  0xfb   : > { %v892_v25 = vpop.f32.mrb[0].mxu0 }
  0xfc   : > { %v940_v26 = vpop.f32.mrb[0].mxu1  ;;  %v333_v27 = vadd.f32 %v892_v25, %v1203_v24  ;;  %v327_v29 = vpop.f32.mrb[1].mxu0 }
  0xfd   : > { %v493_v28 = vadd.f32 %v940_v26, %v1203_v24  ;;  %v487_v30 = vpop.f32.mrb[1].mxu1  ;;  %v328_v31 = vadd.f32 %v1203_v24, %v327_v29 }
  0xfe   : > { %v488_v32 = vadd.f32 %v1203_v24, %v487_v30  ;;  %647 = vst [vmem:[%s1210_s4 + $0x8] sm:$0xff] %v333_v27 }
  0xff   : > { %679 = vst [vmem:[%s1210_s4 + $0x108] sm:$0xff] %v493_v28  ;;  %646 = vst [vmem:[%s1210_s4] sm:$0xff] %v328_v31  ;;  %v895_v33 = vpop.f32.mrb[2].mxu0 }
 0x100   : > { %678 = vst [vmem:[%s1210_s4 + $0x100] sm:$0xff] %v488_v32  ;;  %v943_v34 = vpop.f32.mrb[2].mxu1  ;;  %v343_v35 = vadd.f32 %v895_v33, %v1203_v24  ;;  %v337_v37 = vpop.f32.mrb[3].mxu0 }
 0x101   : > { %v503_v36 = vadd.f32 %v943_v34, %v1203_v24  ;;  %v497_v38 = vpop.f32.mrb[3].mxu1  ;;  %v338_v39 = vadd.f32 %v1203_v24, %v337_v37 }
 0x102   : > { %v498_v40 = vadd.f32 %v1203_v24, %v497_v38  ;;  %649 = vst [vmem:[%s1210_s4 + $0x18] sm:$0xff] %v343_v35 }
 0x103   : > { %681 = vst [vmem:[%s1210_s4 + $0x118] sm:$0xff] %v503_v36  ;;  %648 = vst [vmem:[%s1210_s4 + $0x10] sm:$0xff] %v338_v39  ;;  %v898_v41 = vpop.f32.mrb[4].mxu0 }
 0x104   : > { %680 = vst [vmem:[%s1210_s4 + $0x110] sm:$0xff] %v498_v40  ;;  %v946_v42 = vpop.f32.mrb[4].mxu1  ;;  %v353_v43 = vadd.f32 %v898_v41, %v1203_v24  ;;  %v347_v45 = vpop.f32.mrb[5].mxu0 }
 0x105   : > { %v513_v44 = vadd.f32 %v946_v42, %v1203_v24  ;;  %v507_v46 = vpop.f32.mrb[5].mxu1  ;;  %v348_v47 = vadd.f32 %v1203_v24, %v347_v45 }
 0x106   : > { %v508_v48 = vadd.f32 %v1203_v24, %v507_v46  ;;  %651 = vst [vmem:[%s1210_s4 + $0x28] sm:$0xff] %v353_v43 }
 0x107   : > { %683 = vst [vmem:[%s1210_s4 + $0x128] sm:$0xff] %v513_v44  ;;  %650 = vst [vmem:[%s1210_s4 + $0x20] sm:$0xff] %v348_v47  ;;  %v901_v49 = vpop.f32.mrb[6].mxu0 }
 0x108   : > { %682 = vst [vmem:[%s1210_s4 + $0x120] sm:$0xff] %v508_v48  ;;  %v949_v50 = vpop.f32.mrb[6].mxu1  ;;  %v363_v51 = vadd.f32 %v901_v49, %v1203_v24  ;;  %v357_v53 = vpop.f32.mrb[7].mxu0 }
 0x109   : > { %v523_v52 = vadd.f32 %v949_v50, %v1203_v24  ;;  %v517_v54 = vpop.f32.mrb[7].mxu1  ;;  %v358_v55 = vadd.f32 %v1203_v24, %v357_v53 }
 0x10a   : > { %v518_v56 = vadd.f32 %v1203_v24, %v517_v54  ;;  %653 = vst [vmem:[%s1210_s4 + $0x38] sm:$0xff] %v363_v51 }
 0x10b   : > { %685 = vst [vmem:[%s1210_s4 + $0x138] sm:$0xff] %v523_v52  ;;  %652 = vst [vmem:[%s1210_s4 + $0x30] sm:$0xff] %v358_v55  ;;  %v904_v57 = vpop.f32.mrb[8].mxu0 }
 0x10c   : > { %684 = vst [vmem:[%s1210_s4 + $0x130] sm:$0xff] %v518_v56  ;;  %v952_v58 = vpop.f32.mrb[8].mxu1  ;;  %v373_v59 = vadd.f32 %v904_v57, %v1203_v24  ;;  %v367_v61 = vpop.f32.mrb[9].mxu0 }
 0x10d   : > { %v533_v60 = vadd.f32 %v952_v58, %v1203_v24  ;;  %v527_v62 = vpop.f32.mrb[9].mxu1  ;;  %v368_v63 = vadd.f32 %v1203_v24, %v367_v61 }
 0x10e   : > { %v528_v0 = vadd.f32 %v1203_v24, %v527_v62  ;;  %655 = vst [vmem:[%s1210_s4 + $0x48] sm:$0xff] %v373_v59 }
 0x10f   : > { %687 = vst [vmem:[%s1210_s4 + $0x148] sm:$0xff] %v533_v60  ;;  %654 = vst [vmem:[%s1210_s4 + $0x40] sm:$0xff] %v368_v63  ;;  %v907_v1 = vpop.f32.mrb[10].mxu0 }
 0x110   : > { %686 = vst [vmem:[%s1210_s4 + $0x140] sm:$0xff] %v528_v0  ;;  %v955_v2 = vpop.f32.mrb[10].mxu1  ;;  %v383_v3 = vadd.f32 %v907_v1, %v1203_v24  ;;  %v377_v5 = vpop.f32.mrb[11].mxu0 }
 0x111   : > { %v543_v4 = vadd.f32 %v955_v2, %v1203_v24  ;;  %v537_v6 = vpop.f32.mrb[11].mxu1  ;;  %v378_v7 = vadd.f32 %v1203_v24, %v377_v5 }
 0x112   : > { %v538_v8 = vadd.f32 %v1203_v24, %v537_v6  ;;  %657 = vst [vmem:[%s1210_s4 + $0x58] sm:$0xff] %v383_v3 }
 0x113   : > { %689 = vst [vmem:[%s1210_s4 + $0x158] sm:$0xff] %v543_v4  ;;  %656 = vst [vmem:[%s1210_s4 + $0x50] sm:$0xff] %v378_v7  ;;  %v910_v9 = vpop.f32.mrb[12].mxu0 }
 0x114   : > { %688 = vst [vmem:[%s1210_s4 + $0x150] sm:$0xff] %v538_v8  ;;  %v958_v10 = vpop.f32.mrb[12].mxu1  ;;  %v393_v11 = vadd.f32 %v910_v9, %v1203_v24  ;;  %v387_v13 = vpop.f32.mrb[13].mxu0 }
 0x115   : > { %v553_v12 = vadd.f32 %v958_v10, %v1203_v24  ;;  %v547_v14 = vpop.f32.mrb[13].mxu1  ;;  %v388_v15 = vadd.f32 %v1203_v24, %v387_v13 }
 0x116   : > { %v548_v16 = vadd.f32 %v1203_v24, %v547_v14  ;;  %659 = vst [vmem:[%s1210_s4 + $0x68] sm:$0xff] %v393_v11 }
 0x117   : > { %691 = vst [vmem:[%s1210_s4 + $0x168] sm:$0xff] %v553_v12  ;;  %658 = vst [vmem:[%s1210_s4 + $0x60] sm:$0xff] %v388_v15  ;;  %v913_v17 = vpop.f32.mrb[14].mxu0 }
 0x118   : > { %690 = vst [vmem:[%s1210_s4 + $0x160] sm:$0xff] %v548_v16  ;;  %v961_v18 = vpop.f32.mrb[14].mxu1  ;;  %v403_v19 = vadd.f32 %v913_v17, %v1203_v24  ;;  %v397_v21 = vpop.f32.mrb[15].mxu0 }
 0x119   : > { %v563_v20 = vadd.f32 %v961_v18, %v1203_v24  ;;  %v557_v22 = vpop.f32.mrb[15].mxu1  ;;  %v398_v23 = vadd.f32 %v1203_v24, %v397_v21 }
 0x11a   : > { %v558_v25 = vadd.f32 %v1203_v24, %v557_v22  ;;  %661 = vst [vmem:[%s1210_s4 + $0x78] sm:$0xff] %v403_v19 }
 0x11b   : > { %693 = vst [vmem:[%s1210_s4 + $0x178] sm:$0xff] %v563_v20  ;;  %660 = vst [vmem:[%s1210_s4 + $0x70] sm:$0xff] %v398_v23  ;;  %v916_v26 = vpop.f32.mrb[16].mxu0 }
 0x11c   : > { %692 = vst [vmem:[%s1210_s4 + $0x170] sm:$0xff] %v558_v25  ;;  %v964_v27 = vpop.f32.mrb[16].mxu1  ;;  %v413_v28 = vadd.f32 %v916_v26, %v1203_v24  ;;  %v407_v30 = vpop.f32.mrb[17].mxu0 }
 0x11d   : > { %v573_v29 = vadd.f32 %v964_v27, %v1203_v24  ;;  %v567_v31 = vpop.f32.mrb[17].mxu1  ;;  %v408_v32 = vadd.f32 %v1203_v24, %v407_v30 }
 0x11e   : > { %v568_v33 = vadd.f32 %v1203_v24, %v567_v31  ;;  %663 = vst [vmem:[%s1210_s4 + $0x88] sm:$0xff] %v413_v28 }
 0x11f   : > { %695 = vst [vmem:[%s1210_s4 + $0x188] sm:$0xff] %v573_v29  ;;  %662 = vst [vmem:[%s1210_s4 + $0x80] sm:$0xff] %v408_v32  ;;  %v919_v34 = vpop.f32.mrb[18].mxu0 }
 0x120   : > { %694 = vst [vmem:[%s1210_s4 + $0x180] sm:$0xff] %v568_v33  ;;  %v967_v35 = vpop.f32.mrb[18].mxu1  ;;  %v423_v36 = vadd.f32 %v919_v34, %v1203_v24  ;;  %v417_v38 = vpop.f32.mrb[19].mxu0 }
 0x121   : > { %v583_v37 = vadd.f32 %v967_v35, %v1203_v24  ;;  %v577_v39 = vpop.f32.mrb[19].mxu1  ;;  %v418_v40 = vadd.f32 %v1203_v24, %v417_v38 }
 0x122   : > { %v578_v41 = vadd.f32 %v1203_v24, %v577_v39  ;;  %665 = vst [vmem:[%s1210_s4 + $0x98] sm:$0xff] %v423_v36 }
 0x123   : > { %697 = vst [vmem:[%s1210_s4 + $0x198] sm:$0xff] %v583_v37  ;;  %664 = vst [vmem:[%s1210_s4 + $0x90] sm:$0xff] %v418_v40  ;;  %v922_v42 = vpop.f32.mrb[20].mxu0 }
 0x124   : > { %696 = vst [vmem:[%s1210_s4 + $0x190] sm:$0xff] %v578_v41  ;;  %v970_v43 = vpop.f32.mrb[20].mxu1  ;;  %v433_v44 = vadd.f32 %v922_v42, %v1203_v24  ;;  %v427_v46 = vpop.f32.mrb[21].mxu0 }
 0x125   : > { %v593_v45 = vadd.f32 %v970_v43, %v1203_v24  ;;  %v587_v47 = vpop.f32.mrb[21].mxu1  ;;  %v428_v48 = vadd.f32 %v1203_v24, %v427_v46 }
 0x126   : > { %v588_v49 = vadd.f32 %v1203_v24, %v587_v47  ;;  %667 = vst [vmem:[%s1210_s4 + $0xa8] sm:$0xff] %v433_v44 }
 0x127   : > { %699 = vst [vmem:[%s1210_s4 + $0x1a8] sm:$0xff] %v593_v45  ;;  %666 = vst [vmem:[%s1210_s4 + $0xa0] sm:$0xff] %v428_v48  ;;  %v925_v50 = vpop.f32.mrb[22].mxu0 }
 0x128   : > { %698 = vst [vmem:[%s1210_s4 + $0x1a0] sm:$0xff] %v588_v49  ;;  %v973_v51 = vpop.f32.mrb[22].mxu1  ;;  %v443_v52 = vadd.f32 %v925_v50, %v1203_v24  ;;  %v437_v54 = vpop.f32.mrb[23].mxu0 }
 0x129   : > { %v603_v53 = vadd.f32 %v973_v51, %v1203_v24  ;;  %v597_v55 = vpop.f32.mrb[23].mxu1  ;;  %v438_v56 = vadd.f32 %v1203_v24, %v437_v54 }
 0x12a   : > { %v598_v57 = vadd.f32 %v1203_v24, %v597_v55  ;;  %669 = vst [vmem:[%s1210_s4 + $0xb8] sm:$0xff] %v443_v52 }
 0x12b   : > { %701 = vst [vmem:[%s1210_s4 + $0x1b8] sm:$0xff] %v603_v53  ;;  %668 = vst [vmem:[%s1210_s4 + $0xb0] sm:$0xff] %v438_v56  ;;  %v928_v58 = vpop.f32.mrb[24].mxu0 }
 0x12c   : > { %700 = vst [vmem:[%s1210_s4 + $0x1b0] sm:$0xff] %v598_v57  ;;  %v976_v59 = vpop.f32.mrb[24].mxu1  ;;  %v453_v60 = vadd.f32 %v928_v58, %v1203_v24  ;;  %v447_v62 = vpop.f32.mrb[25].mxu0 }
 0x12d   : > { %v613_v61 = vadd.f32 %v976_v59, %v1203_v24  ;;  %v607_v63 = vpop.f32.mrb[25].mxu1  ;;  %v448_v0 = vadd.f32 %v1203_v24, %v447_v62 }
 0x12e   : > { %v608_v1 = vadd.f32 %v1203_v24, %v607_v63  ;;  %671 = vst [vmem:[%s1210_s4 + $0xc8] sm:$0xff] %v453_v60 }
 0x12f   : > { %703 = vst [vmem:[%s1210_s4 + $0x1c8] sm:$0xff] %v613_v61  ;;  %670 = vst [vmem:[%s1210_s4 + $0xc0] sm:$0xff] %v448_v0  ;;  %v931_v2 = vpop.f32.mrb[26].mxu0 }
 0x130   : > { %702 = vst [vmem:[%s1210_s4 + $0x1c0] sm:$0xff] %v608_v1  ;;  %v979_v3 = vpop.f32.mrb[26].mxu1  ;;  %v463_v4 = vadd.f32 %v931_v2, %v1203_v24  ;;  %v457_v6 = vpop.f32.mrb[27].mxu0 }
 0x131   : > { %v623_v5 = vadd.f32 %v979_v3, %v1203_v24  ;;  %v617_v7 = vpop.f32.mrb[27].mxu1  ;;  %v458_v8 = vadd.f32 %v1203_v24, %v457_v6 }
 0x132   : > { %v618_v9 = vadd.f32 %v1203_v24, %v617_v7  ;;  %673 = vst [vmem:[%s1210_s4 + $0xd8] sm:$0xff] %v463_v4 }
 0x133   : > { %705 = vst [vmem:[%s1210_s4 + $0x1d8] sm:$0xff] %v623_v5  ;;  %672 = vst [vmem:[%s1210_s4 + $0xd0] sm:$0xff] %v458_v8  ;;  %v934_v10 = vpop.f32.mrb[28].mxu0 }
 0x134   : > { %704 = vst [vmem:[%s1210_s4 + $0x1d0] sm:$0xff] %v618_v9  ;;  %v982_v11 = vpop.f32.mrb[28].mxu1  ;;  %v473_v12 = vadd.f32 %v934_v10, %v1203_v24  ;;  %v467_v14 = vpop.f32.mrb[29].mxu0 }
 0x135   : > { %v633_v13 = vadd.f32 %v982_v11, %v1203_v24  ;;  %v627_v15 = vpop.f32.mrb[29].mxu1  ;;  %v468_v16 = vadd.f32 %v1203_v24, %v467_v14 }
 0x136   : > { %v628_v17 = vadd.f32 %v1203_v24, %v627_v15  ;;  %675 = vst [vmem:[%s1210_s4 + $0xe8] sm:$0xff] %v473_v12 }
 0x137   : > { %707 = vst [vmem:[%s1210_s4 + $0x1e8] sm:$0xff] %v633_v13  ;;  %674 = vst [vmem:[%s1210_s4 + $0xe0] sm:$0xff] %v468_v16  ;;  %v937_v18 = vpop.f32.mrb[30].mxu0 }
 0x138   : > { %706 = vst [vmem:[%s1210_s4 + $0x1e0] sm:$0xff] %v628_v17  ;;  %v985_v19 = vpop.f32.mrb[30].mxu1  ;;  %v483_v20 = vadd.f32 %v937_v18, %v1203_v24  ;;  %v477_v22 = vpop.f32.mrb[31].mxu0 }
 0x139   : > { %v643_v21 = vadd.f32 %v985_v19, %v1203_v24  ;;  %v637_v23 = vpop.f32.mrb[31].mxu1  ;;  %v478_v25 = vadd.f32 %v1203_v24, %v477_v22 }
 0x13a   : > { %v638_v26 = vadd.f32 %v1203_v24, %v637_v23  ;;  %677 = vst [vmem:[%s1210_s4 + $0xf8] sm:$0xff] %v483_v20 }
 0x13b   : > { %709 = vst [vmem:[%s1210_s4 + $0x1f8] sm:$0xff] %v643_v21  ;;  %676 = vst [vmem:[%s1210_s4 + $0xf0] sm:$0xff] %v478_v25 }
 0x13c   : > { %708 = vst [vmem:[%s1210_s4 + $0x1f0] sm:$0xff] %v638_v26 }
 0x13d PF: > { %s13_s12 = sadd.s32 1, %s1048_s12  }
 0x13e   : > { %p10_p4 = scmp.ge.s32.totalorder %s13_s12, 6  }
 0x140   :  { %12 = sbr.rel (!%p10_p4) target bundleno = 1 (0x1), region = 62 }

</bundles_post_ra>
